<compile_context>
chip_gen: v7x
topology: tpu7x:2x2x1
jax: 0.10.0
libtpu: 0.0.40
codegen_flags: <defaults>
</compile_context>

<pallas_src>
import functools

import jax
import jax.numpy as jnp
from jax.experimental import pallas as pl
from jax.experimental.pallas import tpu as pltpu


# ----------------------------------------------------------------------------
# Fused Actor kernel.  Gate order follows PyTorch: [r, z, n], each gate padded
# to its own 128-lane group.
#   r = sigmoid(Wir x + (bir+bhr) + Whr h)
#   z = sigmoid(Wiz x + (biz+bhz) + Whz h)
#   n = tanh   (Win x + bin + r * (Whn h + bhn))
#   h' = (1 - z) * n + z * h  ==  n + z * (h - n)
# ----------------------------------------------------------------------------
def _actor_kernel(x_ref, h0_ref, wi_ref, wh_ref, bi_ref, bhn_ref,
                  whead_ref, bhead_ref,
                  out_ref, hfin_ref, seq_ref, *, T, BP, A, L, G):
    f32 = jnp.float32
    bf16 = jnp.bfloat16

    # Layer-0 input projection hoisted over the whole sequence (off the critical path).
    xw0 = jnp.dot(x_ref[...].astype(bf16), wi_ref[0],
                  preferred_element_type=f32) + bi_ref[0]              # (T*BP, 3G)

    # Hoist bias broadcasts out of the unrolled loops (no CSE of broadcast_in_dim).
    bi_b = [jnp.broadcast_to(bi_ref[l], (BP, 3 * G)) for l in range(1, L)]
    bhn_b = [jnp.broadcast_to(bhn_ref[l], (BP, G)) for l in range(L)]

    h = [h0_ref[l] for l in range(L)]                                  # (BP, G) f32 each

    for t in range(T):        # wavefront: (t, l) depends only on (t-1, l) and (t, l-1)
        for l in range(L):
            if l == 0:
                gx = xw0[t * BP:(t + 1) * BP, :]                       # (BP, 3G)
            else:
                gx = jnp.dot(h[l - 1].astype(bf16), wi_ref[l],
                             preferred_element_type=f32) + bi_b[l - 1]
            gh = jnp.dot(h[l].astype(bf16), wh_ref[l],
                         preferred_element_type=f32)                   # (BP, 3G)
            rz = jax.nn.sigmoid(gx[:, :2 * G] + gh[:, :2 * G])         # lane-aligned slab
            r = rz[:, :G]
            z = rz[:, G:]
            n = jnp.tanh(gx[:, 2 * G:] + r * (gh[:, 2 * G:] + bhn_b[l]))
            h[l] = n + z * (h[l] - n)                                  # == (1-z)*n + z*h
        seq_ref[t * BP:(t + 1) * BP, :] = h[L - 1]                     # aligned (8,128) write

    for l in range(L):
        hfin_ref[l] = h[l]

    # Fused heads: one matmul, one tanh, exp only on the log_std half.
    hz = jnp.tanh(jnp.dot(seq_ref[...].astype(bf16), whead_ref[...],
                          preferred_element_type=f32) + bhead_ref[...])  # (T*BP, 2A)
    col = jax.lax.broadcasted_iota(jnp.int32, hz.shape, 1)
    out_ref[...] = jnp.where(col < A, hz, jnp.exp(hz))


@jax.jit
def _actor_call(params, x, hx):
    T, B, D = x.shape                                   # static under jit
    L = params["wi"].shape[0]
    G = params["bhn"].shape[-1]                         # lane-group width (>=128)
    A = params["whead"].shape[-1] // 2
    H = D                                               # Actor: input == hidden == action dim
    BP = max(8, ((B + 7) // 8) * 8)                     # pad batch to full sublane tile

    x_pad = jnp.zeros((T, BP, G), jnp.float32).at[:, :B, :D].set(x)
    h0_pad = jnp.zeros((L, BP, G), jnp.float32).at[:, :B, :H].set(hx)

    kernel = functools.partial(_actor_kernel, T=T, BP=BP, A=A, L=L, G=G)
    vmem = pl.BlockSpec(memory_space=pltpu.MemorySpace.VMEM)

    out, hfin = pl.pallas_call(
        kernel,
        out_shape=(
            jax.ShapeDtypeStruct((T * BP, 2 * A), jnp.float32),
            jax.ShapeDtypeStruct((L, BP, G), jnp.float32),
        ),
        in_specs=[vmem] * 8,
        out_specs=(vmem, vmem),
        scratch_shapes=[pltpu.VMEM((T * BP, G), jnp.float32)],
        compiler_params=pltpu.CompilerParams(vmem_limit_bytes=32 * 1024 * 1024),
    )(x_pad.reshape(T * BP, G), h0_pad,
      params["wi"], params["wh"], params["bi"], params["bhn"],
      params["whead"], params["bhead"])

    out = out.reshape(T, BP, 2 * A)[:, :B]
    mu = out[..., :A]
    std = out[..., A:]
    hidden = hfin[:, :B, :H]
    return mu, std, hidden


def actor_forward(params, x, hx=None, decay=None):
    """Mirrors Actor.forward.

    x: (T, B, D) batched, or (T, D) / (D,) unbatched like the PyTorch module.
    hx: (L, B, H), (L, H), or None (-> zeros, as in PyTorch).
    Returns (mu, std, hidden_state).
    """
    x = jnp.asarray(x, jnp.float32)
    unbatched = False
    if x.ndim == 1:
        x = x[None, :]
    if x.ndim == 2:                                     # (T, D): unbatched sequence
        unbatched = True
        x = x[:, None, :]

    L = params["wi"].shape[0]
    T, B, H = x.shape

    if hx is None:
        hx = jnp.zeros((L, B, H), jnp.float32)
    else:
        hx = jnp.asarray(hx, jnp.float32)
        if hx.ndim == 2:
            hx = hx[:, None, :]

    mu, std, hidden = _actor_call(params, x, hx)

    if decay is not None:
        # Elementwise epilogue, equivalent to:
        #   mu = mu * decay; log_std += log(0.1*|mu|); std = exp(log_std)
        mu = mu * jnp.asarray(decay, jnp.float32)
        std = std * 0.1 * jnp.abs(mu)

    if unbatched:
        mu, std, hidden = mu[:, 0], std[:, 0], hidden[:, 0]
    return mu, std, hidden


# ----------------------------------------------------------------------------
# Parameter construction (deterministic, PyTorch-style uniform init).
# Gates stored lane-aligned: each of [r|z|n] in its own 128-lane group, zero-padded.
# Matmul weights stored bf16; biases stay f32 (b_ih+b_hh folded for r,z; b_hn separate).
# ----------------------------------------------------------------------------
def init_actor_params(key, state_dim, num_layers=3):
    H = state_dim
    A = state_dim
    D = state_dim
    G = ((H + 127) // 128) * 128                        # lane-group width per gate
    bound = 1.0 / float(H) ** 0.5

    def uni(k, shape):
        return jax.random.uniform(k, shape, jnp.float32, -bound, bound)

    keys = jax.random.split(key, num_layers * 4 + 4)
    wi = jnp.zeros((num_layers, G, 3 * G), jnp.float32)
    wh = jnp.zeros((num_layers, G, 3 * G), jnp.float32)
    bi = jnp.zeros((num_layers, 1, 3 * G), jnp.float32)
    bhn = jnp.zeros((num_layers, 1, G), jnp.float32)

    ki = 0
    for l in range(num_layers):
        w_ih = uni(keys[ki], (D, 3 * H)); ki += 1       # [r|z|n] along columns
        w_hh = uni(keys[ki], (H, 3 * H)); ki += 1
        b_ih = uni(keys[ki], (3 * H,)); ki += 1
        b_hh = uni(keys[ki], (3 * H,)); ki += 1
        for g in range(3):
            wi = wi.at[l, :D, g * G:g * G + H].set(w_ih[:, g * H:(g + 1) * H])
            wh = wh.at[l, :H, g * G:g * G + H].set(w_hh[:, g * H:(g + 1) * H])
        bi = bi.at[l, 0, 0 * G:0 * G + H].set(b_ih[0:H] + b_hh[0:H])          # r (folded)
        bi = bi.at[l, 0, 1 * G:1 * G + H].set(b_ih[H:2 * H] + b_hh[H:2 * H])  # z (folded)
        bi = bi.at[l, 0, 2 * G:2 * G + H].set(b_ih[2 * H:3 * H])              # n (input side)
        bhn = bhn.at[l, 0, :H].set(b_hh[2 * H:3 * H])                         # n (hidden side)

    wmu = uni(keys[ki], (H, A)); ki += 1
    bmu = uni(keys[ki], (A,)); ki += 1
    wls = uni(keys[ki], (H, A)); ki += 1
    bls = uni(keys[ki], (A,)); ki += 1
    whead = jnp.zeros((G, 2 * A), jnp.float32)
    whead = whead.at[:H, :A].set(wmu).at[:H, A:].set(wls)
    bhead = jnp.concatenate([bmu, bls])[None, :]

    return {
        "wi": wi.astype(jnp.bfloat16),                  # (L, G, 3G)
        "wh": wh.astype(jnp.bfloat16),                  # (L, G, 3G)
        "bi": bi,                                       # (L, 1, 3G)
        "bhn": bhn,                                     # (L, 1, G)
        "whead": whead.astype(jnp.bfloat16),            # (G, 2A) = [Wmu | Wls]
        "bhead": bhead,                                 # (1, 2A)
    }


# ----------------------------------------------------------------------------
# Pure-JAX reference (standard GRU form, f32 HIGHEST precision on the same
# bf16-rounded weights) for a semantic sanity check.
# ----------------------------------------------------------------------------
def _actor_reference(params, x, hx):
    T, B, D = x.shape
    L = params["wi"].shape[0]
    G = params["bhn"].shape[-1]
    A = params["whead"].shape[-1] // 2
    H = D
    hp = jax.lax.Precision.HIGHEST
    dot = lambda a, b: jnp.dot(a, b, precision=hp)

    def gate_blocks(w, l):
        w = w[l].astype(jnp.float32)
        return [w[:H, g * G:g * G + H] for g in range(3)]

    seq = x
    h_fin = []
    for l in range(L):
        wir, wiz, win = gate_blocks(params["wi"], l)
        whr, whz, whn = gate_blocks(params["wh"], l)
        b = params["bi"][l, 0]
        br, bz, bn = b[:H], b[G:G + H], b[2 * G:2 * G + H]
        bhn = params["bhn"][l, 0, :H]
        h = hx[l]
        outs = []
        for t in range(T):
            xt = seq[t]
            r = jax.nn.sigmoid(dot(xt, wir) + br + dot(h, whr))
            z = jax.nn.sigmoid(dot(xt, wiz) + bz + dot(h, whz))
            n = jnp.tanh(dot(xt, win) + bn + r * (dot(h, whn) + bhn))
            h = (1.0 - z) * n + z * h
            outs.append(h)
        seq = jnp.stack(outs, axis=0)
        h_fin.append(h)

    wmu = params["whead"][:H, :A].astype(jnp.float32)
    wls = params["whead"][:H, A:].astype(jnp.float32)
    bmu = params["bhead"][0, :A]
    bls = params["bhead"][0, A:]
    flat = seq.reshape(T * B, H)
    mu = jnp.tanh(dot(flat, wmu) + bmu).reshape(T, B, A)
    std = jnp.exp(jnp.tanh(dot(flat, wls) + bls)).reshape(T, B, A)
    return mu, std, jnp.stack(h_fin, axis=0)


if __name__ == "__main__":
    state_dim = 32
    num_layers = 3
    T, B = 8, 4

    key = jax.random.PRNGKey(0)
    k_params, k_x, k_h = jax.random.split(key, 3)

    params = init_actor_params(k_params, state_dim, num_layers)
    x = jax.random.normal(k_x, (T, B, state_dim), jnp.float32)
    hx = jax.random.normal(k_h, (num_layers, B, state_dim), jnp.float32)

    mu, std, hidden = actor_forward(params, x, hx)
    jax.block_until_ready((mu, std, hidden))

    assert mu.shape == (T, B, state_dim)
    assert std.shape == (T, B, state_dim)
    assert hidden.shape == (num_layers, B, state_dim)
    assert bool(jnp.all(jnp.isfinite(mu)))
    assert bool(jnp.all(std > 0.0))

    # Semantic check vs pure-JAX f32 reference (tolerance absorbs bf16 matmul operands).
    mu_r, std_r, hid_r = _actor_reference(params, x, hx)
    assert float(jnp.max(jnp.abs(mu - mu_r))) < 5e-2
    assert float(jnp.max(jnp.abs(std - std_r))) < 5e-2
    assert float(jnp.max(jnp.abs(hidden - hid_r))) < 5e-2

    # hx = None path (PyTorch defaults the initial hidden state to zeros).
    mu0, std0, hidden0 = actor_forward(params, x, None)
    jax.block_until_ready((mu0, std0, hidden0))
    assert mu0.shape == (T, B, state_dim)
    assert bool(jnp.all(std0 > 0.0))

    # decay path (elementwise epilogue in the wrapper).
    mud, stdd, hidd = actor_forward(params, x, hx, decay=0.9)
    jax.block_until_ready((mud, stdd, hidd))
    assert mud.shape == (T, B, state_dim)
    assert bool(jnp.all(jnp.isfinite(mud)))

    print("KERNEL_OK")
</pallas_src>

<mosaic_0001>
module attributes {stable_mosaic.version = 11 : i64} {
  func.func @_actor_kernel(%arg0: memref<64x128xf32, #tpu.memory_space<vmem>>, %arg1: memref<3x8x128xf32, #tpu.memory_space<vmem>>, %arg2: memref<3x128x384xbf16, #tpu.memory_space<vmem>>, %arg3: memref<3x128x384xbf16, #tpu.memory_space<vmem>>, %arg4: memref<3x1x384xf32, #tpu.memory_space<vmem>>, %arg5: memref<3x1x128xf32, #tpu.memory_space<vmem>>, %arg6: memref<128x64xbf16, #tpu.memory_space<vmem>>, %arg7: memref<1x64xf32, #tpu.memory_space<vmem>>, %arg8: memref<64x64xf32, #tpu.memory_space<vmem>>, %arg9: memref<3x8x128xf32, #tpu.memory_space<vmem>>, %arg10: memref<64x128xf32, #tpu.memory_space<vmem>>) attributes {dimension_semantics = [], scalar_prefetch = 0 : i64, scratch_operands = 1 : i64, tpu.core_type = #tpu.core_type<tc>} {
    %c0 = arith.constant 0 : index
    %c0_0 = arith.constant 0 : index
    %0 = vector.load %arg0[%c0, %c0_0] : memref<64x128xf32, #tpu.memory_space<vmem>>, vector<64x128xf32>
    %1 = arith.truncf %0 : vector<64x128xf32> to vector<64x128xbf16>
    %c0_1 = arith.constant 0 : index
    %c0_2 = arith.constant 0 : index
    %c0_3 = arith.constant 0 : index
    %2 = vector.load %arg2[%c0_1, %c0_2, %c0_3] : memref<3x128x384xbf16, #tpu.memory_space<vmem>>, vector<1x128x384xbf16>
    %3 = vector.shape_cast %2 : vector<1x128x384xbf16> to vector<128x384xbf16>
    %cst = arith.constant dense<0.000000e+00> : vector<64x384xf32>
    %4 = tpu.matmul %1, %3, %cst {dimension_numbers = #tpu.dot_dimension_numbers<[1], [0], [0], [1], [0, 0, 1, 1], [], []>} : vector<64x128xbf16>, vector<128x384xbf16>, vector<64x384xf32> -> vector<64x384xf32>
    %c0_4 = arith.constant 0 : index
    %c0_5 = arith.constant 0 : index
    %c0_6 = arith.constant 0 : index
    %5 = vector.load %arg4[%c0_4, %c0_5, %c0_6] : memref<3x1x384xf32, #tpu.memory_space<vmem>>, vector<1x1x384xf32>
    %6 = vector.shape_cast %5 : vector<1x1x384xf32> to vector<1x384xf32>
    %7 = vector.broadcast %6 : vector<1x384xf32> to vector<64x384xf32>
    %8 = arith.addf %4, %7 : vector<64x384xf32>
    %c1 = arith.constant 1 : index
    %c0_7 = arith.constant 0 : index
    %c0_8 = arith.constant 0 : index
    %9 = vector.load %arg4[%c1, %c0_7, %c0_8] : memref<3x1x384xf32, #tpu.memory_space<vmem>>, vector<1x1x384xf32>
    %10 = vector.shape_cast %9 : vector<1x1x384xf32> to vector<1x384xf32>
    %11 = vector.shape_cast %10 : vector<1x384xf32> to vector<1x384xf32>
    %12 = vector.broadcast %11 : vector<1x384xf32> to vector<8x384xf32>
    %c2 = arith.constant 2 : index
    %c0_9 = arith.constant 0 : index
    %c0_10 = arith.constant 0 : index
    %13 = vector.load %arg4[%c2, %c0_9, %c0_10] : memref<3x1x384xf32, #tpu.memory_space<vmem>>, vector<1x1x384xf32>
    %14 = vector.shape_cast %13 : vector<1x1x384xf32> to vector<1x384xf32>
    %15 = vector.shape_cast %14 : vector<1x384xf32> to vector<1x384xf32>
    %16 = vector.broadcast %15 : vector<1x384xf32> to vector<8x384xf32>
    %c0_11 = arith.constant 0 : index
    %c0_12 = arith.constant 0 : index
    %c0_13 = arith.constant 0 : index
    %17 = vector.load %arg5[%c0_11, %c0_12, %c0_13] : memref<3x1x128xf32, #tpu.memory_space<vmem>>, vector<1x1x128xf32>
    %18 = vector.shape_cast %17 : vector<1x1x128xf32> to vector<1x128xf32>
    %19 = vector.shape_cast %18 : vector<1x128xf32> to vector<1x128xf32>
    %20 = vector.broadcast %19 : vector<1x128xf32> to vector<8x128xf32>
    %c1_14 = arith.constant 1 : index
    %c0_15 = arith.constant 0 : index
    %c0_16 = arith.constant 0 : index
    %21 = vector.load %arg5[%c1_14, %c0_15, %c0_16] : memref<3x1x128xf32, #tpu.memory_space<vmem>>, vector<1x1x128xf32>
    %22 = vector.shape_cast %21 : vector<1x1x128xf32> to vector<1x128xf32>
    %23 = vector.shape_cast %22 : vector<1x128xf32> to vector<1x128xf32>
    %24 = vector.broadcast %23 : vector<1x128xf32> to vector<8x128xf32>
    %c2_17 = arith.constant 2 : index
    %c0_18 = arith.constant 0 : index
    %c0_19 = arith.constant 0 : index
    %25 = vector.load %arg5[%c2_17, %c0_18, %c0_19] : memref<3x1x128xf32, #tpu.memory_space<vmem>>, vector<1x1x128xf32>
    %26 = vector.shape_cast %25 : vector<1x1x128xf32> to vector<1x128xf32>
    %27 = vector.shape_cast %26 : vector<1x128xf32> to vector<1x128xf32>
    %28 = vector.broadcast %27 : vector<1x128xf32> to vector<8x128xf32>
    %c0_20 = arith.constant 0 : index
    %c0_21 = arith.constant 0 : index
    %c0_22 = arith.constant 0 : index
    %29 = vector.load %arg1[%c0_20, %c0_21, %c0_22] : memref<3x8x128xf32, #tpu.memory_space<vmem>>, vector<1x8x128xf32>
    %30 = vector.shape_cast %29 : vector<1x8x128xf32> to vector<8x128xf32>
    %c1_23 = arith.constant 1 : index
    %c0_24 = arith.constant 0 : index
    %c0_25 = arith.constant 0 : index
    %31 = vector.load %arg1[%c1_23, %c0_24, %c0_25] : memref<3x8x128xf32, #tpu.memory_space<vmem>>, vector<1x8x128xf32>
    %32 = vector.shape_cast %31 : vector<1x8x128xf32> to vector<8x128xf32>
    %c2_26 = arith.constant 2 : index
    %c0_27 = arith.constant 0 : index
    %c0_28 = arith.constant 0 : index
    %33 = vector.load %arg1[%c2_26, %c0_27, %c0_28] : memref<3x8x128xf32, #tpu.memory_space<vmem>>, vector<1x8x128xf32>
    %34 = vector.shape_cast %33 : vector<1x8x128xf32> to vector<8x128xf32>
    %35 = vector.extract_strided_slice %8 {offsets = [0, 0], sizes = [8, 384], strides = [1, 1]} : vector<64x384xf32> to vector<8x384xf32>
    %36 = arith.truncf %30 : vector<8x128xf32> to vector<8x128xbf16>
    %c0_29 = arith.constant 0 : index
    %c0_30 = arith.constant 0 : index
    %c0_31 = arith.constant 0 : index
    %37 = vector.load %arg3[%c0_29, %c0_30, %c0_31] : memref<3x128x384xbf16, #tpu.memory_space<vmem>>, vector<1x128x384xbf16>
    %38 = vector.shape_cast %37 : vector<1x128x384xbf16> to vector<128x384xbf16>
    %cst_32 = arith.constant dense<0.000000e+00> : vector<8x384xf32>
    %39 = tpu.matmul %36, %38, %cst_32 {dimension_numbers = #tpu.dot_dimension_numbers<[1], [0], [0], [1], [0, 0, 1, 1], [], []>} : vector<8x128xbf16>, vector<128x384xbf16>, vector<8x384xf32> -> vector<8x384xf32>
    %40 = vector.extract_strided_slice %35 {offsets = [0, 0], sizes = [8, 256], strides = [1, 1]} : vector<8x384xf32> to vector<8x256xf32>
    %41 = vector.extract_strided_slice %39 {offsets = [0, 0], sizes = [8, 256], strides = [1, 1]} : vector<8x384xf32> to vector<8x256xf32>
    %42 = arith.addf %40, %41 : vector<8x256xf32>
    %43 = arith.negf %42 : vector<8x256xf32>
    %44 = math.exp %43 : vector<8x256xf32>
    %cst_33 = arith.constant 1.000000e+00 : f32
    %45 = vector.broadcast %cst_33 : f32 to vector<8x256xf32>
    %46 = arith.addf %45, %44 : vector<8x256xf32>
    %47 = arith.divf %45, %46 : vector<8x256xf32>
    %48 = vector.extract_strided_slice %47 {offsets = [0, 0], sizes = [8, 128], strides = [1, 1]} : vector<8x256xf32> to vector<8x128xf32>
    %49 = vector.extract_strided_slice %47 {offsets = [0, 128], sizes = [8, 128], strides = [1, 1]} : vector<8x256xf32> to vector<8x128xf32>
    %50 = vector.extract_strided_slice %35 {offsets = [0, 256], sizes = [8, 128], strides = [1, 1]} : vector<8x384xf32> to vector<8x128xf32>
    %51 = vector.extract_strided_slice %39 {offsets = [0, 256], sizes = [8, 128], strides = [1, 1]} : vector<8x384xf32> to vector<8x128xf32>
    %52 = arith.addf %51, %20 : vector<8x128xf32>
    %53 = arith.mulf %48, %52 : vector<8x128xf32>
    %54 = arith.addf %50, %53 : vector<8x128xf32>
    %55 = math.tanh %54 : vector<8x128xf32>
    %56 = arith.subf %30, %55 : vector<8x128xf32>
    %57 = arith.mulf %49, %56 : vector<8x128xf32>
    %58 = arith.addf %55, %57 : vector<8x128xf32>
    %59 = arith.truncf %58 : vector<8x128xf32> to vector<8x128xbf16>
    %c1_34 = arith.constant 1 : index
    %c0_35 = arith.constant 0 : index
    %c0_36 = arith.constant 0 : index
    %60 = vector.load %arg2[%c1_34, %c0_35, %c0_36] : memref<3x128x384xbf16, #tpu.memory_space<vmem>>, vector<1x128x384xbf16>
    %61 = vector.shape_cast %60 : vector<1x128x384xbf16> to vector<128x384xbf16>
    %cst_37 = arith.constant dense<0.000000e+00> : vector<8x384xf32>
    %62 = tpu.matmul %59, %61, %cst_37 {dimension_numbers = #tpu.dot_dimension_numbers<[1], [0], [0], [1], [0, 0, 1, 1], [], []>} : vector<8x128xbf16>, vector<128x384xbf16>, vector<8x384xf32> -> vector<8x384xf32>
    %63 = arith.addf %62, %12 : vector<8x384xf32>
    %64 = arith.truncf %32 : vector<8x128xf32> to vector<8x128xbf16>
    %c1_38 = arith.constant 1 : index
    %c0_39 = arith.constant 0 : index
    %c0_40 = arith.constant 0 : index
    %65 = vector.load %arg3[%c1_38, %c0_39, %c0_40] : memref<3x128x384xbf16, #tpu.memory_space<vmem>>, vector<1x128x384xbf16>
    %66 = vector.shape_cast %65 : vector<1x128x384xbf16> to vector<128x384xbf16>
    %cst_41 = arith.constant dense<0.000000e+00> : vector<8x384xf32>
    %67 = tpu.matmul %64, %66, %cst_41 {dimension_numbers = #tpu.dot_dimension_numbers<[1], [0], [0], [1], [0, 0, 1, 1], [], []>} : vector<8x128xbf16>, vector<128x384xbf16>, vector<8x384xf32> -> vector<8x384xf32>
    %68 = vector.extract_strided_slice %63 {offsets = [0, 0], sizes = [8, 256], strides = [1, 1]} : vector<8x384xf32> to vector<8x256xf32>
    %69 = vector.extract_strided_slice %67 {offsets = [0, 0], sizes = [8, 256], strides = [1, 1]} : vector<8x384xf32> to vector<8x256xf32>
    %70 = arith.addf %68, %69 : vector<8x256xf32>
    %71 = arith.negf %70 : vector<8x256xf32>
    %72 = math.exp %71 : vector<8x256xf32>
    %cst_42 = arith.constant 1.000000e+00 : f32
    %73 = vector.broadcast %cst_42 : f32 to vector<8x256xf32>
    %74 = arith.addf %73, %72 : vector<8x256xf32>
    %75 = arith.divf %73, %74 : vector<8x256xf32>
    %76 = vector.extract_strided_slice %75 {offsets = [0, 0], sizes = [8, 128], strides = [1, 1]} : vector<8x256xf32> to vector<8x128xf32>
    %77 = vector.extract_strided_slice %75 {offsets = [0, 128], sizes = [8, 128], strides = [1, 1]} : vector<8x256xf32> to vector<8x128xf32>
    %78 = vector.extract_strided_slice %63 {offsets = [0, 256], sizes = [8, 128], strides = [1, 1]} : vector<8x384xf32> to vector<8x128xf32>
    %79 = vector.extract_strided_slice %67 {offsets = [0, 256], sizes = [8, 128], strides = [1, 1]} : vector<8x384xf32> to vector<8x128xf32>
    %80 = arith.addf %79, %24 : vector<8x128xf32>
    %81 = arith.mulf %76, %80 : vector<8x128xf32>
    %82 = arith.addf %78, %81 : vector<8x128xf32>
    %83 = math.tanh %82 : vector<8x128xf32>
    %84 = arith.subf %32, %83 : vector<8x128xf32>
    %85 = arith.mulf %77, %84 : vector<8x128xf32>
    %86 = arith.addf %83, %85 : vector<8x128xf32>
    %87 = arith.truncf %86 : vector<8x128xf32> to vector<8x128xbf16>
    %c2_43 = arith.constant 2 : index
    %c0_44 = arith.constant 0 : index
    %c0_45 = arith.constant 0 : index
    %88 = vector.load %arg2[%c2_43, %c0_44, %c0_45] : memref<3x128x384xbf16, #tpu.memory_space<vmem>>, vector<1x128x384xbf16>
    %89 = vector.shape_cast %88 : vector<1x128x384xbf16> to vector<128x384xbf16>
    %cst_46 = arith.constant dense<0.000000e+00> : vector<8x384xf32>
    %90 = tpu.matmul %87, %89, %cst_46 {dimension_numbers = #tpu.dot_dimension_numbers<[1], [0], [0], [1], [0, 0, 1, 1], [], []>} : vector<8x128xbf16>, vector<128x384xbf16>, vector<8x384xf32> -> vector<8x384xf32>
    %91 = arith.addf %90, %16 : vector<8x384xf32>
    %92 = arith.truncf %34 : vector<8x128xf32> to vector<8x128xbf16>
    %c2_47 = arith.constant 2 : index
    %c0_48 = arith.constant 0 : index
    %c0_49 = arith.constant 0 : index
    %93 = vector.load %arg3[%c2_47, %c0_48, %c0_49] : memref<3x128x384xbf16, #tpu.memory_space<vmem>>, vector<1x128x384xbf16>
    %94 = vector.shape_cast %93 : vector<1x128x384xbf16> to vector<128x384xbf16>
    %cst_50 = arith.constant dense<0.000000e+00> : vector<8x384xf32>
    %95 = tpu.matmul %92, %94, %cst_50 {dimension_numbers = #tpu.dot_dimension_numbers<[1], [0], [0], [1], [0, 0, 1, 1], [], []>} : vector<8x128xbf16>, vector<128x384xbf16>, vector<8x384xf32> -> vector<8x384xf32>
    %96 = vector.extract_strided_slice %91 {offsets = [0, 0], sizes = [8, 256], strides = [1, 1]} : vector<8x384xf32> to vector<8x256xf32>
    %97 = vector.extract_strided_slice %95 {offsets = [0, 0], sizes = [8, 256], strides = [1, 1]} : vector<8x384xf32> to vector<8x256xf32>
    %98 = arith.addf %96, %97 : vector<8x256xf32>
    %99 = arith.negf %98 : vector<8x256xf32>
    %100 = math.exp %99 : vector<8x256xf32>
    %cst_51 = arith.constant 1.000000e+00 : f32
    %101 = vector.broadcast %cst_51 : f32 to vector<8x256xf32>
    %102 = arith.addf %101, %100 : vector<8x256xf32>
    %103 = arith.divf %101, %102 : vector<8x256xf32>
    %104 = vector.extract_strided_slice %103 {offsets = [0, 0], sizes = [8, 128], strides = [1, 1]} : vector<8x256xf32> to vector<8x128xf32>
    %105 = vector.extract_strided_slice %103 {offsets = [0, 128], sizes = [8, 128], strides = [1, 1]} : vector<8x256xf32> to vector<8x128xf32>
    %106 = vector.extract_strided_slice %91 {offsets = [0, 256], sizes = [8, 128], strides = [1, 1]} : vector<8x384xf32> to vector<8x128xf32>
    %107 = vector.extract_strided_slice %95 {offsets = [0, 256], sizes = [8, 128], strides = [1, 1]} : vector<8x384xf32> to vector<8x128xf32>
    %108 = arith.addf %107, %28 : vector<8x128xf32>
    %109 = arith.mulf %104, %108 : vector<8x128xf32>
    %110 = arith.addf %106, %109 : vector<8x128xf32>
    %111 = math.tanh %110 : vector<8x128xf32>
    %112 = arith.subf %34, %111 : vector<8x128xf32>
    %113 = arith.mulf %105, %112 : vector<8x128xf32>
    %114 = arith.addf %111, %113 : vector<8x128xf32>
    %c0_52 = arith.constant 0 : index
    %c0_53 = arith.constant 0 : index
    %115 = vector.load %arg10[%c0_52, %c0_53] : memref<64x128xf32, #tpu.memory_space<vmem>>, vector<8x128xf32>
    tpu.vector_store %arg10[%c0_52, %c0_53], %114 {strides = array<i32>} : memref<64x128xf32, #tpu.memory_space<vmem>>, vector<8x128xf32>,
    %116 = vector.extract_strided_slice %8 {offsets = [8, 0], sizes = [8, 384], strides = [1, 1]} : vector<64x384xf32> to vector<8x384xf32>
    %117 = arith.truncf %58 : vector<8x128xf32> to vector<8x128xbf16>
    %c0_54 = arith.constant 0 : index
    %c0_55 = arith.constant 0 : index
    %c0_56 = arith.constant 0 : index
    %118 = vector.load %arg3[%c0_54, %c0_55, %c0_56] : memref<3x128x384xbf16, #tpu.memory_space<vmem>>, vector<1x128x384xbf16>
    %119 = vector.shape_cast %118 : vector<1x128x384xbf16> to vector<128x384xbf16>
    %cst_57 = arith.constant dense<0.000000e+00> : vector<8x384xf32>
    %120 = tpu.matmul %117, %119, %cst_57 {dimension_numbers = #tpu.dot_dimension_numbers<[1], [0], [0], [1], [0, 0, 1, 1], [], []>} : vector<8x128xbf16>, vector<128x384xbf16>, vector<8x384xf32> -> vector<8x384xf32>
    %121 = vector.extract_strided_slice %116 {offsets = [0, 0], sizes = [8, 256], strides = [1, 1]} : vector<8x384xf32> to vector<8x256xf32>
    %122 = vector.extract_strided_slice %120 {offsets = [0, 0], sizes = [8, 256], strides = [1, 1]} : vector<8x384xf32> to vector<8x256xf32>
    %123 = arith.addf %121, %122 : vector<8x256xf32>
    %124 = arith.negf %123 : vector<8x256xf32>
    %125 = math.exp %124 : vector<8x256xf32>
    %cst_58 = arith.constant 1.000000e+00 : f32
    %126 = vector.broadcast %cst_58 : f32 to vector<8x256xf32>
    %127 = arith.addf %126, %125 : vector<8x256xf32>
    %128 = arith.divf %126, %127 : vector<8x256xf32>
    %129 = vector.extract_strided_slice %128 {offsets = [0, 0], sizes = [8, 128], strides = [1, 1]} : vector<8x256xf32> to vector<8x128xf32>
    %130 = vector.extract_strided_slice %128 {offsets = [0, 128], sizes = [8, 128], strides = [1, 1]} : vector<8x256xf32> to vector<8x128xf32>
    %131 = vector.extract_strided_slice %116 {offsets = [0, 256], sizes = [8, 128], strides = [1, 1]} : vector<8x384xf32> to vector<8x128xf32>
    %132 = vector.extract_strided_slice %120 {offsets = [0, 256], sizes = [8, 128], strides = [1, 1]} : vector<8x384xf32> to vector<8x128xf32>
    %133 = arith.addf %132, %20 : vector<8x128xf32>
    %134 = arith.mulf %129, %133 : vector<8x128xf32>
    %135 = arith.addf %131, %134 : vector<8x128xf32>
    %136 = math.tanh %135 : vector<8x128xf32>
    %137 = arith.subf %58, %136 : vector<8x128xf32>
    %138 = arith.mulf %130, %137 : vector<8x128xf32>
    %139 = arith.addf %136, %138 : vector<8x128xf32>
    %140 = arith.truncf %139 : vector<8x128xf32> to vector<8x128xbf16>
    %c1_59 = arith.constant 1 : index
    %c0_60 = arith.constant 0 : index
    %c0_61 = arith.constant 0 : index
    %141 = vector.load %arg2[%c1_59, %c0_60, %c0_61] : memref<3x128x384xbf16, #tpu.memory_space<vmem>>, vector<1x128x384xbf16>
    %142 = vector.shape_cast %141 : vector<1x128x384xbf16> to vector<128x384xbf16>
    %cst_62 = arith.constant dense<0.000000e+00> : vector<8x384xf32>
    %143 = tpu.matmul %140, %142, %cst_62 {dimension_numbers = #tpu.dot_dimension_numbers<[1], [0], [0], [1], [0, 0, 1, 1], [], []>} : vector<8x128xbf16>, vector<128x384xbf16>, vector<8x384xf32> -> vector<8x384xf32>
    %144 = arith.addf %143, %12 : vector<8x384xf32>
    %145 = arith.truncf %86 : vector<8x128xf32> to vector<8x128xbf16>
    %c1_63 = arith.constant 1 : index
    %c0_64 = arith.constant 0 : index
    %c0_65 = arith.constant 0 : index
    %146 = vector.load %arg3[%c1_63, %c0_64, %c0_65] : memref<3x128x384xbf16, #tpu.memory_space<vmem>>, vector<1x128x384xbf16>
    %147 = vector.shape_cast %146 : vector<1x128x384xbf16> to vector<128x384xbf16>
    %cst_66 = arith.constant dense<0.000000e+00> : vector<8x384xf32>
    %148 = tpu.matmul %145, %147, %cst_66 {dimension_numbers = #tpu.dot_dimension_numbers<[1], [0], [0], [1], [0, 0, 1, 1], [], []>} : vector<8x128xbf16>, vector<128x384xbf16>, vector<8x384xf32> -> vector<8x384xf32>
    %149 = vector.extract_strided_slice %144 {offsets = [0, 0], sizes = [8, 256], strides = [1, 1]} : vector<8x384xf32> to vector<8x256xf32>
    %150 = vector.extract_strided_slice %148 {offsets = [0, 0], sizes = [8, 256], strides = [1, 1]} : vector<8x384xf32> to vector<8x256xf32>
    %151 = arith.addf %149, %150 : vector<8x256xf32>
    %152 = arith.negf %151 : vector<8x256xf32>
    %153 = math.exp %152 : vector<8x256xf32>
    %cst_67 = arith.constant 1.000000e+00 : f32
    %154 = vector.broadcast %cst_67 : f32 to vector<8x256xf32>
    %155 = arith.addf %154, %153 : vector<8x256xf32>
    %156 = arith.divf %154, %155 : vector<8x256xf32>
    %157 = vector.extract_strided_slice %156 {offsets = [0, 0], sizes = [8, 128], strides = [1, 1]} : vector<8x256xf32> to vector<8x128xf32>
    %158 = vector.extract_strided_slice %156 {offsets = [0, 128], sizes = [8, 128], strides = [1, 1]} : vector<8x256xf32> to vector<8x128xf32>
    %159 = vector.extract_strided_slice %144 {offsets = [0, 256], sizes = [8, 128], strides = [1, 1]} : vector<8x384xf32> to vector<8x128xf32>
    %160 = vector.extract_strided_slice %148 {offsets = [0, 256], sizes = [8, 128], strides = [1, 1]} : vector<8x384xf32> to vector<8x128xf32>
    %161 = arith.addf %160, %24 : vector<8x128xf32>
    %162 = arith.mulf %157, %161 : vector<8x128xf32>
    %163 = arith.addf %159, %162 : vector<8x128xf32>
    %164 = math.tanh %163 : vector<8x128xf32>
    %165 = arith.subf %86, %164 : vector<8x128xf32>
    %166 = arith.mulf %158, %165 : vector<8x128xf32>
    %167 = arith.addf %164, %166 : vector<8x128xf32>
    %168 = arith.truncf %167 : vector<8x128xf32> to vector<8x128xbf16>
    %c2_68 = arith.constant 2 : index
    %c0_69 = arith.constant 0 : index
    %c0_70 = arith.constant 0 : index
    %169 = vector.load %arg2[%c2_68, %c0_69, %c0_70] : memref<3x128x384xbf16, #tpu.memory_space<vmem>>, vector<1x128x384xbf16>
    %170 = vector.shape_cast %169 : vector<1x128x384xbf16> to vector<128x384xbf16>
    %cst_71 = arith.constant dense<0.000000e+00> : vector<8x384xf32>
    %171 = tpu.matmul %168, %170, %cst_71 {dimension_numbers = #tpu.dot_dimension_numbers<[1], [0], [0], [1], [0, 0, 1, 1], [], []>} : vector<8x128xbf16>, vector<128x384xbf16>, vector<8x384xf32> -> vector<8x384xf32>
    %172 = arith.addf %171, %16 : vector<8x384xf32>
    %173 = arith.truncf %114 : vector<8x128xf32> to vector<8x128xbf16>
    %c2_72 = arith.constant 2 : index
    %c0_73 = arith.constant 0 : index
    %c0_74 = arith.constant 0 : index
    %174 = vector.load %arg3[%c2_72, %c0_73, %c0_74] : memref<3x128x384xbf16, #tpu.memory_space<vmem>>, vector<1x128x384xbf16>
    %175 = vector.shape_cast %174 : vector<1x128x384xbf16> to vector<128x384xbf16>
    %cst_75 = arith.constant dense<0.000000e+00> : vector<8x384xf32>
    %176 = tpu.matmul %173, %175, %cst_75 {dimension_numbers = #tpu.dot_dimension_numbers<[1], [0], [0], [1], [0, 0, 1, 1], [], []>} : vector<8x128xbf16>, vector<128x384xbf16>, vector<8x384xf32> -> vector<8x384xf32>
    %177 = vector.extract_strided_slice %172 {offsets = [0, 0], sizes = [8, 256], strides = [1, 1]} : vector<8x384xf32> to vector<8x256xf32>
    %178 = vector.extract_strided_slice %176 {offsets = [0, 0], sizes = [8, 256], strides = [1, 1]} : vector<8x384xf32> to vector<8x256xf32>
    %179 = arith.addf %177, %178 : vector<8x256xf32>
    %180 = arith.negf %179 : vector<8x256xf32>
    %181 = math.exp %180 : vector<8x256xf32>
    %cst_76 = arith.constant 1.000000e+00 : f32
    %182 = vector.broadcast %cst_76 : f32 to vector<8x256xf32>
    %183 = arith.addf %182, %181 : vector<8x256xf32>
    %184 = arith.divf %182, %183 : vector<8x256xf32>
    %185 = vector.extract_strided_slice %184 {offsets = [0, 0], sizes = [8, 128], strides = [1, 1]} : vector<8x256xf32> to vector<8x128xf32>
    %186 = vector.extract_strided_slice %184 {offsets = [0, 128], sizes = [8, 128], strides = [1, 1]} : vector<8x256xf32> to vector<8x128xf32>
    %187 = vector.extract_strided_slice %172 {offsets = [0, 256], sizes = [8, 128], strides = [1, 1]} : vector<8x384xf32> to vector<8x128xf32>
    %188 = vector.extract_strided_slice %176 {offsets = [0, 256], sizes = [8, 128], strides = [1, 1]} : vector<8x384xf32> to vector<8x128xf32>
    %189 = arith.addf %188, %28 : vector<8x128xf32>
    %190 = arith.mulf %185, %189 : vector<8x128xf32>
    %191 = arith.addf %187, %190 : vector<8x128xf32>
    %192 = math.tanh %191 : vector<8x128xf32>
    %193 = arith.subf %114, %192 : vector<8x128xf32>
    %194 = arith.mulf %186, %193 : vector<8x128xf32>
    %195 = arith.addf %192, %194 : vector<8x128xf32>
    %c8 = arith.constant 8 : index
    %c0_77 = arith.constant 0 : index
    %196 = vector.load %arg10[%c8, %c0_77] : memref<64x128xf32, #tpu.memory_space<vmem>>, vector<8x128xf32>
    tpu.vector_store %arg10[%c8, %c0_77], %195 {strides = array<i32>} : memref<64x128xf32, #tpu.memory_space<vmem>>, vector<8x128xf32>,
    %197 = vector.extract_strided_slice %8 {offsets = [16, 0], sizes = [8, 384], strides = [1, 1]} : vector<64x384xf32> to vector<8x384xf32>
    %198 = arith.truncf %139 : vector<8x128xf32> to vector<8x128xbf16>
    %c0_78 = arith.constant 0 : index
    %c0_79 = arith.constant 0 : index
    %c0_80 = arith.constant 0 : index
    %199 = vector.load %arg3[%c0_78, %c0_79, %c0_80] : memref<3x128x384xbf16, #tpu.memory_space<vmem>>, vector<1x128x384xbf16>
    %200 = vector.shape_cast %199 : vector<1x128x384xbf16> to vector<128x384xbf16>
    %cst_81 = arith.constant dense<0.000000e+00> : vector<8x384xf32>
    %201 = tpu.matmul %198, %200, %cst_81 {dimension_numbers = #tpu.dot_dimension_numbers<[1], [0], [0], [1], [0, 0, 1, 1], [], []>} : vector<8x128xbf16>, vector<128x384xbf16>, vector<8x384xf32> -> vector<8x384xf32>
    %202 = vector.extract_strided_slice %197 {offsets = [0, 0], sizes = [8, 256], strides = [1, 1]} : vector<8x384xf32> to vector<8x256xf32>
    %203 = vector.extract_strided_slice %201 {offsets = [0, 0], sizes = [8, 256], strides = [1, 1]} : vector<8x384xf32> to vector<8x256xf32>
    %204 = arith.addf %202, %203 : vector<8x256xf32>
    %205 = arith.negf %204 : vector<8x256xf32>
    %206 = math.exp %205 : vector<8x256xf32>
    %cst_82 = arith.constant 1.000000e+00 : f32
    %207 = vector.broadcast %cst_82 : f32 to vector<8x256xf32>
    %208 = arith.addf %207, %206 : vector<8x256xf32>
    %209 = arith.divf %207, %208 : vector<8x256xf32>
    %210 = vector.extract_strided_slice %209 {offsets = [0, 0], sizes = [8, 128], strides = [1, 1]} : vector<8x256xf32> to vector<8x128xf32>
    %211 = vector.extract_strided_slice %209 {offsets = [0, 128], sizes = [8, 128], strides = [1, 1]} : vector<8x256xf32> to vector<8x128xf32>
    %212 = vector.extract_strided_slice %197 {offsets = [0, 256], sizes = [8, 128], strides = [1, 1]} : vector<8x384xf32> to vector<8x128xf32>
    %213 = vector.extract_strided_slice %201 {offsets = [0, 256], sizes = [8, 128], strides = [1, 1]} : vector<8x384xf32> to vector<8x128xf32>
    %214 = arith.addf %213, %20 : vector<8x128xf32>
    %215 = arith.mulf %210, %214 : vector<8x128xf32>
    %216 = arith.addf %212, %215 : vector<8x128xf32>
    %217 = math.tanh %216 : vector<8x128xf32>
    %218 = arith.subf %139, %217 : vector<8x128xf32>
    %219 = arith.mulf %211, %218 : vector<8x128xf32>
    %220 = arith.addf %217, %219 : vector<8x128xf32>
    %221 = arith.truncf %220 : vector<8x128xf32> to vector<8x128xbf16>
    %c1_83 = arith.constant 1 : index
    %c0_84 = arith.constant 0 : index
    %c0_85 = arith.constant 0 : index
    %222 = vector.load %arg2[%c1_83, %c0_84, %c0_85] : memref<3x128x384xbf16, #tpu.memory_space<vmem>>, vector<1x128x384xbf16>
    %223 = vector.shape_cast %222 : vector<1x128x384xbf16> to vector<128x384xbf16>
    %cst_86 = arith.constant dense<0.000000e+00> : vector<8x384xf32>
    %224 = tpu.matmul %221, %223, %cst_86 {dimension_numbers = #tpu.dot_dimension_numbers<[1], [0], [0], [1], [0, 0, 1, 1], [], []>} : vector<8x128xbf16>, vector<128x384xbf16>, vector<8x384xf32> -> vector<8x384xf32>
    %225 = arith.addf %224, %12 : vector<8x384xf32>
    %226 = arith.truncf %167 : vector<8x128xf32> to vector<8x128xbf16>
    %c1_87 = arith.constant 1 : index
    %c0_88 = arith.constant 0 : index
    %c0_89 = arith.constant 0 : index
    %227 = vector.load %arg3[%c1_87, %c0_88, %c0_89] : memref<3x128x384xbf16, #tpu.memory_space<vmem>>, vector<1x128x384xbf16>
    %228 = vector.shape_cast %227 : vector<1x128x384xbf16> to vector<128x384xbf16>
    %cst_90 = arith.constant dense<0.000000e+00> : vector<8x384xf32>
    %229 = tpu.matmul %226, %228, %cst_90 {dimension_numbers = #tpu.dot_dimension_numbers<[1], [0], [0], [1], [0, 0, 1, 1], [], []>} : vector<8x128xbf16>, vector<128x384xbf16>, vector<8x384xf32> -> vector<8x384xf32>
    %230 = vector.extract_strided_slice %225 {offsets = [0, 0], sizes = [8, 256], strides = [1, 1]} : vector<8x384xf32> to vector<8x256xf32>
    %231 = vector.extract_strided_slice %229 {offsets = [0, 0], sizes = [8, 256], strides = [1, 1]} : vector<8x384xf32> to vector<8x256xf32>
    %232 = arith.addf %230, %231 : vector<8x256xf32>
    %233 = arith.negf %232 : vector<8x256xf32>
    %234 = math.exp %233 : vector<8x256xf32>
    %cst_91 = arith.constant 1.000000e+00 : f32
    %235 = vector.broadcast %cst_91 : f32 to vector<8x256xf32>
    %236 = arith.addf %235, %234 : vector<8x256xf32>
    %237 = arith.divf %235, %236 : vector<8x256xf32>
    %238 = vector.extract_strided_slice %237 {offsets = [0, 0], sizes = [8, 128], strides = [1, 1]} : vector<8x256xf32> to vector<8x128xf32>
    %239 = vector.extract_strided_slice %237 {offsets = [0, 128], sizes = [8, 128], strides = [1, 1]} : vector<8x256xf32> to vector<8x128xf32>
    %240 = vector.extract_strided_slice %225 {offsets = [0, 256], sizes = [8, 128], strides = [1, 1]} : vector<8x384xf32> to vector<8x128xf32>
    %241 = vector.extract_strided_slice %229 {offsets = [0, 256], sizes = [8, 128], strides = [1, 1]} : vector<8x384xf32> to vector<8x128xf32>
    %242 = arith.addf %241, %24 : vector<8x128xf32>
    %243 = arith.mulf %238, %242 : vector<8x128xf32>
    %244 = arith.addf %240, %243 : vector<8x128xf32>
    %245 = math.tanh %244 : vector<8x128xf32>
    %246 = arith.subf %167, %245 : vector<8x128xf32>
    %247 = arith.mulf %239, %246 : vector<8x128xf32>
    %248 = arith.addf %245, %247 : vector<8x128xf32>
    %249 = arith.truncf %248 : vector<8x128xf32> to vector<8x128xbf16>
    %c2_92 = arith.constant 2 : index
    %c0_93 = arith.constant 0 : index
    %c0_94 = arith.constant 0 : index
    %250 = vector.load %arg2[%c2_92, %c0_93, %c0_94] : memref<3x128x384xbf16, #tpu.memory_space<vmem>>, vector<1x128x384xbf16>
    %251 = vector.shape_cast %250 : vector<1x128x384xbf16> to vector<128x384xbf16>
    %cst_95 = arith.constant dense<0.000000e+00> : vector<8x384xf32>
    %252 = tpu.matmul %249, %251, %cst_95 {dimension_numbers = #tpu.dot_dimension_numbers<[1], [0], [0], [1], [0, 0, 1, 1], [], []>} : vector<8x128xbf16>, vector<128x384xbf16>, vector<8x384xf32> -> vector<8x384xf32>
    %253 = arith.addf %252, %16 : vector<8x384xf32>
    %254 = arith.truncf %195 : vector<8x128xf32> to vector<8x128xbf16>
    %c2_96 = arith.constant 2 : index
    %c0_97 = arith.constant 0 : index
    %c0_98 = arith.constant 0 : index
    %255 = vector.load %arg3[%c2_96, %c0_97, %c0_98] : memref<3x128x384xbf16, #tpu.memory_space<vmem>>, vector<1x128x384xbf16>
    %256 = vector.shape_cast %255 : vector<1x128x384xbf16> to vector<128x384xbf16>
    %cst_99 = arith.constant dense<0.000000e+00> : vector<8x384xf32>
    %257 = tpu.matmul %254, %256, %cst_99 {dimension_numbers = #tpu.dot_dimension_numbers<[1], [0], [0], [1], [0, 0, 1, 1], [], []>} : vector<8x128xbf16>, vector<128x384xbf16>, vector<8x384xf32> -> vector<8x384xf32>
    %258 = vector.extract_strided_slice %253 {offsets = [0, 0], sizes = [8, 256], strides = [1, 1]} : vector<8x384xf32> to vector<8x256xf32>
    %259 = vector.extract_strided_slice %257 {offsets = [0, 0], sizes = [8, 256], strides = [1, 1]} : vector<8x384xf32> to vector<8x256xf32>
    %260 = arith.addf %258, %259 : vector<8x256xf32>
    %261 = arith.negf %260 : vector<8x256xf32>
    %262 = math.exp %261 : vector<8x256xf32>
    %cst_100 = arith.constant 1.000000e+00 : f32
    %263 = vector.broadcast %cst_100 : f32 to vector<8x256xf32>
    %264 = arith.addf %263, %262 : vector<8x256xf32>
    %265 = arith.divf %263, %264 : vector<8x256xf32>
    %266 = vector.extract_strided_slice %265 {offsets = [0, 0], sizes = [8, 128], strides = [1, 1]} : vector<8x256xf32> to vector<8x128xf32>
    %267 = vector.extract_strided_slice %265 {offsets = [0, 128], sizes = [8, 128], strides = [1, 1]} : vector<8x256xf32> to vector<8x128xf32>
    %268 = vector.extract_strided_slice %253 {offsets = [0, 256], sizes = [8, 128], strides = [1, 1]} : vector<8x384xf32> to vector<8x128xf32>
    %269 = vector.extract_strided_slice %257 {offsets = [0, 256], sizes = [8, 128], strides = [1, 1]} : vector<8x384xf32> to vector<8x128xf32>
    %270 = arith.addf %269, %28 : vector<8x128xf32>
    %271 = arith.mulf %266, %270 : vector<8x128xf32>
    %272 = arith.addf %268, %271 : vector<8x128xf32>
    %273 = math.tanh %272 : vector<8x128xf32>
    %274 = arith.subf %195, %273 : vector<8x128xf32>
    %275 = arith.mulf %267, %274 : vector<8x128xf32>
    %276 = arith.addf %273, %275 : vector<8x128xf32>
    %c16 = arith.constant 16 : index
    %c0_101 = arith.constant 0 : index
    %277 = vector.load %arg10[%c16, %c0_101] : memref<64x128xf32, #tpu.memory_space<vmem>>, vector<8x128xf32>
    tpu.vector_store %arg10[%c16, %c0_101], %276 {strides = array<i32>} : memref<64x128xf32, #tpu.memory_space<vmem>>, vector<8x128xf32>,
    %278 = vector.extract_strided_slice %8 {offsets = [24, 0], sizes = [8, 384], strides = [1, 1]} : vector<64x384xf32> to vector<8x384xf32>
    %279 = arith.truncf %220 : vector<8x128xf32> to vector<8x128xbf16>
    %c0_102 = arith.constant 0 : index
    %c0_103 = arith.constant 0 : index
    %c0_104 = arith.constant 0 : index
    %280 = vector.load %arg3[%c0_102, %c0_103, %c0_104] : memref<3x128x384xbf16, #tpu.memory_space<vmem>>, vector<1x128x384xbf16>
    %281 = vector.shape_cast %280 : vector<1x128x384xbf16> to vector<128x384xbf16>
    %cst_105 = arith.constant dense<0.000000e+00> : vector<8x384xf32>
    %282 = tpu.matmul %279, %281, %cst_105 {dimension_numbers = #tpu.dot_dimension_numbers<[1], [0], [0], [1], [0, 0, 1, 1], [], []>} : vector<8x128xbf16>, vector<128x384xbf16>, vector<8x384xf32> -> vector<8x384xf32>
    %283 = vector.extract_strided_slice %278 {offsets = [0, 0], sizes = [8, 256], strides = [1, 1]} : vector<8x384xf32> to vector<8x256xf32>
    %284 = vector.extract_strided_slice %282 {offsets = [0, 0], sizes = [8, 256], strides = [1, 1]} : vector<8x384xf32> to vector<8x256xf32>
    %285 = arith.addf %283, %284 : vector<8x256xf32>
    %286 = arith.negf %285 : vector<8x256xf32>
    %287 = math.exp %286 : vector<8x256xf32>
    %cst_106 = arith.constant 1.000000e+00 : f32
    %288 = vector.broadcast %cst_106 : f32 to vector<8x256xf32>
    %289 = arith.addf %288, %287 : vector<8x256xf32>
    %290 = arith.divf %288, %289 : vector<8x256xf32>
    %291 = vector.extract_strided_slice %290 {offsets = [0, 0], sizes = [8, 128], strides = [1, 1]} : vector<8x256xf32> to vector<8x128xf32>
    %292 = vector.extract_strided_slice %290 {offsets = [0, 128], sizes = [8, 128], strides = [1, 1]} : vector<8x256xf32> to vector<8x128xf32>
    %293 = vector.extract_strided_slice %278 {offsets = [0, 256], sizes = [8, 128], strides = [1, 1]} : vector<8x384xf32> to vector<8x128xf32>
    %294 = vector.extract_strided_slice %282 {offsets = [0, 256], sizes = [8, 128], strides = [1, 1]} : vector<8x384xf32> to vector<8x128xf32>
    %295 = arith.addf %294, %20 : vector<8x128xf32>
    %296 = arith.mulf %291, %295 : vector<8x128xf32>
    %297 = arith.addf %293, %296 : vector<8x128xf32>
    %298 = math.tanh %297 : vector<8x128xf32>
    %299 = arith.subf %220, %298 : vector<8x128xf32>
    %300 = arith.mulf %292, %299 : vector<8x128xf32>
    %301 = arith.addf %298, %300 : vector<8x128xf32>
    %302 = arith.truncf %301 : vector<8x128xf32> to vector<8x128xbf16>
    %c1_107 = arith.constant 1 : index
    %c0_108 = arith.constant 0 : index
    %c0_109 = arith.constant 0 : index
    %303 = vector.load %arg2[%c1_107, %c0_108, %c0_109] : memref<3x128x384xbf16, #tpu.memory_space<vmem>>, vector<1x128x384xbf16>
    %304 = vector.shape_cast %303 : vector<1x128x384xbf16> to vector<128x384xbf16>
    %cst_110 = arith.constant dense<0.000000e+00> : vector<8x384xf32>
    %305 = tpu.matmul %302, %304, %cst_110 {dimension_numbers = #tpu.dot_dimension_numbers<[1], [0], [0], [1], [0, 0, 1, 1], [], []>} : vector<8x128xbf16>, vector<128x384xbf16>, vector<8x384xf32> -> vector<8x384xf32>
    %306 = arith.addf %305, %12 : vector<8x384xf32>
    %307 = arith.truncf %248 : vector<8x128xf32> to vector<8x128xbf16>
    %c1_111 = arith.constant 1 : index
    %c0_112 = arith.constant 0 : index
    %c0_113 = arith.constant 0 : index
    %308 = vector.load %arg3[%c1_111, %c0_112, %c0_113] : memref<3x128x384xbf16, #tpu.memory_space<vmem>>, vector<1x128x384xbf16>
    %309 = vector.shape_cast %308 : vector<1x128x384xbf16> to vector<128x384xbf16>
    %cst_114 = arith.constant dense<0.000000e+00> : vector<8x384xf32>
    %310 = tpu.matmul %307, %309, %cst_114 {dimension_numbers = #tpu.dot_dimension_numbers<[1], [0], [0], [1], [0, 0, 1, 1], [], []>} : vector<8x128xbf16>, vector<128x384xbf16>, vector<8x384xf32> -> vector<8x384xf32>
    %311 = vector.extract_strided_slice %306 {offsets = [0, 0], sizes = [8, 256], strides = [1, 1]} : vector<8x384xf32> to vector<8x256xf32>
    %312 = vector.extract_strided_slice %310 {offsets = [0, 0], sizes = [8, 256], strides = [1, 1]} : vector<8x384xf32> to vector<8x256xf32>
    %313 = arith.addf %311, %312 : vector<8x256xf32>
    %314 = arith.negf %313 : vector<8x256xf32>
    %315 = math.exp %314 : vector<8x256xf32>
    %cst_115 = arith.constant 1.000000e+00 : f32
    %316 = vector.broadcast %cst_115 : f32 to vector<8x256xf32>
    %317 = arith.addf %316, %315 : vector<8x256xf32>
    %318 = arith.divf %316, %317 : vector<8x256xf32>
    %319 = vector.extract_strided_slice %318 {offsets = [0, 0], sizes = [8, 128], strides = [1, 1]} : vector<8x256xf32> to vector<8x128xf32>
    %320 = vector.extract_strided_slice %318 {offsets = [0, 128], sizes = [8, 128], strides = [1, 1]} : vector<8x256xf32> to vector<8x128xf32>
    %321 = vector.extract_strided_slice %306 {offsets = [0, 256], sizes = [8, 128], strides = [1, 1]} : vector<8x384xf32> to vector<8x128xf32>
    %322 = vector.extract_strided_slice %310 {offsets = [0, 256], sizes = [8, 128], strides = [1, 1]} : vector<8x384xf32> to vector<8x128xf32>
    %323 = arith.addf %322, %24 : vector<8x128xf32>
    %324 = arith.mulf %319, %323 : vector<8x128xf32>
    %325 = arith.addf %321, %324 : vector<8x128xf32>
    %326 = math.tanh %325 : vector<8x128xf32>
    %327 = arith.subf %248, %326 : vector<8x128xf32>
    %328 = arith.mulf %320, %327 : vector<8x128xf32>
    %329 = arith.addf %326, %328 : vector<8x128xf32>
    %330 = arith.truncf %329 : vector<8x128xf32> to vector<8x128xbf16>
    %c2_116 = arith.constant 2 : index
    %c0_117 = arith.constant 0 : index
    %c0_118 = arith.constant 0 : index
    %331 = vector.load %arg2[%c2_116, %c0_117, %c0_118] : memref<3x128x384xbf16, #tpu.memory_space<vmem>>, vector<1x128x384xbf16>
    %332 = vector.shape_cast %331 : vector<1x128x384xbf16> to vector<128x384xbf16>
    %cst_119 = arith.constant dense<0.000000e+00> : vector<8x384xf32>
    %333 = tpu.matmul %330, %332, %cst_119 {dimension_numbers = #tpu.dot_dimension_numbers<[1], [0], [0], [1], [0, 0, 1, 1], [], []>} : vector<8x128xbf16>, vector<128x384xbf16>, vector<8x384xf32> -> vector<8x384xf32>
    %334 = arith.addf %333, %16 : vector<8x384xf32>
    %335 = arith.truncf %276 : vector<8x128xf32> to vector<8x128xbf16>
    %c2_120 = arith.constant 2 : index
    %c0_121 = arith.constant 0 : index
    %c0_122 = arith.constant 0 : index
    %336 = vector.load %arg3[%c2_120, %c0_121, %c0_122] : memref<3x128x384xbf16, #tpu.memory_space<vmem>>, vector<1x128x384xbf16>
    %337 = vector.shape_cast %336 : vector<1x128x384xbf16> to vector<128x384xbf16>
    %cst_123 = arith.constant dense<0.000000e+00> : vector<8x384xf32>
    %338 = tpu.matmul %335, %337, %cst_123 {dimension_numbers = #tpu.dot_dimension_numbers<[1], [0], [0], [1], [0, 0, 1, 1], [], []>} : vector<8x128xbf16>, vector<128x384xbf16>, vector<8x384xf32> -> vector<8x384xf32>
    %339 = vector.extract_strided_slice %334 {offsets = [0, 0], sizes = [8, 256], strides = [1, 1]} : vector<8x384xf32> to vector<8x256xf32>
    %340 = vector.extract_strided_slice %338 {offsets = [0, 0], sizes = [8, 256], strides = [1, 1]} : vector<8x384xf32> to vector<8x256xf32>
    %341 = arith.addf %339, %340 : vector<8x256xf32>
    %342 = arith.negf %341 : vector<8x256xf32>
    %343 = math.exp %342 : vector<8x256xf32>
    %cst_124 = arith.constant 1.000000e+00 : f32
    %344 = vector.broadcast %cst_124 : f32 to vector<8x256xf32>
    %345 = arith.addf %344, %343 : vector<8x256xf32>
    %346 = arith.divf %344, %345 : vector<8x256xf32>
    %347 = vector.extract_strided_slice %346 {offsets = [0, 0], sizes = [8, 128], strides = [1, 1]} : vector<8x256xf32> to vector<8x128xf32>
    %348 = vector.extract_strided_slice %346 {offsets = [0, 128], sizes = [8, 128], strides = [1, 1]} : vector<8x256xf32> to vector<8x128xf32>
    %349 = vector.extract_strided_slice %334 {offsets = [0, 256], sizes = [8, 128], strides = [1, 1]} : vector<8x384xf32> to vector<8x128xf32>
    %350 = vector.extract_strided_slice %338 {offsets = [0, 256], sizes = [8, 128], strides = [1, 1]} : vector<8x384xf32> to vector<8x128xf32>
    %351 = arith.addf %350, %28 : vector<8x128xf32>
    %352 = arith.mulf %347, %351 : vector<8x128xf32>
    %353 = arith.addf %349, %352 : vector<8x128xf32>
    %354 = math.tanh %353 : vector<8x128xf32>
    %355 = arith.subf %276, %354 : vector<8x128xf32>
    %356 = arith.mulf %348, %355 : vector<8x128xf32>
    %357 = arith.addf %354, %356 : vector<8x128xf32>
    %c24 = arith.constant 24 : index
    %c0_125 = arith.constant 0 : index
    %358 = vector.load %arg10[%c24, %c0_125] : memref<64x128xf32, #tpu.memory_space<vmem>>, vector<8x128xf32>
    tpu.vector_store %arg10[%c24, %c0_125], %357 {strides = array<i32>} : memref<64x128xf32, #tpu.memory_space<vmem>>, vector<8x128xf32>,
    %359 = vector.extract_strided_slice %8 {offsets = [32, 0], sizes = [8, 384], strides = [1, 1]} : vector<64x384xf32> to vector<8x384xf32>
    %360 = arith.truncf %301 : vector<8x128xf32> to vector<8x128xbf16>
    %c0_126 = arith.constant 0 : index
    %c0_127 = arith.constant 0 : index
    %c0_128 = arith.constant 0 : index
    %361 = vector.load %arg3[%c0_126, %c0_127, %c0_128] : memref<3x128x384xbf16, #tpu.memory_space<vmem>>, vector<1x128x384xbf16>
    %362 = vector.shape_cast %361 : vector<1x128x384xbf16> to vector<128x384xbf16>
    %cst_129 = arith.constant dense<0.000000e+00> : vector<8x384xf32>
    %363 = tpu.matmul %360, %362, %cst_129 {dimension_numbers = #tpu.dot_dimension_numbers<[1], [0], [0], [1], [0, 0, 1, 1], [], []>} : vector<8x128xbf16>, vector<128x384xbf16>, vector<8x384xf32> -> vector<8x384xf32>
    %364 = vector.extract_strided_slice %359 {offsets = [0, 0], sizes = [8, 256], strides = [1, 1]} : vector<8x384xf32> to vector<8x256xf32>
    %365 = vector.extract_strided_slice %363 {offsets = [0, 0], sizes = [8, 256], strides = [1, 1]} : vector<8x384xf32> to vector<8x256xf32>
    %366 = arith.addf %364, %365 : vector<8x256xf32>
    %367 = arith.negf %366 : vector<8x256xf32>
    %368 = math.exp %367 : vector<8x256xf32>
    %cst_130 = arith.constant 1.000000e+00 : f32
    %369 = vector.broadcast %cst_130 : f32 to vector<8x256xf32>
    %370 = arith.addf %369, %368 : vector<8x256xf32>
    %371 = arith.divf %369, %370 : vector<8x256xf32>
    %372 = vector.extract_strided_slice %371 {offsets = [0, 0], sizes = [8, 128], strides = [1, 1]} : vector<8x256xf32> to vector<8x128xf32>
    %373 = vector.extract_strided_slice %371 {offsets = [0, 128], sizes = [8, 128], strides = [1, 1]} : vector<8x256xf32> to vector<8x128xf32>
    %374 = vector.extract_strided_slice %359 {offsets = [0, 256], sizes = [8, 128], strides = [1, 1]} : vector<8x384xf32> to vector<8x128xf32>
    %375 = vector.extract_strided_slice %363 {offsets = [0, 256], sizes = [8, 128], strides = [1, 1]} : vector<8x384xf32> to vector<8x128xf32>
    %376 = arith.addf %375, %20 : vector<8x128xf32>
    %377 = arith.mulf %372, %376 : vector<8x128xf32>
    %378 = arith.addf %374, %377 : vector<8x128xf32>
    %379 = math.tanh %378 : vector<8x128xf32>
    %380 = arith.subf %301, %379 : vector<8x128xf32>
    %381 = arith.mulf %373, %380 : vector<8x128xf32>
    %382 = arith.addf %379, %381 : vector<8x128xf32>
    %383 = arith.truncf %382 : vector<8x128xf32> to vector<8x128xbf16>
    %c1_131 = arith.constant 1 : index
    %c0_132 = arith.constant 0 : index
    %c0_133 = arith.constant 0 : index
    %384 = vector.load %arg2[%c1_131, %c0_132, %c0_133] : memref<3x128x384xbf16, #tpu.memory_space<vmem>>, vector<1x128x384xbf16>
    %385 = vector.shape_cast %384 : vector<1x128x384xbf16> to vector<128x384xbf16>
    %cst_134 = arith.constant dense<0.000000e+00> : vector<8x384xf32>
    %386 = tpu.matmul %383, %385, %cst_134 {dimension_numbers = #tpu.dot_dimension_numbers<[1], [0], [0], [1], [0, 0, 1, 1], [], []>} : vector<8x128xbf16>, vector<128x384xbf16>, vector<8x384xf32> -> vector<8x384xf32>
    %387 = arith.addf %386, %12 : vector<8x384xf32>
    %388 = arith.truncf %329 : vector<8x128xf32> to vector<8x128xbf16>
    %c1_135 = arith.constant 1 : index
    %c0_136 = arith.constant 0 : index
    %c0_137 = arith.constant 0 : index
    %389 = vector.load %arg3[%c1_135, %c0_136, %c0_137] : memref<3x128x384xbf16, #tpu.memory_space<vmem>>, vector<1x128x384xbf16>
    %390 = vector.shape_cast %389 : vector<1x128x384xbf16> to vector<128x384xbf16>
    %cst_138 = arith.constant dense<0.000000e+00> : vector<8x384xf32>
    %391 = tpu.matmul %388, %390, %cst_138 {dimension_numbers = #tpu.dot_dimension_numbers<[1], [0], [0], [1], [0, 0, 1, 1], [], []>} : vector<8x128xbf16>, vector<128x384xbf16>, vector<8x384xf32> -> vector<8x384xf32>
    %392 = vector.extract_strided_slice %387 {offsets = [0, 0], sizes = [8, 256], strides = [1, 1]} : vector<8x384xf32> to vector<8x256xf32>
    %393 = vector.extract_strided_slice %391 {offsets = [0, 0], sizes = [8, 256], strides = [1, 1]} : vector<8x384xf32> to vector<8x256xf32>
    %394 = arith.addf %392, %393 : vector<8x256xf32>
    %395 = arith.negf %394 : vector<8x256xf32>
    %396 = math.exp %395 : vector<8x256xf32>
    %cst_139 = arith.constant 1.000000e+00 : f32
    %397 = vector.broadcast %cst_139 : f32 to vector<8x256xf32>
    %398 = arith.addf %397, %396 : vector<8x256xf32>
    %399 = arith.divf %397, %398 : vector<8x256xf32>
    %400 = vector.extract_strided_slice %399 {offsets = [0, 0], sizes = [8, 128], strides = [1, 1]} : vector<8x256xf32> to vector<8x128xf32>
    %401 = vector.extract_strided_slice %399 {offsets = [0, 128], sizes = [8, 128], strides = [1, 1]} : vector<8x256xf32> to vector<8x128xf32>
    %402 = vector.extract_strided_slice %387 {offsets = [0, 256], sizes = [8, 128], strides = [1, 1]} : vector<8x384xf32> to vector<8x128xf32>
    %403 = vector.extract_strided_slice %391 {offsets = [0, 256], sizes = [8, 128], strides = [1, 1]} : vector<8x384xf32> to vector<8x128xf32>
    %404 = arith.addf %403, %24 : vector<8x128xf32>
    %405 = arith.mulf %400, %404 : vector<8x128xf32>
    %406 = arith.addf %402, %405 : vector<8x128xf32>
    %407 = math.tanh %406 : vector<8x128xf32>
    %408 = arith.subf %329, %407 : vector<8x128xf32>
    %409 = arith.mulf %401, %408 : vector<8x128xf32>
    %410 = arith.addf %407, %409 : vector<8x128xf32>
    %411 = arith.truncf %410 : vector<8x128xf32> to vector<8x128xbf16>
    %c2_140 = arith.constant 2 : index
    %c0_141 = arith.constant 0 : index
    %c0_142 = arith.constant 0 : index
    %412 = vector.load %arg2[%c2_140, %c0_141, %c0_142] : memref<3x128x384xbf16, #tpu.memory_space<vmem>>, vector<1x128x384xbf16>
    %413 = vector.shape_cast %412 : vector<1x128x384xbf16> to vector<128x384xbf16>
    %cst_143 = arith.constant dense<0.000000e+00> : vector<8x384xf32>
    %414 = tpu.matmul %411, %413, %cst_143 {dimension_numbers = #tpu.dot_dimension_numbers<[1], [0], [0], [1], [0, 0, 1, 1], [], []>} : vector<8x128xbf16>, vector<128x384xbf16>, vector<8x384xf32> -> vector<8x384xf32>
    %415 = arith.addf %414, %16 : vector<8x384xf32>
    %416 = arith.truncf %357 : vector<8x128xf32> to vector<8x128xbf16>
    %c2_144 = arith.constant 2 : index
    %c0_145 = arith.constant 0 : index
    %c0_146 = arith.constant 0 : index
    %417 = vector.load %arg3[%c2_144, %c0_145, %c0_146] : memref<3x128x384xbf16, #tpu.memory_space<vmem>>, vector<1x128x384xbf16>
    %418 = vector.shape_cast %417 : vector<1x128x384xbf16> to vector<128x384xbf16>
    %cst_147 = arith.constant dense<0.000000e+00> : vector<8x384xf32>
    %419 = tpu.matmul %416, %418, %cst_147 {dimension_numbers = #tpu.dot_dimension_numbers<[1], [0], [0], [1], [0, 0, 1, 1], [], []>} : vector<8x128xbf16>, vector<128x384xbf16>, vector<8x384xf32> -> vector<8x384xf32>
    %420 = vector.extract_strided_slice %415 {offsets = [0, 0], sizes = [8, 256], strides = [1, 1]} : vector<8x384xf32> to vector<8x256xf32>
    %421 = vector.extract_strided_slice %419 {offsets = [0, 0], sizes = [8, 256], strides = [1, 1]} : vector<8x384xf32> to vector<8x256xf32>
    %422 = arith.addf %420, %421 : vector<8x256xf32>
    %423 = arith.negf %422 : vector<8x256xf32>
    %424 = math.exp %423 : vector<8x256xf32>
    %cst_148 = arith.constant 1.000000e+00 : f32
    %425 = vector.broadcast %cst_148 : f32 to vector<8x256xf32>
    %426 = arith.addf %425, %424 : vector<8x256xf32>
    %427 = arith.divf %425, %426 : vector<8x256xf32>
    %428 = vector.extract_strided_slice %427 {offsets = [0, 0], sizes = [8, 128], strides = [1, 1]} : vector<8x256xf32> to vector<8x128xf32>
    %429 = vector.extract_strided_slice %427 {offsets = [0, 128], sizes = [8, 128], strides = [1, 1]} : vector<8x256xf32> to vector<8x128xf32>
    %430 = vector.extract_strided_slice %415 {offsets = [0, 256], sizes = [8, 128], strides = [1, 1]} : vector<8x384xf32> to vector<8x128xf32>
    %431 = vector.extract_strided_slice %419 {offsets = [0, 256], sizes = [8, 128], strides = [1, 1]} : vector<8x384xf32> to vector<8x128xf32>
    %432 = arith.addf %431, %28 : vector<8x128xf32>
    %433 = arith.mulf %428, %432 : vector<8x128xf32>
    %434 = arith.addf %430, %433 : vector<8x128xf32>
    %435 = math.tanh %434 : vector<8x128xf32>
    %436 = arith.subf %357, %435 : vector<8x128xf32>
    %437 = arith.mulf %429, %436 : vector<8x128xf32>
    %438 = arith.addf %435, %437 : vector<8x128xf32>
    %c32 = arith.constant 32 : index
    %c0_149 = arith.constant 0 : index
    %439 = vector.load %arg10[%c32, %c0_149] : memref<64x128xf32, #tpu.memory_space<vmem>>, vector<8x128xf32>
    tpu.vector_store %arg10[%c32, %c0_149], %438 {strides = array<i32>} : memref<64x128xf32, #tpu.memory_space<vmem>>, vector<8x128xf32>,
    %440 = vector.extract_strided_slice %8 {offsets = [40, 0], sizes = [8, 384], strides = [1, 1]} : vector<64x384xf32> to vector<8x384xf32>
    %441 = arith.truncf %382 : vector<8x128xf32> to vector<8x128xbf16>
    %c0_150 = arith.constant 0 : index
    %c0_151 = arith.constant 0 : index
    %c0_152 = arith.constant 0 : index
    %442 = vector.load %arg3[%c0_150, %c0_151, %c0_152] : memref<3x128x384xbf16, #tpu.memory_space<vmem>>, vector<1x128x384xbf16>
    %443 = vector.shape_cast %442 : vector<1x128x384xbf16> to vector<128x384xbf16>
    %cst_153 = arith.constant dense<0.000000e+00> : vector<8x384xf32>
    %444 = tpu.matmul %441, %443, %cst_153 {dimension_numbers = #tpu.dot_dimension_numbers<[1], [0], [0], [1], [0, 0, 1, 1], [], []>} : vector<8x128xbf16>, vector<128x384xbf16>, vector<8x384xf32> -> vector<8x384xf32>
    %445 = vector.extract_strided_slice %440 {offsets = [0, 0], sizes = [8, 256], strides = [1, 1]} : vector<8x384xf32> to vector<8x256xf32>
    %446 = vector.extract_strided_slice %444 {offsets = [0, 0], sizes = [8, 256], strides = [1, 1]} : vector<8x384xf32> to vector<8x256xf32>
    %447 = arith.addf %445, %446 : vector<8x256xf32>
    %448 = arith.negf %447 : vector<8x256xf32>
    %449 = math.exp %448 : vector<8x256xf32>
    %cst_154 = arith.constant 1.000000e+00 : f32
    %450 = vector.broadcast %cst_154 : f32 to vector<8x256xf32>
    %451 = arith.addf %450, %449 : vector<8x256xf32>
    %452 = arith.divf %450, %451 : vector<8x256xf32>
    %453 = vector.extract_strided_slice %452 {offsets = [0, 0], sizes = [8, 128], strides = [1, 1]} : vector<8x256xf32> to vector<8x128xf32>
    %454 = vector.extract_strided_slice %452 {offsets = [0, 128], sizes = [8, 128], strides = [1, 1]} : vector<8x256xf32> to vector<8x128xf32>
    %455 = vector.extract_strided_slice %440 {offsets = [0, 256], sizes = [8, 128], strides = [1, 1]} : vector<8x384xf32> to vector<8x128xf32>
    %456 = vector.extract_strided_slice %444 {offsets = [0, 256], sizes = [8, 128], strides = [1, 1]} : vector<8x384xf32> to vector<8x128xf32>
    %457 = arith.addf %456, %20 : vector<8x128xf32>
    %458 = arith.mulf %453, %457 : vector<8x128xf32>
    %459 = arith.addf %455, %458 : vector<8x128xf32>
    %460 = math.tanh %459 : vector<8x128xf32>
    %461 = arith.subf %382, %460 : vector<8x128xf32>
    %462 = arith.mulf %454, %461 : vector<8x128xf32>
    %463 = arith.addf %460, %462 : vector<8x128xf32>
    %464 = arith.truncf %463 : vector<8x128xf32> to vector<8x128xbf16>
    %c1_155 = arith.constant 1 : index
    %c0_156 = arith.constant 0 : index
    %c0_157 = arith.constant 0 : index
    %465 = vector.load %arg2[%c1_155, %c0_156, %c0_157] : memref<3x128x384xbf16, #tpu.memory_space<vmem>>, vector<1x128x384xbf16>
    %466 = vector.shape_cast %465 : vector<1x128x384xbf16> to vector<128x384xbf16>
    %cst_158 = arith.constant dense<0.000000e+00> : vector<8x384xf32>
    %467 = tpu.matmul %464, %466, %cst_158 {dimension_numbers = #tpu.dot_dimension_numbers<[1], [0], [0], [1], [0, 0, 1, 1], [], []>} : vector<8x128xbf16>, vector<128x384xbf16>, vector<8x384xf32> -> vector<8x384xf32>
    %468 = arith.addf %467, %12 : vector<8x384xf32>
    %469 = arith.truncf %410 : vector<8x128xf32> to vector<8x128xbf16>
    %c1_159 = arith.constant 1 : index
    %c0_160 = arith.constant 0 : index
    %c0_161 = arith.constant 0 : index
    %470 = vector.load %arg3[%c1_159, %c0_160, %c0_161] : memref<3x128x384xbf16, #tpu.memory_space<vmem>>, vector<1x128x384xbf16>
    %471 = vector.shape_cast %470 : vector<1x128x384xbf16> to vector<128x384xbf16>
    %cst_162 = arith.constant dense<0.000000e+00> : vector<8x384xf32>
    %472 = tpu.matmul %469, %471, %cst_162 {dimension_numbers = #tpu.dot_dimension_numbers<[1], [0], [0], [1], [0, 0, 1, 1], [], []>} : vector<8x128xbf16>, vector<128x384xbf16>, vector<8x384xf32> -> vector<8x384xf32>
    %473 = vector.extract_strided_slice %468 {offsets = [0, 0], sizes = [8, 256], strides = [1, 1]} : vector<8x384xf32> to vector<8x256xf32>
    %474 = vector.extract_strided_slice %472 {offsets = [0, 0], sizes = [8, 256], strides = [1, 1]} : vector<8x384xf32> to vector<8x256xf32>
    %475 = arith.addf %473, %474 : vector<8x256xf32>
    %476 = arith.negf %475 : vector<8x256xf32>
    %477 = math.exp %476 : vector<8x256xf32>
    %cst_163 = arith.constant 1.000000e+00 : f32
    %478 = vector.broadcast %cst_163 : f32 to vector<8x256xf32>
    %479 = arith.addf %478, %477 : vector<8x256xf32>
    %480 = arith.divf %478, %479 : vector<8x256xf32>
    %481 = vector.extract_strided_slice %480 {offsets = [0, 0], sizes = [8, 128], strides = [1, 1]} : vector<8x256xf32> to vector<8x128xf32>
    %482 = vector.extract_strided_slice %480 {offsets = [0, 128], sizes = [8, 128], strides = [1, 1]} : vector<8x256xf32> to vector<8x128xf32>
    %483 = vector.extract_strided_slice %468 {offsets = [0, 256], sizes = [8, 128], strides = [1, 1]} : vector<8x384xf32> to vector<8x128xf32>
    %484 = vector.extract_strided_slice %472 {offsets = [0, 256], sizes = [8, 128], strides = [1, 1]} : vector<8x384xf32> to vector<8x128xf32>
    %485 = arith.addf %484, %24 : vector<8x128xf32>
    %486 = arith.mulf %481, %485 : vector<8x128xf32>
    %487 = arith.addf %483, %486 : vector<8x128xf32>
    %488 = math.tanh %487 : vector<8x128xf32>
    %489 = arith.subf %410, %488 : vector<8x128xf32>
    %490 = arith.mulf %482, %489 : vector<8x128xf32>
    %491 = arith.addf %488, %490 : vector<8x128xf32>
    %492 = arith.truncf %491 : vector<8x128xf32> to vector<8x128xbf16>
    %c2_164 = arith.constant 2 : index
    %c0_165 = arith.constant 0 : index
    %c0_166 = arith.constant 0 : index
    %493 = vector.load %arg2[%c2_164, %c0_165, %c0_166] : memref<3x128x384xbf16, #tpu.memory_space<vmem>>, vector<1x128x384xbf16>
    %494 = vector.shape_cast %493 : vector<1x128x384xbf16> to vector<128x384xbf16>
    %cst_167 = arith.constant dense<0.000000e+00> : vector<8x384xf32>
    %495 = tpu.matmul %492, %494, %cst_167 {dimension_numbers = #tpu.dot_dimension_numbers<[1], [0], [0], [1], [0, 0, 1, 1], [], []>} : vector<8x128xbf16>, vector<128x384xbf16>, vector<8x384xf32> -> vector<8x384xf32>
    %496 = arith.addf %495, %16 : vector<8x384xf32>
    %497 = arith.truncf %438 : vector<8x128xf32> to vector<8x128xbf16>
    %c2_168 = arith.constant 2 : index
    %c0_169 = arith.constant 0 : index
    %c0_170 = arith.constant 0 : index
    %498 = vector.load %arg3[%c2_168, %c0_169, %c0_170] : memref<3x128x384xbf16, #tpu.memory_space<vmem>>, vector<1x128x384xbf16>
    %499 = vector.shape_cast %498 : vector<1x128x384xbf16> to vector<128x384xbf16>
    %cst_171 = arith.constant dense<0.000000e+00> : vector<8x384xf32>
    %500 = tpu.matmul %497, %499, %cst_171 {dimension_numbers = #tpu.dot_dimension_numbers<[1], [0], [0], [1], [0, 0, 1, 1], [], []>} : vector<8x128xbf16>, vector<128x384xbf16>, vector<8x384xf32> -> vector<8x384xf32>
    %501 = vector.extract_strided_slice %496 {offsets = [0, 0], sizes = [8, 256], strides = [1, 1]} : vector<8x384xf32> to vector<8x256xf32>
    %502 = vector.extract_strided_slice %500 {offsets = [0, 0], sizes = [8, 256], strides = [1, 1]} : vector<8x384xf32> to vector<8x256xf32>
    %503 = arith.addf %501, %502 : vector<8x256xf32>
    %504 = arith.negf %503 : vector<8x256xf32>
    %505 = math.exp %504 : vector<8x256xf32>
    %cst_172 = arith.constant 1.000000e+00 : f32
    %506 = vector.broadcast %cst_172 : f32 to vector<8x256xf32>
    %507 = arith.addf %506, %505 : vector<8x256xf32>
    %508 = arith.divf %506, %507 : vector<8x256xf32>
    %509 = vector.extract_strided_slice %508 {offsets = [0, 0], sizes = [8, 128], strides = [1, 1]} : vector<8x256xf32> to vector<8x128xf32>
    %510 = vector.extract_strided_slice %508 {offsets = [0, 128], sizes = [8, 128], strides = [1, 1]} : vector<8x256xf32> to vector<8x128xf32>
    %511 = vector.extract_strided_slice %496 {offsets = [0, 256], sizes = [8, 128], strides = [1, 1]} : vector<8x384xf32> to vector<8x128xf32>
    %512 = vector.extract_strided_slice %500 {offsets = [0, 256], sizes = [8, 128], strides = [1, 1]} : vector<8x384xf32> to vector<8x128xf32>
    %513 = arith.addf %512, %28 : vector<8x128xf32>
    %514 = arith.mulf %509, %513 : vector<8x128xf32>
    %515 = arith.addf %511, %514 : vector<8x128xf32>
    %516 = math.tanh %515 : vector<8x128xf32>
    %517 = arith.subf %438, %516 : vector<8x128xf32>
    %518 = arith.mulf %510, %517 : vector<8x128xf32>
    %519 = arith.addf %516, %518 : vector<8x128xf32>
    %c40 = arith.constant 40 : index
    %c0_173 = arith.constant 0 : index
    %520 = vector.load %arg10[%c40, %c0_173] : memref<64x128xf32, #tpu.memory_space<vmem>>, vector<8x128xf32>
    tpu.vector_store %arg10[%c40, %c0_173], %519 {strides = array<i32>} : memref<64x128xf32, #tpu.memory_space<vmem>>, vector<8x128xf32>,
    %521 = vector.extract_strided_slice %8 {offsets = [48, 0], sizes = [8, 384], strides = [1, 1]} : vector<64x384xf32> to vector<8x384xf32>
    %522 = arith.truncf %463 : vector<8x128xf32> to vector<8x128xbf16>
    %c0_174 = arith.constant 0 : index
    %c0_175 = arith.constant 0 : index
    %c0_176 = arith.constant 0 : index
    %523 = vector.load %arg3[%c0_174, %c0_175, %c0_176] : memref<3x128x384xbf16, #tpu.memory_space<vmem>>, vector<1x128x384xbf16>
    %524 = vector.shape_cast %523 : vector<1x128x384xbf16> to vector<128x384xbf16>
    %cst_177 = arith.constant dense<0.000000e+00> : vector<8x384xf32>
    %525 = tpu.matmul %522, %524, %cst_177 {dimension_numbers = #tpu.dot_dimension_numbers<[1], [0], [0], [1], [0, 0, 1, 1], [], []>} : vector<8x128xbf16>, vector<128x384xbf16>, vector<8x384xf32> -> vector<8x384xf32>
    %526 = vector.extract_strided_slice %521 {offsets = [0, 0], sizes = [8, 256], strides = [1, 1]} : vector<8x384xf32> to vector<8x256xf32>
    %527 = vector.extract_strided_slice %525 {offsets = [0, 0], sizes = [8, 256], strides = [1, 1]} : vector<8x384xf32> to vector<8x256xf32>
    %528 = arith.addf %526, %527 : vector<8x256xf32>
    %529 = arith.negf %528 : vector<8x256xf32>
    %530 = math.exp %529 : vector<8x256xf32>
    %cst_178 = arith.constant 1.000000e+00 : f32
    %531 = vector.broadcast %cst_178 : f32 to vector<8x256xf32>
    %532 = arith.addf %531, %530 : vector<8x256xf32>
    %533 = arith.divf %531, %532 : vector<8x256xf32>
    %534 = vector.extract_strided_slice %533 {offsets = [0, 0], sizes = [8, 128], strides = [1, 1]} : vector<8x256xf32> to vector<8x128xf32>
    %535 = vector.extract_strided_slice %533 {offsets = [0, 128], sizes = [8, 128], strides = [1, 1]} : vector<8x256xf32> to vector<8x128xf32>
    %536 = vector.extract_strided_slice %521 {offsets = [0, 256], sizes = [8, 128], strides = [1, 1]} : vector<8x384xf32> to vector<8x128xf32>
    %537 = vector.extract_strided_slice %525 {offsets = [0, 256], sizes = [8, 128], strides = [1, 1]} : vector<8x384xf32> to vector<8x128xf32>
    %538 = arith.addf %537, %20 : vector<8x128xf32>
    %539 = arith.mulf %534, %538 : vector<8x128xf32>
    %540 = arith.addf %536, %539 : vector<8x128xf32>
    %541 = math.tanh %540 : vector<8x128xf32>
    %542 = arith.subf %463, %541 : vector<8x128xf32>
    %543 = arith.mulf %535, %542 : vector<8x128xf32>
    %544 = arith.addf %541, %543 : vector<8x128xf32>
    %545 = arith.truncf %544 : vector<8x128xf32> to vector<8x128xbf16>
    %c1_179 = arith.constant 1 : index
    %c0_180 = arith.constant 0 : index
    %c0_181 = arith.constant 0 : index
    %546 = vector.load %arg2[%c1_179, %c0_180, %c0_181] : memref<3x128x384xbf16, #tpu.memory_space<vmem>>, vector<1x128x384xbf16>
    %547 = vector.shape_cast %546 : vector<1x128x384xbf16> to vector<128x384xbf16>
    %cst_182 = arith.constant dense<0.000000e+00> : vector<8x384xf32>
    %548 = tpu.matmul %545, %547, %cst_182 {dimension_numbers = #tpu.dot_dimension_numbers<[1], [0], [0], [1], [0, 0, 1, 1], [], []>} : vector<8x128xbf16>, vector<128x384xbf16>, vector<8x384xf32> -> vector<8x384xf32>
    %549 = arith.addf %548, %12 : vector<8x384xf32>
    %550 = arith.truncf %491 : vector<8x128xf32> to vector<8x128xbf16>
    %c1_183 = arith.constant 1 : index
    %c0_184 = arith.constant 0 : index
    %c0_185 = arith.constant 0 : index
    %551 = vector.load %arg3[%c1_183, %c0_184, %c0_185] : memref<3x128x384xbf16, #tpu.memory_space<vmem>>, vector<1x128x384xbf16>
    %552 = vector.shape_cast %551 : vector<1x128x384xbf16> to vector<128x384xbf16>
    %cst_186 = arith.constant dense<0.000000e+00> : vector<8x384xf32>
    %553 = tpu.matmul %550, %552, %cst_186 {dimension_numbers = #tpu.dot_dimension_numbers<[1], [0], [0], [1], [0, 0, 1, 1], [], []>} : vector<8x128xbf16>, vector<128x384xbf16>, vector<8x384xf32> -> vector<8x384xf32>
    %554 = vector.extract_strided_slice %549 {offsets = [0, 0], sizes = [8, 256], strides = [1, 1]} : vector<8x384xf32> to vector<8x256xf32>
    %555 = vector.extract_strided_slice %553 {offsets = [0, 0], sizes = [8, 256], strides = [1, 1]} : vector<8x384xf32> to vector<8x256xf32>
    %556 = arith.addf %554, %555 : vector<8x256xf32>
    %557 = arith.negf %556 : vector<8x256xf32>
    %558 = math.exp %557 : vector<8x256xf32>
    %cst_187 = arith.constant 1.000000e+00 : f32
    %559 = vector.broadcast %cst_187 : f32 to vector<8x256xf32>
    %560 = arith.addf %559, %558 : vector<8x256xf32>
    %561 = arith.divf %559, %560 : vector<8x256xf32>
    %562 = vector.extract_strided_slice %561 {offsets = [0, 0], sizes = [8, 128], strides = [1, 1]} : vector<8x256xf32> to vector<8x128xf32>
    %563 = vector.extract_strided_slice %561 {offsets = [0, 128], sizes = [8, 128], strides = [1, 1]} : vector<8x256xf32> to vector<8x128xf32>
    %564 = vector.extract_strided_slice %549 {offsets = [0, 256], sizes = [8, 128], strides = [1, 1]} : vector<8x384xf32> to vector<8x128xf32>
    %565 = vector.extract_strided_slice %553 {offsets = [0, 256], sizes = [8, 128], strides = [1, 1]} : vector<8x384xf32> to vector<8x128xf32>
    %566 = arith.addf %565, %24 : vector<8x128xf32>
    %567 = arith.mulf %562, %566 : vector<8x128xf32>
    %568 = arith.addf %564, %567 : vector<8x128xf32>
    %569 = math.tanh %568 : vector<8x128xf32>
    %570 = arith.subf %491, %569 : vector<8x128xf32>
    %571 = arith.mulf %563, %570 : vector<8x128xf32>
    %572 = arith.addf %569, %571 : vector<8x128xf32>
    %573 = arith.truncf %572 : vector<8x128xf32> to vector<8x128xbf16>
    %c2_188 = arith.constant 2 : index
    %c0_189 = arith.constant 0 : index
    %c0_190 = arith.constant 0 : index
    %574 = vector.load %arg2[%c2_188, %c0_189, %c0_190] : memref<3x128x384xbf16, #tpu.memory_space<vmem>>, vector<1x128x384xbf16>
    %575 = vector.shape_cast %574 : vector<1x128x384xbf16> to vector<128x384xbf16>
    %cst_191 = arith.constant dense<0.000000e+00> : vector<8x384xf32>
    %576 = tpu.matmul %573, %575, %cst_191 {dimension_numbers = #tpu.dot_dimension_numbers<[1], [0], [0], [1], [0, 0, 1, 1], [], []>} : vector<8x128xbf16>, vector<128x384xbf16>, vector<8x384xf32> -> vector<8x384xf32>
    %577 = arith.addf %576, %16 : vector<8x384xf32>
    %578 = arith.truncf %519 : vector<8x128xf32> to vector<8x128xbf16>
    %c2_192 = arith.constant 2 : index
    %c0_193 = arith.constant 0 : index
    %c0_194 = arith.constant 0 : index
    %579 = vector.load %arg3[%c2_192, %c0_193, %c0_194] : memref<3x128x384xbf16, #tpu.memory_space<vmem>>, vector<1x128x384xbf16>
    %580 = vector.shape_cast %579 : vector<1x128x384xbf16> to vector<128x384xbf16>
    %cst_195 = arith.constant dense<0.000000e+00> : vector<8x384xf32>
    %581 = tpu.matmul %578, %580, %cst_195 {dimension_numbers = #tpu.dot_dimension_numbers<[1], [0], [0], [1], [0, 0, 1, 1], [], []>} : vector<8x128xbf16>, vector<128x384xbf16>, vector<8x384xf32> -> vector<8x384xf32>
    %582 = vector.extract_strided_slice %577 {offsets = [0, 0], sizes = [8, 256], strides = [1, 1]} : vector<8x384xf32> to vector<8x256xf32>
    %583 = vector.extract_strided_slice %581 {offsets = [0, 0], sizes = [8, 256], strides = [1, 1]} : vector<8x384xf32> to vector<8x256xf32>
    %584 = arith.addf %582, %583 : vector<8x256xf32>
    %585 = arith.negf %584 : vector<8x256xf32>
    %586 = math.exp %585 : vector<8x256xf32>
    %cst_196 = arith.constant 1.000000e+00 : f32
    %587 = vector.broadcast %cst_196 : f32 to vector<8x256xf32>
    %588 = arith.addf %587, %586 : vector<8x256xf32>
    %589 = arith.divf %587, %588 : vector<8x256xf32>
    %590 = vector.extract_strided_slice %589 {offsets = [0, 0], sizes = [8, 128], strides = [1, 1]} : vector<8x256xf32> to vector<8x128xf32>
    %591 = vector.extract_strided_slice %589 {offsets = [0, 128], sizes = [8, 128], strides = [1, 1]} : vector<8x256xf32> to vector<8x128xf32>
    %592 = vector.extract_strided_slice %577 {offsets = [0, 256], sizes = [8, 128], strides = [1, 1]} : vector<8x384xf32> to vector<8x128xf32>
    %593 = vector.extract_strided_slice %581 {offsets = [0, 256], sizes = [8, 128], strides = [1, 1]} : vector<8x384xf32> to vector<8x128xf32>
    %594 = arith.addf %593, %28 : vector<8x128xf32>
    %595 = arith.mulf %590, %594 : vector<8x128xf32>
    %596 = arith.addf %592, %595 : vector<8x128xf32>
    %597 = math.tanh %596 : vector<8x128xf32>
    %598 = arith.subf %519, %597 : vector<8x128xf32>
    %599 = arith.mulf %591, %598 : vector<8x128xf32>
    %600 = arith.addf %597, %599 : vector<8x128xf32>
    %c48 = arith.constant 48 : index
    %c0_197 = arith.constant 0 : index
    %601 = vector.load %arg10[%c48, %c0_197] : memref<64x128xf32, #tpu.memory_space<vmem>>, vector<8x128xf32>
    tpu.vector_store %arg10[%c48, %c0_197], %600 {strides = array<i32>} : memref<64x128xf32, #tpu.memory_space<vmem>>, vector<8x128xf32>,
    %602 = vector.extract_strided_slice %8 {offsets = [56, 0], sizes = [8, 384], strides = [1, 1]} : vector<64x384xf32> to vector<8x384xf32>
    %603 = arith.truncf %544 : vector<8x128xf32> to vector<8x128xbf16>
    %c0_198 = arith.constant 0 : index
    %c0_199 = arith.constant 0 : index
    %c0_200 = arith.constant 0 : index
    %604 = vector.load %arg3[%c0_198, %c0_199, %c0_200] : memref<3x128x384xbf16, #tpu.memory_space<vmem>>, vector<1x128x384xbf16>
    %605 = vector.shape_cast %604 : vector<1x128x384xbf16> to vector<128x384xbf16>
    %cst_201 = arith.constant dense<0.000000e+00> : vector<8x384xf32>
    %606 = tpu.matmul %603, %605, %cst_201 {dimension_numbers = #tpu.dot_dimension_numbers<[1], [0], [0], [1], [0, 0, 1, 1], [], []>} : vector<8x128xbf16>, vector<128x384xbf16>, vector<8x384xf32> -> vector<8x384xf32>
    %607 = vector.extract_strided_slice %602 {offsets = [0, 0], sizes = [8, 256], strides = [1, 1]} : vector<8x384xf32> to vector<8x256xf32>
    %608 = vector.extract_strided_slice %606 {offsets = [0, 0], sizes = [8, 256], strides = [1, 1]} : vector<8x384xf32> to vector<8x256xf32>
    %609 = arith.addf %607, %608 : vector<8x256xf32>
    %610 = arith.negf %609 : vector<8x256xf32>
    %611 = math.exp %610 : vector<8x256xf32>
    %cst_202 = arith.constant 1.000000e+00 : f32
    %612 = vector.broadcast %cst_202 : f32 to vector<8x256xf32>
    %613 = arith.addf %612, %611 : vector<8x256xf32>
    %614 = arith.divf %612, %613 : vector<8x256xf32>
    %615 = vector.extract_strided_slice %614 {offsets = [0, 0], sizes = [8, 128], strides = [1, 1]} : vector<8x256xf32> to vector<8x128xf32>
    %616 = vector.extract_strided_slice %614 {offsets = [0, 128], sizes = [8, 128], strides = [1, 1]} : vector<8x256xf32> to vector<8x128xf32>
    %617 = vector.extract_strided_slice %602 {offsets = [0, 256], sizes = [8, 128], strides = [1, 1]} : vector<8x384xf32> to vector<8x128xf32>
    %618 = vector.extract_strided_slice %606 {offsets = [0, 256], sizes = [8, 128], strides = [1, 1]} : vector<8x384xf32> to vector<8x128xf32>
    %619 = arith.addf %618, %20 : vector<8x128xf32>
    %620 = arith.mulf %615, %619 : vector<8x128xf32>
    %621 = arith.addf %617, %620 : vector<8x128xf32>
    %622 = math.tanh %621 : vector<8x128xf32>
    %623 = arith.subf %544, %622 : vector<8x128xf32>
    %624 = arith.mulf %616, %623 : vector<8x128xf32>
    %625 = arith.addf %622, %624 : vector<8x128xf32>
    %626 = arith.truncf %625 : vector<8x128xf32> to vector<8x128xbf16>
    %c1_203 = arith.constant 1 : index
    %c0_204 = arith.constant 0 : index
    %c0_205 = arith.constant 0 : index
    %627 = vector.load %arg2[%c1_203, %c0_204, %c0_205] : memref<3x128x384xbf16, #tpu.memory_space<vmem>>, vector<1x128x384xbf16>
    %628 = vector.shape_cast %627 : vector<1x128x384xbf16> to vector<128x384xbf16>
    %cst_206 = arith.constant dense<0.000000e+00> : vector<8x384xf32>
    %629 = tpu.matmul %626, %628, %cst_206 {dimension_numbers = #tpu.dot_dimension_numbers<[1], [0], [0], [1], [0, 0, 1, 1], [], []>} : vector<8x128xbf16>, vector<128x384xbf16>, vector<8x384xf32> -> vector<8x384xf32>
    %630 = arith.addf %629, %12 : vector<8x384xf32>
    %631 = arith.truncf %572 : vector<8x128xf32> to vector<8x128xbf16>
    %c1_207 = arith.constant 1 : index
    %c0_208 = arith.constant 0 : index
    %c0_209 = arith.constant 0 : index
    %632 = vector.load %arg3[%c1_207, %c0_208, %c0_209] : memref<3x128x384xbf16, #tpu.memory_space<vmem>>, vector<1x128x384xbf16>
    %633 = vector.shape_cast %632 : vector<1x128x384xbf16> to vector<128x384xbf16>
    %cst_210 = arith.constant dense<0.000000e+00> : vector<8x384xf32>
    %634 = tpu.matmul %631, %633, %cst_210 {dimension_numbers = #tpu.dot_dimension_numbers<[1], [0], [0], [1], [0, 0, 1, 1], [], []>} : vector<8x128xbf16>, vector<128x384xbf16>, vector<8x384xf32> -> vector<8x384xf32>
    %635 = vector.extract_strided_slice %630 {offsets = [0, 0], sizes = [8, 256], strides = [1, 1]} : vector<8x384xf32> to vector<8x256xf32>
    %636 = vector.extract_strided_slice %634 {offsets = [0, 0], sizes = [8, 256], strides = [1, 1]} : vector<8x384xf32> to vector<8x256xf32>
    %637 = arith.addf %635, %636 : vector<8x256xf32>
    %638 = arith.negf %637 : vector<8x256xf32>
    %639 = math.exp %638 : vector<8x256xf32>
    %cst_211 = arith.constant 1.000000e+00 : f32
    %640 = vector.broadcast %cst_211 : f32 to vector<8x256xf32>
    %641 = arith.addf %640, %639 : vector<8x256xf32>
    %642 = arith.divf %640, %641 : vector<8x256xf32>
    %643 = vector.extract_strided_slice %642 {offsets = [0, 0], sizes = [8, 128], strides = [1, 1]} : vector<8x256xf32> to vector<8x128xf32>
    %644 = vector.extract_strided_slice %642 {offsets = [0, 128], sizes = [8, 128], strides = [1, 1]} : vector<8x256xf32> to vector<8x128xf32>
    %645 = vector.extract_strided_slice %630 {offsets = [0, 256], sizes = [8, 128], strides = [1, 1]} : vector<8x384xf32> to vector<8x128xf32>
    %646 = vector.extract_strided_slice %634 {offsets = [0, 256], sizes = [8, 128], strides = [1, 1]} : vector<8x384xf32> to vector<8x128xf32>
    %647 = arith.addf %646, %24 : vector<8x128xf32>
    %648 = arith.mulf %643, %647 : vector<8x128xf32>
    %649 = arith.addf %645, %648 : vector<8x128xf32>
    %650 = math.tanh %649 : vector<8x128xf32>
    %651 = arith.subf %572, %650 : vector<8x128xf32>
    %652 = arith.mulf %644, %651 : vector<8x128xf32>
    %653 = arith.addf %650, %652 : vector<8x128xf32>
    %654 = arith.truncf %653 : vector<8x128xf32> to vector<8x128xbf16>
    %c2_212 = arith.constant 2 : index
    %c0_213 = arith.constant 0 : index
    %c0_214 = arith.constant 0 : index
    %655 = vector.load %arg2[%c2_212, %c0_213, %c0_214] : memref<3x128x384xbf16, #tpu.memory_space<vmem>>, vector<1x128x384xbf16>
    %656 = vector.shape_cast %655 : vector<1x128x384xbf16> to vector<128x384xbf16>
    %cst_215 = arith.constant dense<0.000000e+00> : vector<8x384xf32>
    %657 = tpu.matmul %654, %656, %cst_215 {dimension_numbers = #tpu.dot_dimension_numbers<[1], [0], [0], [1], [0, 0, 1, 1], [], []>} : vector<8x128xbf16>, vector<128x384xbf16>, vector<8x384xf32> -> vector<8x384xf32>
    %658 = arith.addf %657, %16 : vector<8x384xf32>
    %659 = arith.truncf %600 : vector<8x128xf32> to vector<8x128xbf16>
    %c2_216 = arith.constant 2 : index
    %c0_217 = arith.constant 0 : index
    %c0_218 = arith.constant 0 : index
    %660 = vector.load %arg3[%c2_216, %c0_217, %c0_218] : memref<3x128x384xbf16, #tpu.memory_space<vmem>>, vector<1x128x384xbf16>
    %661 = vector.shape_cast %660 : vector<1x128x384xbf16> to vector<128x384xbf16>
    %cst_219 = arith.constant dense<0.000000e+00> : vector<8x384xf32>
    %662 = tpu.matmul %659, %661, %cst_219 {dimension_numbers = #tpu.dot_dimension_numbers<[1], [0], [0], [1], [0, 0, 1, 1], [], []>} : vector<8x128xbf16>, vector<128x384xbf16>, vector<8x384xf32> -> vector<8x384xf32>
    %663 = vector.extract_strided_slice %658 {offsets = [0, 0], sizes = [8, 256], strides = [1, 1]} : vector<8x384xf32> to vector<8x256xf32>
    %664 = vector.extract_strided_slice %662 {offsets = [0, 0], sizes = [8, 256], strides = [1, 1]} : vector<8x384xf32> to vector<8x256xf32>
    %665 = arith.addf %663, %664 : vector<8x256xf32>
    %666 = arith.negf %665 : vector<8x256xf32>
    %667 = math.exp %666 : vector<8x256xf32>
    %cst_220 = arith.constant 1.000000e+00 : f32
    %668 = vector.broadcast %cst_220 : f32 to vector<8x256xf32>
    %669 = arith.addf %668, %667 : vector<8x256xf32>
    %670 = arith.divf %668, %669 : vector<8x256xf32>
    %671 = vector.extract_strided_slice %670 {offsets = [0, 0], sizes = [8, 128], strides = [1, 1]} : vector<8x256xf32> to vector<8x128xf32>
    %672 = vector.extract_strided_slice %670 {offsets = [0, 128], sizes = [8, 128], strides = [1, 1]} : vector<8x256xf32> to vector<8x128xf32>
    %673 = vector.extract_strided_slice %658 {offsets = [0, 256], sizes = [8, 128], strides = [1, 1]} : vector<8x384xf32> to vector<8x128xf32>
    %674 = vector.extract_strided_slice %662 {offsets = [0, 256], sizes = [8, 128], strides = [1, 1]} : vector<8x384xf32> to vector<8x128xf32>
    %675 = arith.addf %674, %28 : vector<8x128xf32>
    %676 = arith.mulf %671, %675 : vector<8x128xf32>
    %677 = arith.addf %673, %676 : vector<8x128xf32>
    %678 = math.tanh %677 : vector<8x128xf32>
    %679 = arith.subf %600, %678 : vector<8x128xf32>
    %680 = arith.mulf %672, %679 : vector<8x128xf32>
    %681 = arith.addf %678, %680 : vector<8x128xf32>
    %c56 = arith.constant 56 : index
    %c0_221 = arith.constant 0 : index
    %682 = vector.load %arg10[%c56, %c0_221] : memref<64x128xf32, #tpu.memory_space<vmem>>, vector<8x128xf32>
    tpu.vector_store %arg10[%c56, %c0_221], %681 {strides = array<i32>} : memref<64x128xf32, #tpu.memory_space<vmem>>, vector<8x128xf32>,
    %c0_222 = arith.constant 0 : index
    %c0_223 = arith.constant 0 : index
    %c0_224 = arith.constant 0 : index
    %683 = vector.load %arg9[%c0_222, %c0_223, %c0_224] : memref<3x8x128xf32, #tpu.memory_space<vmem>>, vector<1x8x128xf32>
    %684 = vector.shape_cast %683 : vector<1x8x128xf32> to vector<8x128xf32>
    %685 = vector.shape_cast %625 : vector<8x128xf32> to vector<1x8x128xf32>
    tpu.vector_store %arg9[%c0_222, %c0_223, %c0_224], %685 {strides = array<i32>} : memref<3x8x128xf32, #tpu.memory_space<vmem>>, vector<1x8x128xf32>,
    %c1_225 = arith.constant 1 : index
    %c0_226 = arith.constant 0 : index
    %c0_227 = arith.constant 0 : index
    %686 = vector.load %arg9[%c1_225, %c0_226, %c0_227] : memref<3x8x128xf32, #tpu.memory_space<vmem>>, vector<1x8x128xf32>
    %687 = vector.shape_cast %686 : vector<1x8x128xf32> to vector<8x128xf32>
    %688 = vector.shape_cast %653 : vector<8x128xf32> to vector<1x8x128xf32>
    tpu.vector_store %arg9[%c1_225, %c0_226, %c0_227], %688 {strides = array<i32>} : memref<3x8x128xf32, #tpu.memory_space<vmem>>, vector<1x8x128xf32>,
    %c2_228 = arith.constant 2 : index
    %c0_229 = arith.constant 0 : index
    %c0_230 = arith.constant 0 : index
    %689 = vector.load %arg9[%c2_228, %c0_229, %c0_230] : memref<3x8x128xf32, #tpu.memory_space<vmem>>, vector<1x8x128xf32>
    %690 = vector.shape_cast %689 : vector<1x8x128xf32> to vector<8x128xf32>
    %691 = vector.shape_cast %681 : vector<8x128xf32> to vector<1x8x128xf32>
    tpu.vector_store %arg9[%c2_228, %c0_229, %c0_230], %691 {strides = array<i32>} : memref<3x8x128xf32, #tpu.memory_space<vmem>>, vector<1x8x128xf32>,
    %c0_231 = arith.constant 0 : index
    %c0_232 = arith.constant 0 : index
    %692 = vector.load %arg10[%c0_231, %c0_232] : memref<64x128xf32, #tpu.memory_space<vmem>>, vector<64x128xf32>
    %693 = arith.truncf %692 : vector<64x128xf32> to vector<64x128xbf16>
    %c0_233 = arith.constant 0 : index
    %c0_234 = arith.constant 0 : index
    %694 = vector.load %arg6[%c0_233, %c0_234] : memref<128x64xbf16, #tpu.memory_space<vmem>>, vector<128x64xbf16>
    %cst_235 = arith.constant dense<0.000000e+00> : vector<64x64xf32>
    %695 = tpu.matmul %693, %694, %cst_235 {dimension_numbers = #tpu.dot_dimension_numbers<[1], [0], [0], [1], [0, 0, 1, 1], [], []>} : vector<64x128xbf16>, vector<128x64xbf16>, vector<64x64xf32> -> vector<64x64xf32>
    %c0_236 = arith.constant 0 : index
    %c0_237 = arith.constant 0 : index
    %696 = vector.load %arg7[%c0_236, %c0_237] : memref<1x64xf32, #tpu.memory_space<vmem>>, vector<1x64xf32>
    %697 = vector.broadcast %696 : vector<1x64xf32> to vector<64x64xf32>
    %698 = arith.addf %695, %697 : vector<64x64xf32>
    %699 = math.tanh %698 : vector<64x64xf32>
    %700 = tpu.iota {dimensions = array<i32: 1>} : vector<64x64xi32>
    %c32_i32 = arith.constant 32 : i32
    %701 = vector.broadcast %c32_i32 : i32 to vector<64x64xi32>
    %702 = arith.cmpi slt, %700, %701 : vector<64x64xi32>
    %703 = math.exp %699 : vector<64x64xf32>
    %704 = arith.select %702, %699, %703 : vector<64x64xi1>, vector<64x64xf32>
    %c0_238 = arith.constant 0 : index
    %c0_239 = arith.constant 0 : index
    %705 = vector.load %arg8[%c0_238, %c0_239] : memref<64x64xf32, #tpu.memory_space<vmem>>, vector<64x64xf32>
    tpu.vector_store %arg8[%c0_238, %c0_239], %704 {strides = array<i32>} : memref<64x64xf32, #tpu.memory_space<vmem>>, vector<64x64xf32>,
    return
  }
}

</mosaic_0001>

<bundles_post_ra>
// kernel: _actor_call.1
= control target key start
LH: loop header
LB: loop body
LE: loop exit
PB: predicated region body
PF: predicated region fallthrough
CT: control target
= control target key end

     0   :  { %15 = vsyncpa [#allocation4], 0  ;;  %s15957_s0 = inlined_call_operand.vmem [shape: f32[64,128], index: 0, kind: input, shape index: {}]   ;;  %s15958_s1 = inlined_call_operand.vmem [shape: f32[3,8,128], index: 1, kind: input, shape index: {}]   ;;  %s15959_s2 = inlined_call_operand.hbm [shape: bf16[3,128,384], index: 2, kind: input, shape index: {}]   ;;  %s15960_s3 = inlined_call_operand.hbm [shape: bf16[3,128,384], index: 3, kind: input, shape index: {}]   ;;  %s15961_s4 = inlined_call_operand.vmem [shape: f32[3,1,384], index: 4, kind: input, shape index: {}]   ;;  %s15962_s5 = inlined_call_operand.vmem [shape: f32[3,1,128], index: 5, kind: input, shape index: {}]   ;;  %s15963_s6 = inlined_call_operand.vmem [shape: bf16[128,64], index: 6, kind: input, shape index: {}]   ;;  %s15964_s7 = inlined_call_operand.vmem [shape: f32[1,64], index: 7, kind: input, shape index: {}]   ;;  %s15965_s8 = inlined_call_operand.vmem [shape: f32[64,64], index: 8, kind: output, shape index: {0}]   ;;  %s15966_s9 = inlined_call_operand.vmem [shape: f32[3,8,128], index: 9, kind: output, shape index: {1}]  }
   0x1   :  { %16 = vsyncpa [#allocation6], 0  ;;  %s14878_s30 = smov [#allocation3]   ;;  %s14830_s13 = scalar_lea.hbm %s15959_s2, 9216 }
   0x2   :  { %s26_s10 = sshll.u32 %s14878_s30, 4  ;;  %p14831_p0 = scmp.ne.s32.totalorder %s15959_s2, %s14830_s13  ;;  %s27_s10 = int_to_ptr.vmem [resolvable:$true] %s26_s10 }
   0x3   :  { %p14834_p1 = scmp.lt.u32.totalorder %s14830_s13, %s15959_s2 }
   0x5   :  { %p14836_p2 = pnand %p14834_p1, %p14831_p0 }
   0x7   :  { %14839 = shalt.err (!%p14836_p2)
}
   0x8   :  { %s14840_s18 = scalar_lea.vmem %s27_s10, 9216  ;;  %p14845_p4 = scmp.lt.s32.totalorder %s27_s10, %s27_s10 }
   0x9   :  { %p14841_p3 = scmp.ne.s32.totalorder %s27_s10, %s14840_s18  ;;  %p14846_p5 = scmp.lt.s32.totalorder %s14840_s18, %s14840_s18 }
   0xb   :  { %p14847_p6 = por %p14846_p5, %p14845_p4 }
   0xd   :  { %p14848_p7 = pnand %p14847_p6, %p14841_p3 }
   0xf   :  { %14851 = shalt.err (!%p14848_p7)
}
  0x10   :  { %s14879_s19 = smov 192   ;;  %s14880_s20 = smov 12  }
  0x11   :  { %32 = dma.hbm_to_vmem [thread:$0]  %s15959_s2, 9216, %s27_s10, [#allocation4], %s14879_s19, %s14879_s19, %s14880_s20  }
  0x12   :  { %s14881_s23 = smov [#allocation5]   ;;  %s14852_s27 = scalar_lea.hbm %s15960_s3, 9216 }
  0x13   :  { %s38_s24 = sshll.u32 %s14881_s23, 4  ;;  %p14853_p8 = scmp.ne.s32.totalorder %s15960_s3, %s14852_s27  ;;  %s39_s24 = int_to_ptr.vmem [resolvable:$true] %s38_s24 }
  0x14   :  { %p14856_p9 = scmp.lt.u32.totalorder %s14852_s27, %s15960_s3 }
  0x16   :  { %p14858_p10 = pnand %p14856_p9, %p14853_p8 }
  0x18   :  { %14861 = shalt.err (!%p14858_p10)
}
  0x19   :  { %s14862_s12 = scalar_lea.vmem %s39_s24, 9216  ;;  %p14867_p12 = scmp.lt.s32.totalorder %s39_s24, %s39_s24 }
  0x1a   :  { %p14863_p11 = scmp.ne.s32.totalorder %s39_s24, %s14862_s12  ;;  %p14868_p13 = scmp.lt.s32.totalorder %s14862_s12, %s14862_s12 }
  0x1c   :  { %p14869_p0 = por %p14868_p13, %p14867_p12 }
  0x1e   :  { %p14870_p1 = pnand %p14869_p0, %p14863_p11 }
  0x20   :  { %14873 = shalt.err (!%p14870_p1)
}
  0x21   :  { %44 = dma.hbm_to_vmem [thread:$0]  %s15960_s3, 9216, %s39_s24, [#allocation6], %s14879_s19, %s14879_s19, %s14880_s20  }
  0x22   :  { %14874 = dma.done.wait [#allocation4], 9216  }
  0x23   :  { %14875 = vsyncadd [#allocation4], 4294958080 }
  0x24   :  { %14876 = dma.done.wait [#allocation6], 9216  }
  0x25   :  { %14877 = vsyncadd [#allocation6], 4294958080  ;;  %v14882_v0 = vmov 0   ;;  %v13227_v1 = vld [vmem:[#allocation3 + $0x4] ss:$12 sps:$4 sm:$0xff]   ;;  %v61_v33 = vld [vmem:[%s15957_s0 + $0x8] sm:$0xff] }
  0x26   :  { %281 = vmatprep.mubr.bf16.mxu1 %v14882_v0  ;;  %644 = vmatprep.mubr.bf16.mxu0 %v14882_v0  ;;  %v13229_v2 = vld [vmem:[#allocation3] ss:$12 sps:$4 sm:$0xff]   ;;  %v13230_v3 = vld [vmem:[#allocation5 + $0x4] ss:$12 sps:$4 sm:$0xff]   ;;  %v13233_v5 = vld [vmem:[#allocation3 + $0x1c] ss:$12 sps:$4 sm:$0xff]  }
  0x27   :  { %249 = vmatprep.subr.bf16.mxu1 %v13227_v1  ;;  %v13232_v4 = vld [vmem:[#allocation5] ss:$12 sps:$4 sm:$0xff]   ;;  %v13235_v6 = vld [vmem:[#allocation3 + $0x18] ss:$12 sps:$4 sm:$0xff]   ;;  %612 = vmatprep.subr.bf16.mxu0 %v13230_v3  ;;  %v13236_v7 = vld [vmem:[#allocation5 + $0x1c] ss:$12 sps:$4 sm:$0xff]  }
  0x28   :  { %250 = vmatpush1.bf16.msra.mxu1 %v13229_v2  ;;  %613 = vmatpush1.bf16.msra.mxu0 %v13232_v4  ;;  %v13238_v8 = vld [vmem:[#allocation5 + $0x18] ss:$12 sps:$4 sm:$0xff]   ;;  %v13239_v9 = vld [vmem:[#allocation3 + $0x34] ss:$12 sps:$4 sm:$0xff]   ;;  %v13241_v10 = vld [vmem:[#allocation3 + $0x30] ss:$12 sps:$4 sm:$0xff]  }
  0x29   :  { %251 = vmatprep.subr.bf16.mxu1 %v13233_v5  ;;  %614 = vmatprep.subr.bf16.mxu0 %v13236_v7  ;;  %v13242_v11 = vld [vmem:[#allocation5 + $0x34] ss:$12 sps:$4 sm:$0xff]   ;;  %v13245_v12 = vld [vmem:[#allocation3 + $0x4c] ss:$12 sps:$4 sm:$0xff]   ;;  %v13244_v13 = vld [vmem:[#allocation5 + $0x30] ss:$12 sps:$4 sm:$0xff]  }
  0x2a   :  { %v13248_v14 = vld [vmem:[#allocation5 + $0x4c] ss:$12 sps:$4 sm:$0xff]   ;;  %v13247_v15 = vld [vmem:[#allocation3 + $0x48] ss:$12 sps:$4 sm:$0xff]   ;;  %v13251_v16 = vld [vmem:[#allocation3 + $0x64] ss:$12 sps:$4 sm:$0xff]  }
  0x2b   :  { %v13250_v17 = vld [vmem:[#allocation5 + $0x48] ss:$12 sps:$4 sm:$0xff]   ;;  %v13254_v18 = vld [vmem:[#allocation5 + $0x64] ss:$12 sps:$4 sm:$0xff]   ;;  %v13253_v19 = vld [vmem:[#allocation3 + $0x60] ss:$12 sps:$4 sm:$0xff]  }
  0x2c   :  { %252 = vmatpush1.bf16.msra.mxu1 %v13235_v6  ;;  %615 = vmatpush1.bf16.msra.mxu0 %v13238_v8  ;;  %v13257_v20 = vld [vmem:[#allocation3 + $0x7c] ss:$12 sps:$4 sm:$0xff]   ;;  %v13256_v21 = vld [vmem:[#allocation5 + $0x60] ss:$12 sps:$4 sm:$0xff]   ;;  %v13259_v23 = vld [vmem:[#allocation3 + $0x78] ss:$12 sps:$4 sm:$0xff]  }
  0x2d   :  { %253 = vmatprep.subr.bf16.mxu1 %v13239_v9  ;;  %616 = vmatprep.subr.bf16.mxu0 %v13242_v11  ;;  %v13260_v22 = vld [vmem:[#allocation5 + $0x7c] ss:$12 sps:$4 sm:$0xff]   ;;  %v13263_v24 = vld [vmem:[#allocation3 + $0x94] ss:$12 sps:$4 sm:$0xff]   ;;  %v13262_v25 = vld [vmem:[#allocation5 + $0x78] ss:$12 sps:$4 sm:$0xff]  }
  0x2e   :  { %v13266_v26 = vld [vmem:[#allocation5 + $0x94] ss:$12 sps:$4 sm:$0xff]   ;;  %v13265_v27 = vld [vmem:[#allocation3 + $0x90] ss:$12 sps:$4 sm:$0xff]   ;;  %v13269_v29 = vld [vmem:[#allocation3 + $0xac] ss:$12 sps:$4 sm:$0xff]  }
  0x2f   :  { %v13268_v28 = vld [vmem:[#allocation5 + $0x90] ss:$12 sps:$4 sm:$0xff]   ;;  %v13271_v30 = vld [vmem:[#allocation3 + $0xa8] ss:$12 sps:$4 sm:$0xff]   ;;  %v13272_v31 = vld [vmem:[#allocation5 + $0xac] ss:$12 sps:$4 sm:$0xff]  }
  0x30   :  { %254 = vmatpush1.bf16.msra.mxu1 %v13241_v10  ;;  %617 = vmatpush1.bf16.msra.mxu0 %v13244_v13  ;;  %v60_v32 = vld [vmem:[%s15957_s0] sm:$0xff]  ;;  %v13275_v34 = vld [vmem:[#allocation3 + $0x8] ss:$12 sps:$4 sm:$0xff]   ;;  %v63_v41 = vld [vmem:[%s15957_s0 + $0x18] sm:$0xff]  ;;  %v14883_v56 = vmov 0.0   ;;  %vm14884_vm0 = vmmov 0  }
  0x31   :  { %255 = vmatprep.subr.bf16.mxu1 %v13245_v12  ;;  %618 = vmatprep.subr.bf16.mxu0 %v13248_v14  ;;  %v13274_v35 = vld [vmem:[#allocation5 + $0xa8] ss:$12 sps:$4 sm:$0xff]   ;;  %v446_v36 = vld [vmem:[%s15958_s1] sm:$0xff]  ;;  %v68_v37 = vpack.c.bf16 %v61_v33, %v60_v32  ;;  %v13278_v44 = vld [vmem:[#allocation3 + $0x50] ss:$12 sps:$4 sm:$0xff]   ;;  %vm10821_vm2 = vcmask 523264  }
  0x32   :  { %v14970_v38 = vpack.c.bf16 %v446_v36, %v446_v36  ;;  %v13276_v39 = vld [vmem:[#allocation3 + $0x20] ss:$12 sps:$4 sm:$0xff]   ;;  %v62_v40 = vld [vmem:[%s15957_s0 + $0x10] sm:$0xff]  ;;  %v13277_v42 = vld [vmem:[#allocation3 + $0x38] ss:$12 sps:$4 sm:$0xff]  }
  0x33   :  { %v69_v43 = vpack.c.bf16 %v63_v41, %v62_v40  ;;  %v64_v45 = vld [vmem:[%s15957_s0 + $0x20] sm:$0xff]  ;;  %v65_v46 = vld [vmem:[%s15957_s0 + $0x28] sm:$0xff]  ;;  %v66_v50 = vld [vmem:[%s15957_s0 + $0x30] sm:$0xff] }
  0x34   :  { %256 = vmatpush1.bf16.msra.mxu1 %v13247_v15  ;;  %619 = vmatpush1.bf16.msra.mxu0 %v13250_v17  ;;  %v13279_v47 = vld [vmem:[#allocation3 + $0x68] ss:$12 sps:$4 sm:$0xff]   ;;  %v70_v48 = vpack.c.bf16 %v65_v46, %v64_v45  ;;  %v13280_v49 = vld [vmem:[#allocation3 + $0x80] ss:$12 sps:$4 sm:$0xff]   ;;  %v67_v51 = vld [vmem:[%s15957_s0 + $0x38] sm:$0xff] }
  0x35   :  { %257 = vmatprep.subr.bf16.mxu1 %v13251_v16  ;;  %620 = vmatprep.subr.bf16.mxu0 %v13254_v18  ;;  %v13281_v52 = vld [vmem:[#allocation3 + $0x98] ss:$12 sps:$4 sm:$0xff]   ;;  %v71_v53 = vpack.c.bf16 %v67_v51, %v66_v50  ;;  %v13282_v54 = vld [vmem:[#allocation3 + $0xb0] ss:$12 sps:$4 sm:$0xff]   ;;  %v13283_v55 = vld [vmem:[#allocation5 + $0x8] ss:$12 sps:$4 sm:$0xff]  }
  0x36   :  { %v13284_v57 = vld [vmem:[#allocation5 + $0x20] ss:$12 sps:$4 sm:$0xff]   ;;  %v13285_v58 = vld [vmem:[#allocation5 + $0x38] ss:$12 sps:$4 sm:$0xff]   ;;  %v13286_v59 = vld [vmem:[#allocation5 + $0x50] ss:$12 sps:$4 sm:$0xff]  }
  0x37   :  { %v13287_v60 = vld [vmem:[#allocation5 + $0x68] ss:$12 sps:$4 sm:$0xff]   ;;  %v13288_v61 = vld [vmem:[#allocation5 + $0x80] ss:$12 sps:$4 sm:$0xff]   ;;  %v13289_v62 = vld [vmem:[#allocation5 + $0x98] ss:$12 sps:$4 sm:$0xff]  }
  0x38   :  { %258 = vmatpush1.bf16.msra.mxu1 %v13253_v19  ;;  %621 = vmatpush1.bf16.msra.mxu0 %v13256_v21  ;;  %v13290_v63 = vld [vmem:[#allocation5 + $0xb0] ss:$12 sps:$4 sm:$0xff]   ;;  %v13291_v1 = vld [vmem:[#allocation3 + $0xc0] ss:$12 sps:$4 sm:$0xff]   ;;  %v13294_v3 = vld [vmem:[#allocation3 + $0xc8] ss:$12 sps:$4 sm:$0xff]  }
  0x39   :  { %259 = vmatprep.subr.bf16.mxu1 %v13257_v20  ;;  %622 = vmatprep.subr.bf16.mxu0 %v13260_v22  ;;  %v13293_v2 = vld [vmem:[#allocation3 + $0xc4] ss:$12 sps:$4 sm:$0xff]   ;;  %v13297_v5 = vld [vmem:[#allocation3 + $0xdc] ss:$12 sps:$4 sm:$0xff]   ;;  %v13298_v6 = vld [vmem:[#allocation3 + $0xe0] ss:$12 sps:$4 sm:$0xff]  }
  0x3a   :  { %v13295_v4 = vld [vmem:[#allocation3 + $0xd8] ss:$12 sps:$4 sm:$0xff]   ;;  %v13301_v7 = vld [vmem:[#allocation3 + $0xf4] ss:$12 sps:$4 sm:$0xff]   ;;  %v13299_v8 = vld [vmem:[#allocation3 + $0xf0] ss:$12 sps:$4 sm:$0xff]  }
  0x3b   :  { %v13302_v9 = vld [vmem:[#allocation3 + $0xf8] ss:$12 sps:$4 sm:$0xff]   ;;  %v13303_v11 = vld [vmem:[#allocation3 + $0x108] ss:$12 sps:$4 sm:$0xff]   ;;  %v13306_v12 = vld [vmem:[#allocation3 + $0x110] ss:$12 sps:$4 sm:$0xff]  }
  0x3c   :  { %260 = vmatpush1.bf16.msra.mxu1 %v13259_v23  ;;  %623 = vmatpush1.bf16.msra.mxu0 %v13262_v25  ;;  %v13305_v10 = vld [vmem:[#allocation3 + $0x10c] ss:$12 sps:$4 sm:$0xff]   ;;  %v13309_v14 = vld [vmem:[#allocation3 + $0x124] ss:$12 sps:$4 sm:$0xff]   ;;  %v13310_v15 = vld [vmem:[#allocation3 + $0x128] ss:$12 sps:$4 sm:$0xff]  }
  0x3d   :  { %261 = vmatprep.subr.bf16.mxu1 %v13263_v24  ;;  %624 = vmatprep.subr.bf16.mxu0 %v13266_v26  ;;  %v13307_v13 = vld [vmem:[#allocation3 + $0x120] ss:$12 sps:$4 sm:$0xff]   ;;  %v13313_v16 = vld [vmem:[#allocation3 + $0x13c] ss:$12 sps:$4 sm:$0xff]   ;;  %v13311_v17 = vld [vmem:[#allocation3 + $0x138] ss:$12 sps:$4 sm:$0xff]   ;;  %v106_v26 = vlaneseq }
  0x3e   :  { %v13314_v18 = vld [vmem:[#allocation3 + $0x140] ss:$12 sps:$4 sm:$0xff]   ;;  %v13315_v20 = vld [vmem:[#allocation3 + $0x150] ss:$12 sps:$4 sm:$0xff]   ;;  %v13318_v21 = vld [vmem:[#allocation3 + $0x158] ss:$12 sps:$4 sm:$0xff]  }
  0x3f   :  { %v13317_v19 = vld [vmem:[#allocation3 + $0x154] ss:$12 sps:$4 sm:$0xff]   ;;  %v13321_v22 = vld [vmem:[#allocation3 + $0x16c] ss:$12 sps:$4 sm:$0xff]   ;;  %v13322_v24 = vld [vmem:[#allocation3 + $0x170] ss:$12 sps:$4 sm:$0xff]  }
  0x40   :  { %262 = vmatpush1.bf16.msra.mxu1 %v13265_v27  ;;  %625 = vmatpush1.bf16.msra.mxu0 %v13268_v28  ;;  %v13319_v23 = vld [vmem:[#allocation3 + $0x168] ss:$12 sps:$4 sm:$0xff]   ;;  %v13325_v25 = vld [vmem:[#allocation5 + $0xc4] ss:$12 sps:$4 sm:$0xff]   ;;  %v107_v27 = vshrl.u32 %v106_v26, 7 }
  0x41   :  { %263 = vmatprep.subr.bf16.mxu1 %v13269_v29  ;;  %626 = vmatprep.subr.bf16.mxu0 %v13272_v31  ;;  %v104_v29 = vld [vmem:[%s15961_s4] sm:$0x7] }
  0x42   :  { %v15018_v28 = vsub.s32 0, %v107_v27 }
  0x44   :  { %264 = vmatpush1.bf16.msra.mxu1 %v13271_v30  ;;  %627 = vmatpush1.bf16.msra.mxu0 %v13274_v35  ;;  %v15023_v30 = vsub.s32 1, %v107_v27  ;;  %v109_v31 = vrot.slane %v104_v29, %v15018_v28 }
  0x45   :  { %12276 = vmatprep.subr.bf16.mxu1 %v13275_v34  ;;  %876 = vmatprep.subr.bf16.mxu0 %v13293_v2 }
  0x46   :  { %v113_v32 = vrot.slane %v104_v29, %v15023_v30 }
  0x47   :  { %282 = vmatmul.mubr.bf16.vlgmr.msra.gmra.mrb[0].mxu1 %v68_v37  ;;  %645 = vmatmul.mubr.bf16.vlgmr.msra.gmra.mrb[0].mxu0 %v14970_v38 }
  0x48   :  { %12277 = vmatpush3.bf16.msra.mxu1 %v13275_v34  ;;  %291 = vmatprep.mubr.bf16.mxu1 %v14882_v0 }
  0x49   :  { %12278 = vmatprep.subr.bf16.mxu1 %v13276_v39  ;;  %908 = vmatprep.mubr.bf16.mxu0 %v14882_v0 }
  0x4a   :  { %877 = vmatpush1.bf16.msra.mxu0 %v13291_v1 }
  0x4b   :  { %878 = vmatprep.subr.bf16.mxu0 %v13297_v5 }
  0x4c   :  { %12279 = vmatpush3.bf16.msra.mxu1 %v13276_v39 }
  0x4d   :  { %12280 = vmatprep.subr.bf16.mxu1 %v13277_v42 }
  0x4e   :  { %879 = vmatpush1.bf16.msra.mxu0 %v13295_v4  ;;  %v15049_v4 = vsub.s32 2, %v107_v27 }
  0x4f   :  { %292 = vmatmul.mubr.bf16.gmra.mrb[4].mxu1 %v69_v43  ;;  %880 = vmatprep.subr.bf16.mxu0 %v13301_v7 }
  0x50   :  { %12281 = vmatpush3.bf16.msra.mxu1 %v13277_v42  ;;  %301 = vmatprep.mubr.bf16.mxu1 %v14882_v0 }
  0x51   :  { %12282 = vmatprep.subr.bf16.mxu1 %v13278_v44 }
  0x52   :  { %881 = vmatpush1.bf16.msra.mxu0 %v13299_v8 }
  0x53   :  { %882 = vmatprep.subr.bf16.mxu0 %v13305_v10 }
  0x54   :  { %12283 = vmatpush3.bf16.msra.mxu1 %v13278_v44 }
  0x55   :  { %12284 = vmatprep.subr.bf16.mxu1 %v13279_v47 }
  0x56   :  { %883 = vmatpush1.bf16.msra.mxu0 %v13303_v11  ;;  %v117_v11 = vrot.slane %v104_v29, %v15049_v4 }
  0x57   :  { %302 = vmatmul.mubr.bf16.gmra.mrb[8].mxu1 %v70_v48  ;;  %884 = vmatprep.subr.bf16.mxu0 %v13309_v14 }
  0x58   :  { %12285 = vmatpush3.bf16.msra.mxu1 %v13279_v47  ;;  %311 = vmatprep.mubr.bf16.mxu1 %v14882_v0 }
  0x59   :  { %12286 = vmatprep.subr.bf16.mxu1 %v13280_v49 }
  0x5a   :  { %885 = vmatpush1.bf16.msra.mxu0 %v13307_v13 }
  0x5b   :  { %886 = vmatprep.subr.bf16.mxu0 %v13313_v16 }
  0x5c   :  { %12287 = vmatpush3.bf16.msra.mxu1 %v13280_v49 }
  0x5d   :  { %12288 = vmatprep.subr.bf16.mxu1 %v13281_v52 }
  0x5e   :  { %887 = vmatpush1.bf16.msra.mxu0 %v13311_v17 }
  0x5f   :  { %312 = vmatmul.mubr.bf16.gmra.mrb[12].mxu1 %v71_v53  ;;  %888 = vmatprep.subr.bf16.mxu0 %v13317_v19 }
  0x60   :  { %12289 = vmatpush3.bf16.msra.mxu1 %v13281_v52  ;;  %12292 = vmatprep.mubr.bf16.mxu1 %v68_v37 }
  0x61   :  { %12290 = vmatprep.subr.bf16.mxu1 %v13282_v54 }
  0x62   :  { %889 = vmatpush1.bf16.msra.mxu0 %v13315_v20 }
  0x63   :  { %890 = vmatprep.subr.bf16.mxu0 %v13321_v22 }
  0x64   :  { %12291 = vmatpush3.bf16.msra.mxu1 %v13282_v54 }
  0x65   :  { %12300 = vmatprep.subr.bf16.mxu1 %v14883_v56 }
  0x66   :  { %891 = vmatpush1.bf16.msra.mxu0 %v13319_v23 }
  0x67   :  { %12293 = vmatmul.mubr.bf16.vlgmr.msra.gmra.mrb[16].mxu1 %v69_v43  ;;  %1119 = vmatprep.subr.bf16.mxu0 %v13325_v25 }
  0x68   :  { %12301 = vmatpush3.bf16.msra.mxu1 %v13283_v55  ;;  %12296 = vmatprep.mubr.bf16.mxu1 %v70_v48 }
  0x69   :  { %12302 = vmatprep.subr.bf16.mxu1 %v14883_v56 }
  0x6c   :  { %12303 = vmatpush3.bf16.msra.mxu1 %v13284_v57 }
  0x6d   :  { %12304 = vmatprep.subr.bf16.mxu1 %v14883_v56 }
  0x6f   :  { %12297 = vmatmul.mubr.bf16.gmra.mrb[20].mxu1 %v71_v53 }
  0x70   :  { %12305 = vmatpush3.bf16.msra.mxu1 %v13285_v58  ;;  %12316 = vmatprep.mubr.msk.bf16.mxu1 %vm14884_vm0, %v14883_v56 }
  0x71   :  { %12306 = vmatprep.subr.bf16.mxu1 %v14883_v56 }
  0x74   :  { %12307 = vmatpush3.bf16.msra.mxu1 %v13286_v59 }
  0x75   :  { %12308 = vmatprep.subr.bf16.mxu1 %v14883_v56 }
  0x78   :  { %12309 = vmatpush3.bf16.msra.mxu1 %v13287_v60 }
  0x79   :  { %12310 = vmatprep.subr.bf16.mxu1 %v14883_v56 }
  0x7c   :  { %12311 = vmatpush3.bf16.msra.mxu1 %v13288_v61 }
  0x7d   :  { %12312 = vmatprep.subr.bf16.mxu1 %v14883_v56 }
  0x80   :  { %12313 = vmatpush3.bf16.msra.mxu1 %v13289_v62 }
  0x81   :  { %12314 = vmatprep.subr.bf16.mxu1 %v14883_v56 }
  0x84   :  { %12315 = vmatpush3.bf16.msra.mxu1 %v13290_v63 }
  0x85   :  { %12320 = vmatprep.subr.bf16.mxu1 %v14883_v56 }
  0x87   :  { %12317 = vmatmul.mubr.bf16.vlgmr.msra.gmra.mrb[24].mxu1 %v14970_v38 }
  0x88   :  { %12336 = vmatprep.mubr.msk.bf16.mxu1 %vm14884_vm0, %v14883_v56  ;;  %12321 = vmatpush3.bf16.msra.mxu1 %v13294_v3 }
  0x89   :  { %12322 = vmatprep.subr.bf16.mxu1 %v14883_v56 }
  0x8c   :  { %12323 = vmatpush3.bf16.msra.mxu1 %v13298_v6 }
  0x8d   :  { %12324 = vmatprep.subr.bf16.mxu1 %v14883_v56 }
  0x90   :  { %12325 = vmatpush3.bf16.msra.mxu1 %v13302_v9 }
  0x91   :  { %12326 = vmatprep.subr.bf16.mxu1 %v14883_v56 }
  0x94   :  { %12327 = vmatpush3.bf16.msra.mxu1 %v13306_v12 }
  0x95   :  { %12328 = vmatprep.subr.bf16.mxu1 %v14883_v56 }
  0x98   :  { %12329 = vmatpush3.bf16.msra.mxu1 %v13310_v15 }
  0x99   :  { %12330 = vmatprep.subr.bf16.mxu1 %v14883_v56 }
  0x9c   :  { %12331 = vmatpush3.bf16.msra.mxu1 %v13314_v18 }
  0x9d   :  { %12332 = vmatprep.subr.bf16.mxu1 %v14883_v56 }
  0xa0   :  { %12333 = vmatpush3.bf16.msra.mxu1 %v13318_v21 }
  0xa1   :  { %12334 = vmatprep.subr.bf16.mxu1 %v14883_v56 }
  0xa4   :  { %12335 = vmatpush3.bf16.msra.mxu1 %v13322_v24 }
  0xa5   :  { %12340 = vmatprep.subr.bf16.mxu1 %v14883_v56 }
 0x11a   :  { %v283_v33 = vpop.f32.mrb[0].mxu1  ;;  %v646_v38 = vpop.f32.mrb[0].mxu0 }
 0x11b   :  { %v284_v34 = vadd.f32 %v283_v33, %v109_v31  ;;  %v285_v35 = vpop.f32.mrb[1].mxu1  ;;  %v648_v42 = vpop.f32.mrb[1].mxu0  ;;  %v10866_v33 = vld [vmem:[%s15962_s5] ss:$0 sm:$0xff] }
 0x11c   :  { %v286_v36 = vadd.f32 %v285_v35, %v113_v32  ;;  %v287_v37 = vpop.f32.mrb[2].mxu1  ;;  %v650_v45 = vpop.f32.mrb[2].mxu0 }
 0x11d   :  { %v15027_v39 = vadd.f32 %v287_v37, %v109_v31  ;;  %v693_v40 = vadd.f32 %v646_v38, %v284_v34  ;;  %v289_v41 = vpop.f32.mrb[3].mxu1  ;;  %v651_v46 = vpop.f32.mrb[3].mxu0 }
 0x11e   :  { %v15029_v43 = vadd.f32 %v289_v41, %v113_v32  ;;  %v694_v44 = vadd.f32 %v648_v42, %v286_v36 }
 0x11f   :  { %v10897_v10 = vmul.f32 -1.442695, %v693_v40 }
 0x121   :  { %14547 = vpow2.f32 %v10897_v10  ;;  %v13331_v10 = vld [vmem:[#allocation5 + $0xf4] ss:$12 sps:$4 sm:$0xff]  }
 0x122   :  { %v293_v47 = vpop.f32.mrb[4].mxu1 }
 0x123   :  { %v15031_v48 = vadd.f32 %v293_v47, %v109_v31  ;;  %v295_v49 = vpop.f32.mrb[5].mxu1 }
 0x124   :  { %v15033_v50 = vadd.f32 %v295_v49, %v113_v32  ;;  %v297_v51 = vpop.f32.mrb[6].mxu1  ;;  %v14819_v49 = vld [vmem:[%s15958_s1] sm:$0xff] }
 0x125   :  { %v15035_v52 = vadd.f32 %v297_v51, %v109_v31  ;;  %v299_v53 = vpop.f32.mrb[7].mxu1 }
 0x126   :  { %v15037_v54 = vadd.f32 %v299_v53, %v113_v32 }
 0x12a   :  { %v303_v55 = vpop.f32.mrb[8].mxu1 }
 0x12b   :  { %v15039_v57 = vadd.f32 %v303_v55, %v109_v31  ;;  %v305_v58 = vpop.f32.mrb[9].mxu1  ;;  %v14548_v29 = vpop.eup %14547 }
 0x12c   :  { %v15041_v59 = vadd.f32 %v305_v58, %v113_v32  ;;  %v307_v60 = vpop.f32.mrb[10].mxu1  ;;  %v13323_v58 = vld [vmem:[#allocation5 + $0xc0] ss:$12 sps:$4 sm:$0xff]  }
 0x12d   :  { %v15043_v61 = vadd.f32 %v307_v60, %v109_v31  ;;  %v309_v62 = vpop.f32.mrb[11].mxu1  ;;  %v13344_v60 = vld [vmem:[#allocation5 + $0xc8] ss:$12 sps:$4 sm:$0xff]  }
 0x12e   :  { %v15045_v63 = vadd.f32 %v309_v62, %v113_v32 }
 0x132   :  { %v313_v1 = vpop.f32.mrb[12].mxu1 }
 0x133   :  { %v15047_v2 = vadd.f32 %v313_v1, %v109_v31  ;;  %v315_v3 = vpop.f32.mrb[13].mxu1  ;;  %v13328_v1 = vld [vmem:[#allocation5 + $0xdc] ss:$12 sps:$4 sm:$0xff]  }
 0x134   :  { %v15051_v5 = vadd.f32 %v315_v3, %v113_v32  ;;  %v317_v6 = vpop.f32.mrb[14].mxu1 }
 0x135   :  { %v15053_v7 = vadd.f32 %v317_v6, %v109_v31  ;;  %v319_v8 = vpop.f32.mrb[15].mxu1  ;;  %v10898_v31 = vmul.f32 -1.442695, %v694_v44  ;;  %v13326_v6 = vld [vmem:[#allocation5 + $0xd8] ss:$12 sps:$4 sm:$0xff]  }
 0x136   :  { %v15055_v9 = vadd.f32 %v319_v8, %v113_v32  ;;  %v701_v32 = vadd.f32 1.0, %v14548_v29  ;;  %v13348_v8 = vld [vmem:[#allocation5 + $0xe0] ss:$12 sps:$4 sm:$0xff]   ;;  %v13338_v29 = vld [vmem:[#allocation5 + $0x138] ss:$12 sps:$4 sm:$0xff]  }
 0x137   :  { %14549 = vpow2.f32 %v10898_v31  ;;  %v13352_v31 = vld [vmem:[#allocation5 + $0x140] ss:$12 sps:$4 sm:$0xff]  }
 0x138   :  { %14551 = vrcp.f32 %v701_v32  ;;  %v13343_v32 = vld [vmem:[#allocation5 + $0x154] ss:$12 sps:$4 sm:$0xff]  }
 0x13a   :  { %v12294_v12 = vpop.f32.mrb[16].mxu1 }
 0x13b   :  { %v15058_v13 = vadd.f32 %v12294_v12, %v117_v11  ;;  %v356_v14 = vpop.f32.mrb[17].mxu1  ;;  %v13349_v12 = vld [vmem:[#allocation5 + $0xf8] ss:$12 sps:$4 sm:$0xff]  }
 0x13c   :  { %v12295_v15 = vpop.f32.mrb[18].mxu1  ;;  %v357_v41 = vadd.f32 %v356_v14, %v117_v11  ;;  %v13334_v14 = vld [vmem:[#allocation5 + $0x10c] ss:$12 sps:$4 sm:$0xff]  }
 0x13d   :  { %v15060_v16 = vadd.f32 %v12295_v15, %v117_v11  ;;  %v359_v17 = vpop.f32.mrb[19].mxu1  ;;  %v13332_v15 = vld [vmem:[#allocation5 + $0x108] ss:$12 sps:$4 sm:$0xff]  }
 0x13e   :  { %v15062_v18 = vadd.f32 %v359_v17, %v117_v11  ;;  %v13350_v17 = vld [vmem:[#allocation5 + $0x110] ss:$12 sps:$4 sm:$0xff]  }
 0x141   :  { %v14550_v35 = vpop.eup %14549 }
 0x142   :  { %v12298_v19 = vpop.f32.mrb[20].mxu1  ;;  %v14552_v38 = vpop.eup %14551  ;;  %v702_v46 = vadd.f32 1.0, %v14550_v35  ;;  %v13347_v35 = vld [vmem:[#allocation5 + $0x16c] ss:$12 sps:$4 sm:$0xff]  }
 0x143   :  { %v15064_v20 = vadd.f32 %v12298_v19, %v117_v11  ;;  %v372_v21 = vpop.f32.mrb[21].mxu1  ;;  %v13337_v19 = vld [vmem:[#allocation5 + $0x124] ss:$12 sps:$4 sm:$0xff]  }
 0x144   :  { %v15066_v22 = vadd.f32 %v372_v21, %v117_v11  ;;  %v12299_v23 = vpop.f32.mrb[22].mxu1  ;;  %v13335_v21 = vld [vmem:[#allocation5 + $0x120] ss:$12 sps:$4 sm:$0xff]  }
 0x145   :  { %v15068_v24 = vadd.f32 %v12299_v23, %v117_v11  ;;  %v375_v25 = vpop.f32.mrb[23].mxu1  ;;  %v13351_v23 = vld [vmem:[#allocation5 + $0x128] ss:$12 sps:$4 sm:$0xff]  }
 0x146   :  { %v15070_v27 = vadd.f32 %v375_v25, %v117_v11  ;;  %v13329_v11 = vld [vmem:[#allocation5 + $0xf0] ss:$12 sps:$4 sm:$0xff]  }
 0x147   :  { %v13340_v25 = vld [vmem:[#allocation5 + $0x13c] ss:$12 sps:$4 sm:$0xff]  }
 0x15a   :  { %v687_v34 = vpop.f32.mrb[24].mxu1 }
 0x15b   :  { %v707_v36 = vadd.f32 %v10866_v33, %v687_v34  ;;  %v12318_v37 = vpop.f32.mrb[25].mxu1  ;;  %v13341_v33 = vld [vmem:[#allocation5 + $0x150] ss:$12 sps:$4 sm:$0xff]   ;;  %v13353_v34 = vld [vmem:[#allocation5 + $0x158] ss:$12 sps:$4 sm:$0xff]  }
 0x15c   :  { %v690_v40 = vpop.f32.mrb[26].mxu1  ;;  %v15098_v37 = vld [vmem:[%s15958_s1 + $0x8] sm:$0xff] }
 0x15d   :  { %v708_v42 = vmul.f32 %v14552_v38, %v707_v36  ;;  %v12319_v45 = vpop.f32.mrb[27].mxu1  ;;  %v13345_v36 = vld [vmem:[#allocation5 + $0x168] ss:$12 sps:$4 sm:$0xff]   ;;  %v13354_v38 = vld [vmem:[#allocation5 + $0x170] ss:$12 sps:$4 sm:$0xff]   ;;  %v957_v40 = vpack.c.bf16 %v15098_v37, %v15098_v37 }
 0x15e   :  { %v13358_v45 = vld [vmem:[#allocation3 + $0x188] ss:$12 sps:$4 sm:$0xff]  }
 0x15f   :  { %v709_v47 = vadd.f32 %v708_v42, %v357_v41  ;;  %v13357_v41 = vld [vmem:[#allocation3 + $0x184] ss:$12 sps:$4 sm:$0xff]   ;;  %v13355_v42 = vld [vmem:[#allocation3 + $0x180] ss:$12 sps:$4 sm:$0xff]  }
 0x161   :  { %14553 = vtanh.f32 %v709_v47  ;;  %v13359_v47 = vld [vmem:[#allocation3 + $0x198] ss:$12 sps:$4 sm:$0xff]  }
 0x162   :  { %14555 = vrcp.f32 %v702_v46  ;;  %v13361_v46 = vld [vmem:[#allocation3 + $0x19c] ss:$12 sps:$4 sm:$0xff]  }
 0x16b   :  { %v14554_v44 = vpop.eup %14553 }
 0x16c   :  { %v711_v51 = vsub.f32 %v14819_v49, %v14554_v44  ;;  %v14556_v53 = vpop.eup %14555  ;;  %v13365_v49 = vld [vmem:[#allocation3 + $0x1b4] ss:$12 sps:$4 sm:$0xff]  }
 0x16e   :  { %v712_v55 = vmul.f32 %v14556_v53, %v711_v51  ;;  %v13363_v51 = vld [vmem:[#allocation3 + $0x1b0] ss:$12 sps:$4 sm:$0xff]   ;;  %v13366_v53 = vld [vmem:[#allocation3 + $0x1b8] ss:$12 sps:$4 sm:$0xff]  }
 0x170   :  { %v15078_v62 = vadd.f32 %v14554_v44, %v712_v55  ;;  %v13362_v44 = vld [vmem:[#allocation3 + $0x1a0] ss:$12 sps:$4 sm:$0xff]  }
 0x171   :  { %v13369_v55 = vld [vmem:[#allocation3 + $0x1cc] ss:$12 sps:$4 sm:$0xff]  }
 0x172   :  { %v15082_v3 = vpack.c.bf16 %v15078_v62, %v15078_v62 }
 0x174   :  { %909 = vmatmul.mubr.bf16.vlgmr.msra.gmra.mrb[4].mxu0 %v15082_v3  ;;  %12337 = vmatmul.mubr.bf16.vlgmr.msra.gmra.mrb[28].mxu1 %v15082_v3 }
 0x175   :  { %1120 = vmatpush1.bf16.msra.mxu0 %v13323_v58  ;;  %12341 = vmatpush3.bf16.msra.mxu1 %v13344_v60  ;;  %v13367_v58 = vld [vmem:[#allocation3 + $0x1c8] ss:$12 sps:$4 sm:$0xff]   ;;  %v13370_v60 = vld [vmem:[#allocation3 + $0x1d0] ss:$12 sps:$4 sm:$0xff]  }
 0x176   :  { %1121 = vmatprep.subr.bf16.mxu0 %v13328_v1  ;;  %12342 = vmatprep.subr.bf16.mxu1 %v14883_v56  ;;  %v13371_v1 = vld [vmem:[#allocation3 + $0x1e0] ss:$12 sps:$4 sm:$0xff]  }
 0x177   :  { %1151 = vmatprep.mubr.bf16.mxu0 %v14882_v0  ;;  %12356 = vmatprep.mubr.msk.bf16.mxu1 %vm14884_vm0, %v14883_v56 }
 0x179   :  { %1122 = vmatpush1.bf16.msra.mxu0 %v13326_v6  ;;  %12343 = vmatpush3.bf16.msra.mxu1 %v13348_v8  ;;  %v13373_v6 = vld [vmem:[#allocation3 + $0x1e4] ss:$12 sps:$4 sm:$0xff]   ;;  %v13374_v8 = vld [vmem:[#allocation3 + $0x1e8] ss:$12 sps:$4 sm:$0xff]  }
 0x17a   :  { %1123 = vmatprep.subr.bf16.mxu0 %v13331_v10  ;;  %12344 = vmatprep.subr.bf16.mxu1 %v14883_v56  ;;  %v13377_v10 = vld [vmem:[#allocation3 + $0x1fc] ss:$12 sps:$4 sm:$0xff]  }
 0x17d   :  { %1124 = vmatpush1.bf16.msra.mxu0 %v13329_v11  ;;  %12345 = vmatpush3.bf16.msra.mxu1 %v13349_v12  ;;  %v13375_v11 = vld [vmem:[#allocation3 + $0x1f8] ss:$12 sps:$4 sm:$0xff]   ;;  %v13378_v12 = vld [vmem:[#allocation3 + $0x200] ss:$12 sps:$4 sm:$0xff]  }
 0x17e   :  { %1125 = vmatprep.subr.bf16.mxu0 %v13334_v14  ;;  %12346 = vmatprep.subr.bf16.mxu1 %v14883_v56  ;;  %v13381_v14 = vld [vmem:[#allocation3 + $0x214] ss:$12 sps:$4 sm:$0xff]  }
 0x181   :  { %1126 = vmatpush1.bf16.msra.mxu0 %v13332_v15  ;;  %12347 = vmatpush3.bf16.msra.mxu1 %v13350_v17  ;;  %v13379_v15 = vld [vmem:[#allocation3 + $0x210] ss:$12 sps:$4 sm:$0xff]   ;;  %v13382_v17 = vld [vmem:[#allocation3 + $0x218] ss:$12 sps:$4 sm:$0xff]  }
 0x182   :  { %1127 = vmatprep.subr.bf16.mxu0 %v13337_v19  ;;  %12348 = vmatprep.subr.bf16.mxu1 %v14883_v56  ;;  %v13385_v19 = vld [vmem:[#allocation3 + $0x22c] ss:$12 sps:$4 sm:$0xff]  }
 0x185   :  { %1128 = vmatpush1.bf16.msra.mxu0 %v13335_v21  ;;  %12349 = vmatpush3.bf16.msra.mxu1 %v13351_v23  ;;  %v13383_v21 = vld [vmem:[#allocation3 + $0x228] ss:$12 sps:$4 sm:$0xff]   ;;  %v13386_v23 = vld [vmem:[#allocation3 + $0x230] ss:$12 sps:$4 sm:$0xff]  }
 0x186   :  { %1129 = vmatprep.subr.bf16.mxu0 %v13340_v25  ;;  %12350 = vmatprep.subr.bf16.mxu1 %v14883_v56  ;;  %v13389_v25 = vld [vmem:[#allocation5 + $0x184] ss:$12 sps:$4 sm:$0xff]  }
 0x189   :  { %1130 = vmatpush1.bf16.msra.mxu0 %v13338_v29  ;;  %12351 = vmatpush3.bf16.msra.mxu1 %v13352_v31 }
 0x18a   :  { %1131 = vmatprep.subr.bf16.mxu0 %v13343_v32  ;;  %12352 = vmatprep.subr.bf16.mxu1 %v14883_v56 }
 0x18d   :  { %1132 = vmatpush1.bf16.msra.mxu0 %v13341_v33  ;;  %12353 = vmatpush3.bf16.msra.mxu1 %v13353_v34  ;;  %v10864_v34 = vld [vmem:[%s15961_s4 + $0x3] sm:$0x7] }
 0x18e   :  { %1133 = vmatprep.subr.bf16.mxu0 %v13347_v35  ;;  %12354 = vmatprep.subr.bf16.mxu1 %v14883_v56  ;;  %v15119_v35 = vrot.slane %v10864_v34, %v15018_v28 }
 0x191   :  { %1134 = vmatpush1.bf16.msra.mxu0 %v13345_v36  ;;  %12355 = vmatpush3.bf16.msra.mxu1 %v13354_v38 }
 0x192   :  { %12360 = vmatprep.subr.bf16.mxu1 %v14883_v56  ;;  %1383 = vmatprep.subr.bf16.mxu0 %v13357_v41 }
 0x194   :  { %1152 = vmatmul.mubr.bf16.vlgmr.msra.gmra.mrb[4].mxu0 %v957_v40  ;;  %12357 = vmatmul.mubr.bf16.vlgmr.msra.gmra.mrb[32].mxu1 %v957_v40 }
 0x195   :  { %1415 = vmatprep.mubr.bf16.mxu0 %v14882_v0  ;;  %12376 = vmatprep.mubr.msk.bf16.mxu1 %vm14884_vm0, %v14883_v56 }
 0x196   :  { %1384 = vmatpush1.bf16.msra.mxu0 %v13355_v42  ;;  %12361 = vmatpush3.bf16.msra.mxu1 %v13358_v45 }
 0x197   :  { %12362 = vmatprep.subr.bf16.mxu1 %v14883_v56  ;;  %1385 = vmatprep.subr.bf16.mxu0 %v13361_v46 }
 0x19a   :  { %1386 = vmatpush1.bf16.msra.mxu0 %v13359_v47  ;;  %12363 = vmatpush3.bf16.msra.mxu1 %v13362_v44 }
 0x19b   :  { %12364 = vmatprep.subr.bf16.mxu1 %v14883_v56  ;;  %1387 = vmatprep.subr.bf16.mxu0 %v13365_v49 }
 0x19e   :  { %1388 = vmatpush1.bf16.msra.mxu0 %v13363_v51  ;;  %12365 = vmatpush3.bf16.msra.mxu1 %v13366_v53  ;;  %v15123_v51 = vrot.slane %v10864_v34, %v15023_v30 }
 0x19f   :  { %12366 = vmatprep.subr.bf16.mxu1 %v14883_v56  ;;  %1389 = vmatprep.subr.bf16.mxu0 %v13369_v55 }
 0x1a2   :  { %1390 = vmatpush1.bf16.msra.mxu0 %v13367_v58  ;;  %12367 = vmatpush3.bf16.msra.mxu1 %v13370_v60 }
 0x1a3   :  { %12368 = vmatprep.subr.bf16.mxu1 %v14883_v56  ;;  %1391 = vmatprep.subr.bf16.mxu0 %v13373_v6  ;;  %v15132_v6 = vrot.slane %v10864_v34, %v15049_v4 }
 0x1a6   :  { %1392 = vmatpush1.bf16.msra.mxu0 %v13371_v1  ;;  %12369 = vmatpush3.bf16.msra.mxu1 %v13374_v8  ;;  %v15129_v1 = vld [vmem:[%s15962_s5 + $0x1] ss:$0 sm:$0xff] }
 0x1a7   :  { %1393 = vmatprep.subr.bf16.mxu0 %v13377_v10  ;;  %12370 = vmatprep.subr.bf16.mxu1 %v14883_v56 }
 0x1aa   :  { %1394 = vmatpush1.bf16.msra.mxu0 %v13375_v11  ;;  %12371 = vmatpush3.bf16.msra.mxu1 %v13378_v12 }
 0x1ab   :  { %1395 = vmatprep.subr.bf16.mxu0 %v13381_v14  ;;  %12372 = vmatprep.subr.bf16.mxu1 %v14883_v56 }
 0x1ae   :  { %1396 = vmatpush1.bf16.msra.mxu0 %v13379_v15  ;;  %12373 = vmatpush3.bf16.msra.mxu1 %v13382_v17 }
 0x1af   :  { %1397 = vmatprep.subr.bf16.mxu0 %v13385_v19  ;;  %12374 = vmatprep.subr.bf16.mxu1 %v14883_v56 }
 0x1b2   :  { %1398 = vmatpush1.bf16.msra.mxu0 %v13383_v21  ;;  %12375 = vmatpush3.bf16.msra.mxu1 %v13386_v23 }
 0x1b3   :  { %1626 = vmatprep.subr.bf16.mxu0 %v13389_v25  ;;  %12380 = vmatprep.subr.bf16.mxu1 %v14883_v56 }
 0x247   :  { %v951_v29 = vpop.f32.mrb[28].mxu1 }
 0x248   :  { %v12338_v31 = vpop.f32.mrb[29].mxu1  ;;  %v952_v12 = vadd.f32 %v951_v29, %v15132_v6  ;;  %v13391_v29 = vld [vmem:[#allocation5 + $0x198] ss:$12 sps:$4 sm:$0xff]  }
 0x249   :  { %v954_v32 = vpop.f32.mrb[30].mxu1 }
 0x24a   :  { %v12339_v33 = vpop.f32.mrb[31].mxu1  ;;  %v13387_v32 = vld [vmem:[#allocation5 + $0x180] ss:$12 sps:$4 sm:$0xff]  }
 0x24b   :  { %v13390_v33 = vld [vmem:[#allocation5 + $0x188] ss:$12 sps:$4 sm:$0xff]  }
 0x267   :  { %v1153_v36 = vpop.f32.mrb[4].mxu0  ;;  %v1194_v38 = vpop.f32.mrb[32].mxu1 }
 0x268   :  { %v13124_v40 = vadd.f32 %v1153_v36, %v15119_v35  ;;  %v1155_v41 = vpop.f32.mrb[5].mxu0  ;;  %v12358_v42 = vpop.f32.mrb[33].mxu1  ;;  %v1214_v8 = vadd.f32 %v15129_v1, %v1194_v38  ;;  %v13393_v36 = vld [vmem:[#allocation5 + $0x19c] ss:$12 sps:$4 sm:$0xff]   ;;  %v13394_v38 = vld [vmem:[#allocation5 + $0x1a0] ss:$12 sps:$4 sm:$0xff]  }
 0x269   :  { %v1157_v45 = vpop.f32.mrb[6].mxu0  ;;  %v1197_v46 = vpop.f32.mrb[34].mxu1  ;;  %v13125_v53 = vadd.f32 %v1155_v41, %v15123_v51  ;;  %v13398_v41 = vld [vmem:[#allocation5 + $0x1b8] ss:$12 sps:$4 sm:$0xff]  }
 0x26a   :  { %v10947_v47 = vmul.f32 -1.442695, %v13124_v40  ;;  %v1158_v44 = vpop.f32.mrb[7].mxu0  ;;  %v12359_v49 = vpop.f32.mrb[35].mxu1  ;;  %v13395_v40 = vld [vmem:[#allocation5 + $0x1b0] ss:$12 sps:$4 sm:$0xff]  }
 0x26b   :  { %v10948_v55 = vmul.f32 -1.442695, %v13125_v53  ;;  %v13401_v42 = vld [vmem:[#allocation5 + $0x1cc] ss:$12 sps:$4 sm:$0xff]   ;;  %v13399_v45 = vld [vmem:[#allocation5 + $0x1c8] ss:$12 sps:$4 sm:$0xff]  }
 0x26c   :  { %14557 = vpow2.f32 %v10947_v47  ;;  %v13402_v46 = vld [vmem:[#allocation5 + $0x1d0] ss:$12 sps:$4 sm:$0xff]   ;;  %v13403_v44 = vld [vmem:[#allocation5 + $0x1e0] ss:$12 sps:$4 sm:$0xff]   ;;  %v13406_v49 = vld [vmem:[#allocation5 + $0x1e8] ss:$12 sps:$4 sm:$0xff]  }
 0x26d   :  { %14559 = vpow2.f32 %v10948_v55  ;;  %v13405_v47 = vld [vmem:[#allocation5 + $0x1e4] ss:$12 sps:$4 sm:$0xff]   ;;  %v13409_v53 = vld [vmem:[#allocation5 + $0x1fc] ss:$12 sps:$4 sm:$0xff]  }
 0x26e   :  { %v13407_v55 = vld [vmem:[#allocation5 + $0x1f8] ss:$12 sps:$4 sm:$0xff]  }
 0x276   :  { %v14558_v58 = vpop.eup %14557 }
 0x277   :  { %v1208_v60 = vadd.f32 1.0, %v14558_v58  ;;  %v14560_v10 = vpop.eup %14559  ;;  %v13410_v58 = vld [vmem:[#allocation5 + $0x200] ss:$12 sps:$4 sm:$0xff]  }
 0x278   :  { %v1209_v15 = vadd.f32 1.0, %v14560_v10  ;;  %v13414_v10 = vld [vmem:[#allocation5 + $0x218] ss:$12 sps:$4 sm:$0xff]  }
 0x279   :  { %14561 = vrcp.f32 %v1208_v60  ;;  %v13413_v60 = vld [vmem:[#allocation5 + $0x214] ss:$12 sps:$4 sm:$0xff]  }
 0x283   :  { %v14562_v11 = vpop.eup %14561 }
 0x284   :  { %v1215_v14 = vmul.f32 %v14562_v11, %v1214_v8  ;;  %v13411_v8 = vld [vmem:[#allocation5 + $0x210] ss:$12 sps:$4 sm:$0xff]   ;;  %v13417_v11 = vld [vmem:[#allocation5 + $0x22c] ss:$12 sps:$4 sm:$0xff]  }
 0x286   :  { %v1216_v17 = vadd.f32 %v1215_v14, %v952_v12  ;;  %v13415_v12 = vld [vmem:[#allocation5 + $0x228] ss:$12 sps:$4 sm:$0xff]   ;;  %v13418_v14 = vld [vmem:[#allocation5 + $0x230] ss:$12 sps:$4 sm:$0xff]  }
 0x288   :  { %14563 = vtanh.f32 %v1216_v17  ;;  %v13421_v17 = vld [vmem:[#allocation5 + $0x4] ss:$12 sps:$4 sm:$0xff]  }
 0x289   :  { %14565 = vrcp.f32 %v1209_v15  ;;  %v15157_v15 = vld [vmem:[%s15958_s1 + $0x10] sm:$0xff] }
 0x292   :  { %v14564_v19 = vpop.eup %14563 }
 0x293   :  { %v1218_v21 = vsub.f32 %v15098_v37, %v14564_v19  ;;  %v14566_v23 = vpop.eup %14565  ;;  %v13397_v37 = vld [vmem:[#allocation5 + $0x1b4] ss:$12 sps:$4 sm:$0xff]  }
 0x295   :  { %v1219_v25 = vmul.f32 %v14566_v23, %v1218_v21  ;;  %v13419_v21 = vld [vmem:[#allocation5] ss:$12 sps:$4 sm:$0xff]   ;;  %v13422_v23 = vld [vmem:[#allocation5 + $0x8] ss:$12 sps:$4 sm:$0xff]  }
 0x297   :  { %v15137_v31 = vadd.f32 %v14564_v19, %v1219_v25  ;;  %v1464_v19 = vpack.c.bf16 %v15157_v15, %v15157_v15  ;;  %v13425_v25 = vld [vmem:[#allocation5 + $0x1c] ss:$12 sps:$4 sm:$0xff]  }
 0x299   :  { %v15141_v34 = vpack.c.bf16 %v15137_v31, %v15137_v31 }
 0x29b   :  { %1416 = vmatmul.mubr.bf16.vlgmr.msra.gmra.mrb[8].mxu0 %v15141_v34  ;;  %12377 = vmatmul.mubr.bf16.vlgmr.msra.gmra.mrb[36].mxu1 %v15141_v34 }
 0x29c   :  { %1627 = vmatpush1.bf16.msra.mxu0 %v13387_v32  ;;  %12381 = vmatpush3.bf16.msra.mxu1 %v13390_v33  ;;  %v13423_v32 = vld [vmem:[#allocation5 + $0x18] ss:$12 sps:$4 sm:$0xff]   ;;  %v13426_v33 = vld [vmem:[#allocation5 + $0x20] ss:$12 sps:$4 sm:$0xff]  }
 0x29d   :  { %1628 = vmatprep.subr.bf16.mxu0 %v13393_v36  ;;  %12382 = vmatprep.subr.bf16.mxu1 %v14883_v56  ;;  %v13429_v36 = vld [vmem:[#allocation5 + $0x34] ss:$12 sps:$4 sm:$0xff]  }
 0x29e   :  { %1658 = vmatprep.mubr.bf16.mxu0 %v14882_v0  ;;  %12396 = vmatprep.mubr.msk.bf16.mxu1 %vm14884_vm0, %v14883_v56 }
 0x2a0   :  { %1629 = vmatpush1.bf16.msra.mxu0 %v13391_v29  ;;  %12383 = vmatpush3.bf16.msra.mxu1 %v13394_v38  ;;  %v13427_v29 = vld [vmem:[#allocation5 + $0x30] ss:$12 sps:$4 sm:$0xff]   ;;  %v13430_v38 = vld [vmem:[#allocation5 + $0x38] ss:$12 sps:$4 sm:$0xff]  }
 0x2a1   :  { %1630 = vmatprep.subr.bf16.mxu0 %v13397_v37  ;;  %12384 = vmatprep.subr.bf16.mxu1 %v14883_v56  ;;  %v13433_v37 = vld [vmem:[#allocation5 + $0x4c] ss:$12 sps:$4 sm:$0xff]  }
 0x2a4   :  { %1631 = vmatpush1.bf16.msra.mxu0 %v13395_v40  ;;  %12385 = vmatpush3.bf16.msra.mxu1 %v13398_v41  ;;  %v13431_v40 = vld [vmem:[#allocation5 + $0x48] ss:$12 sps:$4 sm:$0xff]   ;;  %v13434_v41 = vld [vmem:[#allocation5 + $0x50] ss:$12 sps:$4 sm:$0xff]  }
 0x2a5   :  { %1632 = vmatprep.subr.bf16.mxu0 %v13401_v42  ;;  %12386 = vmatprep.subr.bf16.mxu1 %v14883_v56  ;;  %v13437_v42 = vld [vmem:[#allocation5 + $0x64] ss:$12 sps:$4 sm:$0xff]  }
 0x2a8   :  { %1633 = vmatpush1.bf16.msra.mxu0 %v13399_v45  ;;  %12387 = vmatpush3.bf16.msra.mxu1 %v13402_v46  ;;  %v13435_v45 = vld [vmem:[#allocation5 + $0x60] ss:$12 sps:$4 sm:$0xff]   ;;  %v13438_v46 = vld [vmem:[#allocation5 + $0x68] ss:$12 sps:$4 sm:$0xff]  }
 0x2a9   :  { %1634 = vmatprep.subr.bf16.mxu0 %v13405_v47  ;;  %12388 = vmatprep.subr.bf16.mxu1 %v14883_v56  ;;  %v13441_v47 = vld [vmem:[#allocation5 + $0x7c] ss:$12 sps:$4 sm:$0xff]  }
 0x2ac   :  { %1635 = vmatpush1.bf16.msra.mxu0 %v13403_v44  ;;  %12389 = vmatpush3.bf16.msra.mxu1 %v13406_v49  ;;  %v13439_v44 = vld [vmem:[#allocation5 + $0x78] ss:$12 sps:$4 sm:$0xff]   ;;  %v13442_v49 = vld [vmem:[#allocation5 + $0x80] ss:$12 sps:$4 sm:$0xff]  }
 0x2ad   :  { %1636 = vmatprep.subr.bf16.mxu0 %v13409_v53  ;;  %12390 = vmatprep.subr.bf16.mxu1 %v14883_v56  ;;  %v13445_v53 = vld [vmem:[#allocation5 + $0x94] ss:$12 sps:$4 sm:$0xff]  }
 0x2b0   :  { %1637 = vmatpush1.bf16.msra.mxu0 %v13407_v55  ;;  %12391 = vmatpush3.bf16.msra.mxu1 %v13410_v58  ;;  %v13443_v55 = vld [vmem:[#allocation5 + $0x90] ss:$12 sps:$4 sm:$0xff]   ;;  %v13446_v58 = vld [vmem:[#allocation5 + $0x98] ss:$12 sps:$4 sm:$0xff]  }
 0x2b1   :  { %1638 = vmatprep.subr.bf16.mxu0 %v13413_v60  ;;  %12392 = vmatprep.subr.bf16.mxu1 %v14883_v56  ;;  %v13449_v60 = vld [vmem:[#allocation5 + $0xac] ss:$12 sps:$4 sm:$0xff]  }
 0x2b4   :  { %1639 = vmatpush1.bf16.msra.mxu0 %v13411_v8  ;;  %12393 = vmatpush3.bf16.msra.mxu1 %v13414_v10  ;;  %v13447_v8 = vld [vmem:[#allocation5 + $0xa8] ss:$12 sps:$4 sm:$0xff]   ;;  %v13450_v10 = vld [vmem:[#allocation5 + $0xb0] ss:$12 sps:$4 sm:$0xff]  }
 0x2b5   :  { %1640 = vmatprep.subr.bf16.mxu0 %v13417_v11  ;;  %12394 = vmatprep.subr.bf16.mxu1 %v14883_v56  ;;  %v13453_v11 = vld [vmem:[#allocation3 + $0xc4] ss:$12 sps:$4 sm:$0xff]  }
 0x2b8   :  { %1641 = vmatpush1.bf16.msra.mxu0 %v13415_v12  ;;  %12395 = vmatpush3.bf16.msra.mxu1 %v13418_v14  ;;  %v13451_v12 = vld [vmem:[#allocation3 + $0xc0] ss:$12 sps:$4 sm:$0xff]   ;;  %v13454_v14 = vld [vmem:[#allocation3 + $0xc8] ss:$12 sps:$4 sm:$0xff]  }
 0x2b9   :  { %1889 = vmatprep.subr.bf16.mxu0 %v13421_v17  ;;  %12400 = vmatprep.subr.bf16.mxu1 %v14883_v56  ;;  %v13457_v17 = vld [vmem:[#allocation3 + $0xdc] ss:$12 sps:$4 sm:$0xff]  }
 0x2bb   :  { %1659 = vmatmul.mubr.bf16.vlgmr.msra.gmra.mrb[8].mxu0 %v1464_v19  ;;  %12397 = vmatmul.mubr.bf16.vlgmr.msra.gmra.mrb[40].mxu1 %v1464_v19  ;;  %v13455_v19 = vld [vmem:[#allocation3 + $0xd8] ss:$12 sps:$4 sm:$0xff]  }
 0x2bc   :  { %1890 = vmatpush1.bf16.msra.mxu0 %v13419_v21  ;;  %12401 = vmatpush3.bf16.msra.mxu1 %v13422_v23  ;;  %v13458_v21 = vld [vmem:[#allocation3 + $0xe0] ss:$12 sps:$4 sm:$0xff]   ;;  %v13459_v23 = vld [vmem:[#allocation3 + $0xf0] ss:$12 sps:$4 sm:$0xff]  }
 0x2bd   :  { %1891 = vmatprep.subr.bf16.mxu0 %v13425_v25  ;;  %12402 = vmatprep.subr.bf16.mxu1 %v14883_v56  ;;  %v13462_v25 = vld [vmem:[#allocation3 + $0xf8] ss:$12 sps:$4 sm:$0xff]  }
 0x2be   :  { %1921 = vmatprep.mubr.bf16.mxu0 %v14882_v0  ;;  %12416 = vmatprep.mubr.msk.bf16.mxu1 %vm14884_vm0, %v14883_v56 }
 0x2c0   :  { %1892 = vmatpush1.bf16.msra.mxu0 %v13423_v32  ;;  %12403 = vmatpush3.bf16.msra.mxu1 %v13426_v33  ;;  %v13465_v32 = vld [vmem:[#allocation3 + $0x10c] ss:$12 sps:$4 sm:$0xff]   ;;  %v13463_v33 = vld [vmem:[#allocation3 + $0x108] ss:$12 sps:$4 sm:$0xff]  }
 0x2c1   :  { %1893 = vmatprep.subr.bf16.mxu0 %v13429_v36  ;;  %12404 = vmatprep.subr.bf16.mxu1 %v14883_v56  ;;  %v13466_v36 = vld [vmem:[#allocation3 + $0x110] ss:$12 sps:$4 sm:$0xff]  }
 0x2c4   :  { %1894 = vmatpush1.bf16.msra.mxu0 %v13427_v29  ;;  %12405 = vmatpush3.bf16.msra.mxu1 %v13430_v38  ;;  %v13467_v29 = vld [vmem:[#allocation3 + $0x120] ss:$12 sps:$4 sm:$0xff]   ;;  %v13469_v38 = vld [vmem:[#allocation3 + $0x124] ss:$12 sps:$4 sm:$0xff]  }
 0x2c5   :  { %1895 = vmatprep.subr.bf16.mxu0 %v13433_v37  ;;  %12406 = vmatprep.subr.bf16.mxu1 %v14883_v56  ;;  %v13470_v37 = vld [vmem:[#allocation3 + $0x128] ss:$12 sps:$4 sm:$0xff]  }
 0x2c8   :  { %1896 = vmatpush1.bf16.msra.mxu0 %v13431_v40  ;;  %12407 = vmatpush3.bf16.msra.mxu1 %v13434_v41  ;;  %v13473_v40 = vld [vmem:[#allocation3 + $0x13c] ss:$12 sps:$4 sm:$0xff]   ;;  %v13471_v41 = vld [vmem:[#allocation3 + $0x138] ss:$12 sps:$4 sm:$0xff]  }
 0x2c9   :  { %1897 = vmatprep.subr.bf16.mxu0 %v13437_v42  ;;  %12408 = vmatprep.subr.bf16.mxu1 %v14883_v56  ;;  %v13474_v42 = vld [vmem:[#allocation3 + $0x140] ss:$12 sps:$4 sm:$0xff]  }
 0x2cc   :  { %1898 = vmatpush1.bf16.msra.mxu0 %v13435_v45  ;;  %12409 = vmatpush3.bf16.msra.mxu1 %v13438_v46  ;;  %v13477_v45 = vld [vmem:[#allocation3 + $0x154] ss:$12 sps:$4 sm:$0xff]   ;;  %v13475_v46 = vld [vmem:[#allocation3 + $0x150] ss:$12 sps:$4 sm:$0xff]  }
 0x2cd   :  { %1899 = vmatprep.subr.bf16.mxu0 %v13441_v47  ;;  %12410 = vmatprep.subr.bf16.mxu1 %v14883_v56  ;;  %v13478_v47 = vld [vmem:[#allocation3 + $0x158] ss:$12 sps:$4 sm:$0xff]  }
 0x2d0   :  { %1900 = vmatpush1.bf16.msra.mxu0 %v13439_v44  ;;  %12411 = vmatpush3.bf16.msra.mxu1 %v13442_v49  ;;  %v13481_v44 = vld [vmem:[#allocation3 + $0x16c] ss:$12 sps:$4 sm:$0xff]   ;;  %v13479_v49 = vld [vmem:[#allocation3 + $0x168] ss:$12 sps:$4 sm:$0xff]  }
 0x2d1   :  { %1901 = vmatprep.subr.bf16.mxu0 %v13445_v53  ;;  %12412 = vmatprep.subr.bf16.mxu1 %v14883_v56  ;;  %v13482_v53 = vld [vmem:[#allocation3 + $0x170] ss:$12 sps:$4 sm:$0xff]  }
 0x2d4   :  { %1902 = vmatpush1.bf16.msra.mxu0 %v13443_v55  ;;  %12413 = vmatpush3.bf16.msra.mxu1 %v13446_v58  ;;  %v13485_v55 = vld [vmem:[#allocation5 + $0xc4] ss:$12 sps:$4 sm:$0xff]  }
 0x2d5   :  { %1903 = vmatprep.subr.bf16.mxu0 %v13449_v60  ;;  %12414 = vmatprep.subr.bf16.mxu1 %v14883_v56 }
 0x2d8   :  { %1904 = vmatpush1.bf16.msra.mxu0 %v13447_v8  ;;  %12415 = vmatpush3.bf16.msra.mxu1 %v13450_v10 }
 0x2d9   :  { %12420 = vmatprep.subr.bf16.mxu1 %v14883_v56  ;;  %2152 = vmatprep.subr.bf16.mxu0 %v13453_v11  ;;  %v10865_v11 = vld [vmem:[%s15961_s4 + $0x6] sm:$0x7] }
 0x2db   :  { %1922 = vmatmul.mubr.bf16.vlgmr.msra.gmra.mrb[12].mxu0 %v15082_v3  ;;  %12417 = vmatmul.mubr.bf16.vlgmr.msra.gmra.mrb[44].mxu1 %v15082_v3  ;;  %v13461_v3 = vld [vmem:[#allocation3 + $0xf4] ss:$12 sps:$4 sm:$0xff]  }
 0x2dc   :  { %2184 = vmatprep.mubr.bf16.mxu0 %v14882_v0  ;;  %12436 = vmatprep.mubr.msk.bf16.mxu1 %vm14884_vm0, %v14883_v56 }
 0x2dd   :  { %2153 = vmatpush1.bf16.msra.mxu0 %v13451_v12  ;;  %12421 = vmatpush3.bf16.msra.mxu1 %v13454_v14  ;;  %v15191_v12 = vrot.slane %v10865_v11, %v15018_v28 }
 0x2de   :  { %12422 = vmatprep.subr.bf16.mxu1 %v14883_v56  ;;  %2154 = vmatprep.subr.bf16.mxu0 %v13457_v17 }
 0x2e1   :  { %2155 = vmatpush1.bf16.msra.mxu0 %v13455_v19  ;;  %12423 = vmatpush3.bf16.msra.mxu1 %v13458_v21 }
 0x2e2   :  { %12424 = vmatprep.subr.bf16.mxu1 %v14883_v56  ;;  %2156 = vmatprep.subr.bf16.mxu0 %v13461_v3 }
 0x2e5   :  { %2157 = vmatpush1.bf16.msra.mxu0 %v13459_v23  ;;  %12425 = vmatpush3.bf16.msra.mxu1 %v13462_v25 }
 0x2e6   :  { %12426 = vmatprep.subr.bf16.mxu1 %v14883_v56  ;;  %2158 = vmatprep.subr.bf16.mxu0 %v13465_v32 }
 0x2e9   :  { %2159 = vmatpush1.bf16.msra.mxu0 %v13463_v33  ;;  %12427 = vmatpush3.bf16.msra.mxu1 %v13466_v36 }
 0x2ea   :  { %12428 = vmatprep.subr.bf16.mxu1 %v14883_v56  ;;  %2160 = vmatprep.subr.bf16.mxu0 %v13469_v38 }
 0x2ed   :  { %2161 = vmatpush1.bf16.msra.mxu0 %v13467_v29  ;;  %12429 = vmatpush3.bf16.msra.mxu1 %v13470_v37  ;;  %v15195_v29 = vrot.slane %v10865_v11, %v15023_v30 }
 0x2ee   :  { %2162 = vmatprep.subr.bf16.mxu0 %v13473_v40  ;;  %12430 = vmatprep.subr.bf16.mxu1 %v14883_v56 }
 0x2f1   :  { %2163 = vmatpush1.bf16.msra.mxu0 %v13471_v41  ;;  %12431 = vmatpush3.bf16.msra.mxu1 %v13474_v42  ;;  %v15201_v41 = vld [vmem:[%s15962_s5 + $0x2] ss:$0 sm:$0xff]  ;;  %v15204_v42 = vrot.slane %v10865_v11, %v15049_v4 }
 0x2f2   :  { %2164 = vmatprep.subr.bf16.mxu0 %v13477_v45  ;;  %12432 = vmatprep.subr.bf16.mxu1 %v14883_v56 }
 0x2f5   :  { %2165 = vmatpush1.bf16.msra.mxu0 %v13475_v46  ;;  %12433 = vmatpush3.bf16.msra.mxu1 %v13478_v47 }
 0x2f6   :  { %2166 = vmatprep.subr.bf16.mxu0 %v13481_v44  ;;  %12434 = vmatprep.subr.bf16.mxu1 %v14883_v56 }
 0x2f9   :  { %2167 = vmatpush1.bf16.msra.mxu0 %v13479_v49  ;;  %12435 = vmatpush3.bf16.msra.mxu1 %v13482_v53 }
 0x2fa   :  { %2393 = vmatprep.subr.bf16.mxu0 %v13485_v55  ;;  %12440 = vmatprep.subr.bf16.mxu1 %v14883_v56 }
 0x36e   :  { %v1458_v58 = vpop.f32.mrb[36].mxu1 }
 0x36f   :  { %v12378_v60 = vpop.f32.mrb[37].mxu1  ;;  %v1459_v47 = vadd.f32 %v1458_v58, %v15204_v42 }
 0x370   :  { %v1461_v8 = vpop.f32.mrb[38].mxu1 }
 0x371   :  { %v12379_v10 = vpop.f32.mrb[39].mxu1 }
 0x38e   :  { %v1660_v14 = vpop.f32.mrb[8].mxu0  ;;  %v1701_v17 = vpop.f32.mrb[40].mxu1 }
 0x38f   :  { %v13126_v19 = vadd.f32 %v1660_v14, %v15191_v12  ;;  %v1662_v21 = vpop.f32.mrb[9].mxu0  ;;  %v12398_v3 = vpop.f32.mrb[41].mxu1  ;;  %v1721_v45 = vadd.f32 %v15201_v41, %v1701_v17 }
 0x390   :  { %v1664_v23 = vpop.f32.mrb[10].mxu0  ;;  %v1704_v25 = vpop.f32.mrb[42].mxu1  ;;  %v13127_v38 = vadd.f32 %v1662_v21, %v15195_v29 }
 0x391   :  { %v10997_v32 = vmul.f32 -1.442695, %v13126_v19  ;;  %v1665_v33 = vpop.f32.mrb[11].mxu0  ;;  %v12399_v36 = vpop.f32.mrb[43].mxu1 }
 0x392   :  { %v10998_v37 = vmul.f32 -1.442695, %v13127_v38 }
 0x393   :  { %14567 = vpow2.f32 %v10997_v32 }
 0x394   :  { %14569 = vpow2.f32 %v10998_v37  ;;  %v15216_v37 = vld [vmem:[%s15962_s5] ss:$0 sm:$0xff] }
 0x39d   :  { %v14568_v28 = vpop.eup %14567 }
 0x39e   :  { %v1715_v40 = vadd.f32 1.0, %v14568_v28  ;;  %v14570_v46 = vpop.eup %14569 }
 0x39f   :  { %v1716_v49 = vadd.f32 1.0, %v14570_v46 }
 0x3a0   :  { %14571 = vrcp.f32 %v1715_v40 }
 0x3aa   :  { %v14572_v30 = vpop.eup %14571 }
 0x3ab   :  { %v1722_v44 = vmul.f32 %v14572_v30, %v1721_v45 }
 0x3ad   :  { %v1723_v53 = vadd.f32 %v1722_v44, %v1459_v47 }
 0x3ae   :  { %v1923_v55 = vpop.f32.mrb[12].mxu0  ;;  %v1964_v60 = vpop.f32.mrb[44].mxu1 }
 0x3af   :  { %14573 = vtanh.f32 %v1723_v53  ;;  %v1970_v8 = vadd.f32 %v1923_v55, %v15027_v39  ;;  %v1925_v10 = vpop.f32.mrb[13].mxu0  ;;  %v12418_v14 = vpop.f32.mrb[45].mxu1  ;;  %v1984_v28 = vadd.f32 %v15216_v37, %v1964_v60  ;;  %v13483_v55 = vld [vmem:[#allocation5 + $0xc0] ss:$12 sps:$4 sm:$0xff]   ;;  %v13489_v60 = vld [vmem:[#allocation5 + $0xdc] ss:$12 sps:$4 sm:$0xff]  }
 0x3b0   :  { %v1971_v19 = vadd.f32 %v1925_v10, %v15029_v43  ;;  %v1927_v4 = vpop.f32.mrb[14].mxu0  ;;  %v1967_v11 = vpop.f32.mrb[46].mxu1  ;;  %14575 = vrcp.f32 %v1716_v49  ;;  %v13490_v14 = vld [vmem:[#allocation5 + $0xe0] ss:$12 sps:$4 sm:$0xff]  }
 0x3b1   :  { %v11023_v17 = vmul.f32 -1.442695, %v1970_v8  ;;  %v1928_v21 = vpop.f32.mrb[15].mxu0  ;;  %v12419_v3 = vpop.f32.mrb[47].mxu1  ;;  %v13486_v8 = vld [vmem:[#allocation5 + $0xc8] ss:$12 sps:$4 sm:$0xff]  }
 0x3b2   :  { %v11024_v32 = vmul.f32 -1.442695, %v1971_v19  ;;  %v13491_v19 = vld [vmem:[#allocation5 + $0xf0] ss:$12 sps:$4 sm:$0xff]   ;;  %v13494_v4 = vld [vmem:[#allocation5 + $0xf8] ss:$12 sps:$4 sm:$0xff]  }
 0x3b3   :  { %14577 = vpow2.f32 %v11023_v17  ;;  %v13497_v11 = vld [vmem:[#allocation5 + $0x10c] ss:$12 sps:$4 sm:$0xff]   ;;  %v13495_v17 = vld [vmem:[#allocation5 + $0x108] ss:$12 sps:$4 sm:$0xff]   ;;  %v13498_v21 = vld [vmem:[#allocation5 + $0x110] ss:$12 sps:$4 sm:$0xff]  }
 0x3b4   :  { %14579 = vpow2.f32 %v11024_v32  ;;  %v13501_v3 = vld [vmem:[#allocation5 + $0x124] ss:$12 sps:$4 sm:$0xff]  }
 0x3b5   :  { %v13503_v32 = vld [vmem:[#allocation5 + $0x138] ss:$12 sps:$4 sm:$0xff]  }
 0x3b9   :  { %v14574_v58 = vpop.eup %14573 }
 0x3ba   :  { %v1725_v23 = vsub.f32 %v15157_v15, %v14574_v58  ;;  %v14576_v25 = vpop.eup %14575 }
 0x3bc   :  { %v1726_v33 = vmul.f32 %v14576_v25, %v1725_v23  ;;  %v13502_v23 = vld [vmem:[#allocation5 + $0x128] ss:$12 sps:$4 sm:$0xff]  }
 0x3bd   :  { %v14578_v36 = vpop.eup %14577  ;;  %v13505_v25 = vld [vmem:[#allocation5 + $0x13c] ss:$12 sps:$4 sm:$0xff]  }
 0x3be   :  { %v1978_v38 = vadd.f32 1.0, %v14578_v36  ;;  %v15211_v39 = vadd.f32 %v14574_v58, %v1726_v33  ;;  %v14580_v43 = vpop.eup %14579  ;;  %v13499_v58 = vld [vmem:[#allocation5 + $0x120] ss:$12 sps:$4 sm:$0xff]  }
 0x3bf   :  { %v1979_v46 = vadd.f32 1.0, %v14580_v43  ;;  %v13506_v33 = vld [vmem:[#allocation5 + $0x140] ss:$12 sps:$4 sm:$0xff]   ;;  %v13510_v43 = vld [vmem:[#allocation5 + $0x158] ss:$12 sps:$4 sm:$0xff]  }
 0x3c0   :  { %14581 = vrcp.f32 %v1978_v38  ;;  %v13509_v36 = vld [vmem:[#allocation5 + $0x154] ss:$12 sps:$4 sm:$0xff]   ;;  %v13507_v38 = vld [vmem:[#allocation5 + $0x150] ss:$12 sps:$4 sm:$0xff]  }
 0x3ca   :  { %v14582_v40 = vpop.eup %14581 }
 0x3cb   :  { %v1985_v45 = vmul.f32 %v14582_v40, %v1984_v28  ;;  %v13513_v28 = vld [vmem:[#allocation5 + $0x16c] ss:$12 sps:$4 sm:$0xff]   ;;  %v13511_v40 = vld [vmem:[#allocation5 + $0x168] ss:$12 sps:$4 sm:$0xff]  }
 0x3cd   :  { %v1986_v15 = vadd.f32 %v1985_v45, %v15062_v18  ;;  %v13487_v18 = vld [vmem:[#allocation5 + $0xd8] ss:$12 sps:$4 sm:$0xff]   ;;  %v13514_v45 = vld [vmem:[#allocation5 + $0x170] ss:$12 sps:$4 sm:$0xff]  }
 0x3cf   :  { %14583 = vtanh.f32 %v1986_v15  ;;  %v13517_v15 = vld [vmem:[#allocation3 + $0x184] ss:$12 sps:$4 sm:$0xff]  }
 0x3d0   :  { %14585 = vrcp.f32 %v1979_v46  ;;  %v13515_v46 = vld [vmem:[#allocation3 + $0x180] ss:$12 sps:$4 sm:$0xff]  }
 0x3d9   :  { %v14584_v30 = vpop.eup %14583 }
 0x3da   :  { %v1988_v47 = vsub.f32 %v15078_v62, %v14584_v30  ;;  %v14586_v44 = vpop.eup %14585  ;;  %v13493_v62 = vld [vmem:[#allocation5 + $0xf4] ss:$12 sps:$4 sm:$0xff]  }
 0x3dc   :  { %v1989_v49 = vmul.f32 %v14586_v44, %v1988_v47  ;;  %v13521_v47 = vld [vmem:[#allocation3 + $0x19c] ss:$12 sps:$4 sm:$0xff]   ;;  %v13519_v44 = vld [vmem:[#allocation3 + $0x198] ss:$12 sps:$4 sm:$0xff]  }
 0x3de   :  { %v15221_v53 = vadd.f32 %v14584_v30, %v1989_v49  ;;  %v13518_v30 = vld [vmem:[#allocation3 + $0x188] ss:$12 sps:$4 sm:$0xff]   ;;  %v13522_v49 = vld [vmem:[#allocation3 + $0x1a0] ss:$12 sps:$4 sm:$0xff]  }
 0x3e0   :  { %v15225_v10 = vpack.c.bf16 %v15221_v53, %v15221_v53 }
 0x3e2   :  { %2185 = vmatmul.mubr.bf16.vlgmr.msra.gmra.mrb[16].mxu0 %v15225_v10  ;;  %12437 = vmatmul.mubr.bf16.vlgmr.msra.gmra.mrb[48].mxu1 %v15225_v10 }
 0x3e3   :  { %2394 = vmatpush1.bf16.msra.mxu0 %v13483_v55  ;;  %12441 = vmatpush3.bf16.msra.mxu1 %v13486_v8  ;;  %v13523_v55 = vld [vmem:[#allocation3 + $0x1b0] ss:$12 sps:$4 sm:$0xff]   ;;  %v13526_v8 = vld [vmem:[#allocation3 + $0x1b8] ss:$12 sps:$4 sm:$0xff]  }
 0x3e4   :  { %2395 = vmatprep.subr.bf16.mxu0 %v13489_v60  ;;  %12442 = vmatprep.subr.bf16.mxu1 %v14883_v56  ;;  %v13529_v60 = vld [vmem:[#allocation3 + $0x1cc] ss:$12 sps:$4 sm:$0xff]  }
 0x3e5   :  { %2425 = vmatprep.mubr.bf16.mxu0 %v14882_v0  ;;  %12456 = vmatprep.mubr.msk.bf16.mxu1 %vm14884_vm0, %v14883_v56 }
 0x3e7   :  { %2396 = vmatpush1.bf16.msra.mxu0 %v13487_v18  ;;  %12443 = vmatpush3.bf16.msra.mxu1 %v13490_v14  ;;  %v13527_v18 = vld [vmem:[#allocation3 + $0x1c8] ss:$12 sps:$4 sm:$0xff]   ;;  %v13530_v14 = vld [vmem:[#allocation3 + $0x1d0] ss:$12 sps:$4 sm:$0xff]  }
 0x3e8   :  { %2397 = vmatprep.subr.bf16.mxu0 %v13493_v62  ;;  %12444 = vmatprep.subr.bf16.mxu1 %v14883_v56  ;;  %v13531_v62 = vld [vmem:[#allocation3 + $0x1e0] ss:$12 sps:$4 sm:$0xff]  }
 0x3eb   :  { %2398 = vmatpush1.bf16.msra.mxu0 %v13491_v19  ;;  %12445 = vmatpush3.bf16.msra.mxu1 %v13494_v4  ;;  %v13533_v19 = vld [vmem:[#allocation3 + $0x1e4] ss:$12 sps:$4 sm:$0xff]   ;;  %v13534_v4 = vld [vmem:[#allocation3 + $0x1e8] ss:$12 sps:$4 sm:$0xff]  }
 0x3ec   :  { %2399 = vmatprep.subr.bf16.mxu0 %v13497_v11  ;;  %12446 = vmatprep.subr.bf16.mxu1 %v14883_v56  ;;  %v13537_v11 = vld [vmem:[#allocation3 + $0x1fc] ss:$12 sps:$4 sm:$0xff]  }
 0x3ef   :  { %2400 = vmatpush1.bf16.msra.mxu0 %v13495_v17  ;;  %12447 = vmatpush3.bf16.msra.mxu1 %v13498_v21  ;;  %v13535_v17 = vld [vmem:[#allocation3 + $0x1f8] ss:$12 sps:$4 sm:$0xff]   ;;  %v13538_v21 = vld [vmem:[#allocation3 + $0x200] ss:$12 sps:$4 sm:$0xff]  }
 0x3f0   :  { %2401 = vmatprep.subr.bf16.mxu0 %v13501_v3  ;;  %12448 = vmatprep.subr.bf16.mxu1 %v14883_v56  ;;  %v13541_v3 = vld [vmem:[#allocation3 + $0x214] ss:$12 sps:$4 sm:$0xff]  }
 0x3f3   :  { %2402 = vmatpush1.bf16.msra.mxu0 %v13499_v58  ;;  %12449 = vmatpush3.bf16.msra.mxu1 %v13502_v23  ;;  %v13539_v58 = vld [vmem:[#allocation3 + $0x210] ss:$12 sps:$4 sm:$0xff]   ;;  %v13542_v23 = vld [vmem:[#allocation3 + $0x218] ss:$12 sps:$4 sm:$0xff]  }
 0x3f4   :  { %2403 = vmatprep.subr.bf16.mxu0 %v13505_v25  ;;  %12450 = vmatprep.subr.bf16.mxu1 %v14883_v56  ;;  %v13545_v25 = vld [vmem:[#allocation3 + $0x22c] ss:$12 sps:$4 sm:$0xff]  }
 0x3f7   :  { %2404 = vmatpush1.bf16.msra.mxu0 %v13503_v32  ;;  %12451 = vmatpush3.bf16.msra.mxu1 %v13506_v33  ;;  %v13543_v32 = vld [vmem:[#allocation3 + $0x228] ss:$12 sps:$4 sm:$0xff]   ;;  %v13546_v33 = vld [vmem:[#allocation3 + $0x230] ss:$12 sps:$4 sm:$0xff]  }
 0x3f8   :  { %2405 = vmatprep.subr.bf16.mxu0 %v13509_v36  ;;  %12452 = vmatprep.subr.bf16.mxu1 %v14883_v56  ;;  %v13549_v36 = vld [vmem:[#allocation5 + $0x184] ss:$12 sps:$4 sm:$0xff]  }
 0x3fb   :  { %2406 = vmatpush1.bf16.msra.mxu0 %v13507_v38  ;;  %12453 = vmatpush3.bf16.msra.mxu1 %v13510_v43 }
 0x3fc   :  { %2407 = vmatprep.subr.bf16.mxu0 %v13513_v28  ;;  %12454 = vmatprep.subr.bf16.mxu1 %v14883_v56 }
 0x3ff   :  { %2408 = vmatpush1.bf16.msra.mxu0 %v13511_v40  ;;  %12455 = vmatpush3.bf16.msra.mxu1 %v13514_v45 }
 0x400   :  { %12460 = vmatprep.subr.bf16.mxu1 %v14883_v56  ;;  %2656 = vmatprep.subr.bf16.mxu0 %v13517_v15 }
 0x402   :  { %2426 = vmatmul.mubr.bf16.vlgmr.msra.gmra.mrb[16].mxu0 %v15141_v34  ;;  %12457 = vmatmul.mubr.bf16.vlgmr.msra.gmra.mrb[52].mxu1 %v15141_v34  ;;  %v13525_v34 = vld [vmem:[#allocation3 + $0x1b4] ss:$12 sps:$4 sm:$0xff]  }
 0x403   :  { %2688 = vmatprep.mubr.bf16.mxu0 %v14882_v0  ;;  %12476 = vmatprep.mubr.msk.bf16.mxu1 %vm14884_vm0, %v14883_v56 }
 0x404   :  { %2657 = vmatpush1.bf16.msra.mxu0 %v13515_v46  ;;  %12461 = vmatpush3.bf16.msra.mxu1 %v13518_v30 }
 0x405   :  { %12462 = vmatprep.subr.bf16.mxu1 %v14883_v56  ;;  %2658 = vmatprep.subr.bf16.mxu0 %v13521_v47 }
 0x408   :  { %2659 = vmatpush1.bf16.msra.mxu0 %v13519_v44  ;;  %12463 = vmatpush3.bf16.msra.mxu1 %v13522_v49 }
 0x409   :  { %12464 = vmatprep.subr.bf16.mxu1 %v14883_v56  ;;  %2660 = vmatprep.subr.bf16.mxu0 %v13525_v34 }
 0x40c   :  { %2661 = vmatpush1.bf16.msra.mxu0 %v13523_v55  ;;  %12465 = vmatpush3.bf16.msra.mxu1 %v13526_v8 }
 0x40d   :  { %12466 = vmatprep.subr.bf16.mxu1 %v14883_v56  ;;  %2662 = vmatprep.subr.bf16.mxu0 %v13529_v60 }
 0x410   :  { %2663 = vmatpush1.bf16.msra.mxu0 %v13527_v18  ;;  %12467 = vmatpush3.bf16.msra.mxu1 %v13530_v14 }
 0x411   :  { %12468 = vmatprep.subr.bf16.mxu1 %v14883_v56  ;;  %2664 = vmatprep.subr.bf16.mxu0 %v13533_v19 }
 0x414   :  { %2665 = vmatpush1.bf16.msra.mxu0 %v13531_v62  ;;  %12469 = vmatpush3.bf16.msra.mxu1 %v13534_v4 }
 0x415   :  { %2666 = vmatprep.subr.bf16.mxu0 %v13537_v11  ;;  %12470 = vmatprep.subr.bf16.mxu1 %v14883_v56 }
 0x418   :  { %2667 = vmatpush1.bf16.msra.mxu0 %v13535_v17  ;;  %12471 = vmatpush3.bf16.msra.mxu1 %v13538_v21 }
 0x419   :  { %2668 = vmatprep.subr.bf16.mxu0 %v13541_v3  ;;  %12472 = vmatprep.subr.bf16.mxu1 %v14883_v56 }
 0x41c   :  { %2669 = vmatpush1.bf16.msra.mxu0 %v13539_v58  ;;  %12473 = vmatpush3.bf16.msra.mxu1 %v13542_v23 }
 0x41d   :  { %2670 = vmatprep.subr.bf16.mxu0 %v13545_v25  ;;  %12474 = vmatprep.subr.bf16.mxu1 %v14883_v56 }
 0x420   :  { %2671 = vmatpush1.bf16.msra.mxu0 %v13543_v32  ;;  %12475 = vmatpush3.bf16.msra.mxu1 %v13546_v33 }
 0x421   :  { %2898 = vmatprep.subr.bf16.mxu0 %v13549_v36  ;;  %12480 = vmatprep.subr.bf16.mxu1 %v14883_v56 }
 0x4b5   :  { %v2227_v38 = vpop.f32.mrb[48].mxu1 }
 0x4b6   :  { %v12438_v43 = vpop.f32.mrb[49].mxu1  ;;  %v2228_v17 = vadd.f32 %v2227_v38, %v15132_v6  ;;  %v13551_v38 = vld [vmem:[#allocation5 + $0x198] ss:$12 sps:$4 sm:$0xff]  }
 0x4b7   :  { %v2230_v28 = vpop.f32.mrb[50].mxu1  ;;  %v13547_v43 = vld [vmem:[#allocation5 + $0x180] ss:$12 sps:$4 sm:$0xff]  }
 0x4b8   :  { %v12439_v40 = vpop.f32.mrb[51].mxu1  ;;  %v13550_v28 = vld [vmem:[#allocation5 + $0x188] ss:$12 sps:$4 sm:$0xff]  }
 0x4b9   :  { %v13553_v40 = vld [vmem:[#allocation5 + $0x19c] ss:$12 sps:$4 sm:$0xff]  }
 0x4d5   :  { %v2427_v45 = vpop.f32.mrb[16].mxu0  ;;  %v2468_v15 = vpop.f32.mrb[52].mxu1 }
 0x4d6   :  { %v13128_v46 = vadd.f32 %v2427_v45, %v15119_v35  ;;  %v2429_v30 = vpop.f32.mrb[17].mxu0  ;;  %v12458_v47 = vpop.f32.mrb[53].mxu1  ;;  %v2488_v4 = vadd.f32 %v15129_v1, %v2468_v15  ;;  %v13554_v45 = vld [vmem:[#allocation5 + $0x1a0] ss:$12 sps:$4 sm:$0xff]   ;;  %v13555_v15 = vld [vmem:[#allocation5 + $0x1b0] ss:$12 sps:$4 sm:$0xff]  }
 0x4d7   :  { %v2431_v44 = vpop.f32.mrb[18].mxu0  ;;  %v2471_v49 = vpop.f32.mrb[54].mxu1  ;;  %v13129_v60 = vadd.f32 %v2429_v30, %v15123_v51  ;;  %v13561_v30 = vld [vmem:[#allocation5 + $0x1cc] ss:$12 sps:$4 sm:$0xff]   ;;  %v13559_v47 = vld [vmem:[#allocation5 + $0x1c8] ss:$12 sps:$4 sm:$0xff]  }
 0x4d8   :  { %v11073_v34 = vmul.f32 -1.442695, %v13128_v46  ;;  %v2432_v55 = vpop.f32.mrb[19].mxu0  ;;  %v12459_v8 = vpop.f32.mrb[55].mxu1  ;;  %v13558_v46 = vld [vmem:[#allocation5 + $0x1b8] ss:$12 sps:$4 sm:$0xff]  }
 0x4d9   :  { %v11074_v18 = vmul.f32 -1.442695, %v13129_v60  ;;  %v13562_v44 = vld [vmem:[#allocation5 + $0x1d0] ss:$12 sps:$4 sm:$0xff]   ;;  %v13566_v55 = vld [vmem:[#allocation5 + $0x1e8] ss:$12 sps:$4 sm:$0xff]  }
 0x4da   :  { %14587 = vpow2.f32 %v11073_v34  ;;  %v13565_v49 = vld [vmem:[#allocation5 + $0x1e4] ss:$12 sps:$4 sm:$0xff]   ;;  %v13563_v34 = vld [vmem:[#allocation5 + $0x1e0] ss:$12 sps:$4 sm:$0xff]   ;;  %v13569_v8 = vld [vmem:[#allocation5 + $0x1fc] ss:$12 sps:$4 sm:$0xff]  }
 0x4db   :  { %14589 = vpow2.f32 %v11074_v18  ;;  %v13567_v60 = vld [vmem:[#allocation5 + $0x1f8] ss:$12 sps:$4 sm:$0xff]   ;;  %v13570_v18 = vld [vmem:[#allocation5 + $0x200] ss:$12 sps:$4 sm:$0xff]  }
 0x4e4   :  { %v14588_v14 = vpop.eup %14587 }
 0x4e5   :  { %v2482_v62 = vadd.f32 1.0, %v14588_v14  ;;  %v14590_v19 = vpop.eup %14589  ;;  %v13573_v14 = vld [vmem:[#allocation5 + $0x214] ss:$12 sps:$4 sm:$0xff]  }
 0x4e6   :  { %v2483_v58 = vadd.f32 1.0, %v14590_v19  ;;  %v13574_v19 = vld [vmem:[#allocation5 + $0x218] ss:$12 sps:$4 sm:$0xff]  }
 0x4e7   :  { %14591 = vrcp.f32 %v2482_v62  ;;  %v13571_v62 = vld [vmem:[#allocation5 + $0x210] ss:$12 sps:$4 sm:$0xff]  }
 0x4f1   :  { %v14592_v11 = vpop.eup %14591 }
 0x4f2   :  { %v2489_v21 = vmul.f32 %v14592_v11, %v2488_v4  ;;  %v13577_v4 = vld [vmem:[#allocation5 + $0x22c] ss:$12 sps:$4 sm:$0xff]   ;;  %v13575_v11 = vld [vmem:[#allocation5 + $0x228] ss:$12 sps:$4 sm:$0xff]  }
 0x4f4   :  { %v2490_v3 = vadd.f32 %v2489_v21, %v2228_v17  ;;  %v13578_v17 = vld [vmem:[#allocation5 + $0x230] ss:$12 sps:$4 sm:$0xff]  }
 0x4f5   :  { %v13581_v21 = vld [vmem:[#allocation5 + $0x4] ss:$12 sps:$4 sm:$0xff]  }
 0x4f6   :  { %14593 = vtanh.f32 %v2490_v3  ;;  %v13579_v3 = vld [vmem:[#allocation5] ss:$12 sps:$4 sm:$0xff]  }
 0x4f7   :  { %14595 = vrcp.f32 %v2483_v58  ;;  %v13582_v58 = vld [vmem:[#allocation5 + $0x8] ss:$12 sps:$4 sm:$0xff]  }
 0x500   :  { %v14594_v23 = vpop.eup %14593 }
 0x501   :  { %v2492_v25 = vsub.f32 %v15137_v31, %v14594_v23  ;;  %v14596_v32 = vpop.eup %14595  ;;  %v13557_v31 = vld [vmem:[#allocation5 + $0x1b4] ss:$12 sps:$4 sm:$0xff]  }
 0x503   :  { %v2493_v33 = vmul.f32 %v14596_v32, %v2492_v25  ;;  %v13585_v25 = vld [vmem:[#allocation5 + $0x1c] ss:$12 sps:$4 sm:$0xff]   ;;  %v13583_v32 = vld [vmem:[#allocation5 + $0x18] ss:$12 sps:$4 sm:$0xff]  }
 0x505   :  { %v15258_v36 = vadd.f32 %v14594_v23, %v2493_v33  ;;  %v2737_v23 = vpack.c.bf16 %v15211_v39, %v15211_v39  ;;  %v13586_v33 = vld [vmem:[#allocation5 + $0x20] ss:$12 sps:$4 sm:$0xff]  }
 0x507   :  { %v15262_v1 = vpack.c.bf16 %v15258_v36, %v15258_v36 }
 0x509   :  { %2689 = vmatmul.mubr.bf16.vlgmr.msra.gmra.mrb[20].mxu0 %v15262_v1  ;;  %12477 = vmatmul.mubr.bf16.vlgmr.msra.gmra.mrb[56].mxu1 %v15262_v1 }
 0x50a   :  { %2899 = vmatpush1.bf16.msra.mxu0 %v13547_v43  ;;  %12481 = vmatpush3.bf16.msra.mxu1 %v13550_v28  ;;  %v13589_v43 = vld [vmem:[#allocation5 + $0x34] ss:$12 sps:$4 sm:$0xff]   ;;  %v13587_v28 = vld [vmem:[#allocation5 + $0x30] ss:$12 sps:$4 sm:$0xff]  }
 0x50b   :  { %2900 = vmatprep.subr.bf16.mxu0 %v13553_v40  ;;  %12482 = vmatprep.subr.bf16.mxu1 %v14883_v56  ;;  %v13590_v40 = vld [vmem:[#allocation5 + $0x38] ss:$12 sps:$4 sm:$0xff]  }
 0x50c   :  { %2930 = vmatprep.mubr.bf16.mxu0 %v14882_v0  ;;  %12496 = vmatprep.mubr.msk.bf16.mxu1 %vm14884_vm0, %v14883_v56 }
 0x50e   :  { %2901 = vmatpush1.bf16.msra.mxu0 %v13551_v38  ;;  %12483 = vmatpush3.bf16.msra.mxu1 %v13554_v45  ;;  %v13593_v38 = vld [vmem:[#allocation5 + $0x4c] ss:$12 sps:$4 sm:$0xff]   ;;  %v13591_v45 = vld [vmem:[#allocation5 + $0x48] ss:$12 sps:$4 sm:$0xff]  }
 0x50f   :  { %2902 = vmatprep.subr.bf16.mxu0 %v13557_v31  ;;  %12484 = vmatprep.subr.bf16.mxu1 %v14883_v56  ;;  %v13594_v31 = vld [vmem:[#allocation5 + $0x50] ss:$12 sps:$4 sm:$0xff]  }
 0x512   :  { %2903 = vmatpush1.bf16.msra.mxu0 %v13555_v15  ;;  %12485 = vmatpush3.bf16.msra.mxu1 %v13558_v46  ;;  %v13597_v15 = vld [vmem:[#allocation5 + $0x64] ss:$12 sps:$4 sm:$0xff]   ;;  %v13595_v46 = vld [vmem:[#allocation5 + $0x60] ss:$12 sps:$4 sm:$0xff]  }
 0x513   :  { %2904 = vmatprep.subr.bf16.mxu0 %v13561_v30  ;;  %12486 = vmatprep.subr.bf16.mxu1 %v14883_v56  ;;  %v13598_v30 = vld [vmem:[#allocation5 + $0x68] ss:$12 sps:$4 sm:$0xff]  }
 0x516   :  { %2905 = vmatpush1.bf16.msra.mxu0 %v13559_v47  ;;  %12487 = vmatpush3.bf16.msra.mxu1 %v13562_v44  ;;  %v13601_v47 = vld [vmem:[#allocation5 + $0x7c] ss:$12 sps:$4 sm:$0xff]   ;;  %v13599_v44 = vld [vmem:[#allocation5 + $0x78] ss:$12 sps:$4 sm:$0xff]  }
 0x517   :  { %2906 = vmatprep.subr.bf16.mxu0 %v13565_v49  ;;  %12488 = vmatprep.subr.bf16.mxu1 %v14883_v56  ;;  %v13602_v49 = vld [vmem:[#allocation5 + $0x80] ss:$12 sps:$4 sm:$0xff]  }
 0x51a   :  { %2907 = vmatpush1.bf16.msra.mxu0 %v13563_v34  ;;  %12489 = vmatpush3.bf16.msra.mxu1 %v13566_v55  ;;  %v13605_v34 = vld [vmem:[#allocation5 + $0x94] ss:$12 sps:$4 sm:$0xff]   ;;  %v13603_v55 = vld [vmem:[#allocation5 + $0x90] ss:$12 sps:$4 sm:$0xff]  }
 0x51b   :  { %2908 = vmatprep.subr.bf16.mxu0 %v13569_v8  ;;  %12490 = vmatprep.subr.bf16.mxu1 %v14883_v56  ;;  %v13606_v8 = vld [vmem:[#allocation5 + $0x98] ss:$12 sps:$4 sm:$0xff]  }
 0x51e   :  { %2909 = vmatpush1.bf16.msra.mxu0 %v13567_v60  ;;  %12491 = vmatpush3.bf16.msra.mxu1 %v13570_v18  ;;  %v13609_v60 = vld [vmem:[#allocation5 + $0xac] ss:$12 sps:$4 sm:$0xff]   ;;  %v13607_v18 = vld [vmem:[#allocation5 + $0xa8] ss:$12 sps:$4 sm:$0xff]  }
 0x51f   :  { %2910 = vmatprep.subr.bf16.mxu0 %v13573_v14  ;;  %12492 = vmatprep.subr.bf16.mxu1 %v14883_v56  ;;  %v13610_v14 = vld [vmem:[#allocation5 + $0xb0] ss:$12 sps:$4 sm:$0xff]  }
 0x522   :  { %2911 = vmatpush1.bf16.msra.mxu0 %v13571_v62  ;;  %12493 = vmatpush3.bf16.msra.mxu1 %v13574_v19  ;;  %v13613_v62 = vld [vmem:[#allocation3 + $0xc4] ss:$12 sps:$4 sm:$0xff]   ;;  %v13611_v19 = vld [vmem:[#allocation3 + $0xc0] ss:$12 sps:$4 sm:$0xff]  }
 0x523   :  { %2912 = vmatprep.subr.bf16.mxu0 %v13577_v4  ;;  %12494 = vmatprep.subr.bf16.mxu1 %v14883_v56  ;;  %v13614_v4 = vld [vmem:[#allocation3 + $0xc8] ss:$12 sps:$4 sm:$0xff]  }
 0x526   :  { %2913 = vmatpush1.bf16.msra.mxu0 %v13575_v11  ;;  %12495 = vmatpush3.bf16.msra.mxu1 %v13578_v17  ;;  %v13617_v11 = vld [vmem:[#allocation3 + $0xdc] ss:$12 sps:$4 sm:$0xff]   ;;  %v13615_v17 = vld [vmem:[#allocation3 + $0xd8] ss:$12 sps:$4 sm:$0xff]  }
 0x527   :  { %3161 = vmatprep.subr.bf16.mxu0 %v13581_v21  ;;  %12500 = vmatprep.subr.bf16.mxu1 %v14883_v56  ;;  %v13618_v21 = vld [vmem:[#allocation3 + $0xe0] ss:$12 sps:$4 sm:$0xff]  }
 0x529   :  { %2931 = vmatmul.mubr.bf16.vlgmr.msra.gmra.mrb[20].mxu0 %v2737_v23  ;;  %12497 = vmatmul.mubr.bf16.vlgmr.msra.gmra.mrb[60].mxu1 %v2737_v23  ;;  %v13625_v23 = vld [vmem:[#allocation3 + $0x10c] ss:$12 sps:$4 sm:$0xff]  }
 0x52a   :  { %3162 = vmatpush1.bf16.msra.mxu0 %v13579_v3  ;;  %12501 = vmatpush3.bf16.msra.mxu1 %v13582_v58  ;;  %v13619_v3 = vld [vmem:[#allocation3 + $0xf0] ss:$12 sps:$4 sm:$0xff]   ;;  %v13622_v58 = vld [vmem:[#allocation3 + $0xf8] ss:$12 sps:$4 sm:$0xff]  }
 0x52b   :  { %3163 = vmatprep.subr.bf16.mxu0 %v13585_v25  ;;  %12502 = vmatprep.subr.bf16.mxu1 %v14883_v56  ;;  %v13623_v25 = vld [vmem:[#allocation3 + $0x108] ss:$12 sps:$4 sm:$0xff]  }
 0x52c   :  { %3193 = vmatprep.mubr.bf16.mxu0 %v14882_v0  ;;  %12516 = vmatprep.mubr.msk.bf16.mxu1 %vm14884_vm0, %v14883_v56 }
 0x52e   :  { %3164 = vmatpush1.bf16.msra.mxu0 %v13583_v32  ;;  %12503 = vmatpush3.bf16.msra.mxu1 %v13586_v33  ;;  %v13626_v32 = vld [vmem:[#allocation3 + $0x110] ss:$12 sps:$4 sm:$0xff]   ;;  %v13627_v33 = vld [vmem:[#allocation3 + $0x120] ss:$12 sps:$4 sm:$0xff]  }
 0x52f   :  { %3165 = vmatprep.subr.bf16.mxu0 %v13589_v43  ;;  %12504 = vmatprep.subr.bf16.mxu1 %v14883_v56  ;;  %v13629_v43 = vld [vmem:[#allocation3 + $0x124] ss:$12 sps:$4 sm:$0xff]  }
 0x532   :  { %3166 = vmatpush1.bf16.msra.mxu0 %v13587_v28  ;;  %12505 = vmatpush3.bf16.msra.mxu1 %v13590_v40  ;;  %v13630_v28 = vld [vmem:[#allocation3 + $0x128] ss:$12 sps:$4 sm:$0xff]  }
 0x533   :  { %3167 = vmatprep.subr.bf16.mxu0 %v13593_v38  ;;  %12506 = vmatprep.subr.bf16.mxu1 %v14883_v56  ;;  %v13633_v40 = vld [vmem:[#allocation3 + $0x13c] ss:$12 sps:$4 sm:$0xff]   ;;  %v13631_v38 = vld [vmem:[#allocation3 + $0x138] ss:$12 sps:$4 sm:$0xff]  }
 0x536   :  { %3168 = vmatpush1.bf16.msra.mxu0 %v13591_v45  ;;  %12507 = vmatpush3.bf16.msra.mxu1 %v13594_v31  ;;  %v13634_v45 = vld [vmem:[#allocation3 + $0x140] ss:$12 sps:$4 sm:$0xff]  }
 0x537   :  { %3169 = vmatprep.subr.bf16.mxu0 %v13597_v15  ;;  %12508 = vmatprep.subr.bf16.mxu1 %v14883_v56  ;;  %v13637_v31 = vld [vmem:[#allocation3 + $0x154] ss:$12 sps:$4 sm:$0xff]   ;;  %v13635_v15 = vld [vmem:[#allocation3 + $0x150] ss:$12 sps:$4 sm:$0xff]  }
 0x53a   :  { %3170 = vmatpush1.bf16.msra.mxu0 %v13595_v46  ;;  %12509 = vmatpush3.bf16.msra.mxu1 %v13598_v30  ;;  %v13638_v46 = vld [vmem:[#allocation3 + $0x158] ss:$12 sps:$4 sm:$0xff]  }
 0x53b   :  { %3171 = vmatprep.subr.bf16.mxu0 %v13601_v47  ;;  %12510 = vmatprep.subr.bf16.mxu1 %v14883_v56  ;;  %v13641_v30 = vld [vmem:[#allocation3 + $0x16c] ss:$12 sps:$4 sm:$0xff]   ;;  %v13639_v47 = vld [vmem:[#allocation3 + $0x168] ss:$12 sps:$4 sm:$0xff]  }
 0x53e   :  { %3172 = vmatpush1.bf16.msra.mxu0 %v13599_v44  ;;  %12511 = vmatpush3.bf16.msra.mxu1 %v13602_v49  ;;  %v13642_v44 = vld [vmem:[#allocation3 + $0x170] ss:$12 sps:$4 sm:$0xff]  }
 0x53f   :  { %3173 = vmatprep.subr.bf16.mxu0 %v13605_v34  ;;  %12512 = vmatprep.subr.bf16.mxu1 %v14883_v56  ;;  %v13645_v49 = vld [vmem:[#allocation5 + $0xc4] ss:$12 sps:$4 sm:$0xff]  }
 0x542   :  { %3174 = vmatpush1.bf16.msra.mxu0 %v13603_v55  ;;  %12513 = vmatpush3.bf16.msra.mxu1 %v13606_v8 }
 0x543   :  { %3175 = vmatprep.subr.bf16.mxu0 %v13609_v60  ;;  %12514 = vmatprep.subr.bf16.mxu1 %v14883_v56 }
 0x546   :  { %3176 = vmatpush1.bf16.msra.mxu0 %v13607_v18  ;;  %12515 = vmatpush3.bf16.msra.mxu1 %v13610_v14 }
 0x547   :  { %12520 = vmatprep.subr.bf16.mxu1 %v14883_v56  ;;  %3424 = vmatprep.subr.bf16.mxu0 %v13613_v62 }
 0x549   :  { %3194 = vmatmul.mubr.bf16.vlgmr.msra.gmra.mrb[24].mxu0 %v15225_v10  ;;  %12517 = vmatmul.mubr.bf16.vlgmr.msra.gmra.mrb[64].mxu1 %v15225_v10  ;;  %v13621_v10 = vld [vmem:[#allocation3 + $0xf4] ss:$12 sps:$4 sm:$0xff]  }
 0x54a   :  { %3456 = vmatprep.mubr.bf16.mxu0 %v14882_v0  ;;  %12536 = vmatprep.mubr.msk.bf16.mxu1 %vm14884_vm0, %v14883_v56 }
 0x54b   :  { %3425 = vmatpush1.bf16.msra.mxu0 %v13611_v19  ;;  %12521 = vmatpush3.bf16.msra.mxu1 %v13614_v4 }
 0x54c   :  { %12522 = vmatprep.subr.bf16.mxu1 %v14883_v56  ;;  %3426 = vmatprep.subr.bf16.mxu0 %v13617_v11 }
 0x54f   :  { %3427 = vmatpush1.bf16.msra.mxu0 %v13615_v17  ;;  %12523 = vmatpush3.bf16.msra.mxu1 %v13618_v21 }
 0x550   :  { %12524 = vmatprep.subr.bf16.mxu1 %v14883_v56  ;;  %3428 = vmatprep.subr.bf16.mxu0 %v13621_v10 }
 0x553   :  { %3429 = vmatpush1.bf16.msra.mxu0 %v13619_v3  ;;  %12525 = vmatpush3.bf16.msra.mxu1 %v13622_v58 }
 0x554   :  { %12526 = vmatprep.subr.bf16.mxu1 %v14883_v56  ;;  %3430 = vmatprep.subr.bf16.mxu0 %v13625_v23 }
 0x557   :  { %3431 = vmatpush1.bf16.msra.mxu0 %v13623_v25  ;;  %12527 = vmatpush3.bf16.msra.mxu1 %v13626_v32 }
 0x558   :  { %12528 = vmatprep.subr.bf16.mxu1 %v14883_v56  ;;  %3432 = vmatprep.subr.bf16.mxu0 %v13629_v43 }
 0x55b   :  { %3433 = vmatpush1.bf16.msra.mxu0 %v13627_v33  ;;  %12529 = vmatpush3.bf16.msra.mxu1 %v13630_v28 }
 0x55c   :  { %3434 = vmatprep.subr.bf16.mxu0 %v13633_v40  ;;  %12530 = vmatprep.subr.bf16.mxu1 %v14883_v56 }
 0x55f   :  { %3435 = vmatpush1.bf16.msra.mxu0 %v13631_v38  ;;  %12531 = vmatpush3.bf16.msra.mxu1 %v13634_v45 }
 0x560   :  { %3436 = vmatprep.subr.bf16.mxu0 %v13637_v31  ;;  %12532 = vmatprep.subr.bf16.mxu1 %v14883_v56 }
 0x563   :  { %3437 = vmatpush1.bf16.msra.mxu0 %v13635_v15  ;;  %12533 = vmatpush3.bf16.msra.mxu1 %v13638_v46 }
 0x564   :  { %3438 = vmatprep.subr.bf16.mxu0 %v13641_v30  ;;  %12534 = vmatprep.subr.bf16.mxu1 %v14883_v56 }
 0x567   :  { %3439 = vmatpush1.bf16.msra.mxu0 %v13639_v47  ;;  %12535 = vmatpush3.bf16.msra.mxu1 %v13642_v44 }
 0x568   :  { %3665 = vmatprep.subr.bf16.mxu0 %v13645_v49  ;;  %12540 = vmatprep.subr.bf16.mxu1 %v14883_v56 }
 0x5dc   :  { %v2731_v34 = vpop.f32.mrb[56].mxu1 }
 0x5dd   :  { %v12478_v55 = vpop.f32.mrb[57].mxu1  ;;  %v2732_v40 = vadd.f32 %v2731_v34, %v15204_v42 }
 0x5de   :  { %v2734_v8 = vpop.f32.mrb[58].mxu1 }
 0x5df   :  { %v12479_v60 = vpop.f32.mrb[59].mxu1 }
 0x5fc   :  { %v2932_v18 = vpop.f32.mrb[20].mxu0  ;;  %v2973_v14 = vpop.f32.mrb[60].mxu1 }
 0x5fd   :  { %v13130_v62 = vadd.f32 %v2932_v18, %v15191_v12  ;;  %v2934_v19 = vpop.f32.mrb[21].mxu0  ;;  %v12498_v4 = vpop.f32.mrb[61].mxu1  ;;  %v2993_v43 = vadd.f32 %v15201_v41, %v2973_v14 }
 0x5fe   :  { %v2936_v11 = vpop.f32.mrb[22].mxu0  ;;  %v2976_v17 = vpop.f32.mrb[62].mxu1  ;;  %v13131_v58 = vadd.f32 %v2934_v19, %v15195_v29 }
 0x5ff   :  { %v11123_v21 = vmul.f32 -1.442695, %v13130_v62  ;;  %v2937_v10 = vpop.f32.mrb[23].mxu0  ;;  %v12499_v3 = vpop.f32.mrb[63].mxu1 }
 0x600   :  { %v11124_v23 = vmul.f32 -1.442695, %v13131_v58 }
 0x601   :  { %14597 = vpow2.f32 %v11123_v21 }
 0x602   :  { %14599 = vpow2.f32 %v11124_v23 }
 0x60b   :  { %v14598_v25 = vpop.eup %14597 }
 0x60c   :  { %v2987_v32 = vadd.f32 1.0, %v14598_v25  ;;  %v14600_v33 = vpop.eup %14599 }
 0x60d   :  { %v2988_v31 = vadd.f32 1.0, %v14600_v33 }
 0x60e   :  { %14601 = vrcp.f32 %v2987_v32 }
 0x618   :  { %v14602_v28 = vpop.eup %14601 }
 0x619   :  { %v2994_v38 = vmul.f32 %v14602_v28, %v2993_v43 }
 0x61b   :  { %v2995_v45 = vadd.f32 %v2994_v38, %v2732_v40  ;;  %v13643_v40 = vld [vmem:[#allocation5 + $0xc0] ss:$12 sps:$4 sm:$0xff]   ;;  %v13646_v38 = vld [vmem:[#allocation5 + $0xc8] ss:$12 sps:$4 sm:$0xff]  }
 0x61c   :  { %v3195_v15 = vpop.f32.mrb[24].mxu0  ;;  %v3236_v46 = vpop.f32.mrb[64].mxu1 }
 0x61d   :  { %14603 = vtanh.f32 %v2995_v45  ;;  %v3242_v30 = vadd.f32 %v3195_v15, %v15031_v48  ;;  %v3197_v47 = vpop.f32.mrb[25].mxu0  ;;  %v12518_v44 = vpop.f32.mrb[65].mxu1  ;;  %v3256_v21 = vadd.f32 %v15216_v37, %v3236_v46  ;;  %v13649_v37 = vld [vmem:[#allocation5 + $0xdc] ss:$12 sps:$4 sm:$0xff]   ;;  %v13654_v46 = vld [vmem:[#allocation5 + $0xf8] ss:$12 sps:$4 sm:$0xff]  }
 0x61e   :  { %v3243_v49 = vadd.f32 %v3197_v47, %v15033_v50  ;;  %v3199_v55 = vpop.f32.mrb[26].mxu0  ;;  %v3239_v8 = vpop.f32.mrb[66].mxu1  ;;  %14605 = vrcp.f32 %v2988_v31  ;;  %v13650_v31 = vld [vmem:[#allocation5 + $0xe0] ss:$12 sps:$4 sm:$0xff]   ;;  %v13651_v15 = vld [vmem:[#allocation5 + $0xf0] ss:$12 sps:$4 sm:$0xff]  }
 0x61f   :  { %v11149_v60 = vmul.f32 -1.442695, %v3242_v30  ;;  %v3200_v41 = vpop.f32.mrb[27].mxu0  ;;  %v12519_v18 = vpop.f32.mrb[67].mxu1  ;;  %v13657_v30 = vld [vmem:[#allocation5 + $0x10c] ss:$12 sps:$4 sm:$0xff]  }
 0x620   :  { %v11150_v19 = vmul.f32 -1.442695, %v3243_v49  ;;  %v13655_v47 = vld [vmem:[#allocation5 + $0x108] ss:$12 sps:$4 sm:$0xff]   ;;  %v13658_v44 = vld [vmem:[#allocation5 + $0x110] ss:$12 sps:$4 sm:$0xff]  }
 0x621   :  { %14607 = vpow2.f32 %v11149_v60  ;;  %v13661_v49 = vld [vmem:[#allocation5 + $0x124] ss:$12 sps:$4 sm:$0xff]   ;;  %v13659_v55 = vld [vmem:[#allocation5 + $0x120] ss:$12 sps:$4 sm:$0xff]   ;;  %v13662_v8 = vld [vmem:[#allocation5 + $0x128] ss:$12 sps:$4 sm:$0xff]  }
 0x622   :  { %14609 = vpow2.f32 %v11150_v19  ;;  %v13665_v60 = vld [vmem:[#allocation5 + $0x13c] ss:$12 sps:$4 sm:$0xff]   ;;  %v13663_v41 = vld [vmem:[#allocation5 + $0x138] ss:$12 sps:$4 sm:$0xff]   ;;  %v13666_v18 = vld [vmem:[#allocation5 + $0x140] ss:$12 sps:$4 sm:$0xff]  }
 0x623   :  { %v13673_v19 = vld [vmem:[#allocation5 + $0x16c] ss:$12 sps:$4 sm:$0xff]  }
 0x627   :  { %v14604_v34 = vpop.eup %14603 }
 0x628   :  { %v2997_v14 = vsub.f32 %v15211_v39, %v14604_v34  ;;  %v14606_v62 = vpop.eup %14605 }
 0x62a   :  { %v2998_v4 = vmul.f32 %v14606_v62, %v2997_v14  ;;  %v13667_v14 = vld [vmem:[#allocation5 + $0x150] ss:$12 sps:$4 sm:$0xff]   ;;  %v13670_v62 = vld [vmem:[#allocation5 + $0x158] ss:$12 sps:$4 sm:$0xff]  }
 0x62b   :  { %v14608_v11 = vpop.eup %14607 }
 0x62c   :  { %v3250_v17 = vadd.f32 1.0, %v14608_v11  ;;  %v15310_v48 = vadd.f32 %v14604_v34, %v2998_v4  ;;  %v14610_v50 = vpop.eup %14609  ;;  %v13669_v34 = vld [vmem:[#allocation5 + $0x154] ss:$12 sps:$4 sm:$0xff]   ;;  %v13674_v11 = vld [vmem:[#allocation5 + $0x170] ss:$12 sps:$4 sm:$0xff]  }
 0x62d   :  { %v3251_v23 = vadd.f32 1.0, %v14610_v50  ;;  %v13671_v4 = vld [vmem:[#allocation5 + $0x168] ss:$12 sps:$4 sm:$0xff]   ;;  %v13675_v50 = vld [vmem:[#allocation3 + $0x180] ss:$12 sps:$4 sm:$0xff]  }
 0x62e   :  { %14611 = vrcp.f32 %v3250_v17  ;;  %v13677_v17 = vld [vmem:[#allocation3 + $0x184] ss:$12 sps:$4 sm:$0xff]  }
 0x638   :  { %v14612_v10 = vpop.eup %14611 }
 0x639   :  { %v3257_v3 = vmul.f32 %v14612_v10, %v3256_v21  ;;  %v13678_v21 = vld [vmem:[#allocation3 + $0x188] ss:$12 sps:$4 sm:$0xff]  }
 0x63a   :  { %v13681_v10 = vld [vmem:[#allocation3 + $0x19c] ss:$12 sps:$4 sm:$0xff]  }
 0x63b   :  { %v3258_v58 = vadd.f32 %v3257_v3, %v15058_v13  ;;  %v13647_v13 = vld [vmem:[#allocation5 + $0xd8] ss:$12 sps:$4 sm:$0xff]  }
 0x63c   :  { %v13679_v3 = vld [vmem:[#allocation3 + $0x198] ss:$12 sps:$4 sm:$0xff]  }
 0x63d   :  { %14613 = vtanh.f32 %v3258_v58  ;;  %v13682_v58 = vld [vmem:[#allocation3 + $0x1a0] ss:$12 sps:$4 sm:$0xff]  }
 0x63e   :  { %14615 = vrcp.f32 %v3251_v23  ;;  %v13683_v23 = vld [vmem:[#allocation3 + $0x1b0] ss:$12 sps:$4 sm:$0xff]  }
 0x647   :  { %v14614_v25 = vpop.eup %14613 }
 0x648   :  { %v3260_v32 = vsub.f32 %v15221_v53, %v14614_v25  ;;  %v14616_v33 = vpop.eup %14615  ;;  %v13653_v53 = vld [vmem:[#allocation5 + $0xf4] ss:$12 sps:$4 sm:$0xff]  }
 0x64a   :  { %v3261_v43 = vmul.f32 %v14616_v33, %v3260_v32  ;;  %v13689_v32 = vld [vmem:[#allocation3 + $0x1cc] ss:$12 sps:$4 sm:$0xff]   ;;  %v13687_v33 = vld [vmem:[#allocation3 + $0x1c8] ss:$12 sps:$4 sm:$0xff]  }
 0x64c   :  { %v15315_v28 = vadd.f32 %v14614_v25, %v3261_v43  ;;  %v13686_v25 = vld [vmem:[#allocation3 + $0x1b8] ss:$12 sps:$4 sm:$0xff]   ;;  %v13690_v43 = vld [vmem:[#allocation3 + $0x1d0] ss:$12 sps:$4 sm:$0xff]  }
 0x64e   :  { %v15319_v45 = vpack.c.bf16 %v15315_v28, %v15315_v28 }
 0x650   :  { %3457 = vmatmul.mubr.bf16.vlgmr.msra.gmra.mrb[28].mxu0 %v15319_v45  ;;  %12537 = vmatmul.mubr.bf16.vlgmr.msra.gmra.mrb[68].mxu1 %v15319_v45 }
 0x651   :  { %3666 = vmatpush1.bf16.msra.mxu0 %v13643_v40  ;;  %12541 = vmatpush3.bf16.msra.mxu1 %v13646_v38  ;;  %v13691_v40 = vld [vmem:[#allocation3 + $0x1e0] ss:$12 sps:$4 sm:$0xff]   ;;  %v13693_v38 = vld [vmem:[#allocation3 + $0x1e4] ss:$12 sps:$4 sm:$0xff]  }
 0x652   :  { %3667 = vmatprep.subr.bf16.mxu0 %v13649_v37  ;;  %12542 = vmatprep.subr.bf16.mxu1 %v14883_v56  ;;  %v13694_v37 = vld [vmem:[#allocation3 + $0x1e8] ss:$12 sps:$4 sm:$0xff]  }
 0x653   :  { %3697 = vmatprep.mubr.bf16.mxu0 %v14882_v0  ;;  %12556 = vmatprep.mubr.msk.bf16.mxu1 %vm14884_vm0, %v14883_v56 }
 0x655   :  { %3668 = vmatpush1.bf16.msra.mxu0 %v13647_v13  ;;  %12543 = vmatpush3.bf16.msra.mxu1 %v13650_v31  ;;  %v13697_v13 = vld [vmem:[#allocation3 + $0x1fc] ss:$12 sps:$4 sm:$0xff]   ;;  %v13695_v31 = vld [vmem:[#allocation3 + $0x1f8] ss:$12 sps:$4 sm:$0xff]  }
 0x656   :  { %3669 = vmatprep.subr.bf16.mxu0 %v13653_v53  ;;  %12544 = vmatprep.subr.bf16.mxu1 %v14883_v56  ;;  %v13698_v53 = vld [vmem:[#allocation3 + $0x200] ss:$12 sps:$4 sm:$0xff]  }
 0x659   :  { %3670 = vmatpush1.bf16.msra.mxu0 %v13651_v15  ;;  %12545 = vmatpush3.bf16.msra.mxu1 %v13654_v46  ;;  %v13701_v15 = vld [vmem:[#allocation3 + $0x214] ss:$12 sps:$4 sm:$0xff]   ;;  %v13699_v46 = vld [vmem:[#allocation3 + $0x210] ss:$12 sps:$4 sm:$0xff]  }
 0x65a   :  { %3671 = vmatprep.subr.bf16.mxu0 %v13657_v30  ;;  %12546 = vmatprep.subr.bf16.mxu1 %v14883_v56  ;;  %v13702_v30 = vld [vmem:[#allocation3 + $0x218] ss:$12 sps:$4 sm:$0xff]  }
 0x65d   :  { %3672 = vmatpush1.bf16.msra.mxu0 %v13655_v47  ;;  %12547 = vmatpush3.bf16.msra.mxu1 %v13658_v44  ;;  %v13705_v47 = vld [vmem:[#allocation3 + $0x22c] ss:$12 sps:$4 sm:$0xff]   ;;  %v13703_v44 = vld [vmem:[#allocation3 + $0x228] ss:$12 sps:$4 sm:$0xff]  }
 0x65e   :  { %3673 = vmatprep.subr.bf16.mxu0 %v13661_v49  ;;  %12548 = vmatprep.subr.bf16.mxu1 %v14883_v56  ;;  %v13706_v49 = vld [vmem:[#allocation3 + $0x230] ss:$12 sps:$4 sm:$0xff]  }
 0x661   :  { %3674 = vmatpush1.bf16.msra.mxu0 %v13659_v55  ;;  %12549 = vmatpush3.bf16.msra.mxu1 %v13662_v8  ;;  %v13709_v55 = vld [vmem:[#allocation5 + $0x184] ss:$12 sps:$4 sm:$0xff]  }
 0x662   :  { %3675 = vmatprep.subr.bf16.mxu0 %v13665_v60  ;;  %12550 = vmatprep.subr.bf16.mxu1 %v14883_v56 }
 0x665   :  { %3676 = vmatpush1.bf16.msra.mxu0 %v13663_v41  ;;  %12551 = vmatpush3.bf16.msra.mxu1 %v13666_v18 }
 0x666   :  { %3677 = vmatprep.subr.bf16.mxu0 %v13669_v34  ;;  %12552 = vmatprep.subr.bf16.mxu1 %v14883_v56 }
 0x669   :  { %3678 = vmatpush1.bf16.msra.mxu0 %v13667_v14  ;;  %12553 = vmatpush3.bf16.msra.mxu1 %v13670_v62 }
 0x66a   :  { %3679 = vmatprep.subr.bf16.mxu0 %v13673_v19  ;;  %12554 = vmatprep.subr.bf16.mxu1 %v14883_v56 }
 0x66d   :  { %3680 = vmatpush1.bf16.msra.mxu0 %v13671_v4  ;;  %12555 = vmatpush3.bf16.msra.mxu1 %v13674_v11 }
 0x66e   :  { %12560 = vmatprep.subr.bf16.mxu1 %v14883_v56  ;;  %3928 = vmatprep.subr.bf16.mxu0 %v13677_v17 }
 0x670   :  { %3698 = vmatmul.mubr.bf16.vlgmr.msra.gmra.mrb[28].mxu0 %v15262_v1  ;;  %12557 = vmatmul.mubr.bf16.vlgmr.msra.gmra.mrb[72].mxu1 %v15262_v1  ;;  %v13685_v1 = vld [vmem:[#allocation3 + $0x1b4] ss:$12 sps:$4 sm:$0xff]  }
 0x671   :  { %3960 = vmatprep.mubr.bf16.mxu0 %v14882_v0  ;;  %12576 = vmatprep.mubr.msk.bf16.mxu1 %vm14884_vm0, %v14883_v56 }
 0x672   :  { %3929 = vmatpush1.bf16.msra.mxu0 %v13675_v50  ;;  %12561 = vmatpush3.bf16.msra.mxu1 %v13678_v21 }
 0x673   :  { %12562 = vmatprep.subr.bf16.mxu1 %v14883_v56  ;;  %3930 = vmatprep.subr.bf16.mxu0 %v13681_v10 }
 0x676   :  { %3931 = vmatpush1.bf16.msra.mxu0 %v13679_v3  ;;  %12563 = vmatpush3.bf16.msra.mxu1 %v13682_v58 }
 0x677   :  { %12564 = vmatprep.subr.bf16.mxu1 %v14883_v56  ;;  %3932 = vmatprep.subr.bf16.mxu0 %v13685_v1 }
 0x67a   :  { %3933 = vmatpush1.bf16.msra.mxu0 %v13683_v23  ;;  %12565 = vmatpush3.bf16.msra.mxu1 %v13686_v25 }
 0x67b   :  { %12566 = vmatprep.subr.bf16.mxu1 %v14883_v56  ;;  %3934 = vmatprep.subr.bf16.mxu0 %v13689_v32  ;;  %v15352_v32 = vld [vmem:[%s15962_s5 + $0x1] ss:$0 sm:$0xff] }
 0x67e   :  { %3935 = vmatpush1.bf16.msra.mxu0 %v13687_v33  ;;  %12567 = vmatpush3.bf16.msra.mxu1 %v13690_v43 }
 0x67f   :  { %12568 = vmatprep.subr.bf16.mxu1 %v14883_v56  ;;  %3936 = vmatprep.subr.bf16.mxu0 %v13693_v38 }
 0x682   :  { %3937 = vmatpush1.bf16.msra.mxu0 %v13691_v40  ;;  %12569 = vmatpush3.bf16.msra.mxu1 %v13694_v37 }
 0x683   :  { %3938 = vmatprep.subr.bf16.mxu0 %v13697_v13  ;;  %12570 = vmatprep.subr.bf16.mxu1 %v14883_v56 }
 0x686   :  { %3939 = vmatpush1.bf16.msra.mxu0 %v13695_v31  ;;  %12571 = vmatpush3.bf16.msra.mxu1 %v13698_v53 }
 0x687   :  { %3940 = vmatprep.subr.bf16.mxu0 %v13701_v15  ;;  %12572 = vmatprep.subr.bf16.mxu1 %v14883_v56 }
 0x68a   :  { %3941 = vmatpush1.bf16.msra.mxu0 %v13699_v46  ;;  %12573 = vmatpush3.bf16.msra.mxu1 %v13702_v30 }
 0x68b   :  { %3942 = vmatprep.subr.bf16.mxu0 %v13705_v47  ;;  %12574 = vmatprep.subr.bf16.mxu1 %v14883_v56  ;;  %v13707_v47 = vld [vmem:[#allocation5 + $0x180] ss:$12 sps:$4 sm:$0xff]  }
 0x68e   :  { %3943 = vmatpush1.bf16.msra.mxu0 %v13703_v44  ;;  %12575 = vmatpush3.bf16.msra.mxu1 %v13706_v49  ;;  %v13710_v44 = vld [vmem:[#allocation5 + $0x188] ss:$12 sps:$4 sm:$0xff]  }
 0x68f   :  { %4170 = vmatprep.subr.bf16.mxu0 %v13709_v55  ;;  %12580 = vmatprep.subr.bf16.mxu1 %v14883_v56  ;;  %v13713_v55 = vld [vmem:[#allocation5 + $0x19c] ss:$12 sps:$4 sm:$0xff]  }
 0x723   :  { %v3499_v8 = vpop.f32.mrb[68].mxu1 }
 0x724   :  { %v12538_v60 = vpop.f32.mrb[69].mxu1  ;;  %v3500_v40 = vadd.f32 %v3499_v8, %v15132_v6  ;;  %v13711_v8 = vld [vmem:[#allocation5 + $0x198] ss:$12 sps:$4 sm:$0xff]  }
 0x725   :  { %v3502_v41 = vpop.f32.mrb[70].mxu1  ;;  %v13714_v60 = vld [vmem:[#allocation5 + $0x1a0] ss:$12 sps:$4 sm:$0xff]  }
 0x726   :  { %v12539_v18 = vpop.f32.mrb[71].mxu1  ;;  %v13715_v41 = vld [vmem:[#allocation5 + $0x1b0] ss:$12 sps:$4 sm:$0xff]  }
 0x727   :  { %v13718_v18 = vld [vmem:[#allocation5 + $0x1b8] ss:$12 sps:$4 sm:$0xff]  }
 0x743   :  { %v3699_v34 = vpop.f32.mrb[28].mxu0  ;;  %v3740_v14 = vpop.f32.mrb[72].mxu1 }
 0x744   :  { %v13132_v62 = vadd.f32 %v3699_v34, %v15119_v35  ;;  %v3701_v19 = vpop.f32.mrb[29].mxu0  ;;  %v12558_v4 = vpop.f32.mrb[73].mxu1  ;;  %v3760_v33 = vadd.f32 %v15352_v32, %v3740_v14  ;;  %v13721_v34 = vld [vmem:[#allocation5 + $0x1cc] ss:$12 sps:$4 sm:$0xff]   ;;  %v13719_v14 = vld [vmem:[#allocation5 + $0x1c8] ss:$12 sps:$4 sm:$0xff]  }
 0x745   :  { %v3703_v11 = vpop.f32.mrb[30].mxu0  ;;  %v3743_v17 = vpop.f32.mrb[74].mxu1  ;;  %v13133_v3 = vadd.f32 %v3701_v19, %v15123_v51  ;;  %v13725_v19 = vld [vmem:[#allocation5 + $0x1e4] ss:$12 sps:$4 sm:$0xff]   ;;  %v13723_v4 = vld [vmem:[#allocation5 + $0x1e0] ss:$12 sps:$4 sm:$0xff]  }
 0x746   :  { %v11199_v50 = vmul.f32 -1.442695, %v13132_v62  ;;  %v3704_v21 = vpop.f32.mrb[31].mxu0  ;;  %v12559_v10 = vpop.f32.mrb[75].mxu1  ;;  %v13722_v62 = vld [vmem:[#allocation5 + $0x1d0] ss:$12 sps:$4 sm:$0xff]  }
 0x747   :  { %v11200_v58 = vmul.f32 -1.442695, %v13133_v3  ;;  %v13726_v11 = vld [vmem:[#allocation5 + $0x1e8] ss:$12 sps:$4 sm:$0xff]   ;;  %v13730_v21 = vld [vmem:[#allocation5 + $0x200] ss:$12 sps:$4 sm:$0xff]  }
 0x748   :  { %14617 = vpow2.f32 %v11199_v50  ;;  %v13729_v17 = vld [vmem:[#allocation5 + $0x1fc] ss:$12 sps:$4 sm:$0xff]   ;;  %v13727_v50 = vld [vmem:[#allocation5 + $0x1f8] ss:$12 sps:$4 sm:$0xff]   ;;  %v13733_v10 = vld [vmem:[#allocation5 + $0x214] ss:$12 sps:$4 sm:$0xff]  }
 0x749   :  { %14619 = vpow2.f32 %v11200_v58  ;;  %v13731_v3 = vld [vmem:[#allocation5 + $0x210] ss:$12 sps:$4 sm:$0xff]   ;;  %v13734_v58 = vld [vmem:[#allocation5 + $0x218] ss:$12 sps:$4 sm:$0xff]  }
 0x752   :  { %v14618_v1 = vpop.eup %14617 }
 0x753   :  { %v3754_v23 = vadd.f32 1.0, %v14618_v1  ;;  %v14620_v25 = vpop.eup %14619  ;;  %v13737_v1 = vld [vmem:[#allocation5 + $0x22c] ss:$12 sps:$4 sm:$0xff]  }
 0x754   :  { %v3755_v13 = vadd.f32 1.0, %v14620_v25  ;;  %v13738_v25 = vld [vmem:[#allocation5 + $0x230] ss:$12 sps:$4 sm:$0xff]  }
 0x755   :  { %14621 = vrcp.f32 %v3754_v23  ;;  %v13735_v23 = vld [vmem:[#allocation5 + $0x228] ss:$12 sps:$4 sm:$0xff]  }
 0x75f   :  { %v14622_v43 = vpop.eup %14621 }
 0x760   :  { %v3761_v38 = vmul.f32 %v14622_v43, %v3760_v33  ;;  %v13741_v33 = vld [vmem:[#allocation5 + $0x4] ss:$12 sps:$4 sm:$0xff]   ;;  %v13739_v43 = vld [vmem:[#allocation5] ss:$12 sps:$4 sm:$0xff]  }
 0x762   :  { %v3762_v37 = vadd.f32 %v3761_v38, %v3500_v40  ;;  %v13742_v40 = vld [vmem:[#allocation5 + $0x8] ss:$12 sps:$4 sm:$0xff]   ;;  %v4009_v38 = vpack.c.bf16 %v15310_v48, %v15310_v48 }
 0x764   :  { %14623 = vtanh.f32 %v3762_v37  ;;  %v13745_v37 = vld [vmem:[#allocation5 + $0x1c] ss:$12 sps:$4 sm:$0xff]  }
 0x765   :  { %14625 = vrcp.f32 %v3755_v13  ;;  %v13743_v13 = vld [vmem:[#allocation5 + $0x18] ss:$12 sps:$4 sm:$0xff]  }
 0x76e   :  { %v14624_v31 = vpop.eup %14623 }
 0x76f   :  { %v3764_v53 = vsub.f32 %v15258_v36, %v14624_v31  ;;  %v14626_v15 = vpop.eup %14625  ;;  %v13717_v36 = vld [vmem:[#allocation5 + $0x1b4] ss:$12 sps:$4 sm:$0xff]  }
 0x771   :  { %v3765_v46 = vmul.f32 %v14626_v15, %v3764_v53  ;;  %v13749_v53 = vld [vmem:[#allocation5 + $0x34] ss:$12 sps:$4 sm:$0xff]   ;;  %v13747_v15 = vld [vmem:[#allocation5 + $0x30] ss:$12 sps:$4 sm:$0xff]  }
 0x773   :  { %v15357_v30 = vadd.f32 %v14624_v31, %v3765_v46  ;;  %v13746_v31 = vld [vmem:[#allocation5 + $0x20] ss:$12 sps:$4 sm:$0xff]   ;;  %v13750_v46 = vld [vmem:[#allocation5 + $0x38] ss:$12 sps:$4 sm:$0xff]  }
 0x775   :  { %v15361_v49 = vpack.c.bf16 %v15357_v30, %v15357_v30 }
 0x777   :  { %3961 = vmatmul.mubr.bf16.vlgmr.msra.gmra.mrb[32].mxu0 %v15361_v49  ;;  %12577 = vmatmul.mubr.bf16.vlgmr.msra.gmra.mrb[76].mxu1 %v15361_v49 }
 0x778   :  { %4171 = vmatpush1.bf16.msra.mxu0 %v13707_v47  ;;  %12581 = vmatpush3.bf16.msra.mxu1 %v13710_v44  ;;  %v13753_v47 = vld [vmem:[#allocation5 + $0x4c] ss:$12 sps:$4 sm:$0xff]   ;;  %v13751_v44 = vld [vmem:[#allocation5 + $0x48] ss:$12 sps:$4 sm:$0xff]  }
 0x779   :  { %4172 = vmatprep.subr.bf16.mxu0 %v13713_v55  ;;  %12582 = vmatprep.subr.bf16.mxu1 %v14883_v56  ;;  %v13754_v55 = vld [vmem:[#allocation5 + $0x50] ss:$12 sps:$4 sm:$0xff]  }
 0x77a   :  { %4202 = vmatprep.mubr.bf16.mxu0 %v14882_v0  ;;  %12596 = vmatprep.mubr.msk.bf16.mxu1 %vm14884_vm0, %v14883_v56 }
 0x77c   :  { %4173 = vmatpush1.bf16.msra.mxu0 %v13711_v8  ;;  %12583 = vmatpush3.bf16.msra.mxu1 %v13714_v60  ;;  %v13757_v8 = vld [vmem:[#allocation5 + $0x64] ss:$12 sps:$4 sm:$0xff]   ;;  %v13755_v60 = vld [vmem:[#allocation5 + $0x60] ss:$12 sps:$4 sm:$0xff]  }
 0x77d   :  { %4174 = vmatprep.subr.bf16.mxu0 %v13717_v36  ;;  %12584 = vmatprep.subr.bf16.mxu1 %v14883_v56  ;;  %v13758_v36 = vld [vmem:[#allocation5 + $0x68] ss:$12 sps:$4 sm:$0xff]  }
 0x780   :  { %4175 = vmatpush1.bf16.msra.mxu0 %v13715_v41  ;;  %12585 = vmatpush3.bf16.msra.mxu1 %v13718_v18  ;;  %v13761_v41 = vld [vmem:[#allocation5 + $0x7c] ss:$12 sps:$4 sm:$0xff]   ;;  %v13759_v18 = vld [vmem:[#allocation5 + $0x78] ss:$12 sps:$4 sm:$0xff]  }
 0x781   :  { %4176 = vmatprep.subr.bf16.mxu0 %v13721_v34  ;;  %12586 = vmatprep.subr.bf16.mxu1 %v14883_v56  ;;  %v13762_v34 = vld [vmem:[#allocation5 + $0x80] ss:$12 sps:$4 sm:$0xff]  }
 0x784   :  { %4177 = vmatpush1.bf16.msra.mxu0 %v13719_v14  ;;  %12587 = vmatpush3.bf16.msra.mxu1 %v13722_v62  ;;  %v13765_v14 = vld [vmem:[#allocation5 + $0x94] ss:$12 sps:$4 sm:$0xff]   ;;  %v13763_v62 = vld [vmem:[#allocation5 + $0x90] ss:$12 sps:$4 sm:$0xff]  }
 0x785   :  { %4178 = vmatprep.subr.bf16.mxu0 %v13725_v19  ;;  %12588 = vmatprep.subr.bf16.mxu1 %v14883_v56  ;;  %v13766_v19 = vld [vmem:[#allocation5 + $0x98] ss:$12 sps:$4 sm:$0xff]  }
 0x788   :  { %4179 = vmatpush1.bf16.msra.mxu0 %v13723_v4  ;;  %12589 = vmatpush3.bf16.msra.mxu1 %v13726_v11  ;;  %v13769_v4 = vld [vmem:[#allocation5 + $0xac] ss:$12 sps:$4 sm:$0xff]   ;;  %v13767_v11 = vld [vmem:[#allocation5 + $0xa8] ss:$12 sps:$4 sm:$0xff]  }
 0x789   :  { %4180 = vmatprep.subr.bf16.mxu0 %v13729_v17  ;;  %12590 = vmatprep.subr.bf16.mxu1 %v14883_v56  ;;  %v13770_v17 = vld [vmem:[#allocation5 + $0xb0] ss:$12 sps:$4 sm:$0xff]  }
 0x78c   :  { %4181 = vmatpush1.bf16.msra.mxu0 %v13727_v50  ;;  %12591 = vmatpush3.bf16.msra.mxu1 %v13730_v21  ;;  %v13773_v50 = vld [vmem:[#allocation3 + $0xc4] ss:$12 sps:$4 sm:$0xff]   ;;  %v13771_v21 = vld [vmem:[#allocation3 + $0xc0] ss:$12 sps:$4 sm:$0xff]  }
 0x78d   :  { %4182 = vmatprep.subr.bf16.mxu0 %v13733_v10  ;;  %12592 = vmatprep.subr.bf16.mxu1 %v14883_v56  ;;  %v13774_v10 = vld [vmem:[#allocation3 + $0xc8] ss:$12 sps:$4 sm:$0xff]  }
 0x790   :  { %4183 = vmatpush1.bf16.msra.mxu0 %v13731_v3  ;;  %12593 = vmatpush3.bf16.msra.mxu1 %v13734_v58  ;;  %v13777_v3 = vld [vmem:[#allocation3 + $0xdc] ss:$12 sps:$4 sm:$0xff]   ;;  %v13775_v58 = vld [vmem:[#allocation3 + $0xd8] ss:$12 sps:$4 sm:$0xff]  }
 0x791   :  { %4184 = vmatprep.subr.bf16.mxu0 %v13737_v1  ;;  %12594 = vmatprep.subr.bf16.mxu1 %v14883_v56  ;;  %v13778_v1 = vld [vmem:[#allocation3 + $0xe0] ss:$12 sps:$4 sm:$0xff]  }
 0x794   :  { %4185 = vmatpush1.bf16.msra.mxu0 %v13735_v23  ;;  %12595 = vmatpush3.bf16.msra.mxu1 %v13738_v25  ;;  %v13779_v23 = vld [vmem:[#allocation3 + $0xf0] ss:$12 sps:$4 sm:$0xff]   ;;  %v13782_v25 = vld [vmem:[#allocation3 + $0xf8] ss:$12 sps:$4 sm:$0xff]  }
 0x795   :  { %4433 = vmatprep.subr.bf16.mxu0 %v13741_v33  ;;  %12600 = vmatprep.subr.bf16.mxu1 %v14883_v56  ;;  %v13785_v33 = vld [vmem:[#allocation3 + $0x10c] ss:$12 sps:$4 sm:$0xff]  }
 0x797   :  { %4203 = vmatmul.mubr.bf16.vlgmr.msra.gmra.mrb[32].mxu0 %v4009_v38  ;;  %12597 = vmatmul.mubr.bf16.vlgmr.msra.gmra.mrb[80].mxu1 %v4009_v38  ;;  %v13787_v38 = vld [vmem:[#allocation3 + $0x120] ss:$12 sps:$4 sm:$0xff]  }
 0x798   :  { %4434 = vmatpush1.bf16.msra.mxu0 %v13739_v43  ;;  %12601 = vmatpush3.bf16.msra.mxu1 %v13742_v40  ;;  %v13783_v43 = vld [vmem:[#allocation3 + $0x108] ss:$12 sps:$4 sm:$0xff]   ;;  %v13786_v40 = vld [vmem:[#allocation3 + $0x110] ss:$12 sps:$4 sm:$0xff]  }
 0x799   :  { %4435 = vmatprep.subr.bf16.mxu0 %v13745_v37  ;;  %12602 = vmatprep.subr.bf16.mxu1 %v14883_v56  ;;  %v13789_v37 = vld [vmem:[#allocation3 + $0x124] ss:$12 sps:$4 sm:$0xff]  }
 0x79a   :  { %4465 = vmatprep.mubr.bf16.mxu0 %v14882_v0  ;;  %12616 = vmatprep.mubr.msk.bf16.mxu1 %vm14884_vm0, %v14883_v56 }
 0x79c   :  { %4436 = vmatpush1.bf16.msra.mxu0 %v13743_v13  ;;  %12603 = vmatpush3.bf16.msra.mxu1 %v13746_v31  ;;  %v13790_v13 = vld [vmem:[#allocation3 + $0x128] ss:$12 sps:$4 sm:$0xff]  }
 0x79d   :  { %4437 = vmatprep.subr.bf16.mxu0 %v13749_v53  ;;  %12604 = vmatprep.subr.bf16.mxu1 %v14883_v56  ;;  %v13793_v31 = vld [vmem:[#allocation3 + $0x13c] ss:$12 sps:$4 sm:$0xff]   ;;  %v13791_v53 = vld [vmem:[#allocation3 + $0x138] ss:$12 sps:$4 sm:$0xff]  }
 0x7a0   :  { %4438 = vmatpush1.bf16.msra.mxu0 %v13747_v15  ;;  %12605 = vmatpush3.bf16.msra.mxu1 %v13750_v46  ;;  %v13794_v15 = vld [vmem:[#allocation3 + $0x140] ss:$12 sps:$4 sm:$0xff]  }
 0x7a1   :  { %4439 = vmatprep.subr.bf16.mxu0 %v13753_v47  ;;  %12606 = vmatprep.subr.bf16.mxu1 %v14883_v56  ;;  %v13797_v46 = vld [vmem:[#allocation3 + $0x154] ss:$12 sps:$4 sm:$0xff]   ;;  %v13795_v47 = vld [vmem:[#allocation3 + $0x150] ss:$12 sps:$4 sm:$0xff]  }
 0x7a4   :  { %4440 = vmatpush1.bf16.msra.mxu0 %v13751_v44  ;;  %12607 = vmatpush3.bf16.msra.mxu1 %v13754_v55  ;;  %v13798_v44 = vld [vmem:[#allocation3 + $0x158] ss:$12 sps:$4 sm:$0xff]  }
 0x7a5   :  { %4441 = vmatprep.subr.bf16.mxu0 %v13757_v8  ;;  %12608 = vmatprep.subr.bf16.mxu1 %v14883_v56  ;;  %v13801_v55 = vld [vmem:[#allocation3 + $0x16c] ss:$12 sps:$4 sm:$0xff]   ;;  %v13799_v8 = vld [vmem:[#allocation3 + $0x168] ss:$12 sps:$4 sm:$0xff]  }
 0x7a8   :  { %4442 = vmatpush1.bf16.msra.mxu0 %v13755_v60  ;;  %12609 = vmatpush3.bf16.msra.mxu1 %v13758_v36  ;;  %v13802_v60 = vld [vmem:[#allocation3 + $0x170] ss:$12 sps:$4 sm:$0xff]  }
 0x7a9   :  { %4443 = vmatprep.subr.bf16.mxu0 %v13761_v41  ;;  %12610 = vmatprep.subr.bf16.mxu1 %v14883_v56  ;;  %v13805_v36 = vld [vmem:[#allocation5 + $0xc4] ss:$12 sps:$4 sm:$0xff]  }
 0x7ac   :  { %4444 = vmatpush1.bf16.msra.mxu0 %v13759_v18  ;;  %12611 = vmatpush3.bf16.msra.mxu1 %v13762_v34 }
 0x7ad   :  { %4445 = vmatprep.subr.bf16.mxu0 %v13765_v14  ;;  %12612 = vmatprep.subr.bf16.mxu1 %v14883_v56 }
 0x7b0   :  { %4446 = vmatpush1.bf16.msra.mxu0 %v13763_v62  ;;  %12613 = vmatpush3.bf16.msra.mxu1 %v13766_v19 }
 0x7b1   :  { %4447 = vmatprep.subr.bf16.mxu0 %v13769_v4  ;;  %12614 = vmatprep.subr.bf16.mxu1 %v14883_v56 }
 0x7b4   :  { %4448 = vmatpush1.bf16.msra.mxu0 %v13767_v11  ;;  %12615 = vmatpush3.bf16.msra.mxu1 %v13770_v17 }
 0x7b5   :  { %12620 = vmatprep.subr.bf16.mxu1 %v14883_v56  ;;  %4696 = vmatprep.subr.bf16.mxu0 %v13773_v50 }
 0x7b7   :  { %4466 = vmatmul.mubr.bf16.vlgmr.msra.gmra.mrb[36].mxu0 %v15319_v45  ;;  %12617 = vmatmul.mubr.bf16.vlgmr.msra.gmra.mrb[84].mxu1 %v15319_v45  ;;  %v13781_v45 = vld [vmem:[#allocation3 + $0xf4] ss:$12 sps:$4 sm:$0xff]  }
 0x7b8   :  { %4728 = vmatprep.mubr.bf16.mxu0 %v14882_v0  ;;  %12636 = vmatprep.mubr.msk.bf16.mxu1 %vm14884_vm0, %v14883_v56 }
 0x7b9   :  { %4697 = vmatpush1.bf16.msra.mxu0 %v13771_v21  ;;  %12621 = vmatpush3.bf16.msra.mxu1 %v13774_v10 }
 0x7ba   :  { %12622 = vmatprep.subr.bf16.mxu1 %v14883_v56  ;;  %4698 = vmatprep.subr.bf16.mxu0 %v13777_v3 }
 0x7bd   :  { %4699 = vmatpush1.bf16.msra.mxu0 %v13775_v58  ;;  %12623 = vmatpush3.bf16.msra.mxu1 %v13778_v1 }
 0x7be   :  { %12624 = vmatprep.subr.bf16.mxu1 %v14883_v56  ;;  %4700 = vmatprep.subr.bf16.mxu0 %v13781_v45 }
 0x7c1   :  { %4701 = vmatpush1.bf16.msra.mxu0 %v13779_v23  ;;  %12625 = vmatpush3.bf16.msra.mxu1 %v13782_v25 }
 0x7c2   :  { %12626 = vmatprep.subr.bf16.mxu1 %v14883_v56  ;;  %4702 = vmatprep.subr.bf16.mxu0 %v13785_v33 }
 0x7c5   :  { %4703 = vmatpush1.bf16.msra.mxu0 %v13783_v43  ;;  %12627 = vmatpush3.bf16.msra.mxu1 %v13786_v40  ;;  %v15407_v43 = vld [vmem:[%s15962_s5 + $0x2] ss:$0 sm:$0xff] }
 0x7c6   :  { %12628 = vmatprep.subr.bf16.mxu1 %v14883_v56  ;;  %4704 = vmatprep.subr.bf16.mxu0 %v13789_v37 }
 0x7c9   :  { %4705 = vmatpush1.bf16.msra.mxu0 %v13787_v38  ;;  %12629 = vmatpush3.bf16.msra.mxu1 %v13790_v13 }
 0x7ca   :  { %4706 = vmatprep.subr.bf16.mxu0 %v13793_v31  ;;  %12630 = vmatprep.subr.bf16.mxu1 %v14883_v56 }
 0x7cd   :  { %4707 = vmatpush1.bf16.msra.mxu0 %v13791_v53  ;;  %12631 = vmatpush3.bf16.msra.mxu1 %v13794_v15 }
 0x7ce   :  { %4708 = vmatprep.subr.bf16.mxu0 %v13797_v46  ;;  %12632 = vmatprep.subr.bf16.mxu1 %v14883_v56 }
 0x7d1   :  { %4709 = vmatpush1.bf16.msra.mxu0 %v13795_v47  ;;  %12633 = vmatpush3.bf16.msra.mxu1 %v13798_v44 }
 0x7d2   :  { %4710 = vmatprep.subr.bf16.mxu0 %v13801_v55  ;;  %12634 = vmatprep.subr.bf16.mxu1 %v14883_v56 }
 0x7d5   :  { %4711 = vmatpush1.bf16.msra.mxu0 %v13799_v8  ;;  %12635 = vmatpush3.bf16.msra.mxu1 %v13802_v60 }
 0x7d6   :  { %4937 = vmatprep.subr.bf16.mxu0 %v13805_v36  ;;  %12640 = vmatprep.subr.bf16.mxu1 %v14883_v56 }
 0x84a   :  { %v4003_v41 = vpop.f32.mrb[76].mxu1 }
 0x84b   :  { %v12578_v18 = vpop.f32.mrb[77].mxu1  ;;  %v4004_v37 = vadd.f32 %v4003_v41, %v15204_v42 }
 0x84c   :  { %v4006_v34 = vpop.f32.mrb[78].mxu1 }
 0x84d   :  { %v12579_v14 = vpop.f32.mrb[79].mxu1 }
 0x86a   :  { %v4204_v62 = vpop.f32.mrb[32].mxu0  ;;  %v4245_v19 = vpop.f32.mrb[80].mxu1 }
 0x86b   :  { %v13134_v4 = vadd.f32 %v4204_v62, %v15191_v12  ;;  %v4206_v11 = vpop.f32.mrb[33].mxu0  ;;  %v12598_v17 = vpop.f32.mrb[81].mxu1  ;;  %v4265_v40 = vadd.f32 %v15407_v43, %v4245_v19 }
 0x86c   :  { %v4208_v50 = vpop.f32.mrb[34].mxu0  ;;  %v4248_v21 = vpop.f32.mrb[82].mxu1  ;;  %v13135_v1 = vadd.f32 %v4206_v11, %v15195_v29 }
 0x86d   :  { %v11249_v10 = vmul.f32 -1.442695, %v13134_v4  ;;  %v4209_v3 = vpop.f32.mrb[35].mxu0  ;;  %v12599_v58 = vpop.f32.mrb[83].mxu1  ;;  %v15419_v21 = vld [vmem:[%s15962_s5] ss:$0 sm:$0xff] }
 0x86e   :  { %v11250_v45 = vmul.f32 -1.442695, %v13135_v1 }
 0x86f   :  { %14627 = vpow2.f32 %v11249_v10 }
 0x870   :  { %14629 = vpow2.f32 %v11250_v45 }
 0x879   :  { %v14628_v23 = vpop.eup %14627 }
 0x87a   :  { %v4259_v25 = vadd.f32 1.0, %v14628_v23  ;;  %v14630_v33 = vpop.eup %14629 }
 0x87b   :  { %v4260_v53 = vadd.f32 1.0, %v14630_v33 }
 0x87c   :  { %14631 = vrcp.f32 %v4259_v25 }
 0x886   :  { %v14632_v38 = vpop.eup %14631 }
 0x887   :  { %v4266_v13 = vmul.f32 %v14632_v38, %v4265_v40 }
 0x889   :  { %v4267_v31 = vadd.f32 %v4266_v13, %v4004_v37  ;;  %v13803_v37 = vld [vmem:[#allocation5 + $0xc0] ss:$12 sps:$4 sm:$0xff]   ;;  %v13806_v13 = vld [vmem:[#allocation5 + $0xc8] ss:$12 sps:$4 sm:$0xff]  }
 0x88a   :  { %v4467_v15 = vpop.f32.mrb[36].mxu0  ;;  %v4508_v46 = vpop.f32.mrb[84].mxu1 }
 0x88b   :  { %14633 = vtanh.f32 %v4267_v31  ;;  %v4514_v47 = vadd.f32 %v4467_v15, %v15035_v52  ;;  %v4469_v44 = vpop.f32.mrb[37].mxu0  ;;  %v12618_v55 = vpop.f32.mrb[85].mxu1  ;;  %v4528_v10 = vadd.f32 %v15419_v21, %v4508_v46  ;;  %v13810_v15 = vld [vmem:[#allocation5 + $0xe0] ss:$12 sps:$4 sm:$0xff]   ;;  %v13811_v46 = vld [vmem:[#allocation5 + $0xf0] ss:$12 sps:$4 sm:$0xff]  }
 0x88c   :  { %v4515_v8 = vadd.f32 %v4469_v44, %v15037_v54  ;;  %v4471_v60 = vpop.f32.mrb[38].mxu0  ;;  %v4511_v36 = vpop.f32.mrb[86].mxu1  ;;  %14635 = vrcp.f32 %v4260_v53  ;;  %v13809_v53 = vld [vmem:[#allocation5 + $0xdc] ss:$12 sps:$4 sm:$0xff]   ;;  %v13817_v44 = vld [vmem:[#allocation5 + $0x10c] ss:$12 sps:$4 sm:$0xff]  }
 0x88d   :  { %v11275_v18 = vmul.f32 -1.442695, %v4514_v47  ;;  %v4472_v34 = vpop.f32.mrb[39].mxu0  ;;  %v12619_v14 = vpop.f32.mrb[87].mxu1  ;;  %v13814_v47 = vld [vmem:[#allocation5 + $0xf8] ss:$12 sps:$4 sm:$0xff]  }
 0x88e   :  { %v11276_v4 = vmul.f32 -1.442695, %v4515_v8  ;;  %v13815_v55 = vld [vmem:[#allocation5 + $0x108] ss:$12 sps:$4 sm:$0xff]   ;;  %v13818_v8 = vld [vmem:[#allocation5 + $0x110] ss:$12 sps:$4 sm:$0xff]  }
 0x88f   :  { %14637 = vpow2.f32 %v11275_v18  ;;  %v13821_v60 = vld [vmem:[#allocation5 + $0x124] ss:$12 sps:$4 sm:$0xff]   ;;  %v13819_v36 = vld [vmem:[#allocation5 + $0x120] ss:$12 sps:$4 sm:$0xff]   ;;  %v13822_v18 = vld [vmem:[#allocation5 + $0x128] ss:$12 sps:$4 sm:$0xff]  }
 0x890   :  { %14639 = vpow2.f32 %v11276_v4  ;;  %v13825_v34 = vld [vmem:[#allocation5 + $0x13c] ss:$12 sps:$4 sm:$0xff]   ;;  %v13823_v14 = vld [vmem:[#allocation5 + $0x138] ss:$12 sps:$4 sm:$0xff]  }
 0x891   :  { %v13830_v4 = vld [vmem:[#allocation5 + $0x158] ss:$12 sps:$4 sm:$0xff]  }
 0x895   :  { %v14634_v41 = vpop.eup %14633 }
 0x896   :  { %v4269_v62 = vsub.f32 %v15310_v48, %v14634_v41  ;;  %v14636_v19 = vpop.eup %14635 }
 0x898   :  { %v4270_v11 = vmul.f32 %v14636_v19, %v4269_v62  ;;  %v13829_v62 = vld [vmem:[#allocation5 + $0x154] ss:$12 sps:$4 sm:$0xff]   ;;  %v13827_v19 = vld [vmem:[#allocation5 + $0x150] ss:$12 sps:$4 sm:$0xff]  }
 0x899   :  { %v14638_v17 = vpop.eup %14637 }
 0x89a   :  { %v4522_v50 = vadd.f32 1.0, %v14638_v17  ;;  %v15414_v52 = vadd.f32 %v14634_v41, %v4270_v11  ;;  %v14640_v54 = vpop.eup %14639  ;;  %v13826_v41 = vld [vmem:[#allocation5 + $0x140] ss:$12 sps:$4 sm:$0xff]   ;;  %v13831_v17 = vld [vmem:[#allocation5 + $0x168] ss:$12 sps:$4 sm:$0xff]  }
 0x89b   :  { %v4523_v45 = vadd.f32 1.0, %v14640_v54  ;;  %v13833_v11 = vld [vmem:[#allocation5 + $0x16c] ss:$12 sps:$4 sm:$0xff]   ;;  %v13837_v54 = vld [vmem:[#allocation3 + $0x184] ss:$12 sps:$4 sm:$0xff]  }
 0x89c   :  { %14641 = vrcp.f32 %v4522_v50  ;;  %v13834_v50 = vld [vmem:[#allocation5 + $0x170] ss:$12 sps:$4 sm:$0xff]  }
 0x8a6   :  { %v14642_v3 = vpop.eup %14641 }
 0x8a7   :  { %v4529_v58 = vmul.f32 %v14642_v3, %v4528_v10  ;;  %v13835_v10 = vld [vmem:[#allocation3 + $0x180] ss:$12 sps:$4 sm:$0xff]   ;;  %v13838_v3 = vld [vmem:[#allocation3 + $0x188] ss:$12 sps:$4 sm:$0xff]  }
 0x8a9   :  { %v4530_v1 = vadd.f32 %v4529_v58, %v15060_v16  ;;  %v13807_v16 = vld [vmem:[#allocation5 + $0xd8] ss:$12 sps:$4 sm:$0xff]   ;;  %v13841_v58 = vld [vmem:[#allocation3 + $0x19c] ss:$12 sps:$4 sm:$0xff]  }
 0x8ab   :  { %14643 = vtanh.f32 %v4530_v1  ;;  %v13839_v1 = vld [vmem:[#allocation3 + $0x198] ss:$12 sps:$4 sm:$0xff]  }
 0x8ac   :  { %14645 = vrcp.f32 %v4523_v45  ;;  %v13842_v45 = vld [vmem:[#allocation3 + $0x1a0] ss:$12 sps:$4 sm:$0xff]  }
 0x8b5   :  { %v14644_v23 = vpop.eup %14643 }
 0x8b6   :  { %v4532_v25 = vsub.f32 %v15315_v28, %v14644_v23  ;;  %v14646_v33 = vpop.eup %14645  ;;  %v13813_v28 = vld [vmem:[#allocation5 + $0xf4] ss:$12 sps:$4 sm:$0xff]  }
 0x8b8   :  { %v4533_v40 = vmul.f32 %v14646_v33, %v4532_v25  ;;  %v13846_v25 = vld [vmem:[#allocation3 + $0x1b8] ss:$12 sps:$4 sm:$0xff]  }
 0x8b9   :  { %v13849_v33 = vld [vmem:[#allocation3 + $0x1cc] ss:$12 sps:$4 sm:$0xff]  }
 0x8ba   :  { %v15424_v38 = vadd.f32 %v14644_v23, %v4533_v40  ;;  %v13843_v23 = vld [vmem:[#allocation3 + $0x1b0] ss:$12 sps:$4 sm:$0xff]   ;;  %v13847_v40 = vld [vmem:[#allocation3 + $0x1c8] ss:$12 sps:$4 sm:$0xff]  }
 0x8bc   :  { %v15428_v31 = vpack.c.bf16 %v15424_v38, %v15424_v38 }
 0x8be   :  { %4729 = vmatmul.mubr.bf16.vlgmr.msra.gmra.mrb[40].mxu0 %v15428_v31  ;;  %12637 = vmatmul.mubr.bf16.vlgmr.msra.gmra.mrb[88].mxu1 %v15428_v31 }
 0x8bf   :  { %4938 = vmatpush1.bf16.msra.mxu0 %v13803_v37  ;;  %12641 = vmatpush3.bf16.msra.mxu1 %v13806_v13  ;;  %v13850_v37 = vld [vmem:[#allocation3 + $0x1d0] ss:$12 sps:$4 sm:$0xff]   ;;  %v13851_v13 = vld [vmem:[#allocation3 + $0x1e0] ss:$12 sps:$4 sm:$0xff]  }
 0x8c0   :  { %4939 = vmatprep.subr.bf16.mxu0 %v13809_v53  ;;  %12642 = vmatprep.subr.bf16.mxu1 %v14883_v56  ;;  %v13853_v53 = vld [vmem:[#allocation3 + $0x1e4] ss:$12 sps:$4 sm:$0xff]  }
 0x8c1   :  { %4969 = vmatprep.mubr.bf16.mxu0 %v14882_v0  ;;  %12656 = vmatprep.mubr.msk.bf16.mxu1 %vm14884_vm0, %v14883_v56 }
 0x8c3   :  { %4940 = vmatpush1.bf16.msra.mxu0 %v13807_v16  ;;  %12643 = vmatpush3.bf16.msra.mxu1 %v13810_v15  ;;  %v13854_v16 = vld [vmem:[#allocation3 + $0x1e8] ss:$12 sps:$4 sm:$0xff]  }
 0x8c4   :  { %4941 = vmatprep.subr.bf16.mxu0 %v13813_v28  ;;  %12644 = vmatprep.subr.bf16.mxu1 %v14883_v56  ;;  %v13857_v15 = vld [vmem:[#allocation3 + $0x1fc] ss:$12 sps:$4 sm:$0xff]   ;;  %v13855_v28 = vld [vmem:[#allocation3 + $0x1f8] ss:$12 sps:$4 sm:$0xff]  }
 0x8c7   :  { %4942 = vmatpush1.bf16.msra.mxu0 %v13811_v46  ;;  %12645 = vmatpush3.bf16.msra.mxu1 %v13814_v47  ;;  %v13858_v46 = vld [vmem:[#allocation3 + $0x200] ss:$12 sps:$4 sm:$0xff]  }
 0x8c8   :  { %4943 = vmatprep.subr.bf16.mxu0 %v13817_v44  ;;  %12646 = vmatprep.subr.bf16.mxu1 %v14883_v56  ;;  %v13861_v47 = vld [vmem:[#allocation3 + $0x214] ss:$12 sps:$4 sm:$0xff]   ;;  %v13859_v44 = vld [vmem:[#allocation3 + $0x210] ss:$12 sps:$4 sm:$0xff]  }
 0x8cb   :  { %4944 = vmatpush1.bf16.msra.mxu0 %v13815_v55  ;;  %12647 = vmatpush3.bf16.msra.mxu1 %v13818_v8  ;;  %v13862_v55 = vld [vmem:[#allocation3 + $0x218] ss:$12 sps:$4 sm:$0xff]  }
 0x8cc   :  { %4945 = vmatprep.subr.bf16.mxu0 %v13821_v60  ;;  %12648 = vmatprep.subr.bf16.mxu1 %v14883_v56  ;;  %v13865_v8 = vld [vmem:[#allocation3 + $0x22c] ss:$12 sps:$4 sm:$0xff]   ;;  %v13863_v60 = vld [vmem:[#allocation3 + $0x228] ss:$12 sps:$4 sm:$0xff]  }
 0x8cf   :  { %4946 = vmatpush1.bf16.msra.mxu0 %v13819_v36  ;;  %12649 = vmatpush3.bf16.msra.mxu1 %v13822_v18  ;;  %v13866_v36 = vld [vmem:[#allocation3 + $0x230] ss:$12 sps:$4 sm:$0xff]  }
 0x8d0   :  { %4947 = vmatprep.subr.bf16.mxu0 %v13825_v34  ;;  %12650 = vmatprep.subr.bf16.mxu1 %v14883_v56  ;;  %v13869_v18 = vld [vmem:[#allocation5 + $0x184] ss:$12 sps:$4 sm:$0xff]  }
 0x8d3   :  { %4948 = vmatpush1.bf16.msra.mxu0 %v13823_v14  ;;  %12651 = vmatpush3.bf16.msra.mxu1 %v13826_v41 }
 0x8d4   :  { %4949 = vmatprep.subr.bf16.mxu0 %v13829_v62  ;;  %12652 = vmatprep.subr.bf16.mxu1 %v14883_v56 }
 0x8d7   :  { %4950 = vmatpush1.bf16.msra.mxu0 %v13827_v19  ;;  %12653 = vmatpush3.bf16.msra.mxu1 %v13830_v4 }
 0x8d8   :  { %4951 = vmatprep.subr.bf16.mxu0 %v13833_v11  ;;  %12654 = vmatprep.subr.bf16.mxu1 %v14883_v56 }
 0x8db   :  { %4952 = vmatpush1.bf16.msra.mxu0 %v13831_v17  ;;  %12655 = vmatpush3.bf16.msra.mxu1 %v13834_v50 }
 0x8dc   :  { %12660 = vmatprep.subr.bf16.mxu1 %v14883_v56  ;;  %5200 = vmatprep.subr.bf16.mxu0 %v13837_v54 }
 0x8de   :  { %4970 = vmatmul.mubr.bf16.vlgmr.msra.gmra.mrb[40].mxu0 %v15361_v49  ;;  %12657 = vmatmul.mubr.bf16.vlgmr.msra.gmra.mrb[92].mxu1 %v15361_v49  ;;  %v13845_v49 = vld [vmem:[#allocation3 + $0x1b4] ss:$12 sps:$4 sm:$0xff]  }
 0x8df   :  { %5232 = vmatprep.mubr.bf16.mxu0 %v14882_v0  ;;  %12676 = vmatprep.mubr.msk.bf16.mxu1 %vm14884_vm0, %v14883_v56 }
 0x8e0   :  { %5201 = vmatpush1.bf16.msra.mxu0 %v13835_v10  ;;  %12661 = vmatpush3.bf16.msra.mxu1 %v13838_v3 }
 0x8e1   :  { %12662 = vmatprep.subr.bf16.mxu1 %v14883_v56  ;;  %5202 = vmatprep.subr.bf16.mxu0 %v13841_v58 }
 0x8e4   :  { %5203 = vmatpush1.bf16.msra.mxu0 %v13839_v1  ;;  %12663 = vmatpush3.bf16.msra.mxu1 %v13842_v45 }
 0x8e5   :  { %12664 = vmatprep.subr.bf16.mxu1 %v14883_v56  ;;  %5204 = vmatprep.subr.bf16.mxu0 %v13845_v49 }
 0x8e8   :  { %5205 = vmatpush1.bf16.msra.mxu0 %v13843_v23  ;;  %12665 = vmatpush3.bf16.msra.mxu1 %v13846_v25 }
 0x8e9   :  { %12666 = vmatprep.subr.bf16.mxu1 %v14883_v56  ;;  %5206 = vmatprep.subr.bf16.mxu0 %v13849_v33 }
 0x8ec   :  { %5207 = vmatpush1.bf16.msra.mxu0 %v13847_v40  ;;  %12667 = vmatpush3.bf16.msra.mxu1 %v13850_v37 }
 0x8ed   :  { %12668 = vmatprep.subr.bf16.mxu1 %v14883_v56  ;;  %5208 = vmatprep.subr.bf16.mxu0 %v13853_v53 }
 0x8f0   :  { %5209 = vmatpush1.bf16.msra.mxu0 %v13851_v13  ;;  %12669 = vmatpush3.bf16.msra.mxu1 %v13854_v16 }
 0x8f1   :  { %5210 = vmatprep.subr.bf16.mxu0 %v13857_v15  ;;  %12670 = vmatprep.subr.bf16.mxu1 %v14883_v56 }
 0x8f4   :  { %5211 = vmatpush1.bf16.msra.mxu0 %v13855_v28  ;;  %12671 = vmatpush3.bf16.msra.mxu1 %v13858_v46 }
 0x8f5   :  { %5212 = vmatprep.subr.bf16.mxu0 %v13861_v47  ;;  %12672 = vmatprep.subr.bf16.mxu1 %v14883_v56 }
 0x8f8   :  { %5213 = vmatpush1.bf16.msra.mxu0 %v13859_v44  ;;  %12673 = vmatpush3.bf16.msra.mxu1 %v13862_v55 }
 0x8f9   :  { %5214 = vmatprep.subr.bf16.mxu0 %v13865_v8  ;;  %12674 = vmatprep.subr.bf16.mxu1 %v14883_v56  ;;  %v13867_v8 = vld [vmem:[#allocation5 + $0x180] ss:$12 sps:$4 sm:$0xff]  }
 0x8fc   :  { %5215 = vmatpush1.bf16.msra.mxu0 %v13863_v60  ;;  %12675 = vmatpush3.bf16.msra.mxu1 %v13866_v36  ;;  %v13870_v60 = vld [vmem:[#allocation5 + $0x188] ss:$12 sps:$4 sm:$0xff]  }
 0x8fd   :  { %5442 = vmatprep.subr.bf16.mxu0 %v13869_v18  ;;  %12680 = vmatprep.subr.bf16.mxu1 %v14883_v56  ;;  %v13873_v36 = vld [vmem:[#allocation5 + $0x19c] ss:$12 sps:$4 sm:$0xff]   ;;  %v13871_v18 = vld [vmem:[#allocation5 + $0x198] ss:$12 sps:$4 sm:$0xff]  }
 0x991   :  { %v4771_v34 = vpop.f32.mrb[88].mxu1 }
 0x992   :  { %v12638_v14 = vpop.f32.mrb[89].mxu1  ;;  %v4772_v13 = vadd.f32 %v4771_v34, %v15132_v6  ;;  %v13874_v34 = vld [vmem:[#allocation5 + $0x1a0] ss:$12 sps:$4 sm:$0xff]  }
 0x993   :  { %v4774_v41 = vpop.f32.mrb[90].mxu1  ;;  %v13875_v14 = vld [vmem:[#allocation5 + $0x1b0] ss:$12 sps:$4 sm:$0xff]  }
 0x994   :  { %v12639_v62 = vpop.f32.mrb[91].mxu1  ;;  %v13878_v41 = vld [vmem:[#allocation5 + $0x1b8] ss:$12 sps:$4 sm:$0xff]  }
 0x995   :  { %v13881_v62 = vld [vmem:[#allocation5 + $0x1cc] ss:$12 sps:$4 sm:$0xff]  }
 0x9b1   :  { %v4971_v19 = vpop.f32.mrb[40].mxu0  ;;  %v5012_v4 = vpop.f32.mrb[92].mxu1 }
 0x9b2   :  { %v13136_v11 = vadd.f32 %v4971_v19, %v15119_v35  ;;  %v4973_v17 = vpop.f32.mrb[41].mxu0  ;;  %v12658_v50 = vpop.f32.mrb[93].mxu1  ;;  %v5032_v40 = vadd.f32 %v15352_v32, %v5012_v4  ;;  %v13879_v19 = vld [vmem:[#allocation5 + $0x1c8] ss:$12 sps:$4 sm:$0xff]   ;;  %v13882_v4 = vld [vmem:[#allocation5 + $0x1d0] ss:$12 sps:$4 sm:$0xff]  }
 0x9b3   :  { %v4975_v54 = vpop.f32.mrb[42].mxu0  ;;  %v5015_v10 = vpop.f32.mrb[94].mxu1  ;;  %v13137_v45 = vadd.f32 %v4973_v17, %v15123_v51  ;;  %v13883_v17 = vld [vmem:[#allocation5 + $0x1e0] ss:$12 sps:$4 sm:$0xff]   ;;  %v13886_v50 = vld [vmem:[#allocation5 + $0x1e8] ss:$12 sps:$4 sm:$0xff]  }
 0x9b4   :  { %v11325_v3 = vmul.f32 -1.442695, %v13136_v11  ;;  %v4976_v58 = vpop.f32.mrb[43].mxu0  ;;  %v12659_v1 = vpop.f32.mrb[95].mxu1  ;;  %v13885_v11 = vld [vmem:[#allocation5 + $0x1e4] ss:$12 sps:$4 sm:$0xff]  }
 0x9b5   :  { %v11326_v49 = vmul.f32 -1.442695, %v13137_v45  ;;  %v13889_v54 = vld [vmem:[#allocation5 + $0x1fc] ss:$12 sps:$4 sm:$0xff]   ;;  %v13887_v10 = vld [vmem:[#allocation5 + $0x1f8] ss:$12 sps:$4 sm:$0xff]  }
 0x9b6   :  { %14647 = vpow2.f32 %v11325_v3  ;;  %v13890_v3 = vld [vmem:[#allocation5 + $0x200] ss:$12 sps:$4 sm:$0xff]   ;;  %v13891_v1 = vld [vmem:[#allocation5 + $0x210] ss:$12 sps:$4 sm:$0xff]   ;;  %v13894_v45 = vld [vmem:[#allocation5 + $0x218] ss:$12 sps:$4 sm:$0xff]  }
 0x9b7   :  { %14649 = vpow2.f32 %v11326_v49  ;;  %v13893_v58 = vld [vmem:[#allocation5 + $0x214] ss:$12 sps:$4 sm:$0xff]   ;;  %v13897_v49 = vld [vmem:[#allocation5 + $0x22c] ss:$12 sps:$4 sm:$0xff]  }
 0x9c0   :  { %v14648_v23 = vpop.eup %14647 }
 0x9c1   :  { %v5026_v25 = vadd.f32 1.0, %v14648_v23  ;;  %v14650_v33 = vpop.eup %14649  ;;  %v13895_v23 = vld [vmem:[#allocation5 + $0x228] ss:$12 sps:$4 sm:$0xff]  }
 0x9c2   :  { %v5027_v15 = vadd.f32 1.0, %v14650_v33  ;;  %v13901_v33 = vld [vmem:[#allocation5 + $0x4] ss:$12 sps:$4 sm:$0xff]  }
 0x9c3   :  { %14651 = vrcp.f32 %v5026_v25  ;;  %v13898_v25 = vld [vmem:[#allocation5 + $0x230] ss:$12 sps:$4 sm:$0xff]  }
 0x9cd   :  { %v14652_v37 = vpop.eup %14651 }
 0x9ce   :  { %v5033_v53 = vmul.f32 %v14652_v37, %v5032_v40  ;;  %v13899_v40 = vld [vmem:[#allocation5] ss:$12 sps:$4 sm:$0xff]   ;;  %v13902_v37 = vld [vmem:[#allocation5 + $0x8] ss:$12 sps:$4 sm:$0xff]  }
 0x9d0   :  { %v5034_v16 = vadd.f32 %v5033_v53, %v4772_v13  ;;  %v5281_v13 = vpack.c.bf16 %v15414_v52, %v15414_v52  ;;  %v13905_v53 = vld [vmem:[#allocation5 + $0x1c] ss:$12 sps:$4 sm:$0xff]  }
 0x9d2   :  { %14653 = vtanh.f32 %v5034_v16  ;;  %v13903_v16 = vld [vmem:[#allocation5 + $0x18] ss:$12 sps:$4 sm:$0xff]  }
 0x9d3   :  { %14655 = vrcp.f32 %v5027_v15  ;;  %v13906_v15 = vld [vmem:[#allocation5 + $0x20] ss:$12 sps:$4 sm:$0xff]  }
 0x9dc   :  { %v14654_v28 = vpop.eup %14653 }
 0x9dd   :  { %v5036_v46 = vsub.f32 %v15357_v30, %v14654_v28  ;;  %v14656_v47 = vpop.eup %14655  ;;  %v13877_v30 = vld [vmem:[#allocation5 + $0x1b4] ss:$12 sps:$4 sm:$0xff]  }
 0x9df   :  { %v5037_v44 = vmul.f32 %v14656_v47, %v5036_v46  ;;  %v13907_v46 = vld [vmem:[#allocation5 + $0x30] ss:$12 sps:$4 sm:$0xff]   ;;  %v13910_v47 = vld [vmem:[#allocation5 + $0x38] ss:$12 sps:$4 sm:$0xff]  }
 0x9e1   :  { %v15461_v55 = vadd.f32 %v14654_v28, %v5037_v44  ;;  %v13909_v28 = vld [vmem:[#allocation5 + $0x34] ss:$12 sps:$4 sm:$0xff]   ;;  %v13913_v44 = vld [vmem:[#allocation5 + $0x4c] ss:$12 sps:$4 sm:$0xff]  }
 0x9e3   :  { %v15465_v32 = vpack.c.bf16 %v15461_v55, %v15461_v55 }
 0x9e5   :  { %5233 = vmatmul.mubr.bf16.vlgmr.msra.gmra.mrb[44].mxu0 %v15465_v32  ;;  %12677 = vmatmul.mubr.bf16.vlgmr.msra.gmra.mrb[96].mxu1 %v15465_v32 }
 0x9e6   :  { %5443 = vmatpush1.bf16.msra.mxu0 %v13867_v8  ;;  %12681 = vmatpush3.bf16.msra.mxu1 %v13870_v60  ;;  %v13911_v8 = vld [vmem:[#allocation5 + $0x48] ss:$12 sps:$4 sm:$0xff]   ;;  %v13914_v60 = vld [vmem:[#allocation5 + $0x50] ss:$12 sps:$4 sm:$0xff]  }
 0x9e7   :  { %5444 = vmatprep.subr.bf16.mxu0 %v13873_v36  ;;  %12682 = vmatprep.subr.bf16.mxu1 %v14883_v56  ;;  %v13917_v36 = vld [vmem:[#allocation5 + $0x64] ss:$12 sps:$4 sm:$0xff]  }
 0x9e8   :  { %5474 = vmatprep.mubr.bf16.mxu0 %v14882_v0  ;;  %12696 = vmatprep.mubr.msk.bf16.mxu1 %vm14884_vm0, %v14883_v56 }
 0x9ea   :  { %5445 = vmatpush1.bf16.msra.mxu0 %v13871_v18  ;;  %12683 = vmatpush3.bf16.msra.mxu1 %v13874_v34  ;;  %v13915_v18 = vld [vmem:[#allocation5 + $0x60] ss:$12 sps:$4 sm:$0xff]   ;;  %v13918_v34 = vld [vmem:[#allocation5 + $0x68] ss:$12 sps:$4 sm:$0xff]  }
 0x9eb   :  { %5446 = vmatprep.subr.bf16.mxu0 %v13877_v30  ;;  %12684 = vmatprep.subr.bf16.mxu1 %v14883_v56  ;;  %v13921_v30 = vld [vmem:[#allocation5 + $0x7c] ss:$12 sps:$4 sm:$0xff]  }
 0x9ee   :  { %5447 = vmatpush1.bf16.msra.mxu0 %v13875_v14  ;;  %12685 = vmatpush3.bf16.msra.mxu1 %v13878_v41  ;;  %v13919_v14 = vld [vmem:[#allocation5 + $0x78] ss:$12 sps:$4 sm:$0xff]   ;;  %v13922_v41 = vld [vmem:[#allocation5 + $0x80] ss:$12 sps:$4 sm:$0xff]  }
 0x9ef   :  { %5448 = vmatprep.subr.bf16.mxu0 %v13881_v62  ;;  %12686 = vmatprep.subr.bf16.mxu1 %v14883_v56  ;;  %v13925_v62 = vld [vmem:[#allocation5 + $0x94] ss:$12 sps:$4 sm:$0xff]  }
 0x9f2   :  { %5449 = vmatpush1.bf16.msra.mxu0 %v13879_v19  ;;  %12687 = vmatpush3.bf16.msra.mxu1 %v13882_v4  ;;  %v13923_v19 = vld [vmem:[#allocation5 + $0x90] ss:$12 sps:$4 sm:$0xff]   ;;  %v13926_v4 = vld [vmem:[#allocation5 + $0x98] ss:$12 sps:$4 sm:$0xff]  }
 0x9f3   :  { %5450 = vmatprep.subr.bf16.mxu0 %v13885_v11  ;;  %12688 = vmatprep.subr.bf16.mxu1 %v14883_v56  ;;  %v13929_v11 = vld [vmem:[#allocation5 + $0xac] ss:$12 sps:$4 sm:$0xff]  }
 0x9f6   :  { %5451 = vmatpush1.bf16.msra.mxu0 %v13883_v17  ;;  %12689 = vmatpush3.bf16.msra.mxu1 %v13886_v50  ;;  %v13927_v17 = vld [vmem:[#allocation5 + $0xa8] ss:$12 sps:$4 sm:$0xff]   ;;  %v13930_v50 = vld [vmem:[#allocation5 + $0xb0] ss:$12 sps:$4 sm:$0xff]  }
 0x9f7   :  { %5452 = vmatprep.subr.bf16.mxu0 %v13889_v54  ;;  %12690 = vmatprep.subr.bf16.mxu1 %v14883_v56  ;;  %v13933_v54 = vld [vmem:[#allocation3 + $0xc4] ss:$12 sps:$4 sm:$0xff]  }
 0x9fa   :  { %5453 = vmatpush1.bf16.msra.mxu0 %v13887_v10  ;;  %12691 = vmatpush3.bf16.msra.mxu1 %v13890_v3  ;;  %v13931_v10 = vld [vmem:[#allocation3 + $0xc0] ss:$12 sps:$4 sm:$0xff]   ;;  %v13934_v3 = vld [vmem:[#allocation3 + $0xc8] ss:$12 sps:$4 sm:$0xff]  }
 0x9fb   :  { %5454 = vmatprep.subr.bf16.mxu0 %v13893_v58  ;;  %12692 = vmatprep.subr.bf16.mxu1 %v14883_v56  ;;  %v13937_v58 = vld [vmem:[#allocation3 + $0xdc] ss:$12 sps:$4 sm:$0xff]  }
 0x9fe   :  { %5455 = vmatpush1.bf16.msra.mxu0 %v13891_v1  ;;  %12693 = vmatpush3.bf16.msra.mxu1 %v13894_v45  ;;  %v13935_v1 = vld [vmem:[#allocation3 + $0xd8] ss:$12 sps:$4 sm:$0xff]   ;;  %v13938_v45 = vld [vmem:[#allocation3 + $0xe0] ss:$12 sps:$4 sm:$0xff]  }
 0x9ff   :  { %5456 = vmatprep.subr.bf16.mxu0 %v13897_v49  ;;  %12694 = vmatprep.subr.bf16.mxu1 %v14883_v56  ;;  %v13939_v49 = vld [vmem:[#allocation3 + $0xf0] ss:$12 sps:$4 sm:$0xff]  }
 0xa02   :  { %5457 = vmatpush1.bf16.msra.mxu0 %v13895_v23  ;;  %12695 = vmatpush3.bf16.msra.mxu1 %v13898_v25  ;;  %v13942_v23 = vld [vmem:[#allocation3 + $0xf8] ss:$12 sps:$4 sm:$0xff]  }
 0xa03   :  { %5705 = vmatprep.subr.bf16.mxu0 %v13901_v33  ;;  %12700 = vmatprep.subr.bf16.mxu1 %v14883_v56  ;;  %v13945_v25 = vld [vmem:[#allocation3 + $0x10c] ss:$12 sps:$4 sm:$0xff]   ;;  %v13943_v33 = vld [vmem:[#allocation3 + $0x108] ss:$12 sps:$4 sm:$0xff]  }
 0xa05   :  { %5475 = vmatmul.mubr.bf16.vlgmr.msra.gmra.mrb[44].mxu0 %v5281_v13  ;;  %12697 = vmatmul.mubr.bf16.vlgmr.msra.gmra.mrb[100].mxu1 %v5281_v13  ;;  %v13949_v13 = vld [vmem:[#allocation3 + $0x124] ss:$12 sps:$4 sm:$0xff]  }
 0xa06   :  { %5706 = vmatpush1.bf16.msra.mxu0 %v13899_v40  ;;  %12701 = vmatpush3.bf16.msra.mxu1 %v13902_v37  ;;  %v13946_v40 = vld [vmem:[#allocation3 + $0x110] ss:$12 sps:$4 sm:$0xff]   ;;  %v13947_v37 = vld [vmem:[#allocation3 + $0x120] ss:$12 sps:$4 sm:$0xff]  }
 0xa07   :  { %5707 = vmatprep.subr.bf16.mxu0 %v13905_v53  ;;  %12702 = vmatprep.subr.bf16.mxu1 %v14883_v56  ;;  %v13950_v53 = vld [vmem:[#allocation3 + $0x128] ss:$12 sps:$4 sm:$0xff]  }
 0xa08   :  { %5737 = vmatprep.mubr.bf16.mxu0 %v14882_v0  ;;  %12716 = vmatprep.mubr.msk.bf16.mxu1 %vm14884_vm0, %v14883_v56 }
 0xa0a   :  { %5708 = vmatpush1.bf16.msra.mxu0 %v13903_v16  ;;  %12703 = vmatpush3.bf16.msra.mxu1 %v13906_v15  ;;  %v13953_v16 = vld [vmem:[#allocation3 + $0x13c] ss:$12 sps:$4 sm:$0xff]   ;;  %v13951_v15 = vld [vmem:[#allocation3 + $0x138] ss:$12 sps:$4 sm:$0xff]  }
 0xa0b   :  { %5709 = vmatprep.subr.bf16.mxu0 %v13909_v28  ;;  %12704 = vmatprep.subr.bf16.mxu1 %v14883_v56  ;;  %v13954_v28 = vld [vmem:[#allocation3 + $0x140] ss:$12 sps:$4 sm:$0xff]  }
 0xa0e   :  { %5710 = vmatpush1.bf16.msra.mxu0 %v13907_v46  ;;  %12705 = vmatpush3.bf16.msra.mxu1 %v13910_v47  ;;  %v13957_v46 = vld [vmem:[#allocation3 + $0x154] ss:$12 sps:$4 sm:$0xff]   ;;  %v13955_v47 = vld [vmem:[#allocation3 + $0x150] ss:$12 sps:$4 sm:$0xff]  }
 0xa0f   :  { %5711 = vmatprep.subr.bf16.mxu0 %v13913_v44  ;;  %12706 = vmatprep.subr.bf16.mxu1 %v14883_v56  ;;  %v13958_v44 = vld [vmem:[#allocation3 + $0x158] ss:$12 sps:$4 sm:$0xff]  }
 0xa12   :  { %5712 = vmatpush1.bf16.msra.mxu0 %v13911_v8  ;;  %12707 = vmatpush3.bf16.msra.mxu1 %v13914_v60  ;;  %v13961_v8 = vld [vmem:[#allocation3 + $0x16c] ss:$12 sps:$4 sm:$0xff]   ;;  %v13959_v60 = vld [vmem:[#allocation3 + $0x168] ss:$12 sps:$4 sm:$0xff]  }
 0xa13   :  { %5713 = vmatprep.subr.bf16.mxu0 %v13917_v36  ;;  %12708 = vmatprep.subr.bf16.mxu1 %v14883_v56  ;;  %v13962_v36 = vld [vmem:[#allocation3 + $0x170] ss:$12 sps:$4 sm:$0xff]  }
 0xa16   :  { %5714 = vmatpush1.bf16.msra.mxu0 %v13915_v18  ;;  %12709 = vmatpush3.bf16.msra.mxu1 %v13918_v34  ;;  %v13965_v18 = vld [vmem:[#allocation5 + $0xc4] ss:$12 sps:$4 sm:$0xff]  }
 0xa17   :  { %5715 = vmatprep.subr.bf16.mxu0 %v13921_v30  ;;  %12710 = vmatprep.subr.bf16.mxu1 %v14883_v56 }
 0xa1a   :  { %5716 = vmatpush1.bf16.msra.mxu0 %v13919_v14  ;;  %12711 = vmatpush3.bf16.msra.mxu1 %v13922_v41 }
 0xa1b   :  { %5717 = vmatprep.subr.bf16.mxu0 %v13925_v62  ;;  %12712 = vmatprep.subr.bf16.mxu1 %v14883_v56 }
 0xa1e   :  { %5718 = vmatpush1.bf16.msra.mxu0 %v13923_v19  ;;  %12713 = vmatpush3.bf16.msra.mxu1 %v13926_v4 }
 0xa1f   :  { %5719 = vmatprep.subr.bf16.mxu0 %v13929_v11  ;;  %12714 = vmatprep.subr.bf16.mxu1 %v14883_v56 }
 0xa22   :  { %5720 = vmatpush1.bf16.msra.mxu0 %v13927_v17  ;;  %12715 = vmatpush3.bf16.msra.mxu1 %v13930_v50 }
 0xa23   :  { %12720 = vmatprep.subr.bf16.mxu1 %v14883_v56  ;;  %5968 = vmatprep.subr.bf16.mxu0 %v13933_v54 }
 0xa25   :  { %5738 = vmatmul.mubr.bf16.vlgmr.msra.gmra.mrb[48].mxu0 %v15428_v31  ;;  %12717 = vmatmul.mubr.bf16.vlgmr.msra.gmra.mrb[104].mxu1 %v15428_v31  ;;  %v13941_v31 = vld [vmem:[#allocation3 + $0xf4] ss:$12 sps:$4 sm:$0xff]  }
 0xa26   :  { %6000 = vmatprep.mubr.bf16.mxu0 %v14882_v0  ;;  %12736 = vmatprep.mubr.msk.bf16.mxu1 %vm14884_vm0, %v14883_v56 }
 0xa27   :  { %5969 = vmatpush1.bf16.msra.mxu0 %v13931_v10  ;;  %12721 = vmatpush3.bf16.msra.mxu1 %v13934_v3 }
 0xa28   :  { %12722 = vmatprep.subr.bf16.mxu1 %v14883_v56  ;;  %5970 = vmatprep.subr.bf16.mxu0 %v13937_v58 }
 0xa2b   :  { %5971 = vmatpush1.bf16.msra.mxu0 %v13935_v1  ;;  %12723 = vmatpush3.bf16.msra.mxu1 %v13938_v45 }
 0xa2c   :  { %12724 = vmatprep.subr.bf16.mxu1 %v14883_v56  ;;  %5972 = vmatprep.subr.bf16.mxu0 %v13941_v31 }
 0xa2f   :  { %5973 = vmatpush1.bf16.msra.mxu0 %v13939_v49  ;;  %12725 = vmatpush3.bf16.msra.mxu1 %v13942_v23 }
 0xa30   :  { %12726 = vmatprep.subr.bf16.mxu1 %v14883_v56  ;;  %5974 = vmatprep.subr.bf16.mxu0 %v13945_v25 }
 0xa33   :  { %5975 = vmatpush1.bf16.msra.mxu0 %v13943_v33  ;;  %12727 = vmatpush3.bf16.msra.mxu1 %v13946_v40 }
 0xa34   :  { %12728 = vmatprep.subr.bf16.mxu1 %v14883_v56  ;;  %5976 = vmatprep.subr.bf16.mxu0 %v13949_v13 }
 0xa37   :  { %5977 = vmatpush1.bf16.msra.mxu0 %v13947_v37  ;;  %12729 = vmatpush3.bf16.msra.mxu1 %v13950_v53 }
 0xa38   :  { %5978 = vmatprep.subr.bf16.mxu0 %v13953_v16  ;;  %12730 = vmatprep.subr.bf16.mxu1 %v14883_v56 }
 0xa3b   :  { %5979 = vmatpush1.bf16.msra.mxu0 %v13951_v15  ;;  %12731 = vmatpush3.bf16.msra.mxu1 %v13954_v28 }
 0xa3c   :  { %5980 = vmatprep.subr.bf16.mxu0 %v13957_v46  ;;  %12732 = vmatprep.subr.bf16.mxu1 %v14883_v56 }
 0xa3f   :  { %5981 = vmatpush1.bf16.msra.mxu0 %v13955_v47  ;;  %12733 = vmatpush3.bf16.msra.mxu1 %v13958_v44 }
 0xa40   :  { %5982 = vmatprep.subr.bf16.mxu0 %v13961_v8  ;;  %12734 = vmatprep.subr.bf16.mxu1 %v14883_v56 }
 0xa43   :  { %5983 = vmatpush1.bf16.msra.mxu0 %v13959_v60  ;;  %12735 = vmatpush3.bf16.msra.mxu1 %v13962_v36 }
 0xa44   :  { %6209 = vmatprep.subr.bf16.mxu0 %v13965_v18  ;;  %12740 = vmatprep.subr.bf16.mxu1 %v14883_v56 }
 0xab8   :  { %v5275_v34 = vpop.f32.mrb[96].mxu1 }
 0xab9   :  { %v12678_v30 = vpop.f32.mrb[97].mxu1  ;;  %v5276_v40 = vadd.f32 %v5275_v34, %v15204_v42 }
 0xaba   :  { %v5278_v14 = vpop.f32.mrb[98].mxu1 }
 0xabb   :  { %v12679_v41 = vpop.f32.mrb[99].mxu1 }
 0xad8   :  { %v5476_v62 = vpop.f32.mrb[44].mxu0  ;;  %v5517_v19 = vpop.f32.mrb[100].mxu1 }
 0xad9   :  { %v13138_v4 = vadd.f32 %v5476_v62, %v15191_v12  ;;  %v5478_v11 = vpop.f32.mrb[45].mxu0  ;;  %v12698_v17 = vpop.f32.mrb[101].mxu1  ;;  %v5537_v25 = vadd.f32 %v15407_v43, %v5517_v19 }
 0xada   :  { %v5480_v50 = vpop.f32.mrb[46].mxu0  ;;  %v5520_v54 = vpop.f32.mrb[102].mxu1  ;;  %v13139_v1 = vadd.f32 %v5478_v11, %v15195_v29 }
 0xadb   :  { %v11375_v10 = vmul.f32 -1.442695, %v13138_v4  ;;  %v5481_v3 = vpop.f32.mrb[47].mxu0  ;;  %v12699_v58 = vpop.f32.mrb[103].mxu1 }
 0xadc   :  { %v11376_v45 = vmul.f32 -1.442695, %v13139_v1 }
 0xadd   :  { %14657 = vpow2.f32 %v11375_v10 }
 0xade   :  { %14659 = vpow2.f32 %v11376_v45 }
 0xae7   :  { %v14658_v31 = vpop.eup %14657 }
 0xae8   :  { %v5531_v49 = vadd.f32 1.0, %v14658_v31  ;;  %v14660_v23 = vpop.eup %14659 }
 0xae9   :  { %v5532_v53 = vadd.f32 1.0, %v14660_v23  ;;  %v13966_v23 = vld [vmem:[#allocation5 + $0xc8] ss:$12 sps:$4 sm:$0xff]  }
 0xaea   :  { %14661 = vrcp.f32 %v5531_v49  ;;  %v13963_v49 = vld [vmem:[#allocation5 + $0xc0] ss:$12 sps:$4 sm:$0xff]  }
 0xaf4   :  { %v14662_v33 = vpop.eup %14661 }
 0xaf5   :  { %v5538_v37 = vmul.f32 %v14662_v33, %v5537_v25  ;;  %v13970_v33 = vld [vmem:[#allocation5 + $0xe0] ss:$12 sps:$4 sm:$0xff]  }
 0xaf7   :  { %v5539_v13 = vadd.f32 %v5538_v37, %v5276_v40  ;;  %v13971_v40 = vld [vmem:[#allocation5 + $0xf0] ss:$12 sps:$4 sm:$0xff]   ;;  %v13974_v37 = vld [vmem:[#allocation5 + $0xf8] ss:$12 sps:$4 sm:$0xff]  }
 0xaf8   :  { %v5739_v16 = vpop.f32.mrb[48].mxu0  ;;  %v5780_v15 = vpop.f32.mrb[104].mxu1 }
 0xaf9   :  { %14663 = vtanh.f32 %v5539_v13  ;;  %v5786_v28 = vadd.f32 %v5739_v16, %v15039_v57  ;;  %v5741_v46 = vpop.f32.mrb[49].mxu0  ;;  %v12718_v47 = vpop.f32.mrb[105].mxu1  ;;  %v5800_v11 = vadd.f32 %v15419_v21, %v5780_v15  ;;  %v13969_v21 = vld [vmem:[#allocation5 + $0xdc] ss:$12 sps:$4 sm:$0xff]   ;;  %v13977_v13 = vld [vmem:[#allocation5 + $0x10c] ss:$12 sps:$4 sm:$0xff]  }
 0xafa   :  { %v5787_v44 = vadd.f32 %v5741_v46, %v15041_v59  ;;  %v5743_v8 = vpop.f32.mrb[50].mxu0  ;;  %v5783_v60 = vpop.f32.mrb[106].mxu1  ;;  %14665 = vrcp.f32 %v5532_v53  ;;  %v13975_v53 = vld [vmem:[#allocation5 + $0x108] ss:$12 sps:$4 sm:$0xff]   ;;  %v13978_v16 = vld [vmem:[#allocation5 + $0x110] ss:$12 sps:$4 sm:$0xff]  }
 0xafb   :  { %v11401_v36 = vmul.f32 -1.442695, %v5786_v28  ;;  %v5744_v43 = vpop.f32.mrb[51].mxu0  ;;  %v12719_v18 = vpop.f32.mrb[107].mxu1  ;;  %v13981_v15 = vld [vmem:[#allocation5 + $0x124] ss:$12 sps:$4 sm:$0xff]  }
 0xafc   :  { %v11402_v41 = vmul.f32 -1.442695, %v5787_v44  ;;  %v13979_v28 = vld [vmem:[#allocation5 + $0x120] ss:$12 sps:$4 sm:$0xff]   ;;  %v13982_v46 = vld [vmem:[#allocation5 + $0x128] ss:$12 sps:$4 sm:$0xff]  }
 0xafd   :  { %14667 = vpow2.f32 %v11401_v36  ;;  %v13985_v47 = vld [vmem:[#allocation5 + $0x13c] ss:$12 sps:$4 sm:$0xff]   ;;  %v13983_v44 = vld [vmem:[#allocation5 + $0x138] ss:$12 sps:$4 sm:$0xff]   ;;  %v13986_v8 = vld [vmem:[#allocation5 + $0x140] ss:$12 sps:$4 sm:$0xff]  }
 0xafe   :  { %14669 = vpow2.f32 %v11402_v41  ;;  %v13989_v60 = vld [vmem:[#allocation5 + $0x154] ss:$12 sps:$4 sm:$0xff]   ;;  %v13987_v36 = vld [vmem:[#allocation5 + $0x150] ss:$12 sps:$4 sm:$0xff]   ;;  %v13990_v43 = vld [vmem:[#allocation5 + $0x158] ss:$12 sps:$4 sm:$0xff]  }
 0xaff   :  { %v13993_v18 = vld [vmem:[#allocation5 + $0x16c] ss:$12 sps:$4 sm:$0xff]  }
 0xb00   :  { %v13995_v41 = vld [vmem:[#allocation3 + $0x180] ss:$12 sps:$4 sm:$0xff]  }
 0xb03   :  { %v14664_v34 = vpop.eup %14663 }
 0xb04   :  { %v5541_v30 = vsub.f32 %v15414_v52, %v14664_v34  ;;  %v14666_v14 = vpop.eup %14665 }
 0xb06   :  { %v5542_v62 = vmul.f32 %v14666_v14, %v5541_v30  ;;  %v13994_v30 = vld [vmem:[#allocation5 + $0x170] ss:$12 sps:$4 sm:$0xff]  }
 0xb07   :  { %v14668_v19 = vpop.eup %14667  ;;  %v13997_v14 = vld [vmem:[#allocation3 + $0x184] ss:$12 sps:$4 sm:$0xff]  }
 0xb08   :  { %v5794_v4 = vadd.f32 1.0, %v14668_v19  ;;  %v15513_v57 = vadd.f32 %v14664_v34, %v5542_v62  ;;  %v14670_v59 = vpop.eup %14669  ;;  %v13991_v34 = vld [vmem:[#allocation5 + $0x168] ss:$12 sps:$4 sm:$0xff]  }
 0xb09   :  { %v5795_v10 = vadd.f32 1.0, %v14670_v59  ;;  %v13998_v62 = vld [vmem:[#allocation3 + $0x188] ss:$12 sps:$4 sm:$0xff]   ;;  %v14002_v59 = vld [vmem:[#allocation3 + $0x1a0] ss:$12 sps:$4 sm:$0xff]  }
 0xb0a   :  { %14671 = vrcp.f32 %v5794_v4  ;;  %v14001_v19 = vld [vmem:[#allocation3 + $0x19c] ss:$12 sps:$4 sm:$0xff]   ;;  %v13999_v4 = vld [vmem:[#allocation3 + $0x198] ss:$12 sps:$4 sm:$0xff]  }
 0xb14   :  { %v14672_v17 = vpop.eup %14671 }
 0xb15   :  { %v5801_v50 = vmul.f32 %v14672_v17, %v5800_v11  ;;  %v14003_v11 = vld [vmem:[#allocation3 + $0x1b0] ss:$12 sps:$4 sm:$0xff]   ;;  %v14006_v17 = vld [vmem:[#allocation3 + $0x1b8] ss:$12 sps:$4 sm:$0xff]  }
 0xb17   :  { %v5802_v54 = vadd.f32 %v5801_v50, %v15066_v22  ;;  %v13967_v22 = vld [vmem:[#allocation5 + $0xd8] ss:$12 sps:$4 sm:$0xff]  }
 0xb18   :  { %v14009_v50 = vld [vmem:[#allocation3 + $0x1cc] ss:$12 sps:$4 sm:$0xff]  }
 0xb19   :  { %14673 = vtanh.f32 %v5802_v54  ;;  %v14007_v54 = vld [vmem:[#allocation3 + $0x1c8] ss:$12 sps:$4 sm:$0xff]  }
 0xb1a   :  { %14675 = vrcp.f32 %v5795_v10  ;;  %v14010_v10 = vld [vmem:[#allocation3 + $0x1d0] ss:$12 sps:$4 sm:$0xff]  }
 0xb23   :  { %v14674_v3 = vpop.eup %14673 }
 0xb24   :  { %v5804_v58 = vsub.f32 %v15424_v38, %v14674_v3  ;;  %v14676_v1 = vpop.eup %14675  ;;  %v13973_v38 = vld [vmem:[#allocation5 + $0xf4] ss:$12 sps:$4 sm:$0xff]  }
 0xb26   :  { %v5805_v45 = vmul.f32 %v14676_v1, %v5804_v58  ;;  %v14013_v58 = vld [vmem:[#allocation3 + $0x1e4] ss:$12 sps:$4 sm:$0xff]   ;;  %v14014_v1 = vld [vmem:[#allocation3 + $0x1e8] ss:$12 sps:$4 sm:$0xff]  }
 0xb28   :  { %v15518_v31 = vadd.f32 %v14674_v3, %v5805_v45  ;;  %v14011_v3 = vld [vmem:[#allocation3 + $0x1e0] ss:$12 sps:$4 sm:$0xff]   ;;  %v14017_v45 = vld [vmem:[#allocation3 + $0x1fc] ss:$12 sps:$4 sm:$0xff]  }
 0xb2a   :  { %v15522_v25 = vpack.c.bf16 %v15518_v31, %v15518_v31 }
 0xb2c   :  { %6001 = vmatmul.mubr.bf16.vlgmr.msra.gmra.mrb[52].mxu0 %v15522_v25  ;;  %12737 = vmatmul.mubr.bf16.vlgmr.msra.gmra.mrb[108].mxu1 %v15522_v25 }
 0xb2d   :  { %6210 = vmatpush1.bf16.msra.mxu0 %v13963_v49  ;;  %12741 = vmatpush3.bf16.msra.mxu1 %v13966_v23  ;;  %v14015_v49 = vld [vmem:[#allocation3 + $0x1f8] ss:$12 sps:$4 sm:$0xff]   ;;  %v14018_v23 = vld [vmem:[#allocation3 + $0x200] ss:$12 sps:$4 sm:$0xff]  }
 0xb2e   :  { %6211 = vmatprep.subr.bf16.mxu0 %v13969_v21  ;;  %12742 = vmatprep.subr.bf16.mxu1 %v14883_v56  ;;  %v14021_v21 = vld [vmem:[#allocation3 + $0x214] ss:$12 sps:$4 sm:$0xff]  }
 0xb2f   :  { %6241 = vmatprep.mubr.bf16.mxu0 %v14882_v0  ;;  %12756 = vmatprep.mubr.msk.bf16.mxu1 %vm14884_vm0, %v14883_v56 }
 0xb31   :  { %6212 = vmatpush1.bf16.msra.mxu0 %v13967_v22  ;;  %12743 = vmatpush3.bf16.msra.mxu1 %v13970_v33  ;;  %v14019_v22 = vld [vmem:[#allocation3 + $0x210] ss:$12 sps:$4 sm:$0xff]   ;;  %v14022_v33 = vld [vmem:[#allocation3 + $0x218] ss:$12 sps:$4 sm:$0xff]  }
 0xb32   :  { %6213 = vmatprep.subr.bf16.mxu0 %v13973_v38  ;;  %12744 = vmatprep.subr.bf16.mxu1 %v14883_v56  ;;  %v14025_v38 = vld [vmem:[#allocation3 + $0x22c] ss:$12 sps:$4 sm:$0xff]  }
 0xb35   :  { %6214 = vmatpush1.bf16.msra.mxu0 %v13971_v40  ;;  %12745 = vmatpush3.bf16.msra.mxu1 %v13974_v37  ;;  %v14023_v40 = vld [vmem:[#allocation3 + $0x228] ss:$12 sps:$4 sm:$0xff]   ;;  %v14026_v37 = vld [vmem:[#allocation3 + $0x230] ss:$12 sps:$4 sm:$0xff]  }
 0xb36   :  { %6215 = vmatprep.subr.bf16.mxu0 %v13977_v13  ;;  %12746 = vmatprep.subr.bf16.mxu1 %v14883_v56  ;;  %v14029_v13 = vld [vmem:[#allocation5 + $0x184] ss:$12 sps:$4 sm:$0xff]  }
 0xb39   :  { %6216 = vmatpush1.bf16.msra.mxu0 %v13975_v53  ;;  %12747 = vmatpush3.bf16.msra.mxu1 %v13978_v16 }
 0xb3a   :  { %6217 = vmatprep.subr.bf16.mxu0 %v13981_v15  ;;  %12748 = vmatprep.subr.bf16.mxu1 %v14883_v56 }
 0xb3d   :  { %6218 = vmatpush1.bf16.msra.mxu0 %v13979_v28  ;;  %12749 = vmatpush3.bf16.msra.mxu1 %v13982_v46 }
 0xb3e   :  { %6219 = vmatprep.subr.bf16.mxu0 %v13985_v47  ;;  %12750 = vmatprep.subr.bf16.mxu1 %v14883_v56 }
 0xb41   :  { %6220 = vmatpush1.bf16.msra.mxu0 %v13983_v44  ;;  %12751 = vmatpush3.bf16.msra.mxu1 %v13986_v8 }
 0xb42   :  { %6221 = vmatprep.subr.bf16.mxu0 %v13989_v60  ;;  %12752 = vmatprep.subr.bf16.mxu1 %v14883_v56 }
 0xb45   :  { %6222 = vmatpush1.bf16.msra.mxu0 %v13987_v36  ;;  %12753 = vmatpush3.bf16.msra.mxu1 %v13990_v43 }
 0xb46   :  { %6223 = vmatprep.subr.bf16.mxu0 %v13993_v18  ;;  %12754 = vmatprep.subr.bf16.mxu1 %v14883_v56 }
 0xb49   :  { %6224 = vmatpush1.bf16.msra.mxu0 %v13991_v34  ;;  %12755 = vmatpush3.bf16.msra.mxu1 %v13994_v30 }
 0xb4a   :  { %12760 = vmatprep.subr.bf16.mxu1 %v14883_v56  ;;  %6472 = vmatprep.subr.bf16.mxu0 %v13997_v14 }
 0xb4c   :  { %6242 = vmatmul.mubr.bf16.vlgmr.msra.gmra.mrb[52].mxu0 %v15465_v32  ;;  %12757 = vmatmul.mubr.bf16.vlgmr.msra.gmra.mrb[112].mxu1 %v15465_v32  ;;  %v14005_v32 = vld [vmem:[#allocation3 + $0x1b4] ss:$12 sps:$4 sm:$0xff]  }
 0xb4d   :  { %6504 = vmatprep.mubr.bf16.mxu0 %v14882_v0  ;;  %12776 = vmatprep.mubr.msk.bf16.mxu1 %vm14884_vm0, %v14883_v56 }
 0xb4e   :  { %6473 = vmatpush1.bf16.msra.mxu0 %v13995_v41  ;;  %12761 = vmatpush3.bf16.msra.mxu1 %v13998_v62 }
 0xb4f   :  { %12762 = vmatprep.subr.bf16.mxu1 %v14883_v56  ;;  %6474 = vmatprep.subr.bf16.mxu0 %v14001_v19 }
 0xb52   :  { %6475 = vmatpush1.bf16.msra.mxu0 %v13999_v4  ;;  %12763 = vmatpush3.bf16.msra.mxu1 %v14002_v59  ;;  %v15555_v59 = vld [vmem:[%s15962_s5 + $0x1] ss:$0 sm:$0xff] }
 0xb53   :  { %12764 = vmatprep.subr.bf16.mxu1 %v14883_v56  ;;  %6476 = vmatprep.subr.bf16.mxu0 %v14005_v32 }
 0xb56   :  { %6477 = vmatpush1.bf16.msra.mxu0 %v14003_v11  ;;  %12765 = vmatpush3.bf16.msra.mxu1 %v14006_v17 }
 0xb57   :  { %12766 = vmatprep.subr.bf16.mxu1 %v14883_v56  ;;  %6478 = vmatprep.subr.bf16.mxu0 %v14009_v50 }
 0xb5a   :  { %6479 = vmatpush1.bf16.msra.mxu0 %v14007_v54  ;;  %12767 = vmatpush3.bf16.msra.mxu1 %v14010_v10 }
 0xb5b   :  { %12768 = vmatprep.subr.bf16.mxu1 %v14883_v56  ;;  %6480 = vmatprep.subr.bf16.mxu0 %v14013_v58 }
 0xb5e   :  { %6481 = vmatpush1.bf16.msra.mxu0 %v14011_v3  ;;  %12769 = vmatpush3.bf16.msra.mxu1 %v14014_v1 }
 0xb5f   :  { %6482 = vmatprep.subr.bf16.mxu0 %v14017_v45  ;;  %12770 = vmatprep.subr.bf16.mxu1 %v14883_v56 }
 0xb62   :  { %6483 = vmatpush1.bf16.msra.mxu0 %v14015_v49  ;;  %12771 = vmatpush3.bf16.msra.mxu1 %v14018_v23  ;;  %v14027_v23 = vld [vmem:[#allocation5 + $0x180] ss:$12 sps:$4 sm:$0xff]  }
 0xb63   :  { %6484 = vmatprep.subr.bf16.mxu0 %v14021_v21  ;;  %12772 = vmatprep.subr.bf16.mxu1 %v14883_v56  ;;  %v14030_v21 = vld [vmem:[#allocation5 + $0x188] ss:$12 sps:$4 sm:$0xff]  }
 0xb66   :  { %6485 = vmatpush1.bf16.msra.mxu0 %v14019_v22  ;;  %12773 = vmatpush3.bf16.msra.mxu1 %v14022_v33  ;;  %v14033_v33 = vld [vmem:[#allocation5 + $0x19c] ss:$12 sps:$4 sm:$0xff]  }
 0xb67   :  { %6486 = vmatprep.subr.bf16.mxu0 %v14025_v38  ;;  %12774 = vmatprep.subr.bf16.mxu1 %v14883_v56  ;;  %v14031_v38 = vld [vmem:[#allocation5 + $0x198] ss:$12 sps:$4 sm:$0xff]  }
 0xb6a   :  { %6487 = vmatpush1.bf16.msra.mxu0 %v14023_v40  ;;  %12775 = vmatpush3.bf16.msra.mxu1 %v14026_v37  ;;  %v14034_v40 = vld [vmem:[#allocation5 + $0x1a0] ss:$12 sps:$4 sm:$0xff]   ;;  %v14035_v37 = vld [vmem:[#allocation5 + $0x1b0] ss:$12 sps:$4 sm:$0xff]  }
 0xb6b   :  { %6714 = vmatprep.subr.bf16.mxu0 %v14029_v13  ;;  %12780 = vmatprep.subr.bf16.mxu1 %v14883_v56  ;;  %v14038_v13 = vld [vmem:[#allocation5 + $0x1b8] ss:$12 sps:$4 sm:$0xff]  }
 0xbff   :  { %v6043_v53 = vpop.f32.mrb[108].mxu1 }
 0xc00   :  { %v12738_v16 = vpop.f32.mrb[109].mxu1  ;;  %v6044_v17 = vadd.f32 %v6043_v53, %v15132_v6  ;;  %v14041_v53 = vld [vmem:[#allocation5 + $0x1cc] ss:$12 sps:$4 sm:$0xff]  }
 0xc01   :  { %v6046_v15 = vpop.f32.mrb[110].mxu1  ;;  %v14039_v16 = vld [vmem:[#allocation5 + $0x1c8] ss:$12 sps:$4 sm:$0xff]  }
 0xc02   :  { %v12739_v28 = vpop.f32.mrb[111].mxu1  ;;  %v14042_v15 = vld [vmem:[#allocation5 + $0x1d0] ss:$12 sps:$4 sm:$0xff]  }
 0xc03   :  { %v14045_v28 = vld [vmem:[#allocation5 + $0x1e4] ss:$12 sps:$4 sm:$0xff]  }
 0xc1f   :  { %v6243_v46 = vpop.f32.mrb[52].mxu0  ;;  %v6284_v47 = vpop.f32.mrb[112].mxu1 }
 0xc20   :  { %v13140_v44 = vadd.f32 %v6243_v46, %v15119_v35  ;;  %v6245_v8 = vpop.f32.mrb[53].mxu0  ;;  %v12758_v60 = vpop.f32.mrb[113].mxu1  ;;  %v6304_v32 = vadd.f32 %v15555_v59, %v6284_v47  ;;  %v14043_v46 = vld [vmem:[#allocation5 + $0x1e0] ss:$12 sps:$4 sm:$0xff]   ;;  %v14046_v47 = vld [vmem:[#allocation5 + $0x1e8] ss:$12 sps:$4 sm:$0xff]  }
 0xc21   :  { %v6247_v36 = vpop.f32.mrb[54].mxu0  ;;  %v6287_v43 = vpop.f32.mrb[114].mxu1  ;;  %v13141_v14 = vadd.f32 %v6245_v8, %v15123_v51  ;;  %v14047_v8 = vld [vmem:[#allocation5 + $0x1f8] ss:$12 sps:$4 sm:$0xff]   ;;  %v14050_v60 = vld [vmem:[#allocation5 + $0x200] ss:$12 sps:$4 sm:$0xff]  }
 0xc22   :  { %v11451_v18 = vmul.f32 -1.442695, %v13140_v44  ;;  %v6248_v34 = vpop.f32.mrb[55].mxu0  ;;  %v12759_v30 = vpop.f32.mrb[115].mxu1  ;;  %v14049_v44 = vld [vmem:[#allocation5 + $0x1fc] ss:$12 sps:$4 sm:$0xff]  }
 0xc23   :  { %v11452_v41 = vmul.f32 -1.442695, %v13141_v14  ;;  %v14053_v36 = vld [vmem:[#allocation5 + $0x214] ss:$12 sps:$4 sm:$0xff]   ;;  %v14051_v43 = vld [vmem:[#allocation5 + $0x210] ss:$12 sps:$4 sm:$0xff]  }
 0xc24   :  { %14677 = vpow2.f32 %v11451_v18  ;;  %v14054_v18 = vld [vmem:[#allocation5 + $0x218] ss:$12 sps:$4 sm:$0xff]   ;;  %v14055_v30 = vld [vmem:[#allocation5 + $0x228] ss:$12 sps:$4 sm:$0xff]   ;;  %v14058_v14 = vld [vmem:[#allocation5 + $0x230] ss:$12 sps:$4 sm:$0xff]  }
 0xc25   :  { %14679 = vpow2.f32 %v11452_v41  ;;  %v14057_v34 = vld [vmem:[#allocation5 + $0x22c] ss:$12 sps:$4 sm:$0xff]   ;;  %v14061_v41 = vld [vmem:[#allocation5 + $0x4] ss:$12 sps:$4 sm:$0xff]  }
 0xc2e   :  { %v14678_v62 = vpop.eup %14677 }
 0xc2f   :  { %v6298_v19 = vadd.f32 1.0, %v14678_v62  ;;  %v14680_v4 = vpop.eup %14679  ;;  %v14059_v62 = vld [vmem:[#allocation5] ss:$12 sps:$4 sm:$0xff]  }
 0xc30   :  { %v6299_v10 = vadd.f32 1.0, %v14680_v4  ;;  %v6553_v4 = vpack.c.bf16 %v15513_v57, %v15513_v57 }
 0xc31   :  { %14681 = vrcp.f32 %v6298_v19  ;;  %v14062_v19 = vld [vmem:[#allocation5 + $0x8] ss:$12 sps:$4 sm:$0xff]  }
 0xc3b   :  { %v14682_v11 = vpop.eup %14681 }
 0xc3c   :  { %v6305_v50 = vmul.f32 %v14682_v11, %v6304_v32  ;;  %v14065_v32 = vld [vmem:[#allocation5 + $0x1c] ss:$12 sps:$4 sm:$0xff]   ;;  %v14063_v11 = vld [vmem:[#allocation5 + $0x18] ss:$12 sps:$4 sm:$0xff]  }
 0xc3e   :  { %v6306_v54 = vadd.f32 %v6305_v50, %v6044_v17  ;;  %v14066_v17 = vld [vmem:[#allocation5 + $0x20] ss:$12 sps:$4 sm:$0xff]  }
 0xc3f   :  { %v14069_v50 = vld [vmem:[#allocation5 + $0x34] ss:$12 sps:$4 sm:$0xff]  }
 0xc40   :  { %14683 = vtanh.f32 %v6306_v54  ;;  %v14067_v54 = vld [vmem:[#allocation5 + $0x30] ss:$12 sps:$4 sm:$0xff]  }
 0xc41   :  { %14685 = vrcp.f32 %v6299_v10  ;;  %v14070_v10 = vld [vmem:[#allocation5 + $0x38] ss:$12 sps:$4 sm:$0xff]  }
 0xc4a   :  { %v14684_v3 = vpop.eup %14683 }
 0xc4b   :  { %v6308_v58 = vsub.f32 %v15461_v55, %v14684_v3  ;;  %v14686_v1 = vpop.eup %14685  ;;  %v14037_v55 = vld [vmem:[#allocation5 + $0x1b4] ss:$12 sps:$4 sm:$0xff]  }
 0xc4d   :  { %v6309_v45 = vmul.f32 %v14686_v1, %v6308_v58  ;;  %v14071_v58 = vld [vmem:[#allocation5 + $0x48] ss:$12 sps:$4 sm:$0xff]   ;;  %v14074_v1 = vld [vmem:[#allocation5 + $0x50] ss:$12 sps:$4 sm:$0xff]  }
 0xc4f   :  { %v15560_v49 = vadd.f32 %v14684_v3, %v6309_v45  ;;  %v14073_v3 = vld [vmem:[#allocation5 + $0x4c] ss:$12 sps:$4 sm:$0xff]   ;;  %v14077_v45 = vld [vmem:[#allocation5 + $0x64] ss:$12 sps:$4 sm:$0xff]  }
 0xc51   :  { %v15564_v22 = vpack.c.bf16 %v15560_v49, %v15560_v49 }
 0xc53   :  { %6505 = vmatmul.mubr.bf16.vlgmr.msra.gmra.mrb[56].mxu0 %v15564_v22  ;;  %12777 = vmatmul.mubr.bf16.vlgmr.msra.gmra.mrb[116].mxu1 %v15564_v22 }
 0xc54   :  { %6715 = vmatpush1.bf16.msra.mxu0 %v14027_v23  ;;  %12781 = vmatpush3.bf16.msra.mxu1 %v14030_v21  ;;  %v14075_v23 = vld [vmem:[#allocation5 + $0x60] ss:$12 sps:$4 sm:$0xff]   ;;  %v14078_v21 = vld [vmem:[#allocation5 + $0x68] ss:$12 sps:$4 sm:$0xff]  }
 0xc55   :  { %6716 = vmatprep.subr.bf16.mxu0 %v14033_v33  ;;  %12782 = vmatprep.subr.bf16.mxu1 %v14883_v56  ;;  %v14081_v33 = vld [vmem:[#allocation5 + $0x7c] ss:$12 sps:$4 sm:$0xff]  }
 0xc56   :  { %6746 = vmatprep.mubr.bf16.mxu0 %v14882_v0  ;;  %12796 = vmatprep.mubr.msk.bf16.mxu1 %vm14884_vm0, %v14883_v56 }
 0xc58   :  { %6717 = vmatpush1.bf16.msra.mxu0 %v14031_v38  ;;  %12783 = vmatpush3.bf16.msra.mxu1 %v14034_v40  ;;  %v14079_v38 = vld [vmem:[#allocation5 + $0x78] ss:$12 sps:$4 sm:$0xff]   ;;  %v14082_v40 = vld [vmem:[#allocation5 + $0x80] ss:$12 sps:$4 sm:$0xff]  }
 0xc59   :  { %6718 = vmatprep.subr.bf16.mxu0 %v14037_v55  ;;  %12784 = vmatprep.subr.bf16.mxu1 %v14883_v56  ;;  %v14085_v55 = vld [vmem:[#allocation5 + $0x94] ss:$12 sps:$4 sm:$0xff]  }
 0xc5c   :  { %6719 = vmatpush1.bf16.msra.mxu0 %v14035_v37  ;;  %12785 = vmatpush3.bf16.msra.mxu1 %v14038_v13  ;;  %v14083_v37 = vld [vmem:[#allocation5 + $0x90] ss:$12 sps:$4 sm:$0xff]   ;;  %v14086_v13 = vld [vmem:[#allocation5 + $0x98] ss:$12 sps:$4 sm:$0xff]  }
 0xc5d   :  { %6720 = vmatprep.subr.bf16.mxu0 %v14041_v53  ;;  %12786 = vmatprep.subr.bf16.mxu1 %v14883_v56  ;;  %v14089_v53 = vld [vmem:[#allocation5 + $0xac] ss:$12 sps:$4 sm:$0xff]  }
 0xc60   :  { %6721 = vmatpush1.bf16.msra.mxu0 %v14039_v16  ;;  %12787 = vmatpush3.bf16.msra.mxu1 %v14042_v15  ;;  %v14087_v16 = vld [vmem:[#allocation5 + $0xa8] ss:$12 sps:$4 sm:$0xff]   ;;  %v14090_v15 = vld [vmem:[#allocation5 + $0xb0] ss:$12 sps:$4 sm:$0xff]  }
 0xc61   :  { %6722 = vmatprep.subr.bf16.mxu0 %v14045_v28  ;;  %12788 = vmatprep.subr.bf16.mxu1 %v14883_v56  ;;  %v14093_v28 = vld [vmem:[#allocation3 + $0xc4] ss:$12 sps:$4 sm:$0xff]  }
 0xc64   :  { %6723 = vmatpush1.bf16.msra.mxu0 %v14043_v46  ;;  %12789 = vmatpush3.bf16.msra.mxu1 %v14046_v47  ;;  %v14091_v46 = vld [vmem:[#allocation3 + $0xc0] ss:$12 sps:$4 sm:$0xff]   ;;  %v14094_v47 = vld [vmem:[#allocation3 + $0xc8] ss:$12 sps:$4 sm:$0xff]  }
 0xc65   :  { %6724 = vmatprep.subr.bf16.mxu0 %v14049_v44  ;;  %12790 = vmatprep.subr.bf16.mxu1 %v14883_v56  ;;  %v14097_v44 = vld [vmem:[#allocation3 + $0xdc] ss:$12 sps:$4 sm:$0xff]  }
 0xc68   :  { %6725 = vmatpush1.bf16.msra.mxu0 %v14047_v8  ;;  %12791 = vmatpush3.bf16.msra.mxu1 %v14050_v60  ;;  %v14095_v8 = vld [vmem:[#allocation3 + $0xd8] ss:$12 sps:$4 sm:$0xff]   ;;  %v14098_v60 = vld [vmem:[#allocation3 + $0xe0] ss:$12 sps:$4 sm:$0xff]  }
 0xc69   :  { %6726 = vmatprep.subr.bf16.mxu0 %v14053_v36  ;;  %12792 = vmatprep.subr.bf16.mxu1 %v14883_v56  ;;  %v14099_v36 = vld [vmem:[#allocation3 + $0xf0] ss:$12 sps:$4 sm:$0xff]  }
 0xc6c   :  { %6727 = vmatpush1.bf16.msra.mxu0 %v14051_v43  ;;  %12793 = vmatpush3.bf16.msra.mxu1 %v14054_v18  ;;  %v14102_v43 = vld [vmem:[#allocation3 + $0xf8] ss:$12 sps:$4 sm:$0xff]  }
 0xc6d   :  { %6728 = vmatprep.subr.bf16.mxu0 %v14057_v34  ;;  %12794 = vmatprep.subr.bf16.mxu1 %v14883_v56  ;;  %v14105_v18 = vld [vmem:[#allocation3 + $0x10c] ss:$12 sps:$4 sm:$0xff]   ;;  %v14103_v34 = vld [vmem:[#allocation3 + $0x108] ss:$12 sps:$4 sm:$0xff]  }
 0xc70   :  { %6729 = vmatpush1.bf16.msra.mxu0 %v14055_v30  ;;  %12795 = vmatpush3.bf16.msra.mxu1 %v14058_v14  ;;  %v14106_v30 = vld [vmem:[#allocation3 + $0x110] ss:$12 sps:$4 sm:$0xff]   ;;  %v14107_v14 = vld [vmem:[#allocation3 + $0x120] ss:$12 sps:$4 sm:$0xff]  }
 0xc71   :  { %6977 = vmatprep.subr.bf16.mxu0 %v14061_v41  ;;  %12800 = vmatprep.subr.bf16.mxu1 %v14883_v56  ;;  %v14109_v41 = vld [vmem:[#allocation3 + $0x124] ss:$12 sps:$4 sm:$0xff]  }
 0xc73   :  { %6747 = vmatmul.mubr.bf16.vlgmr.msra.gmra.mrb[56].mxu0 %v6553_v4  ;;  %12797 = vmatmul.mubr.bf16.vlgmr.msra.gmra.mrb[120].mxu1 %v6553_v4  ;;  %v14111_v4 = vld [vmem:[#allocation3 + $0x138] ss:$12 sps:$4 sm:$0xff]  }
 0xc74   :  { %6978 = vmatpush1.bf16.msra.mxu0 %v14059_v62  ;;  %12801 = vmatpush3.bf16.msra.mxu1 %v14062_v19  ;;  %v14110_v62 = vld [vmem:[#allocation3 + $0x128] ss:$12 sps:$4 sm:$0xff]  }
 0xc75   :  { %6979 = vmatprep.subr.bf16.mxu0 %v14065_v32  ;;  %12802 = vmatprep.subr.bf16.mxu1 %v14883_v56  ;;  %v14113_v19 = vld [vmem:[#allocation3 + $0x13c] ss:$12 sps:$4 sm:$0xff]   ;;  %v14114_v32 = vld [vmem:[#allocation3 + $0x140] ss:$12 sps:$4 sm:$0xff]  }
 0xc76   :  { %7009 = vmatprep.mubr.bf16.mxu0 %v14882_v0  ;;  %12816 = vmatprep.mubr.msk.bf16.mxu1 %vm14884_vm0, %v14883_v56 }
 0xc78   :  { %6980 = vmatpush1.bf16.msra.mxu0 %v14063_v11  ;;  %12803 = vmatpush3.bf16.msra.mxu1 %v14066_v17  ;;  %v14117_v11 = vld [vmem:[#allocation3 + $0x154] ss:$12 sps:$4 sm:$0xff]   ;;  %v14115_v17 = vld [vmem:[#allocation3 + $0x150] ss:$12 sps:$4 sm:$0xff]  }
 0xc79   :  { %6981 = vmatprep.subr.bf16.mxu0 %v14069_v50  ;;  %12804 = vmatprep.subr.bf16.mxu1 %v14883_v56  ;;  %v14118_v50 = vld [vmem:[#allocation3 + $0x158] ss:$12 sps:$4 sm:$0xff]  }
 0xc7c   :  { %6982 = vmatpush1.bf16.msra.mxu0 %v14067_v54  ;;  %12805 = vmatpush3.bf16.msra.mxu1 %v14070_v10  ;;  %v14121_v54 = vld [vmem:[#allocation3 + $0x16c] ss:$12 sps:$4 sm:$0xff]   ;;  %v14119_v10 = vld [vmem:[#allocation3 + $0x168] ss:$12 sps:$4 sm:$0xff]  }
 0xc7d   :  { %6983 = vmatprep.subr.bf16.mxu0 %v14073_v3  ;;  %12806 = vmatprep.subr.bf16.mxu1 %v14883_v56  ;;  %v14122_v3 = vld [vmem:[#allocation3 + $0x170] ss:$12 sps:$4 sm:$0xff]  }
 0xc80   :  { %6984 = vmatpush1.bf16.msra.mxu0 %v14071_v58  ;;  %12807 = vmatpush3.bf16.msra.mxu1 %v14074_v1  ;;  %v14125_v58 = vld [vmem:[#allocation5 + $0xc4] ss:$12 sps:$4 sm:$0xff]  }
 0xc81   :  { %6985 = vmatprep.subr.bf16.mxu0 %v14077_v45  ;;  %12808 = vmatprep.subr.bf16.mxu1 %v14883_v56 }
 0xc84   :  { %6986 = vmatpush1.bf16.msra.mxu0 %v14075_v23  ;;  %12809 = vmatpush3.bf16.msra.mxu1 %v14078_v21 }
 0xc85   :  { %6987 = vmatprep.subr.bf16.mxu0 %v14081_v33  ;;  %12810 = vmatprep.subr.bf16.mxu1 %v14883_v56 }
 0xc88   :  { %6988 = vmatpush1.bf16.msra.mxu0 %v14079_v38  ;;  %12811 = vmatpush3.bf16.msra.mxu1 %v14082_v40 }
 0xc89   :  { %6989 = vmatprep.subr.bf16.mxu0 %v14085_v55  ;;  %12812 = vmatprep.subr.bf16.mxu1 %v14883_v56 }
 0xc8c   :  { %6990 = vmatpush1.bf16.msra.mxu0 %v14083_v37  ;;  %12813 = vmatpush3.bf16.msra.mxu1 %v14086_v13 }
 0xc8d   :  { %6991 = vmatprep.subr.bf16.mxu0 %v14089_v53  ;;  %12814 = vmatprep.subr.bf16.mxu1 %v14883_v56 }
 0xc90   :  { %6992 = vmatpush1.bf16.msra.mxu0 %v14087_v16  ;;  %12815 = vmatpush3.bf16.msra.mxu1 %v14090_v15 }
 0xc91   :  { %12820 = vmatprep.subr.bf16.mxu1 %v14883_v56  ;;  %7240 = vmatprep.subr.bf16.mxu0 %v14093_v28 }
 0xc93   :  { %7010 = vmatmul.mubr.bf16.vlgmr.msra.gmra.mrb[60].mxu0 %v15522_v25  ;;  %12817 = vmatmul.mubr.bf16.vlgmr.msra.gmra.mrb[124].mxu1 %v15522_v25  ;;  %v14101_v25 = vld [vmem:[#allocation3 + $0xf4] ss:$12 sps:$4 sm:$0xff]  }
 0xc94   :  { %7272 = vmatprep.mubr.bf16.mxu0 %v14882_v0  ;;  %12836 = vmatprep.mubr.msk.bf16.mxu1 %vm14884_vm0, %v14883_v56 }
 0xc95   :  { %7241 = vmatpush1.bf16.msra.mxu0 %v14091_v46  ;;  %12821 = vmatpush3.bf16.msra.mxu1 %v14094_v47 }
 0xc96   :  { %12822 = vmatprep.subr.bf16.mxu1 %v14883_v56  ;;  %7242 = vmatprep.subr.bf16.mxu0 %v14097_v44 }
 0xc99   :  { %7243 = vmatpush1.bf16.msra.mxu0 %v14095_v8  ;;  %12823 = vmatpush3.bf16.msra.mxu1 %v14098_v60 }
 0xc9a   :  { %12824 = vmatprep.subr.bf16.mxu1 %v14883_v56  ;;  %7244 = vmatprep.subr.bf16.mxu0 %v14101_v25  ;;  %v15610_v25 = vld [vmem:[%s15962_s5 + $0x2] ss:$0 sm:$0xff] }
 0xc9d   :  { %7245 = vmatpush1.bf16.msra.mxu0 %v14099_v36  ;;  %12825 = vmatpush3.bf16.msra.mxu1 %v14102_v43 }
 0xc9e   :  { %12826 = vmatprep.subr.bf16.mxu1 %v14883_v56  ;;  %7246 = vmatprep.subr.bf16.mxu0 %v14105_v18 }
 0xca1   :  { %7247 = vmatpush1.bf16.msra.mxu0 %v14103_v34  ;;  %12827 = vmatpush3.bf16.msra.mxu1 %v14106_v30 }
 0xca2   :  { %12828 = vmatprep.subr.bf16.mxu1 %v14883_v56  ;;  %7248 = vmatprep.subr.bf16.mxu0 %v14109_v41 }
 0xca5   :  { %7249 = vmatpush1.bf16.msra.mxu0 %v14107_v14  ;;  %12829 = vmatpush3.bf16.msra.mxu1 %v14110_v62 }
 0xca6   :  { %7250 = vmatprep.subr.bf16.mxu0 %v14113_v19  ;;  %12830 = vmatprep.subr.bf16.mxu1 %v14883_v56 }
 0xca9   :  { %7251 = vmatpush1.bf16.msra.mxu0 %v14111_v4  ;;  %12831 = vmatpush3.bf16.msra.mxu1 %v14114_v32 }
 0xcaa   :  { %7252 = vmatprep.subr.bf16.mxu0 %v14117_v11  ;;  %12832 = vmatprep.subr.bf16.mxu1 %v14883_v56 }
 0xcad   :  { %7253 = vmatpush1.bf16.msra.mxu0 %v14115_v17  ;;  %12833 = vmatpush3.bf16.msra.mxu1 %v14118_v50 }
 0xcae   :  { %7254 = vmatprep.subr.bf16.mxu0 %v14121_v54  ;;  %12834 = vmatprep.subr.bf16.mxu1 %v14883_v56 }
 0xcb1   :  { %7255 = vmatpush1.bf16.msra.mxu0 %v14119_v10  ;;  %12835 = vmatpush3.bf16.msra.mxu1 %v14122_v3 }
 0xcb2   :  { %7481 = vmatprep.subr.bf16.mxu0 %v14125_v58  ;;  %12840 = vmatprep.subr.bf16.mxu1 %v14883_v56 }
 0xd26   :  { %v6547_v1 = vpop.f32.mrb[116].mxu1 }
 0xd27   :  { %v12778_v45 = vpop.f32.mrb[117].mxu1  ;;  %v6548_v18 = vadd.f32 %v6547_v1, %v15204_v42 }
 0xd28   :  { %v6550_v23 = vpop.f32.mrb[118].mxu1 }
 0xd29   :  { %v12779_v21 = vpop.f32.mrb[119].mxu1 }
 0xd46   :  { %v6748_v33 = vpop.f32.mrb[56].mxu0  ;;  %v6789_v38 = vpop.f32.mrb[120].mxu1 }
 0xd47   :  { %v13142_v40 = vadd.f32 %v6748_v33, %v15191_v12  ;;  %v6750_v55 = vpop.f32.mrb[57].mxu0  ;;  %v12798_v37 = vpop.f32.mrb[121].mxu1  ;;  %v6809_v36 = vadd.f32 %v15610_v25, %v6789_v38 }
 0xd48   :  { %v6752_v13 = vpop.f32.mrb[58].mxu0  ;;  %v6792_v53 = vpop.f32.mrb[122].mxu1  ;;  %v13143_v46 = vadd.f32 %v6750_v55, %v15195_v29 }
 0xd49   :  { %v11501_v16 = vmul.f32 -1.442695, %v13142_v40  ;;  %v6753_v15 = vpop.f32.mrb[59].mxu0  ;;  %v12799_v28 = vpop.f32.mrb[123].mxu1  ;;  %v15622_v40 = vld [vmem:[%s15962_s5] ss:$0 sm:$0xff] }
 0xd4a   :  { %v11502_v47 = vmul.f32 -1.442695, %v13143_v46 }
 0xd4b   :  { %14687 = vpow2.f32 %v11501_v16 }
 0xd4c   :  { %14689 = vpow2.f32 %v11502_v47 }
 0xd55   :  { %v14688_v44 = vpop.eup %14687 }
 0xd56   :  { %v6803_v8 = vadd.f32 1.0, %v14688_v44  ;;  %v14690_v60 = vpop.eup %14689 }
 0xd57   :  { %v6804_v14 = vadd.f32 1.0, %v14690_v60  ;;  %v14126_v60 = vld [vmem:[#allocation5 + $0xc8] ss:$12 sps:$4 sm:$0xff]  }
 0xd58   :  { %14691 = vrcp.f32 %v6803_v8  ;;  %v14123_v8 = vld [vmem:[#allocation5 + $0xc0] ss:$12 sps:$4 sm:$0xff]  }
 0xd62   :  { %v14692_v43 = vpop.eup %14691 }
 0xd63   :  { %v6810_v34 = vmul.f32 %v14692_v43, %v6809_v36  ;;  %v14129_v43 = vld [vmem:[#allocation5 + $0xdc] ss:$12 sps:$4 sm:$0xff]  }
 0xd65   :  { %v6811_v30 = vadd.f32 %v6810_v34, %v6548_v18  ;;  %v14130_v18 = vld [vmem:[#allocation5 + $0xe0] ss:$12 sps:$4 sm:$0xff]   ;;  %v14131_v34 = vld [vmem:[#allocation5 + $0xf0] ss:$12 sps:$4 sm:$0xff]  }
 0xd66   :  { %v7011_v41 = vpop.f32.mrb[60].mxu0  ;;  %v7052_v62 = vpop.f32.mrb[124].mxu1 }
 0xd67   :  { %14693 = vtanh.f32 %v6811_v30  ;;  %v7058_v19 = vadd.f32 %v7011_v41, %v15043_v61  ;;  %v7013_v4 = vpop.f32.mrb[61].mxu0  ;;  %v12818_v32 = vpop.f32.mrb[125].mxu1  ;;  %v7072_v55 = vadd.f32 %v15622_v40, %v7052_v62  ;;  %v14134_v30 = vld [vmem:[#allocation5 + $0xf8] ss:$12 sps:$4 sm:$0xff]   ;;  %v14135_v41 = vld [vmem:[#allocation5 + $0x108] ss:$12 sps:$4 sm:$0xff]  }
 0xd68   :  { %v7059_v11 = vadd.f32 %v7013_v4, %v15045_v63  ;;  %v7015_v17 = vpop.f32.mrb[62].mxu0  ;;  %v7055_v50 = vpop.f32.mrb[126].mxu1  ;;  %14695 = vrcp.f32 %v6804_v14  ;;  %v14137_v14 = vld [vmem:[#allocation5 + $0x10c] ss:$12 sps:$4 sm:$0xff]   ;;  %v14138_v62 = vld [vmem:[#allocation5 + $0x110] ss:$12 sps:$4 sm:$0xff]  }
 0xd69   :  { %v11527_v54 = vmul.f32 -1.442695, %v7058_v19  ;;  %v7016_v10 = vpop.f32.mrb[63].mxu0  ;;  %v12819_v3 = vpop.f32.mrb[127].mxu1  ;;  %v14141_v19 = vld [vmem:[#allocation5 + $0x124] ss:$12 sps:$4 sm:$0xff]  }
 0xd6a   :  { %v11528_v23 = vmul.f32 -1.442695, %v7059_v11  ;;  %v14139_v4 = vld [vmem:[#allocation5 + $0x120] ss:$12 sps:$4 sm:$0xff]   ;;  %v14142_v32 = vld [vmem:[#allocation5 + $0x128] ss:$12 sps:$4 sm:$0xff]  }
 0xd6b   :  { %14697 = vpow2.f32 %v11527_v54  ;;  %v14145_v11 = vld [vmem:[#allocation5 + $0x13c] ss:$12 sps:$4 sm:$0xff]   ;;  %v14143_v17 = vld [vmem:[#allocation5 + $0x138] ss:$12 sps:$4 sm:$0xff]   ;;  %v14146_v50 = vld [vmem:[#allocation5 + $0x140] ss:$12 sps:$4 sm:$0xff]  }
 0xd6c   :  { %14699 = vpow2.f32 %v11528_v23  ;;  %v14149_v54 = vld [vmem:[#allocation5 + $0x154] ss:$12 sps:$4 sm:$0xff]   ;;  %v14147_v10 = vld [vmem:[#allocation5 + $0x150] ss:$12 sps:$4 sm:$0xff]   ;;  %v14150_v3 = vld [vmem:[#allocation5 + $0x158] ss:$12 sps:$4 sm:$0xff]  }
 0xd6d   :  { %v14157_v23 = vld [vmem:[#allocation3 + $0x184] ss:$12 sps:$4 sm:$0xff]  }
 0xd71   :  { %v14694_v58 = vpop.eup %14693 }
 0xd72   :  { %v6813_v1 = vsub.f32 %v15513_v57, %v14694_v58  ;;  %v14696_v45 = vpop.eup %14695 }
 0xd74   :  { %v6814_v21 = vmul.f32 %v14696_v45, %v6813_v1  ;;  %v14151_v1 = vld [vmem:[#allocation5 + $0x168] ss:$12 sps:$4 sm:$0xff]   ;;  %v14154_v45 = vld [vmem:[#allocation5 + $0x170] ss:$12 sps:$4 sm:$0xff]  }
 0xd75   :  { %v14698_v33 = vpop.eup %14697 }
 0xd76   :  { %v7066_v38 = vadd.f32 1.0, %v14698_v33  ;;  %v15617_v61 = vadd.f32 %v14694_v58, %v6814_v21  ;;  %v14700_v63 = vpop.eup %14699  ;;  %v14153_v58 = vld [vmem:[#allocation5 + $0x16c] ss:$12 sps:$4 sm:$0xff]   ;;  %v14158_v33 = vld [vmem:[#allocation3 + $0x188] ss:$12 sps:$4 sm:$0xff]  }
 0xd77   :  { %v7067_v16 = vadd.f32 1.0, %v14700_v63  ;;  %v14155_v21 = vld [vmem:[#allocation3 + $0x180] ss:$12 sps:$4 sm:$0xff]   ;;  %v14159_v63 = vld [vmem:[#allocation3 + $0x198] ss:$12 sps:$4 sm:$0xff]  }
 0xd78   :  { %14701 = vrcp.f32 %v7066_v38  ;;  %v14161_v38 = vld [vmem:[#allocation3 + $0x19c] ss:$12 sps:$4 sm:$0xff]  }
 0xd82   :  { %v14702_v37 = vpop.eup %14701 }
 0xd83   :  { %v7073_v13 = vmul.f32 %v14702_v37, %v7072_v55  ;;  %v14162_v55 = vld [vmem:[#allocation3 + $0x1a0] ss:$12 sps:$4 sm:$0xff]   ;;  %v14163_v37 = vld [vmem:[#allocation3 + $0x1b0] ss:$12 sps:$4 sm:$0xff]  }
 0xd85   :  { %v7074_v53 = vadd.f32 %v7073_v13, %v15070_v27  ;;  %v14127_v27 = vld [vmem:[#allocation5 + $0xd8] ss:$12 sps:$4 sm:$0xff]  }
 0xd86   :  { %v14166_v13 = vld [vmem:[#allocation3 + $0x1b8] ss:$12 sps:$4 sm:$0xff]  }
 0xd87   :  { %14703 = vtanh.f32 %v7074_v53  ;;  %v14169_v53 = vld [vmem:[#allocation3 + $0x1cc] ss:$12 sps:$4 sm:$0xff]  }
 0xd88   :  { %14705 = vrcp.f32 %v7067_v16  ;;  %v14167_v16 = vld [vmem:[#allocation3 + $0x1c8] ss:$12 sps:$4 sm:$0xff]  }
 0xd91   :  { %v14704_v15 = vpop.eup %14703 }
 0xd92   :  { %v7076_v28 = vsub.f32 %v15518_v31, %v14704_v15  ;;  %v14706_v46 = vpop.eup %14705  ;;  %v14133_v31 = vld [vmem:[#allocation5 + $0xf4] ss:$12 sps:$4 sm:$0xff]  }
 0xd94   :  { %v7077_v47 = vmul.f32 %v14706_v46, %v7076_v28  ;;  %v14171_v28 = vld [vmem:[#allocation3 + $0x1e0] ss:$12 sps:$4 sm:$0xff]   ;;  %v14173_v46 = vld [vmem:[#allocation3 + $0x1e4] ss:$12 sps:$4 sm:$0xff]  }
 0xd96   :  { %v15627_v44 = vadd.f32 %v14704_v15, %v7077_v47  ;;  %v14170_v15 = vld [vmem:[#allocation3 + $0x1d0] ss:$12 sps:$4 sm:$0xff]   ;;  %v14174_v47 = vld [vmem:[#allocation3 + $0x1e8] ss:$12 sps:$4 sm:$0xff]  }
 0xd98   :  { %v15631_v36 = vpack.c.bf16 %v15627_v44, %v15627_v44 }
 0xd9a   :  { %7273 = vmatmul.mubr.bf16.vlgmr.msra.gmra.mrb[64].mxu0 %v15631_v36  ;;  %12837 = vmatmul.mubr.bf16.vlgmr.msra.gmra.mrb[128].mxu1 %v15631_v36 }
 0xd9b   :  { %7482 = vmatpush1.bf16.msra.mxu0 %v14123_v8  ;;  %12841 = vmatpush3.bf16.msra.mxu1 %v14126_v60  ;;  %v14177_v8 = vld [vmem:[#allocation3 + $0x1fc] ss:$12 sps:$4 sm:$0xff]   ;;  %v14175_v60 = vld [vmem:[#allocation3 + $0x1f8] ss:$12 sps:$4 sm:$0xff]  }
 0xd9c   :  { %7483 = vmatprep.subr.bf16.mxu0 %v14129_v43  ;;  %12842 = vmatprep.subr.bf16.mxu1 %v14883_v56  ;;  %v14178_v43 = vld [vmem:[#allocation3 + $0x200] ss:$12 sps:$4 sm:$0xff]  }
 0xd9d   :  { %7513 = vmatprep.mubr.bf16.mxu0 %v14882_v0  ;;  %12856 = vmatprep.mubr.msk.bf16.mxu1 %vm14884_vm0, %v14883_v56 }
 0xd9f   :  { %7484 = vmatpush1.bf16.msra.mxu0 %v14127_v27  ;;  %12843 = vmatpush3.bf16.msra.mxu1 %v14130_v18  ;;  %v14181_v27 = vld [vmem:[#allocation3 + $0x214] ss:$12 sps:$4 sm:$0xff]   ;;  %v14179_v18 = vld [vmem:[#allocation3 + $0x210] ss:$12 sps:$4 sm:$0xff]  }
 0xda0   :  { %7485 = vmatprep.subr.bf16.mxu0 %v14133_v31  ;;  %12844 = vmatprep.subr.bf16.mxu1 %v14883_v56  ;;  %v14182_v31 = vld [vmem:[#allocation3 + $0x218] ss:$12 sps:$4 sm:$0xff]  }
 0xda3   :  { %7486 = vmatpush1.bf16.msra.mxu0 %v14131_v34  ;;  %12845 = vmatpush3.bf16.msra.mxu1 %v14134_v30  ;;  %v14185_v34 = vld [vmem:[#allocation3 + $0x22c] ss:$12 sps:$4 sm:$0xff]   ;;  %v14183_v30 = vld [vmem:[#allocation3 + $0x228] ss:$12 sps:$4 sm:$0xff]  }
 0xda4   :  { %7487 = vmatprep.subr.bf16.mxu0 %v14137_v14  ;;  %12846 = vmatprep.subr.bf16.mxu1 %v14883_v56  ;;  %v14186_v14 = vld [vmem:[#allocation3 + $0x230] ss:$12 sps:$4 sm:$0xff]  }
 0xda7   :  { %7488 = vmatpush1.bf16.msra.mxu0 %v14135_v41  ;;  %12847 = vmatpush3.bf16.msra.mxu1 %v14138_v62  ;;  %v14189_v41 = vld [vmem:[#allocation5 + $0x184] ss:$12 sps:$4 sm:$0xff]  }
 0xda8   :  { %7489 = vmatprep.subr.bf16.mxu0 %v14141_v19  ;;  %12848 = vmatprep.subr.bf16.mxu1 %v14883_v56 }
 0xdab   :  { %7490 = vmatpush1.bf16.msra.mxu0 %v14139_v4  ;;  %12849 = vmatpush3.bf16.msra.mxu1 %v14142_v32 }
 0xdac   :  { %7491 = vmatprep.subr.bf16.mxu0 %v14145_v11  ;;  %12850 = vmatprep.subr.bf16.mxu1 %v14883_v56 }
 0xdaf   :  { %7492 = vmatpush1.bf16.msra.mxu0 %v14143_v17  ;;  %12851 = vmatpush3.bf16.msra.mxu1 %v14146_v50 }
 0xdb0   :  { %7493 = vmatprep.subr.bf16.mxu0 %v14149_v54  ;;  %12852 = vmatprep.subr.bf16.mxu1 %v14883_v56 }
 0xdb3   :  { %7494 = vmatpush1.bf16.msra.mxu0 %v14147_v10  ;;  %12853 = vmatpush3.bf16.msra.mxu1 %v14150_v3 }
 0xdb4   :  { %7495 = vmatprep.subr.bf16.mxu0 %v14153_v58  ;;  %12854 = vmatprep.subr.bf16.mxu1 %v14883_v56 }
 0xdb7   :  { %7496 = vmatpush1.bf16.msra.mxu0 %v14151_v1  ;;  %12855 = vmatpush3.bf16.msra.mxu1 %v14154_v45 }
 0xdb8   :  { %12860 = vmatprep.subr.bf16.mxu1 %v14883_v56  ;;  %7744 = vmatprep.subr.bf16.mxu0 %v14157_v23 }
 0xdba   :  { %7514 = vmatmul.mubr.bf16.vlgmr.msra.gmra.mrb[64].mxu0 %v15564_v22  ;;  %12857 = vmatmul.mubr.bf16.vlgmr.msra.gmra.mrb[132].mxu1 %v15564_v22  ;;  %v14165_v22 = vld [vmem:[#allocation3 + $0x1b4] ss:$12 sps:$4 sm:$0xff]  }
 0xdbb   :  { %7776 = vmatprep.mubr.bf16.mxu0 %v14882_v0  ;;  %12876 = vmatprep.mubr.msk.bf16.mxu1 %vm14884_vm0, %v14883_v56 }
 0xdbc   :  { %7745 = vmatpush1.bf16.msra.mxu0 %v14155_v21  ;;  %12861 = vmatpush3.bf16.msra.mxu1 %v14158_v33 }
 0xdbd   :  { %12862 = vmatprep.subr.bf16.mxu1 %v14883_v56  ;;  %7746 = vmatprep.subr.bf16.mxu0 %v14161_v38 }
 0xdc0   :  { %7747 = vmatpush1.bf16.msra.mxu0 %v14159_v63  ;;  %12863 = vmatpush3.bf16.msra.mxu1 %v14162_v55 }
 0xdc1   :  { %12864 = vmatprep.subr.bf16.mxu1 %v14883_v56  ;;  %7748 = vmatprep.subr.bf16.mxu0 %v14165_v22 }
 0xdc4   :  { %7749 = vmatpush1.bf16.msra.mxu0 %v14163_v37  ;;  %12865 = vmatpush3.bf16.msra.mxu1 %v14166_v13 }
 0xdc5   :  { %12866 = vmatprep.subr.bf16.mxu1 %v14883_v56  ;;  %7750 = vmatprep.subr.bf16.mxu0 %v14169_v53 }
 0xdc8   :  { %7751 = vmatpush1.bf16.msra.mxu0 %v14167_v16  ;;  %12867 = vmatpush3.bf16.msra.mxu1 %v14170_v15 }
 0xdc9   :  { %12868 = vmatprep.subr.bf16.mxu1 %v14883_v56  ;;  %7752 = vmatprep.subr.bf16.mxu0 %v14173_v46 }
 0xdcc   :  { %7753 = vmatpush1.bf16.msra.mxu0 %v14171_v28  ;;  %12869 = vmatpush3.bf16.msra.mxu1 %v14174_v47 }
 0xdcd   :  { %7754 = vmatprep.subr.bf16.mxu0 %v14177_v8  ;;  %12870 = vmatprep.subr.bf16.mxu1 %v14883_v56 }
 0xdd0   :  { %7755 = vmatpush1.bf16.msra.mxu0 %v14175_v60  ;;  %12871 = vmatpush3.bf16.msra.mxu1 %v14178_v43  ;;  %v14187_v43 = vld [vmem:[#allocation5 + $0x180] ss:$12 sps:$4 sm:$0xff]  }
 0xdd1   :  { %7756 = vmatprep.subr.bf16.mxu0 %v14181_v27  ;;  %12872 = vmatprep.subr.bf16.mxu1 %v14883_v56  ;;  %v14190_v27 = vld [vmem:[#allocation5 + $0x188] ss:$12 sps:$4 sm:$0xff]  }
 0xdd4   :  { %7757 = vmatpush1.bf16.msra.mxu0 %v14179_v18  ;;  %12873 = vmatpush3.bf16.msra.mxu1 %v14182_v31  ;;  %v14193_v18 = vld [vmem:[#allocation5 + $0x19c] ss:$12 sps:$4 sm:$0xff]   ;;  %v14191_v31 = vld [vmem:[#allocation5 + $0x198] ss:$12 sps:$4 sm:$0xff]  }
 0xdd5   :  { %7758 = vmatprep.subr.bf16.mxu0 %v14185_v34  ;;  %12874 = vmatprep.subr.bf16.mxu1 %v14883_v56  ;;  %v14194_v34 = vld [vmem:[#allocation5 + $0x1a0] ss:$12 sps:$4 sm:$0xff]  }
 0xdd8   :  { %7759 = vmatpush1.bf16.msra.mxu0 %v14183_v30  ;;  %12875 = vmatpush3.bf16.msra.mxu1 %v14186_v14  ;;  %v14195_v30 = vld [vmem:[#allocation5 + $0x1b0] ss:$12 sps:$4 sm:$0xff]   ;;  %v14198_v14 = vld [vmem:[#allocation5 + $0x1b8] ss:$12 sps:$4 sm:$0xff]  }
 0xdd9   :  { %7986 = vmatprep.subr.bf16.mxu0 %v14189_v41  ;;  %12880 = vmatprep.subr.bf16.mxu1 %v14883_v56  ;;  %v14201_v41 = vld [vmem:[#allocation5 + $0x1cc] ss:$12 sps:$4 sm:$0xff]  }
 0xe6d   :  { %v7315_v62 = vpop.f32.mrb[128].mxu1 }
 0xe6e   :  { %v12838_v19 = vpop.f32.mrb[129].mxu1  ;;  %v7316_v13 = vadd.f32 %v7315_v62, %v15132_v6  ;;  %v14199_v62 = vld [vmem:[#allocation5 + $0x1c8] ss:$12 sps:$4 sm:$0xff]  }
 0xe6f   :  { %v7318_v4 = vpop.f32.mrb[130].mxu1  ;;  %v14202_v19 = vld [vmem:[#allocation5 + $0x1d0] ss:$12 sps:$4 sm:$0xff]  }
 0xe70   :  { %v12839_v32 = vpop.f32.mrb[131].mxu1  ;;  %v14205_v4 = vld [vmem:[#allocation5 + $0x1e4] ss:$12 sps:$4 sm:$0xff]  }
 0xe71   :  { %v14203_v32 = vld [vmem:[#allocation5 + $0x1e0] ss:$12 sps:$4 sm:$0xff]  }
 0xe8d   :  { %v7515_v11 = vpop.f32.mrb[64].mxu0  ;;  %v7556_v17 = vpop.f32.mrb[132].mxu1 }
 0xe8e   :  { %v13144_v50 = vadd.f32 %v7515_v11, %v15119_v35  ;;  %v7517_v54 = vpop.f32.mrb[65].mxu0  ;;  %v12858_v10 = vpop.f32.mrb[133].mxu1  ;;  %v7576_v22 = vadd.f32 %v15555_v59, %v7556_v17  ;;  %v14206_v11 = vld [vmem:[#allocation5 + $0x1e8] ss:$12 sps:$4 sm:$0xff]  }
 0xe8f   :  { %v7519_v3 = vpop.f32.mrb[66].mxu0  ;;  %v7559_v58 = vpop.f32.mrb[134].mxu1  ;;  %v13145_v21 = vadd.f32 %v7517_v54, %v15123_v51  ;;  %v14209_v17 = vld [vmem:[#allocation5 + $0x1fc] ss:$12 sps:$4 sm:$0xff]   ;;  %v14210_v54 = vld [vmem:[#allocation5 + $0x200] ss:$12 sps:$4 sm:$0xff]  }
 0xe90   :  { %v11577_v1 = vmul.f32 -1.442695, %v13144_v50  ;;  %v7520_v45 = vpop.f32.mrb[67].mxu0  ;;  %v12859_v23 = vpop.f32.mrb[135].mxu1  ;;  %v14207_v50 = vld [vmem:[#allocation5 + $0x1f8] ss:$12 sps:$4 sm:$0xff]  }
 0xe91   :  { %v11578_v33 = vmul.f32 -1.442695, %v13145_v21  ;;  %v14213_v10 = vld [vmem:[#allocation5 + $0x214] ss:$12 sps:$4 sm:$0xff]   ;;  %v14211_v3 = vld [vmem:[#allocation5 + $0x210] ss:$12 sps:$4 sm:$0xff]  }
 0xe92   :  { %14707 = vpow2.f32 %v11577_v1  ;;  %v14214_v58 = vld [vmem:[#allocation5 + $0x218] ss:$12 sps:$4 sm:$0xff]   ;;  %v14215_v45 = vld [vmem:[#allocation5 + $0x228] ss:$12 sps:$4 sm:$0xff]   ;;  %v14218_v23 = vld [vmem:[#allocation5 + $0x230] ss:$12 sps:$4 sm:$0xff]  }
 0xe93   :  { %14709 = vpow2.f32 %v11578_v33  ;;  %v14217_v1 = vld [vmem:[#allocation5 + $0x22c] ss:$12 sps:$4 sm:$0xff]   ;;  %v14221_v21 = vld [vmem:[#allocation5 + $0x4] ss:$12 sps:$4 sm:$0xff]  }
 0xe94   :  { %v14219_v33 = vld [vmem:[#allocation5] ss:$12 sps:$4 sm:$0xff]  }
 0xe9c   :  { %v14708_v38 = vpop.eup %14707 }
 0xe9d   :  { %v7570_v63 = vadd.f32 1.0, %v14708_v38  ;;  %v14710_v55 = vpop.eup %14709  ;;  %v14222_v38 = vld [vmem:[#allocation5 + $0x8] ss:$12 sps:$4 sm:$0xff]  }
 0xe9e   :  { %v7571_v15 = vadd.f32 1.0, %v14710_v55  ;;  %v14225_v55 = vld [vmem:[#allocation5 + $0x1c] ss:$12 sps:$4 sm:$0xff]  }
 0xe9f   :  { %14711 = vrcp.f32 %v7570_v63  ;;  %v7825_v63 = vpack.c.bf16 %v15617_v61, %v15617_v61 }
 0xea9   :  { %v14712_v37 = vpop.eup %14711 }
 0xeaa   :  { %v7577_v53 = vmul.f32 %v14712_v37, %v7576_v22  ;;  %v14223_v22 = vld [vmem:[#allocation5 + $0x18] ss:$12 sps:$4 sm:$0xff]   ;;  %v14226_v37 = vld [vmem:[#allocation5 + $0x20] ss:$12 sps:$4 sm:$0xff]  }
 0xeac   :  { %v7578_v16 = vadd.f32 %v7577_v53, %v7316_v13  ;;  %v14229_v13 = vld [vmem:[#allocation5 + $0x34] ss:$12 sps:$4 sm:$0xff]   ;;  %v14227_v53 = vld [vmem:[#allocation5 + $0x30] ss:$12 sps:$4 sm:$0xff]  }
 0xeae   :  { %14713 = vtanh.f32 %v7578_v16  ;;  %v14230_v16 = vld [vmem:[#allocation5 + $0x38] ss:$12 sps:$4 sm:$0xff]  }
 0xeaf   :  { %14715 = vrcp.f32 %v7571_v15  ;;  %v14233_v15 = vld [vmem:[#allocation5 + $0x4c] ss:$12 sps:$4 sm:$0xff]  }
 0xeb8   :  { %v14714_v28 = vpop.eup %14713 }
 0xeb9   :  { %v7580_v46 = vsub.f32 %v15560_v49, %v14714_v28  ;;  %v14716_v47 = vpop.eup %14715  ;;  %v14197_v49 = vld [vmem:[#allocation5 + $0x1b4] ss:$12 sps:$4 sm:$0xff]  }
 0xebb   :  { %v7581_v8 = vmul.f32 %v14716_v47, %v7580_v46  ;;  %v14234_v46 = vld [vmem:[#allocation5 + $0x50] ss:$12 sps:$4 sm:$0xff]  }
 0xebc   :  { %v14237_v47 = vld [vmem:[#allocation5 + $0x64] ss:$12 sps:$4 sm:$0xff]  }
 0xebd   :  { %v15664_v60 = vadd.f32 %v14714_v28, %v7581_v8  ;;  %v14231_v28 = vld [vmem:[#allocation5 + $0x48] ss:$12 sps:$4 sm:$0xff]   ;;  %v14235_v8 = vld [vmem:[#allocation5 + $0x60] ss:$12 sps:$4 sm:$0xff]  }
 0xebf   :  { %v15668_v59 = vpack.c.bf16 %v15664_v60, %v15664_v60 }
 0xec1   :  { %7777 = vmatmul.mubr.bf16.vlgmr.msra.gmra.mrb[68].mxu0 %v15668_v59  ;;  %12877 = vmatmul.mubr.bf16.vlgmr.msra.gmra.mrb[136].mxu1 %v15668_v59 }
 0xec2   :  { %7987 = vmatpush1.bf16.msra.mxu0 %v14187_v43  ;;  %12881 = vmatpush3.bf16.msra.mxu1 %v14190_v27  ;;  %v14238_v43 = vld [vmem:[#allocation5 + $0x68] ss:$12 sps:$4 sm:$0xff]  }
 0xec3   :  { %7988 = vmatprep.subr.bf16.mxu0 %v14193_v18  ;;  %12882 = vmatprep.subr.bf16.mxu1 %v14883_v56  ;;  %v14241_v27 = vld [vmem:[#allocation5 + $0x7c] ss:$12 sps:$4 sm:$0xff]   ;;  %v14239_v18 = vld [vmem:[#allocation5 + $0x78] ss:$12 sps:$4 sm:$0xff]  }
 0xec4   :  { %8018 = vmatprep.mubr.bf16.mxu0 %v14882_v0  ;;  %12896 = vmatprep.mubr.msk.bf16.mxu1 %vm14884_vm0, %v14883_v56 }
 0xec6   :  { %7989 = vmatpush1.bf16.msra.mxu0 %v14191_v31  ;;  %12883 = vmatpush3.bf16.msra.mxu1 %v14194_v34  ;;  %v14242_v31 = vld [vmem:[#allocation5 + $0x80] ss:$12 sps:$4 sm:$0xff]  }
 0xec7   :  { %7990 = vmatprep.subr.bf16.mxu0 %v14197_v49  ;;  %12884 = vmatprep.subr.bf16.mxu1 %v14883_v56  ;;  %v14245_v34 = vld [vmem:[#allocation5 + $0x94] ss:$12 sps:$4 sm:$0xff]   ;;  %v14243_v49 = vld [vmem:[#allocation5 + $0x90] ss:$12 sps:$4 sm:$0xff]  }
 0xeca   :  { %7991 = vmatpush1.bf16.msra.mxu0 %v14195_v30  ;;  %12885 = vmatpush3.bf16.msra.mxu1 %v14198_v14  ;;  %v14246_v30 = vld [vmem:[#allocation5 + $0x98] ss:$12 sps:$4 sm:$0xff]  }
 0xecb   :  { %7992 = vmatprep.subr.bf16.mxu0 %v14201_v41  ;;  %12886 = vmatprep.subr.bf16.mxu1 %v14883_v56  ;;  %v14249_v14 = vld [vmem:[#allocation5 + $0xac] ss:$12 sps:$4 sm:$0xff]   ;;  %v14247_v41 = vld [vmem:[#allocation5 + $0xa8] ss:$12 sps:$4 sm:$0xff]  }
 0xece   :  { %7993 = vmatpush1.bf16.msra.mxu0 %v14199_v62  ;;  %12887 = vmatpush3.bf16.msra.mxu1 %v14202_v19  ;;  %v14250_v62 = vld [vmem:[#allocation5 + $0xb0] ss:$12 sps:$4 sm:$0xff]  }
 0xecf   :  { %7994 = vmatprep.subr.bf16.mxu0 %v14205_v4  ;;  %12888 = vmatprep.subr.bf16.mxu1 %v14883_v56  ;;  %v14253_v19 = vld [vmem:[#allocation3 + $0xc4] ss:$12 sps:$4 sm:$0xff]   ;;  %v14251_v4 = vld [vmem:[#allocation3 + $0xc0] ss:$12 sps:$4 sm:$0xff]  }
 0xed2   :  { %7995 = vmatpush1.bf16.msra.mxu0 %v14203_v32  ;;  %12889 = vmatpush3.bf16.msra.mxu1 %v14206_v11  ;;  %v14254_v32 = vld [vmem:[#allocation3 + $0xc8] ss:$12 sps:$4 sm:$0xff]  }
 0xed3   :  { %7996 = vmatprep.subr.bf16.mxu0 %v14209_v17  ;;  %12890 = vmatprep.subr.bf16.mxu1 %v14883_v56  ;;  %v14257_v11 = vld [vmem:[#allocation3 + $0xdc] ss:$12 sps:$4 sm:$0xff]   ;;  %v14255_v17 = vld [vmem:[#allocation3 + $0xd8] ss:$12 sps:$4 sm:$0xff]  }
 0xed6   :  { %7997 = vmatpush1.bf16.msra.mxu0 %v14207_v50  ;;  %12891 = vmatpush3.bf16.msra.mxu1 %v14210_v54  ;;  %v14258_v50 = vld [vmem:[#allocation3 + $0xe0] ss:$12 sps:$4 sm:$0xff]   ;;  %v14259_v54 = vld [vmem:[#allocation3 + $0xf0] ss:$12 sps:$4 sm:$0xff]  }
 0xed7   :  { %7998 = vmatprep.subr.bf16.mxu0 %v14213_v10  ;;  %12892 = vmatprep.subr.bf16.mxu1 %v14883_v56  ;;  %v14262_v10 = vld [vmem:[#allocation3 + $0xf8] ss:$12 sps:$4 sm:$0xff]  }
 0xeda   :  { %7999 = vmatpush1.bf16.msra.mxu0 %v14211_v3  ;;  %12893 = vmatpush3.bf16.msra.mxu1 %v14214_v58  ;;  %v14265_v3 = vld [vmem:[#allocation3 + $0x10c] ss:$12 sps:$4 sm:$0xff]   ;;  %v14263_v58 = vld [vmem:[#allocation3 + $0x108] ss:$12 sps:$4 sm:$0xff]  }
 0xedb   :  { %8000 = vmatprep.subr.bf16.mxu0 %v14217_v1  ;;  %12894 = vmatprep.subr.bf16.mxu1 %v14883_v56  ;;  %v14266_v1 = vld [vmem:[#allocation3 + $0x110] ss:$12 sps:$4 sm:$0xff]  }
 0xede   :  { %8001 = vmatpush1.bf16.msra.mxu0 %v14215_v45  ;;  %12895 = vmatpush3.bf16.msra.mxu1 %v14218_v23  ;;  %v14267_v45 = vld [vmem:[#allocation3 + $0x120] ss:$12 sps:$4 sm:$0xff]   ;;  %v14269_v23 = vld [vmem:[#allocation3 + $0x124] ss:$12 sps:$4 sm:$0xff]  }
 0xedf   :  { %8249 = vmatprep.subr.bf16.mxu0 %v14221_v21  ;;  %12900 = vmatprep.subr.bf16.mxu1 %v14883_v56  ;;  %v14270_v21 = vld [vmem:[#allocation3 + $0x128] ss:$12 sps:$4 sm:$0xff]  }
 0xee1   :  { %8019 = vmatmul.mubr.bf16.vlgmr.msra.gmra.mrb[68].mxu0 %v7825_v63  ;;  %12897 = vmatmul.mubr.bf16.vlgmr.msra.gmra.mrb[140].mxu1 %v7825_v63  ;;  %v14274_v63 = vld [vmem:[#allocation3 + $0x140] ss:$12 sps:$4 sm:$0xff]  }
 0xee2   :  { %8250 = vmatpush1.bf16.msra.mxu0 %v14219_v33  ;;  %12901 = vmatpush3.bf16.msra.mxu1 %v14222_v38  ;;  %v14273_v33 = vld [vmem:[#allocation3 + $0x13c] ss:$12 sps:$4 sm:$0xff]   ;;  %v14271_v38 = vld [vmem:[#allocation3 + $0x138] ss:$12 sps:$4 sm:$0xff]  }
 0xee3   :  { %8251 = vmatprep.subr.bf16.mxu0 %v14225_v55  ;;  %12902 = vmatprep.subr.bf16.mxu1 %v14883_v56  ;;  %v14277_v55 = vld [vmem:[#allocation3 + $0x154] ss:$12 sps:$4 sm:$0xff]  }
 0xee4   :  { %8281 = vmatprep.mubr.bf16.mxu0 %v14882_v0  ;;  %12916 = vmatprep.mubr.msk.bf16.mxu1 %vm14884_vm0, %v14883_v56 }
 0xee6   :  { %8252 = vmatpush1.bf16.msra.mxu0 %v14223_v22  ;;  %12903 = vmatpush3.bf16.msra.mxu1 %v14226_v37  ;;  %v14275_v22 = vld [vmem:[#allocation3 + $0x150] ss:$12 sps:$4 sm:$0xff]   ;;  %v14278_v37 = vld [vmem:[#allocation3 + $0x158] ss:$12 sps:$4 sm:$0xff]  }
 0xee7   :  { %8253 = vmatprep.subr.bf16.mxu0 %v14229_v13  ;;  %12904 = vmatprep.subr.bf16.mxu1 %v14883_v56  ;;  %v14281_v13 = vld [vmem:[#allocation3 + $0x16c] ss:$12 sps:$4 sm:$0xff]  }
 0xeea   :  { %8254 = vmatpush1.bf16.msra.mxu0 %v14227_v53  ;;  %12905 = vmatpush3.bf16.msra.mxu1 %v14230_v16  ;;  %v14279_v53 = vld [vmem:[#allocation3 + $0x168] ss:$12 sps:$4 sm:$0xff]   ;;  %v14282_v16 = vld [vmem:[#allocation3 + $0x170] ss:$12 sps:$4 sm:$0xff]  }
 0xeeb   :  { %8255 = vmatprep.subr.bf16.mxu0 %v14233_v15  ;;  %12906 = vmatprep.subr.bf16.mxu1 %v14883_v56  ;;  %v14285_v15 = vld [vmem:[#allocation5 + $0xc4] ss:$12 sps:$4 sm:$0xff]  }
 0xeee   :  { %8256 = vmatpush1.bf16.msra.mxu0 %v14231_v28  ;;  %12907 = vmatpush3.bf16.msra.mxu1 %v14234_v46 }
 0xeef   :  { %8257 = vmatprep.subr.bf16.mxu0 %v14237_v47  ;;  %12908 = vmatprep.subr.bf16.mxu1 %v14883_v56 }
 0xef2   :  { %8258 = vmatpush1.bf16.msra.mxu0 %v14235_v8  ;;  %12909 = vmatpush3.bf16.msra.mxu1 %v14238_v43 }
 0xef3   :  { %8259 = vmatprep.subr.bf16.mxu0 %v14241_v27  ;;  %12910 = vmatprep.subr.bf16.mxu1 %v14883_v56 }
 0xef6   :  { %8260 = vmatpush1.bf16.msra.mxu0 %v14239_v18  ;;  %12911 = vmatpush3.bf16.msra.mxu1 %v14242_v31 }
 0xef7   :  { %8261 = vmatprep.subr.bf16.mxu0 %v14245_v34  ;;  %12912 = vmatprep.subr.bf16.mxu1 %v14883_v56 }
 0xefa   :  { %8262 = vmatpush1.bf16.msra.mxu0 %v14243_v49  ;;  %12913 = vmatpush3.bf16.msra.mxu1 %v14246_v30 }
 0xefb   :  { %8263 = vmatprep.subr.bf16.mxu0 %v14249_v14  ;;  %12914 = vmatprep.subr.bf16.mxu1 %v14883_v56 }
 0xefe   :  { %8264 = vmatpush1.bf16.msra.mxu0 %v14247_v41  ;;  %12915 = vmatpush3.bf16.msra.mxu1 %v14250_v62 }
 0xeff   :  { %12920 = vmatprep.subr.bf16.mxu1 %v14883_v56  ;;  %8512 = vmatprep.subr.bf16.mxu0 %v14253_v19 }
 0xf01   :  { %8282 = vmatmul.mubr.bf16.vlgmr.msra.gmra.mrb[72].mxu0 %v15631_v36  ;;  %12917 = vmatmul.mubr.bf16.vlgmr.msra.gmra.mrb[144].mxu1 %v15631_v36  ;;  %v14261_v36 = vld [vmem:[#allocation3 + $0xf4] ss:$12 sps:$4 sm:$0xff]  }
 0xf02   :  { %8544 = vmatprep.mubr.bf16.mxu0 %v14882_v0  ;;  %12936 = vmatprep.mubr.msk.bf16.mxu1 %vm14884_vm0, %v14883_v56 }
 0xf03   :  { %8513 = vmatpush1.bf16.msra.mxu0 %v14251_v4  ;;  %12921 = vmatpush3.bf16.msra.mxu1 %v14254_v32 }
 0xf04   :  { %12922 = vmatprep.subr.bf16.mxu1 %v14883_v56  ;;  %8514 = vmatprep.subr.bf16.mxu0 %v14257_v11 }
 0xf07   :  { %8515 = vmatpush1.bf16.msra.mxu0 %v14255_v17  ;;  %12923 = vmatpush3.bf16.msra.mxu1 %v14258_v50 }
 0xf08   :  { %12924 = vmatprep.subr.bf16.mxu1 %v14883_v56  ;;  %8516 = vmatprep.subr.bf16.mxu0 %v14261_v36 }
 0xf0b   :  { %8517 = vmatpush1.bf16.msra.mxu0 %v14259_v54  ;;  %12925 = vmatpush3.bf16.msra.mxu1 %v14262_v10 }
 0xf0c   :  { %12926 = vmatprep.subr.bf16.mxu1 %v14883_v56  ;;  %8518 = vmatprep.subr.bf16.mxu0 %v14265_v3 }
 0xf0f   :  { %8519 = vmatpush1.bf16.msra.mxu0 %v14263_v58  ;;  %12927 = vmatpush3.bf16.msra.mxu1 %v14266_v1 }
 0xf10   :  { %12928 = vmatprep.subr.bf16.mxu1 %v14883_v56  ;;  %8520 = vmatprep.subr.bf16.mxu0 %v14269_v23 }
 0xf13   :  { %8521 = vmatpush1.bf16.msra.mxu0 %v14267_v45  ;;  %12929 = vmatpush3.bf16.msra.mxu1 %v14270_v21 }
 0xf14   :  { %8522 = vmatprep.subr.bf16.mxu0 %v14273_v33  ;;  %12930 = vmatprep.subr.bf16.mxu1 %v14883_v56 }
 0xf17   :  { %8523 = vmatpush1.bf16.msra.mxu0 %v14271_v38  ;;  %12931 = vmatpush3.bf16.msra.mxu1 %v14274_v63 }
 0xf18   :  { %8524 = vmatprep.subr.bf16.mxu0 %v14277_v55  ;;  %12932 = vmatprep.subr.bf16.mxu1 %v14883_v56 }
 0xf1b   :  { %8525 = vmatpush1.bf16.msra.mxu0 %v14275_v22  ;;  %12933 = vmatpush3.bf16.msra.mxu1 %v14278_v37 }
 0xf1c   :  { %8526 = vmatprep.subr.bf16.mxu0 %v14281_v13  ;;  %12934 = vmatprep.subr.bf16.mxu1 %v14883_v56 }
 0xf1f   :  { %8527 = vmatpush1.bf16.msra.mxu0 %v14279_v53  ;;  %12935 = vmatpush3.bf16.msra.mxu1 %v14282_v16 }
 0xf20   :  { %8753 = vmatprep.subr.bf16.mxu0 %v14285_v15  ;;  %12940 = vmatprep.subr.bf16.mxu1 %v14883_v56 }
 0xf94   :  { %v7819_v28 = vpop.f32.mrb[136].mxu1 }
 0xf95   :  { %v12878_v46 = vpop.f32.mrb[137].mxu1  ;;  %v7820_v54 = vadd.f32 %v7819_v28, %v15204_v42 }
 0xf96   :  { %v7822_v47 = vpop.f32.mrb[138].mxu1 }
 0xf97   :  { %v12879_v8 = vpop.f32.mrb[139].mxu1 }
 0xfb4   :  { %v8020_v43 = vpop.f32.mrb[68].mxu0  ;;  %v8061_v27 = vpop.f32.mrb[140].mxu1 }
 0xfb5   :  { %v13146_v18 = vadd.f32 %v8020_v43, %v15191_v12  ;;  %v8022_v31 = vpop.f32.mrb[69].mxu0  ;;  %v12898_v34 = vpop.f32.mrb[141].mxu1  ;;  %v8081_v50 = vadd.f32 %v15610_v25, %v8061_v27 }
 0xfb6   :  { %v8024_v49 = vpop.f32.mrb[70].mxu0  ;;  %v8064_v30 = vpop.f32.mrb[142].mxu1  ;;  %v13147_v19 = vadd.f32 %v8022_v31, %v15195_v29 }
 0xfb7   :  { %v11627_v14 = vmul.f32 -1.442695, %v13146_v18  ;;  %v8025_v41 = vpop.f32.mrb[71].mxu0  ;;  %v12899_v62 = vpop.f32.mrb[143].mxu1 }
 0xfb8   :  { %v11628_v4 = vmul.f32 -1.442695, %v13147_v19  ;;  %v14283_v62 = vld [vmem:[#allocation5 + $0xc0] ss:$12 sps:$4 sm:$0xff]   ;;  %v14286_v19 = vld [vmem:[#allocation5 + $0xc8] ss:$12 sps:$4 sm:$0xff]  }
 0xfb9   :  { %14717 = vpow2.f32 %v11627_v14 }
 0xfba   :  { %14719 = vpow2.f32 %v11628_v4 }
 0xfc3   :  { %v14718_v32 = vpop.eup %14717 }
 0xfc4   :  { %v8075_v11 = vadd.f32 1.0, %v14718_v32  ;;  %v14720_v17 = vpop.eup %14719  ;;  %v14290_v32 = vld [vmem:[#allocation5 + $0xe0] ss:$12 sps:$4 sm:$0xff]  }
 0xfc5   :  { %v8076_v58 = vadd.f32 1.0, %v14720_v17  ;;  %v14294_v17 = vld [vmem:[#allocation5 + $0xf8] ss:$12 sps:$4 sm:$0xff]  }
 0xfc6   :  { %14721 = vrcp.f32 %v8075_v11  ;;  %v14291_v11 = vld [vmem:[#allocation5 + $0xf0] ss:$12 sps:$4 sm:$0xff]  }
 0xfd0   :  { %v14722_v36 = vpop.eup %14721 }
 0xfd1   :  { %v8082_v10 = vmul.f32 %v14722_v36, %v8081_v50  ;;  %v14297_v50 = vld [vmem:[#allocation5 + $0x10c] ss:$12 sps:$4 sm:$0xff]   ;;  %v14295_v36 = vld [vmem:[#allocation5 + $0x108] ss:$12 sps:$4 sm:$0xff]  }
 0xfd3   :  { %v8083_v3 = vadd.f32 %v8082_v10, %v7820_v54  ;;  %v14298_v54 = vld [vmem:[#allocation5 + $0x110] ss:$12 sps:$4 sm:$0xff]  }
 0xfd4   :  { %v8283_v1 = vpop.f32.mrb[72].mxu0  ;;  %v8324_v45 = vpop.f32.mrb[144].mxu1  ;;  %v14301_v10 = vld [vmem:[#allocation5 + $0x124] ss:$12 sps:$4 sm:$0xff]  }
 0xfd5   :  { %14723 = vtanh.f32 %v8083_v3  ;;  %v8330_v23 = vadd.f32 %v8283_v1, %v15047_v2  ;;  %v8285_v21 = vpop.f32.mrb[73].mxu0  ;;  %v12918_v33 = vpop.f32.mrb[145].mxu1  ;;  %v8344_v8 = vadd.f32 %v15622_v40, %v8324_v45  ;;  %v14289_v40 = vld [vmem:[#allocation5 + $0xdc] ss:$12 sps:$4 sm:$0xff]   ;;  %v14299_v3 = vld [vmem:[#allocation5 + $0x120] ss:$12 sps:$4 sm:$0xff]  }
 0xfd6   :  { %v8331_v38 = vadd.f32 %v8285_v21, %v15051_v5  ;;  %v8287_v63 = vpop.f32.mrb[74].mxu0  ;;  %v8327_v55 = vpop.f32.mrb[146].mxu1  ;;  %14725 = vrcp.f32 %v8076_v58  ;;  %v14302_v58 = vld [vmem:[#allocation5 + $0x128] ss:$12 sps:$4 sm:$0xff]   ;;  %v14303_v45 = vld [vmem:[#allocation5 + $0x138] ss:$12 sps:$4 sm:$0xff]  }
 0xfd7   :  { %v11653_v22 = vmul.f32 -1.442695, %v8330_v23  ;;  %v8288_v25 = vpop.f32.mrb[75].mxu0  ;;  %v12919_v37 = vpop.f32.mrb[147].mxu1  ;;  %v14305_v1 = vld [vmem:[#allocation5 + $0x13c] ss:$12 sps:$4 sm:$0xff]  }
 0xfd8   :  { %v11654_v15 = vmul.f32 -1.442695, %v8331_v38  ;;  %v14306_v23 = vld [vmem:[#allocation5 + $0x140] ss:$12 sps:$4 sm:$0xff]   ;;  %v14307_v33 = vld [vmem:[#allocation5 + $0x150] ss:$12 sps:$4 sm:$0xff]  }
 0xfd9   :  { %14727 = vpow2.f32 %v11653_v22  ;;  %v14309_v21 = vld [vmem:[#allocation5 + $0x154] ss:$12 sps:$4 sm:$0xff]   ;;  %v14310_v38 = vld [vmem:[#allocation5 + $0x158] ss:$12 sps:$4 sm:$0xff]   ;;  %v14314_v22 = vld [vmem:[#allocation5 + $0x170] ss:$12 sps:$4 sm:$0xff]  }
 0xfda   :  { %14729 = vpow2.f32 %v11654_v15  ;;  %v14313_v63 = vld [vmem:[#allocation5 + $0x16c] ss:$12 sps:$4 sm:$0xff]   ;;  %v14311_v55 = vld [vmem:[#allocation5 + $0x168] ss:$12 sps:$4 sm:$0xff]   ;;  %v14317_v25 = vld [vmem:[#allocation3 + $0x184] ss:$12 sps:$4 sm:$0xff]  }
 0xfdb   :  { %v14315_v37 = vld [vmem:[#allocation3 + $0x180] ss:$12 sps:$4 sm:$0xff]  }
 0xfdc   :  { %v14322_v15 = vld [vmem:[#allocation3 + $0x1a0] ss:$12 sps:$4 sm:$0xff]  }
 0xfdf   :  { %v14724_v13 = vpop.eup %14723 }
 0xfe0   :  { %v8085_v53 = vsub.f32 %v15617_v61, %v14724_v13  ;;  %v14726_v16 = vpop.eup %14725 }
 0xfe2   :  { %v8086_v28 = vmul.f32 %v14726_v16, %v8085_v53  ;;  %v14321_v53 = vld [vmem:[#allocation3 + $0x19c] ss:$12 sps:$4 sm:$0xff]   ;;  %v14319_v16 = vld [vmem:[#allocation3 + $0x198] ss:$12 sps:$4 sm:$0xff]  }
 0xfe3   :  { %v14728_v46 = vpop.eup %14727 }
 0xfe4   :  { %v8338_v47 = vadd.f32 1.0, %v14728_v46  ;;  %v15716_v2 = vadd.f32 %v14724_v13, %v8086_v28  ;;  %v14730_v5 = vpop.eup %14729  ;;  %v14318_v13 = vld [vmem:[#allocation3 + $0x188] ss:$12 sps:$4 sm:$0xff]   ;;  %v14323_v28 = vld [vmem:[#allocation3 + $0x1b0] ss:$12 sps:$4 sm:$0xff]  }
 0xfe5   :  { %v8339_v31 = vadd.f32 1.0, %v14730_v5  ;;  %v14326_v46 = vld [vmem:[#allocation3 + $0x1b8] ss:$12 sps:$4 sm:$0xff]   ;;  %v14327_v5 = vld [vmem:[#allocation3 + $0x1c8] ss:$12 sps:$4 sm:$0xff]  }
 0xfe6   :  { %14731 = vrcp.f32 %v8338_v47  ;;  %v14329_v47 = vld [vmem:[#allocation3 + $0x1cc] ss:$12 sps:$4 sm:$0xff]  }
 0xff0   :  { %v14732_v43 = vpop.eup %14731 }
 0xff1   :  { %v8345_v27 = vmul.f32 %v14732_v43, %v8344_v8  ;;  %v14330_v8 = vld [vmem:[#allocation3 + $0x1d0] ss:$12 sps:$4 sm:$0xff]   ;;  %v14331_v43 = vld [vmem:[#allocation3 + $0x1e0] ss:$12 sps:$4 sm:$0xff]  }
 0xff3   :  { %v8346_v18 = vadd.f32 %v8345_v27, %v15064_v20  ;;  %v14287_v20 = vld [vmem:[#allocation5 + $0xd8] ss:$12 sps:$4 sm:$0xff]  }
 0xff4   :  { %v14333_v27 = vld [vmem:[#allocation3 + $0x1e4] ss:$12 sps:$4 sm:$0xff]  }
 0xff5   :  { %14733 = vtanh.f32 %v8346_v18  ;;  %v14334_v18 = vld [vmem:[#allocation3 + $0x1e8] ss:$12 sps:$4 sm:$0xff]  }
 0xff6   :  { %14735 = vrcp.f32 %v8339_v31  ;;  %v14337_v31 = vld [vmem:[#allocation3 + $0x1fc] ss:$12 sps:$4 sm:$0xff]  }
 0xfff   :  { %v14734_v34 = vpop.eup %14733 }
0x1000   :  { %v8348_v49 = vsub.f32 %v15627_v44, %v14734_v34  ;;  %v14736_v30 = vpop.eup %14735  ;;  %v14293_v44 = vld [vmem:[#allocation5 + $0xf4] ss:$12 sps:$4 sm:$0xff]  }
0x1002   :  { %v8349_v14 = vmul.f32 %v14736_v30, %v8348_v49  ;;  %v14338_v49 = vld [vmem:[#allocation3 + $0x200] ss:$12 sps:$4 sm:$0xff]  }
0x1003   :  { %v14341_v30 = vld [vmem:[#allocation3 + $0x214] ss:$12 sps:$4 sm:$0xff]  }
0x1004   :  { %v15721_v41 = vadd.f32 %v14734_v34, %v8349_v14  ;;  %v14335_v34 = vld [vmem:[#allocation3 + $0x1f8] ss:$12 sps:$4 sm:$0xff]   ;;  %v14339_v14 = vld [vmem:[#allocation3 + $0x210] ss:$12 sps:$4 sm:$0xff]  }
0x1006   :  { %v15725_v4 = vpack.c.bf16 %v15721_v41, %v15721_v41 }
0x1008   :  { %8545 = vmatmul.mubr.bf16.vlgmr.msra.gmra.mrb[76].mxu0 %v15725_v4  ;;  %12937 = vmatmul.mubr.bf16.vlgmr.msra.gmra.mrb[148].mxu1 %v15725_v4 }
0x1009   :  { %8754 = vmatpush1.bf16.msra.mxu0 %v14283_v62  ;;  %12941 = vmatpush3.bf16.msra.mxu1 %v14286_v19  ;;  %v14342_v62 = vld [vmem:[#allocation3 + $0x218] ss:$12 sps:$4 sm:$0xff]  }
0x100a   :  { %8755 = vmatprep.subr.bf16.mxu0 %v14289_v40  ;;  %12942 = vmatprep.subr.bf16.mxu1 %v14883_v56  ;;  %v14345_v19 = vld [vmem:[#allocation3 + $0x22c] ss:$12 sps:$4 sm:$0xff]   ;;  %v14343_v40 = vld [vmem:[#allocation3 + $0x228] ss:$12 sps:$4 sm:$0xff]  }
0x100b   :  { %8785 = vmatprep.mubr.bf16.mxu0 %v14882_v0  ;;  %12956 = vmatprep.mubr.msk.bf16.mxu1 %vm14884_vm0, %v14883_v56 }
0x100d   :  { %8756 = vmatpush1.bf16.msra.mxu0 %v14287_v20  ;;  %12943 = vmatpush3.bf16.msra.mxu1 %v14290_v32  ;;  %v14346_v20 = vld [vmem:[#allocation3 + $0x230] ss:$12 sps:$4 sm:$0xff]  }
0x100e   :  { %8757 = vmatprep.subr.bf16.mxu0 %v14293_v44  ;;  %12944 = vmatprep.subr.bf16.mxu1 %v14883_v56  ;;  %v14349_v32 = vld [vmem:[#allocation5 + $0x184] ss:$12 sps:$4 sm:$0xff]  }
0x1011   :  { %8758 = vmatpush1.bf16.msra.mxu0 %v14291_v11  ;;  %12945 = vmatpush3.bf16.msra.mxu1 %v14294_v17 }
0x1012   :  { %8759 = vmatprep.subr.bf16.mxu0 %v14297_v50  ;;  %12946 = vmatprep.subr.bf16.mxu1 %v14883_v56 }
0x1015   :  { %8760 = vmatpush1.bf16.msra.mxu0 %v14295_v36  ;;  %12947 = vmatpush3.bf16.msra.mxu1 %v14298_v54 }
0x1016   :  { %8761 = vmatprep.subr.bf16.mxu0 %v14301_v10  ;;  %12948 = vmatprep.subr.bf16.mxu1 %v14883_v56 }
0x1019   :  { %8762 = vmatpush1.bf16.msra.mxu0 %v14299_v3  ;;  %12949 = vmatpush3.bf16.msra.mxu1 %v14302_v58 }
0x101a   :  { %8763 = vmatprep.subr.bf16.mxu0 %v14305_v1  ;;  %12950 = vmatprep.subr.bf16.mxu1 %v14883_v56 }
0x101d   :  { %8764 = vmatpush1.bf16.msra.mxu0 %v14303_v45  ;;  %12951 = vmatpush3.bf16.msra.mxu1 %v14306_v23 }
0x101e   :  { %8765 = vmatprep.subr.bf16.mxu0 %v14309_v21  ;;  %12952 = vmatprep.subr.bf16.mxu1 %v14883_v56 }
0x1021   :  { %8766 = vmatpush1.bf16.msra.mxu0 %v14307_v33  ;;  %12953 = vmatpush3.bf16.msra.mxu1 %v14310_v38 }
0x1022   :  { %8767 = vmatprep.subr.bf16.mxu0 %v14313_v63  ;;  %12954 = vmatprep.subr.bf16.mxu1 %v14883_v56 }
0x1025   :  { %8768 = vmatpush1.bf16.msra.mxu0 %v14311_v55  ;;  %12955 = vmatpush3.bf16.msra.mxu1 %v14314_v22 }
0x1026   :  { %12960 = vmatprep.subr.bf16.mxu1 %v14883_v56  ;;  %9016 = vmatprep.subr.bf16.mxu0 %v14317_v25 }
0x1028   :  { %8786 = vmatmul.mubr.bf16.vlgmr.msra.gmra.mrb[76].mxu0 %v15668_v59  ;;  %12957 = vmatmul.mubr.bf16.vlgmr.msra.gmra.mrb[152].mxu1 %v15668_v59  ;;  %v14325_v59 = vld [vmem:[#allocation3 + $0x1b4] ss:$12 sps:$4 sm:$0xff]  }
0x1029   :  { %9048 = vmatprep.mubr.bf16.mxu0 %v14882_v0  ;;  %12976 = vmatprep.mubr.msk.bf16.mxu1 %vm14884_vm0, %v14883_v56 }
0x102a   :  { %9017 = vmatpush1.bf16.msra.mxu0 %v14315_v37  ;;  %12961 = vmatpush3.bf16.msra.mxu1 %v14318_v13  ;;  %v15758_v37 = vld [vmem:[%s15962_s5 + $0x1] ss:$0 sm:$0xff] }
0x102b   :  { %12962 = vmatprep.subr.bf16.mxu1 %v14883_v56  ;;  %9018 = vmatprep.subr.bf16.mxu0 %v14321_v53 }
0x102e   :  { %9019 = vmatpush1.bf16.msra.mxu0 %v14319_v16  ;;  %12963 = vmatpush3.bf16.msra.mxu1 %v14322_v15 }
0x102f   :  { %12964 = vmatprep.subr.bf16.mxu1 %v14883_v56  ;;  %9020 = vmatprep.subr.bf16.mxu0 %v14325_v59 }
0x1032   :  { %9021 = vmatpush1.bf16.msra.mxu0 %v14323_v28  ;;  %12965 = vmatpush3.bf16.msra.mxu1 %v14326_v46 }
0x1033   :  { %12966 = vmatprep.subr.bf16.mxu1 %v14883_v56  ;;  %9022 = vmatprep.subr.bf16.mxu0 %v14329_v47 }
0x1036   :  { %9023 = vmatpush1.bf16.msra.mxu0 %v14327_v5  ;;  %12967 = vmatpush3.bf16.msra.mxu1 %v14330_v8 }
0x1037   :  { %12968 = vmatprep.subr.bf16.mxu1 %v14883_v56  ;;  %9024 = vmatprep.subr.bf16.mxu0 %v14333_v27  ;;  %v14347_v27 = vld [vmem:[#allocation5 + $0x180] ss:$12 sps:$4 sm:$0xff]  }
0x103a   :  { %9025 = vmatpush1.bf16.msra.mxu0 %v14331_v43  ;;  %12969 = vmatpush3.bf16.msra.mxu1 %v14334_v18  ;;  %v14350_v18 = vld [vmem:[#allocation5 + $0x188] ss:$12 sps:$4 sm:$0xff]  }
0x103b   :  { %9026 = vmatprep.subr.bf16.mxu0 %v14337_v31  ;;  %12970 = vmatprep.subr.bf16.mxu1 %v14883_v56 }
0x103e   :  { %9027 = vmatpush1.bf16.msra.mxu0 %v14335_v34  ;;  %12971 = vmatpush3.bf16.msra.mxu1 %v14338_v49  ;;  %v14353_v34 = vld [vmem:[#allocation5 + $0x19c] ss:$12 sps:$4 sm:$0xff]   ;;  %v14351_v49 = vld [vmem:[#allocation5 + $0x198] ss:$12 sps:$4 sm:$0xff]  }
0x103f   :  { %9028 = vmatprep.subr.bf16.mxu0 %v14341_v30  ;;  %12972 = vmatprep.subr.bf16.mxu1 %v14883_v56  ;;  %v14354_v30 = vld [vmem:[#allocation5 + $0x1a0] ss:$12 sps:$4 sm:$0xff]  }
0x1042   :  { %9029 = vmatpush1.bf16.msra.mxu0 %v14339_v14  ;;  %12973 = vmatpush3.bf16.msra.mxu1 %v14342_v62  ;;  %v14355_v14 = vld [vmem:[#allocation5 + $0x1b0] ss:$12 sps:$4 sm:$0xff]   ;;  %v14358_v62 = vld [vmem:[#allocation5 + $0x1b8] ss:$12 sps:$4 sm:$0xff]  }
0x1043   :  { %9030 = vmatprep.subr.bf16.mxu0 %v14345_v19  ;;  %12974 = vmatprep.subr.bf16.mxu1 %v14883_v56  ;;  %v14361_v19 = vld [vmem:[#allocation5 + $0x1cc] ss:$12 sps:$4 sm:$0xff]  }
0x1046   :  { %9031 = vmatpush1.bf16.msra.mxu0 %v14343_v40  ;;  %12975 = vmatpush3.bf16.msra.mxu1 %v14346_v20  ;;  %v14359_v40 = vld [vmem:[#allocation5 + $0x1c8] ss:$12 sps:$4 sm:$0xff]   ;;  %v14362_v20 = vld [vmem:[#allocation5 + $0x1d0] ss:$12 sps:$4 sm:$0xff]  }
0x1047   :  { %9258 = vmatprep.subr.bf16.mxu0 %v14349_v32  ;;  %12980 = vmatprep.subr.bf16.mxu1 %v14883_v56  ;;  %v14365_v32 = vld [vmem:[#allocation5 + $0x1e4] ss:$12 sps:$4 sm:$0xff]  }
0x10db   :  { %v8587_v44 = vpop.f32.mrb[148].mxu1 }
0x10dc   :  { %v12938_v11 = vpop.f32.mrb[149].mxu1  ;;  %v8588_v16 = vadd.f32 %v8587_v44, %v15132_v6  ;;  %v14363_v44 = vld [vmem:[#allocation5 + $0x1e0] ss:$12 sps:$4 sm:$0xff]  }
0x10dd   :  { %v8590_v17 = vpop.f32.mrb[150].mxu1  ;;  %v14366_v11 = vld [vmem:[#allocation5 + $0x1e8] ss:$12 sps:$4 sm:$0xff]  }
0x10de   :  { %v12939_v50 = vpop.f32.mrb[151].mxu1  ;;  %v14369_v17 = vld [vmem:[#allocation5 + $0x1fc] ss:$12 sps:$4 sm:$0xff]  }
0x10df   :  { %v14367_v50 = vld [vmem:[#allocation5 + $0x1f8] ss:$12 sps:$4 sm:$0xff]  }
0x10fb   :  { %v8787_v36 = vpop.f32.mrb[76].mxu0  ;;  %v8828_v54 = vpop.f32.mrb[152].mxu1 }
0x10fc   :  { %v13148_v10 = vadd.f32 %v8787_v36, %v15119_v35  ;;  %v8789_v3 = vpop.f32.mrb[77].mxu0  ;;  %v12958_v58 = vpop.f32.mrb[153].mxu1  ;;  %v8848_v13 = vadd.f32 %v15758_v37, %v8828_v54  ;;  %v14370_v36 = vld [vmem:[#allocation5 + $0x200] ss:$12 sps:$4 sm:$0xff]  }
0x10fd   :  { %v8791_v1 = vpop.f32.mrb[78].mxu0  ;;  %v8831_v45 = vpop.f32.mrb[154].mxu1  ;;  %v13149_v38 = vadd.f32 %v8789_v3, %v15123_v51  ;;  %v14373_v54 = vld [vmem:[#allocation5 + $0x214] ss:$12 sps:$4 sm:$0xff]   ;;  %v14374_v3 = vld [vmem:[#allocation5 + $0x218] ss:$12 sps:$4 sm:$0xff]  }
0x10fe   :  { %v11703_v23 = vmul.f32 -1.442695, %v13148_v10  ;;  %v8792_v21 = vpop.f32.mrb[79].mxu0  ;;  %v12959_v33 = vpop.f32.mrb[155].mxu1  ;;  %v14371_v10 = vld [vmem:[#allocation5 + $0x210] ss:$12 sps:$4 sm:$0xff]  }
0x10ff   :  { %v11704_v63 = vmul.f32 -1.442695, %v13149_v38  ;;  %v14377_v58 = vld [vmem:[#allocation5 + $0x22c] ss:$12 sps:$4 sm:$0xff]   ;;  %v14375_v1 = vld [vmem:[#allocation5 + $0x228] ss:$12 sps:$4 sm:$0xff]   ;;  %v9097_v38 = vpack.c.bf16 %v15716_v2, %v15716_v2 }
0x1100   :  { %14737 = vpow2.f32 %v11703_v23  ;;  %v14378_v45 = vld [vmem:[#allocation5 + $0x230] ss:$12 sps:$4 sm:$0xff]   ;;  %v14379_v21 = vld [vmem:[#allocation5] ss:$12 sps:$4 sm:$0xff]   ;;  %v14382_v33 = vld [vmem:[#allocation5 + $0x8] ss:$12 sps:$4 sm:$0xff]  }
0x1101   :  { %14739 = vpow2.f32 %v11704_v63  ;;  %v14381_v23 = vld [vmem:[#allocation5 + $0x4] ss:$12 sps:$4 sm:$0xff]   ;;  %v14385_v63 = vld [vmem:[#allocation5 + $0x1c] ss:$12 sps:$4 sm:$0xff]  }
0x110a   :  { %v14738_v55 = vpop.eup %14737 }
0x110b   :  { %v8842_v22 = vadd.f32 1.0, %v14738_v55  ;;  %v14740_v25 = vpop.eup %14739  ;;  %v14383_v55 = vld [vmem:[#allocation5 + $0x18] ss:$12 sps:$4 sm:$0xff]  }
0x110c   :  { %v8843_v28 = vadd.f32 1.0, %v14740_v25  ;;  %v14389_v25 = vld [vmem:[#allocation5 + $0x34] ss:$12 sps:$4 sm:$0xff]  }
0x110d   :  { %14741 = vrcp.f32 %v8842_v22  ;;  %v14386_v22 = vld [vmem:[#allocation5 + $0x20] ss:$12 sps:$4 sm:$0xff]  }
0x1117   :  { %v14742_v53 = vpop.eup %14741 }
0x1118   :  { %v8849_v15 = vmul.f32 %v14742_v53, %v8848_v13  ;;  %v14387_v13 = vld [vmem:[#allocation5 + $0x30] ss:$12 sps:$4 sm:$0xff]   ;;  %v14390_v53 = vld [vmem:[#allocation5 + $0x38] ss:$12 sps:$4 sm:$0xff]  }
0x111a   :  { %v8850_v59 = vadd.f32 %v8849_v15, %v8588_v16  ;;  %v14393_v16 = vld [vmem:[#allocation5 + $0x4c] ss:$12 sps:$4 sm:$0xff]   ;;  %v14391_v15 = vld [vmem:[#allocation5 + $0x48] ss:$12 sps:$4 sm:$0xff]  }
0x111c   :  { %14743 = vtanh.f32 %v8850_v59  ;;  %v14394_v59 = vld [vmem:[#allocation5 + $0x50] ss:$12 sps:$4 sm:$0xff]  }
0x111d   :  { %14745 = vrcp.f32 %v8843_v28  ;;  %v14397_v28 = vld [vmem:[#allocation5 + $0x64] ss:$12 sps:$4 sm:$0xff]  }
0x1126   :  { %v14744_v46 = vpop.eup %14743 }
0x1127   :  { %v8852_v47 = vsub.f32 %v15664_v60, %v14744_v46  ;;  %v14746_v5 = vpop.eup %14745  ;;  %v14357_v60 = vld [vmem:[#allocation5 + $0x1b4] ss:$12 sps:$4 sm:$0xff]  }
0x1129   :  { %v8853_v8 = vmul.f32 %v14746_v5, %v8852_v47  ;;  %v14398_v47 = vld [vmem:[#allocation5 + $0x68] ss:$12 sps:$4 sm:$0xff]  }
0x112a   :  { %v14401_v5 = vld [vmem:[#allocation5 + $0x7c] ss:$12 sps:$4 sm:$0xff]  }
0x112b   :  { %v15763_v43 = vadd.f32 %v14744_v46, %v8853_v8  ;;  %v14395_v46 = vld [vmem:[#allocation5 + $0x60] ss:$12 sps:$4 sm:$0xff]   ;;  %v14399_v8 = vld [vmem:[#allocation5 + $0x78] ss:$12 sps:$4 sm:$0xff]  }
0x112d   :  { %v15767_v31 = vpack.c.bf16 %v15763_v43, %v15763_v43 }
0x112f   :  { %9049 = vmatmul.mubr.bf16.vlgmr.msra.gmra.mrb[80].mxu0 %v15767_v31  ;;  %12977 = vmatmul.mubr.bf16.vlgmr.msra.gmra.mrb[156].mxu1 %v15767_v31 }
0x1130   :  { %9259 = vmatpush1.bf16.msra.mxu0 %v14347_v27  ;;  %12981 = vmatpush3.bf16.msra.mxu1 %v14350_v18  ;;  %v14402_v27 = vld [vmem:[#allocation5 + $0x80] ss:$12 sps:$4 sm:$0xff]  }
0x1131   :  { %9260 = vmatprep.subr.bf16.mxu0 %v14353_v34  ;;  %12982 = vmatprep.subr.bf16.mxu1 %v14883_v56  ;;  %v14405_v18 = vld [vmem:[#allocation5 + $0x94] ss:$12 sps:$4 sm:$0xff]   ;;  %v14403_v34 = vld [vmem:[#allocation5 + $0x90] ss:$12 sps:$4 sm:$0xff]  }
0x1132   :  { %9290 = vmatprep.mubr.bf16.mxu0 %v14882_v0  ;;  %12996 = vmatprep.mubr.msk.bf16.mxu1 %vm14884_vm0, %v14883_v56 }
0x1134   :  { %9261 = vmatpush1.bf16.msra.mxu0 %v14351_v49  ;;  %12983 = vmatpush3.bf16.msra.mxu1 %v14354_v30  ;;  %v14406_v49 = vld [vmem:[#allocation5 + $0x98] ss:$12 sps:$4 sm:$0xff]  }
0x1135   :  { %9262 = vmatprep.subr.bf16.mxu0 %v14357_v60  ;;  %12984 = vmatprep.subr.bf16.mxu1 %v14883_v56  ;;  %v14409_v30 = vld [vmem:[#allocation5 + $0xac] ss:$12 sps:$4 sm:$0xff]   ;;  %v14407_v60 = vld [vmem:[#allocation5 + $0xa8] ss:$12 sps:$4 sm:$0xff]  }
0x1138   :  { %9263 = vmatpush1.bf16.msra.mxu0 %v14355_v14  ;;  %12985 = vmatpush3.bf16.msra.mxu1 %v14358_v62  ;;  %v14410_v14 = vld [vmem:[#allocation5 + $0xb0] ss:$12 sps:$4 sm:$0xff]  }
0x1139   :  { %9264 = vmatprep.subr.bf16.mxu0 %v14361_v19  ;;  %12986 = vmatprep.subr.bf16.mxu1 %v14883_v56  ;;  %v14413_v62 = vld [vmem:[#allocation3 + $0xc4] ss:$12 sps:$4 sm:$0xff]   ;;  %v14411_v19 = vld [vmem:[#allocation3 + $0xc0] ss:$12 sps:$4 sm:$0xff]  }
0x113c   :  { %9265 = vmatpush1.bf16.msra.mxu0 %v14359_v40  ;;  %12987 = vmatpush3.bf16.msra.mxu1 %v14362_v20  ;;  %v14414_v40 = vld [vmem:[#allocation3 + $0xc8] ss:$12 sps:$4 sm:$0xff]  }
0x113d   :  { %9266 = vmatprep.subr.bf16.mxu0 %v14365_v32  ;;  %12988 = vmatprep.subr.bf16.mxu1 %v14883_v56  ;;  %v14417_v20 = vld [vmem:[#allocation3 + $0xdc] ss:$12 sps:$4 sm:$0xff]   ;;  %v14415_v32 = vld [vmem:[#allocation3 + $0xd8] ss:$12 sps:$4 sm:$0xff]  }
0x1140   :  { %9267 = vmatpush1.bf16.msra.mxu0 %v14363_v44  ;;  %12989 = vmatpush3.bf16.msra.mxu1 %v14366_v11  ;;  %v14418_v44 = vld [vmem:[#allocation3 + $0xe0] ss:$12 sps:$4 sm:$0xff]   ;;  %v14419_v11 = vld [vmem:[#allocation3 + $0xf0] ss:$12 sps:$4 sm:$0xff]  }
0x1141   :  { %9268 = vmatprep.subr.bf16.mxu0 %v14369_v17  ;;  %12990 = vmatprep.subr.bf16.mxu1 %v14883_v56  ;;  %v14422_v17 = vld [vmem:[#allocation3 + $0xf8] ss:$12 sps:$4 sm:$0xff]  }
0x1144   :  { %9269 = vmatpush1.bf16.msra.mxu0 %v14367_v50  ;;  %12991 = vmatpush3.bf16.msra.mxu1 %v14370_v36  ;;  %v14425_v50 = vld [vmem:[#allocation3 + $0x10c] ss:$12 sps:$4 sm:$0xff]   ;;  %v14423_v36 = vld [vmem:[#allocation3 + $0x108] ss:$12 sps:$4 sm:$0xff]  }
0x1145   :  { %9270 = vmatprep.subr.bf16.mxu0 %v14373_v54  ;;  %12992 = vmatprep.subr.bf16.mxu1 %v14883_v56  ;;  %v14426_v54 = vld [vmem:[#allocation3 + $0x110] ss:$12 sps:$4 sm:$0xff]  }
0x1148   :  { %9271 = vmatpush1.bf16.msra.mxu0 %v14371_v10  ;;  %12993 = vmatpush3.bf16.msra.mxu1 %v14374_v3  ;;  %v14427_v10 = vld [vmem:[#allocation3 + $0x120] ss:$12 sps:$4 sm:$0xff]   ;;  %v14429_v3 = vld [vmem:[#allocation3 + $0x124] ss:$12 sps:$4 sm:$0xff]  }
0x1149   :  { %9272 = vmatprep.subr.bf16.mxu0 %v14377_v58  ;;  %12994 = vmatprep.subr.bf16.mxu1 %v14883_v56  ;;  %v14430_v58 = vld [vmem:[#allocation3 + $0x128] ss:$12 sps:$4 sm:$0xff]  }
0x114c   :  { %9273 = vmatpush1.bf16.msra.mxu0 %v14375_v1  ;;  %12995 = vmatpush3.bf16.msra.mxu1 %v14378_v45  ;;  %v14433_v1 = vld [vmem:[#allocation3 + $0x13c] ss:$12 sps:$4 sm:$0xff]   ;;  %v14431_v45 = vld [vmem:[#allocation3 + $0x138] ss:$12 sps:$4 sm:$0xff]  }
0x114d   :  { %9521 = vmatprep.subr.bf16.mxu0 %v14381_v23  ;;  %13000 = vmatprep.subr.bf16.mxu1 %v14883_v56  ;;  %v14434_v23 = vld [vmem:[#allocation3 + $0x140] ss:$12 sps:$4 sm:$0xff]  }
0x114f   :  { %9291 = vmatmul.mubr.bf16.vlgmr.msra.gmra.mrb[80].mxu0 %v9097_v38  ;;  %12997 = vmatmul.mubr.bf16.vlgmr.msra.gmra.mrb[160].mxu1 %v9097_v38  ;;  %v14438_v38 = vld [vmem:[#allocation3 + $0x158] ss:$12 sps:$4 sm:$0xff]  }
0x1150   :  { %9522 = vmatpush1.bf16.msra.mxu0 %v14379_v21  ;;  %13001 = vmatpush3.bf16.msra.mxu1 %v14382_v33  ;;  %v14437_v21 = vld [vmem:[#allocation3 + $0x154] ss:$12 sps:$4 sm:$0xff]   ;;  %v14435_v33 = vld [vmem:[#allocation3 + $0x150] ss:$12 sps:$4 sm:$0xff]  }
0x1151   :  { %9523 = vmatprep.subr.bf16.mxu0 %v14385_v63  ;;  %13002 = vmatprep.subr.bf16.mxu1 %v14883_v56  ;;  %v14441_v63 = vld [vmem:[#allocation3 + $0x16c] ss:$12 sps:$4 sm:$0xff]  }
0x1152   :  { %9553 = vmatprep.mubr.bf16.mxu0 %v14882_v0  ;;  %13016 = vmatprep.mubr.msk.bf16.mxu1 %vm14884_vm0, %v14883_v56 }
0x1154   :  { %9524 = vmatpush1.bf16.msra.mxu0 %v14383_v55  ;;  %13003 = vmatpush3.bf16.msra.mxu1 %v14386_v22  ;;  %v14439_v55 = vld [vmem:[#allocation3 + $0x168] ss:$12 sps:$4 sm:$0xff]   ;;  %v14442_v22 = vld [vmem:[#allocation3 + $0x170] ss:$12 sps:$4 sm:$0xff]  }
0x1155   :  { %9525 = vmatprep.subr.bf16.mxu0 %v14389_v25  ;;  %13004 = vmatprep.subr.bf16.mxu1 %v14883_v56  ;;  %v14445_v25 = vld [vmem:[#allocation5 + $0xc4] ss:$12 sps:$4 sm:$0xff]  }
0x1158   :  { %9526 = vmatpush1.bf16.msra.mxu0 %v14387_v13  ;;  %13005 = vmatpush3.bf16.msra.mxu1 %v14390_v53 }
0x1159   :  { %9527 = vmatprep.subr.bf16.mxu0 %v14393_v16  ;;  %13006 = vmatprep.subr.bf16.mxu1 %v14883_v56 }
0x115c   :  { %9528 = vmatpush1.bf16.msra.mxu0 %v14391_v15  ;;  %13007 = vmatpush3.bf16.msra.mxu1 %v14394_v59 }
0x115d   :  { %9529 = vmatprep.subr.bf16.mxu0 %v14397_v28  ;;  %13008 = vmatprep.subr.bf16.mxu1 %v14883_v56 }
0x1160   :  { %9530 = vmatpush1.bf16.msra.mxu0 %v14395_v46  ;;  %13009 = vmatpush3.bf16.msra.mxu1 %v14398_v47 }
0x1161   :  { %9531 = vmatprep.subr.bf16.mxu0 %v14401_v5  ;;  %13010 = vmatprep.subr.bf16.mxu1 %v14883_v56 }
0x1164   :  { %9532 = vmatpush1.bf16.msra.mxu0 %v14399_v8  ;;  %13011 = vmatpush3.bf16.msra.mxu1 %v14402_v27 }
0x1165   :  { %9533 = vmatprep.subr.bf16.mxu0 %v14405_v18  ;;  %13012 = vmatprep.subr.bf16.mxu1 %v14883_v56 }
0x1168   :  { %9534 = vmatpush1.bf16.msra.mxu0 %v14403_v34  ;;  %13013 = vmatpush3.bf16.msra.mxu1 %v14406_v49 }
0x1169   :  { %9535 = vmatprep.subr.bf16.mxu0 %v14409_v30  ;;  %13014 = vmatprep.subr.bf16.mxu1 %v14883_v56 }
0x116c   :  { %9536 = vmatpush1.bf16.msra.mxu0 %v14407_v60  ;;  %13015 = vmatpush3.bf16.msra.mxu1 %v14410_v14 }
0x116d   :  { %13020 = vmatprep.subr.bf16.mxu1 %v14883_v56  ;;  %9784 = vmatprep.subr.bf16.mxu0 %v14413_v62 }
0x116f   :  { %9554 = vmatmul.mubr.bf16.vlgmr.msra.gmra.mrb[84].mxu0 %v15725_v4  ;;  %13017 = vmatmul.mubr.bf16.vlgmr.msra.gmra.mrb[164].mxu1 %v15725_v4  ;;  %v14421_v4 = vld [vmem:[#allocation3 + $0xf4] ss:$12 sps:$4 sm:$0xff]  }
0x1170   :  { %9816 = vmatprep.mubr.bf16.mxu0 %v14882_v0  ;;  %13036 = vmatprep.mubr.msk.bf16.mxu1 %vm14884_vm0, %v14883_v56 }
0x1171   :  { %9785 = vmatpush1.bf16.msra.mxu0 %v14411_v19  ;;  %13021 = vmatpush3.bf16.msra.mxu1 %v14414_v40  ;;  %v15813_v40 = vld [vmem:[%s15962_s5 + $0x2] ss:$0 sm:$0xff] }
0x1172   :  { %13022 = vmatprep.subr.bf16.mxu1 %v14883_v56  ;;  %9786 = vmatprep.subr.bf16.mxu0 %v14417_v20 }
0x1175   :  { %9787 = vmatpush1.bf16.msra.mxu0 %v14415_v32  ;;  %13023 = vmatpush3.bf16.msra.mxu1 %v14418_v44 }
0x1176   :  { %13024 = vmatprep.subr.bf16.mxu1 %v14883_v56  ;;  %9788 = vmatprep.subr.bf16.mxu0 %v14421_v4 }
0x1179   :  { %9789 = vmatpush1.bf16.msra.mxu0 %v14419_v11  ;;  %13025 = vmatpush3.bf16.msra.mxu1 %v14422_v17 }
0x117a   :  { %13026 = vmatprep.subr.bf16.mxu1 %v14883_v56  ;;  %9790 = vmatprep.subr.bf16.mxu0 %v14425_v50 }
0x117d   :  { %9791 = vmatpush1.bf16.msra.mxu0 %v14423_v36  ;;  %13027 = vmatpush3.bf16.msra.mxu1 %v14426_v54 }
0x117e   :  { %13028 = vmatprep.subr.bf16.mxu1 %v14883_v56  ;;  %9792 = vmatprep.subr.bf16.mxu0 %v14429_v3 }
0x1181   :  { %9793 = vmatpush1.bf16.msra.mxu0 %v14427_v10  ;;  %13029 = vmatpush3.bf16.msra.mxu1 %v14430_v58 }
0x1182   :  { %9794 = vmatprep.subr.bf16.mxu0 %v14433_v1  ;;  %13030 = vmatprep.subr.bf16.mxu1 %v14883_v56 }
0x1185   :  { %9795 = vmatpush1.bf16.msra.mxu0 %v14431_v45  ;;  %13031 = vmatpush3.bf16.msra.mxu1 %v14434_v23 }
0x1186   :  { %9796 = vmatprep.subr.bf16.mxu0 %v14437_v21  ;;  %13032 = vmatprep.subr.bf16.mxu1 %v14883_v56 }
0x1189   :  { %9797 = vmatpush1.bf16.msra.mxu0 %v14435_v33  ;;  %13033 = vmatpush3.bf16.msra.mxu1 %v14438_v38 }
0x118a   :  { %9798 = vmatprep.subr.bf16.mxu0 %v14441_v63  ;;  %13034 = vmatprep.subr.bf16.mxu1 %v14883_v56 }
0x118d   :  { %9799 = vmatpush1.bf16.msra.mxu0 %v14439_v55  ;;  %13035 = vmatpush3.bf16.msra.mxu1 %v14442_v22 }
0x118e   :  { %10025 = vmatprep.subr.bf16.mxu0 %v14445_v25  ;;  %13040 = vmatprep.subr.bf16.mxu1 %v14883_v56 }
0x1202   :  { %v9091_v13 = vpop.f32.mrb[156].mxu1 }
0x1203   :  { %v12978_v53 = vpop.f32.mrb[157].mxu1  ;;  %v9092_v44 = vadd.f32 %v9091_v13, %v15204_v42 }
0x1204   :  { %v9094_v16 = vpop.f32.mrb[158].mxu1 }
0x1205   :  { %v12979_v15 = vpop.f32.mrb[159].mxu1  ;;  %v14829_v16 = vld [vmem:[%s15962_s5] ss:$0 sm:$0xff] }
0x1222   :  { %v9292_v59 = vpop.f32.mrb[80].mxu0  ;;  %v9333_v28 = vpop.f32.mrb[160].mxu1 }
0x1223   :  { %v13150_v46 = vadd.f32 %v9292_v59, %v15191_v12  ;;  %v9294_v47 = vpop.f32.mrb[81].mxu0  ;;  %v12998_v5 = vpop.f32.mrb[161].mxu1  ;;  %v9353_v20 = vadd.f32 %v15813_v40, %v9333_v28 }
0x1224   :  { %v9296_v8 = vpop.f32.mrb[82].mxu0  ;;  %v9336_v27 = vpop.f32.mrb[162].mxu1  ;;  %v13151_v30 = vadd.f32 %v9294_v47, %v15195_v29 }
0x1225   :  { %v11753_v18 = vmul.f32 -1.442695, %v13150_v46  ;;  %v9297_v34 = vpop.f32.mrb[83].mxu0  ;;  %v12999_v49 = vpop.f32.mrb[163].mxu1 }
0x1226   :  { %v11754_v60 = vmul.f32 -1.442695, %v13151_v30  ;;  %v14443_v49 = vld [vmem:[#allocation5 + $0xc0] ss:$12 sps:$4 sm:$0xff]   ;;  %v14446_v30 = vld [vmem:[#allocation5 + $0xc8] ss:$12 sps:$4 sm:$0xff]  }
0x1227   :  { %14747 = vpow2.f32 %v11753_v18 }
0x1228   :  { %14749 = vpow2.f32 %v11754_v60 }
0x1231   :  { %v14748_v14 = vpop.eup %14747 }
0x1232   :  { %v9347_v62 = vadd.f32 1.0, %v14748_v14  ;;  %v14750_v19 = vpop.eup %14749  ;;  %v14449_v14 = vld [vmem:[#allocation5 + $0xdc] ss:$12 sps:$4 sm:$0xff]  }
0x1233   :  { %v9348_v17 = vadd.f32 1.0, %v14750_v19  ;;  %v14451_v19 = vld [vmem:[#allocation5 + $0xf0] ss:$12 sps:$4 sm:$0xff]  }
0x1234   :  { %14751 = vrcp.f32 %v9347_v62  ;;  %v14450_v62 = vld [vmem:[#allocation5 + $0xe0] ss:$12 sps:$4 sm:$0xff]  }
0x123e   :  { %v14752_v32 = vpop.eup %14751 }
0x123f   :  { %v9354_v4 = vmul.f32 %v14752_v32, %v9353_v20  ;;  %v14454_v20 = vld [vmem:[#allocation5 + $0xf8] ss:$12 sps:$4 sm:$0xff]  }
0x1240   :  { %v14457_v32 = vld [vmem:[#allocation5 + $0x10c] ss:$12 sps:$4 sm:$0xff]  }
0x1241   :  { %v9355_v11 = vadd.f32 %v9354_v4, %v9092_v44  ;;  %v14455_v44 = vld [vmem:[#allocation5 + $0x108] ss:$12 sps:$4 sm:$0xff]   ;;  %v14458_v4 = vld [vmem:[#allocation5 + $0x110] ss:$12 sps:$4 sm:$0xff]  }
0x1242   :  { %v9555_v50 = vpop.f32.mrb[84].mxu0  ;;  %v9596_v36 = vpop.f32.mrb[164].mxu1 }
0x1243   :  { %14753 = vtanh.f32 %v9355_v11  ;;  %v9602_v54 = vadd.f32 %v9555_v50, %v15053_v7  ;;  %v9557_v10 = vpop.f32.mrb[85].mxu0  ;;  %v13018_v3 = vpop.f32.mrb[165].mxu1  ;;  %v9616_v15 = vadd.f32 %v14829_v16, %v9596_v36  ;;  %v14461_v11 = vld [vmem:[#allocation5 + $0x124] ss:$12 sps:$4 sm:$0xff]   ;;  %v14462_v50 = vld [vmem:[#allocation5 + $0x128] ss:$12 sps:$4 sm:$0xff]  }
0x1244   :  { %v9603_v58 = vadd.f32 %v9557_v10, %v15055_v9  ;;  %v9559_v1 = vpop.f32.mrb[86].mxu0  ;;  %v9599_v45 = vpop.f32.mrb[166].mxu1  ;;  %14755 = vrcp.f32 %v9348_v17  ;;  %v14459_v17 = vld [vmem:[#allocation5 + $0x120] ss:$12 sps:$4 sm:$0xff]   ;;  %v14465_v36 = vld [vmem:[#allocation5 + $0x13c] ss:$12 sps:$4 sm:$0xff]  }
0x1245   :  { %v11779_v23 = vmul.f32 -1.442695, %v9602_v54  ;;  %v9560_v21 = vpop.f32.mrb[87].mxu0  ;;  %v13019_v33 = vpop.f32.mrb[167].mxu1  ;;  %v14463_v54 = vld [vmem:[#allocation5 + $0x138] ss:$12 sps:$4 sm:$0xff]  }
0x1246   :  { %v11780_v22 = vmul.f32 -1.442695, %v9603_v58  ;;  %v14466_v10 = vld [vmem:[#allocation5 + $0x140] ss:$12 sps:$4 sm:$0xff]   ;;  %v14467_v58 = vld [vmem:[#allocation5 + $0x150] ss:$12 sps:$4 sm:$0xff]  }
0x1247   :  { %14757 = vpow2.f32 %v11779_v23  ;;  %v14469_v3 = vld [vmem:[#allocation5 + $0x154] ss:$12 sps:$4 sm:$0xff]   ;;  %v14470_v1 = vld [vmem:[#allocation5 + $0x158] ss:$12 sps:$4 sm:$0xff]   ;;  %v14474_v21 = vld [vmem:[#allocation5 + $0x170] ss:$12 sps:$4 sm:$0xff]  }
0x1248   :  { %14759 = vpow2.f32 %v11780_v22  ;;  %v14473_v45 = vld [vmem:[#allocation5 + $0x16c] ss:$12 sps:$4 sm:$0xff]   ;;  %v14471_v23 = vld [vmem:[#allocation5 + $0x168] ss:$12 sps:$4 sm:$0xff]   ;;  %v14477_v33 = vld [vmem:[#allocation3 + $0x184] ss:$12 sps:$4 sm:$0xff]  }
0x1249   :  { %v14479_v22 = vld [vmem:[#allocation3 + $0x198] ss:$12 sps:$4 sm:$0xff]   ;;  %v14487_v16 = vld [vmem:[#allocation3 + $0x1c8] ss:$12 sps:$4 sm:$0xff]  }
0x124d   :  { %v14754_v38 = vpop.eup %14753 }
0x124e   :  { %v9357_v63 = vsub.f32 %v15716_v2, %v14754_v38  ;;  %v14756_v55 = vpop.eup %14755 }
0x1250   :  { %v9358_v25 = vmul.f32 %v14756_v55, %v9357_v63  ;;  %v14478_v63 = vld [vmem:[#allocation3 + $0x188] ss:$12 sps:$4 sm:$0xff]  }
0x1251   :  { %v14758_v13 = vpop.eup %14757  ;;  %v14481_v55 = vld [vmem:[#allocation3 + $0x19c] ss:$12 sps:$4 sm:$0xff]  }
0x1252   :  { %v9610_v53 = vadd.f32 1.0, %v14758_v13  ;;  %v15820_v7 = vadd.f32 %v14754_v38, %v9358_v25  ;;  %v14760_v9 = vpop.eup %14759  ;;  %v14475_v38 = vld [vmem:[#allocation3 + $0x180] ss:$12 sps:$4 sm:$0xff]   ;;  %v14483_v13 = vld [vmem:[#allocation3 + $0x1b0] ss:$12 sps:$4 sm:$0xff]  }
0x1253   :  { %v9611_v47 = vadd.f32 1.0, %v14760_v9  ;;  %v14482_v25 = vld [vmem:[#allocation3 + $0x1a0] ss:$12 sps:$4 sm:$0xff]  }
0x1254   :  { %14761 = vrcp.f32 %v9610_v53  ;;  %v14486_v53 = vld [vmem:[#allocation3 + $0x1b8] ss:$12 sps:$4 sm:$0xff]  }
0x1255   :  { %v14489_v9 = vld [vmem:[#allocation3 + $0x1cc] ss:$12 sps:$4 sm:$0xff]  }
0x125e   :  { %v14762_v59 = vpop.eup %14761 }
0x125f   :  { %v9617_v28 = vmul.f32 %v14762_v59, %v9616_v15  ;;  %v14490_v15 = vld [vmem:[#allocation3 + $0x1d0] ss:$12 sps:$4 sm:$0xff]   ;;  %v14491_v59 = vld [vmem:[#allocation3 + $0x1e0] ss:$12 sps:$4 sm:$0xff]  }
0x1261   :  { %v9618_v46 = vadd.f32 %v9617_v28, %v15068_v24  ;;  %v14447_v24 = vld [vmem:[#allocation5 + $0xd8] ss:$12 sps:$4 sm:$0xff]  }
0x1262   :  { %v14493_v28 = vld [vmem:[#allocation3 + $0x1e4] ss:$12 sps:$4 sm:$0xff]  }
0x1263   :  { %14763 = vtanh.f32 %v9618_v46  ;;  %v14494_v46 = vld [vmem:[#allocation3 + $0x1e8] ss:$12 sps:$4 sm:$0xff]  }
0x1264   :  { %14765 = vrcp.f32 %v9611_v47  ;;  %v14497_v47 = vld [vmem:[#allocation3 + $0x1fc] ss:$12 sps:$4 sm:$0xff]  }
0x126d   :  { %v14764_v5 = vpop.eup %14763 }
0x126e   :  { %v9620_v8 = vsub.f32 %v15721_v41, %v14764_v5  ;;  %v14766_v27 = vpop.eup %14765  ;;  %v14453_v41 = vld [vmem:[#allocation5 + $0xf4] ss:$12 sps:$4 sm:$0xff]  }
0x1270   :  { %v9621_v18 = vmul.f32 %v14766_v27, %v9620_v8  ;;  %v14498_v8 = vld [vmem:[#allocation3 + $0x200] ss:$12 sps:$4 sm:$0xff]  }
0x1271   :  { %v14501_v27 = vld [vmem:[#allocation3 + $0x214] ss:$12 sps:$4 sm:$0xff]  }
0x1272   :  { %v9622_v34 = vadd.f32 %v14764_v5, %v9621_v18  ;;  %v14495_v5 = vld [vmem:[#allocation3 + $0x1f8] ss:$12 sps:$4 sm:$0xff]   ;;  %v14499_v18 = vld [vmem:[#allocation3 + $0x210] ss:$12 sps:$4 sm:$0xff]  }
0x1274   :  { %v9623_v60 = vpack.c.bf16 %v9622_v34, %v9622_v34  ;;  %10633 = vst [vmem:[%s15966_s9] sm:$0xff] %v9622_v34  ;;  %v14502_v34 = vld [vmem:[#allocation3 + $0x218] ss:$12 sps:$4 sm:$0xff]  }
0x1276   :  { %9817 = vmatmul.mubr.bf16.vlgmr.msra.gmra.mrb[88].mxu0 %v9623_v60  ;;  %13037 = vmatmul.mubr.bf16.vlgmr.msra.gmra.mrb[168].mxu1 %v9623_v60  ;;  %v14506_v60 = vld [vmem:[#allocation3 + $0x230] ss:$12 sps:$4 sm:$0xff]  }
0x1277   :  { %10026 = vmatpush1.bf16.msra.mxu0 %v14443_v49  ;;  %13041 = vmatpush3.bf16.msra.mxu1 %v14446_v30  ;;  %v14505_v49 = vld [vmem:[#allocation3 + $0x22c] ss:$12 sps:$4 sm:$0xff]   ;;  %v14503_v30 = vld [vmem:[#allocation3 + $0x228] ss:$12 sps:$4 sm:$0xff]  }
0x1278   :  { %10027 = vmatprep.subr.bf16.mxu0 %v14449_v14  ;;  %13042 = vmatprep.subr.bf16.mxu1 %v14883_v56  ;;  %v14509_v14 = vld [vmem:[#allocation5 + $0x184] ss:$12 sps:$4 sm:$0xff]  }
0x1279   :  { %10057 = vmatprep.mubr.bf16.mxu0 %v14882_v0  ;;  %13056 = vmatprep.mubr.msk.bf16.mxu1 %vm14884_vm0, %v14883_v56 }
0x127b   :  { %10028 = vmatpush1.bf16.msra.mxu0 %v14447_v24  ;;  %13043 = vmatpush3.bf16.msra.mxu1 %v14450_v62 }
0x127c   :  { %10029 = vmatprep.subr.bf16.mxu0 %v14453_v41  ;;  %13044 = vmatprep.subr.bf16.mxu1 %v14883_v56 }
0x127f   :  { %10030 = vmatpush1.bf16.msra.mxu0 %v14451_v19  ;;  %13045 = vmatpush3.bf16.msra.mxu1 %v14454_v20 }
0x1280   :  { %10031 = vmatprep.subr.bf16.mxu0 %v14457_v32  ;;  %13046 = vmatprep.subr.bf16.mxu1 %v14883_v56 }
0x1283   :  { %10032 = vmatpush1.bf16.msra.mxu0 %v14455_v44  ;;  %13047 = vmatpush3.bf16.msra.mxu1 %v14458_v4 }
0x1284   :  { %10033 = vmatprep.subr.bf16.mxu0 %v14461_v11  ;;  %13048 = vmatprep.subr.bf16.mxu1 %v14883_v56 }
0x1287   :  { %10034 = vmatpush1.bf16.msra.mxu0 %v14459_v17  ;;  %13049 = vmatpush3.bf16.msra.mxu1 %v14462_v50 }
0x1288   :  { %10035 = vmatprep.subr.bf16.mxu0 %v14465_v36  ;;  %13050 = vmatprep.subr.bf16.mxu1 %v14883_v56 }
0x128b   :  { %10036 = vmatpush1.bf16.msra.mxu0 %v14463_v54  ;;  %13051 = vmatpush3.bf16.msra.mxu1 %v14466_v10 }
0x128c   :  { %10037 = vmatprep.subr.bf16.mxu0 %v14469_v3  ;;  %13052 = vmatprep.subr.bf16.mxu1 %v14883_v56 }
0x128f   :  { %10038 = vmatpush1.bf16.msra.mxu0 %v14467_v58  ;;  %13053 = vmatpush3.bf16.msra.mxu1 %v14470_v1 }
0x1290   :  { %10039 = vmatprep.subr.bf16.mxu0 %v14473_v45  ;;  %13054 = vmatprep.subr.bf16.mxu1 %v14883_v56 }
0x1293   :  { %10040 = vmatpush1.bf16.msra.mxu0 %v14471_v23  ;;  %13055 = vmatpush3.bf16.msra.mxu1 %v14474_v21 }
0x1294   :  { %13060 = vmatprep.subr.bf16.mxu1 %v14883_v56  ;;  %10288 = vmatprep.subr.bf16.mxu0 %v14477_v33 }
0x1296   :  { %10058 = vmatmul.mubr.bf16.vlgmr.msra.gmra.mrb[88].mxu0 %v15767_v31  ;;  %13057 = vmatmul.mubr.bf16.vlgmr.msra.gmra.mrb[172].mxu1 %v15767_v31  ;;  %v14485_v31 = vld [vmem:[#allocation3 + $0x1b4] ss:$12 sps:$4 sm:$0xff]  }
0x1297   :  { %10320 = vmatprep.mubr.bf16.mxu0 %v14882_v0  ;;  %13076 = vmatprep.mubr.msk.bf16.mxu1 %vm14884_vm0, %v14883_v56 }
0x1298   :  { %10289 = vmatpush1.bf16.msra.mxu0 %v14475_v38  ;;  %13061 = vmatpush3.bf16.msra.mxu1 %v14478_v63 }
0x1299   :  { %13062 = vmatprep.subr.bf16.mxu1 %v14883_v56  ;;  %10290 = vmatprep.subr.bf16.mxu0 %v14481_v55 }
0x129c   :  { %10291 = vmatpush1.bf16.msra.mxu0 %v14479_v22  ;;  %13063 = vmatpush3.bf16.msra.mxu1 %v14482_v25 }
0x129d   :  { %13064 = vmatprep.subr.bf16.mxu1 %v14883_v56  ;;  %10292 = vmatprep.subr.bf16.mxu0 %v14485_v31 }
0x12a0   :  { %10293 = vmatpush1.bf16.msra.mxu0 %v14483_v13  ;;  %13065 = vmatpush3.bf16.msra.mxu1 %v14486_v53  ;;  %v14507_v53 = vld [vmem:[#allocation5 + $0x180] ss:$12 sps:$4 sm:$0xff]  }
0x12a1   :  { %13066 = vmatprep.subr.bf16.mxu1 %v14883_v56  ;;  %10294 = vmatprep.subr.bf16.mxu0 %v14489_v9  ;;  %v14510_v9 = vld [vmem:[#allocation5 + $0x188] ss:$12 sps:$4 sm:$0xff]  }
0x12a4   :  { %10295 = vmatpush1.bf16.msra.mxu0 %v14487_v16  ;;  %13067 = vmatpush3.bf16.msra.mxu1 %v14490_v15  ;;  %v14514_v15 = vld [vmem:[#allocation5 + $0x1a0] ss:$12 sps:$4 sm:$0xff]  }
0x12a5   :  { %13068 = vmatprep.subr.bf16.mxu1 %v14883_v56  ;;  %10296 = vmatprep.subr.bf16.mxu0 %v14493_v28  ;;  %v14518_v28 = vld [vmem:[#allocation5 + $0x1b8] ss:$12 sps:$4 sm:$0xff]  }
0x12a8   :  { %10297 = vmatpush1.bf16.msra.mxu0 %v14491_v59  ;;  %13069 = vmatpush3.bf16.msra.mxu1 %v14494_v46  ;;  %v14515_v59 = vld [vmem:[#allocation5 + $0x1b0] ss:$12 sps:$4 sm:$0xff]   ;;  %v14521_v46 = vld [vmem:[#allocation5 + $0x1cc] ss:$12 sps:$4 sm:$0xff]  }
0x12a9   :  { %10298 = vmatprep.subr.bf16.mxu0 %v14497_v47  ;;  %13070 = vmatprep.subr.bf16.mxu1 %v14883_v56  ;;  %v14519_v47 = vld [vmem:[#allocation5 + $0x1c8] ss:$12 sps:$4 sm:$0xff]  }
0x12ac   :  { %10299 = vmatpush1.bf16.msra.mxu0 %v14495_v5  ;;  %13071 = vmatpush3.bf16.msra.mxu1 %v14498_v8  ;;  %v14522_v5 = vld [vmem:[#allocation5 + $0x1d0] ss:$12 sps:$4 sm:$0xff]  }
0x12ad   :  { %10300 = vmatprep.subr.bf16.mxu0 %v14501_v27  ;;  %13072 = vmatprep.subr.bf16.mxu1 %v14883_v56  ;;  %v14525_v8 = vld [vmem:[#allocation5 + $0x1e4] ss:$12 sps:$4 sm:$0xff]   ;;  %v14526_v27 = vld [vmem:[#allocation5 + $0x1e8] ss:$12 sps:$4 sm:$0xff]  }
0x12b0   :  { %10301 = vmatpush1.bf16.msra.mxu0 %v14499_v18  ;;  %13073 = vmatpush3.bf16.msra.mxu1 %v14502_v34  ;;  %v14529_v18 = vld [vmem:[#allocation5 + $0x1fc] ss:$12 sps:$4 sm:$0xff]   ;;  %v14527_v34 = vld [vmem:[#allocation5 + $0x1f8] ss:$12 sps:$4 sm:$0xff]  }
0x12b1   :  { %10302 = vmatprep.subr.bf16.mxu0 %v14505_v49  ;;  %13074 = vmatprep.subr.bf16.mxu1 %v14883_v56  ;;  %v14530_v49 = vld [vmem:[#allocation5 + $0x200] ss:$12 sps:$4 sm:$0xff]  }
0x12b4   :  { %10303 = vmatpush1.bf16.msra.mxu0 %v14503_v30  ;;  %13075 = vmatpush3.bf16.msra.mxu1 %v14506_v60  ;;  %v14533_v30 = vld [vmem:[#allocation5 + $0x214] ss:$12 sps:$4 sm:$0xff]   ;;  %v14531_v60 = vld [vmem:[#allocation5 + $0x210] ss:$12 sps:$4 sm:$0xff]  }
0x12b5   :  { %10530 = vmatprep.subr.bf16.mxu0 %v14509_v14  ;;  %13080 = vmatprep.subr.bf16.mxu1 %v14883_v56  ;;  %v14534_v14 = vld [vmem:[#allocation5 + $0x218] ss:$12 sps:$4 sm:$0xff]  }
0x1349   :  { %v9859_v24 = vpop.f32.mrb[168].mxu1 }
0x134a   :  { %v13038_v62 = vpop.f32.mrb[169].mxu1 }
0x134b   :  { %v9862_v41 = vpop.f32.mrb[170].mxu1  ;;  %v14535_v62 = vld [vmem:[#allocation5 + $0x228] ss:$12 sps:$4 sm:$0xff]  }
0x134c   :  { %v13039_v19 = vpop.f32.mrb[171].mxu1  ;;  %v14538_v41 = vld [vmem:[#allocation5 + $0x230] ss:$12 sps:$4 sm:$0xff]  }
0x134d   :  { %v14539_v19 = vld [vmem:[%s15963_s6] sm:$0xff]  }
0x1369   :  { %v10059_v20 = vpop.f32.mrb[88].mxu0  ;;  %v10100_v32 = vpop.f32.mrb[172].mxu1 }
0x136a   :  { %v13152_v44 = vadd.f32 %v10059_v20, %v15119_v35  ;;  %v10061_v4 = vpop.f32.mrb[89].mxu0  ;;  %v13058_v11 = vpop.f32.mrb[173].mxu1  ;;  %v10120_v21 = vadd.f32 %v15758_v37, %v10100_v32  ;;  %v9860_v35 = vadd.f32 %v9859_v24, %v15132_v6  ;;  %v14513_v37 = vld [vmem:[#allocation5 + $0x19c] ss:$12 sps:$4 sm:$0xff]   ;;  %v14511_v6 = vld [vmem:[#allocation5 + $0x198] ss:$12 sps:$4 sm:$0xff]   ;;  %v10369_v20 = vpack.c.bf16 %v15820_v7, %v15820_v7 }
0x136b   :  { %v10063_v17 = vpop.f32.mrb[90].mxu0  ;;  %v10103_v50 = vpop.f32.mrb[174].mxu1  ;;  %v13153_v3 = vadd.f32 %v10061_v4, %v15123_v51  ;;  %v14537_v24 = vld [vmem:[#allocation5 + $0x22c] ss:$12 sps:$4 sm:$0xff]   ;;  %v14545_v11 = vld [vmem:[%s15963_s6 + $0x30] sm:$0xff]  }
0x136c   :  { %v11829_v36 = vmul.f32 -1.442695, %v13152_v44  ;;  %v10064_v54 = vpop.f32.mrb[91].mxu0  ;;  %v13059_v10 = vpop.f32.mrb[175].mxu1  ;;  %v14540_v32 = vld [vmem:[%s15963_s6 + $0x8] sm:$0xff]   ;;  %v10646_v44 = vpack.c.bf16 %v15310_v48, %v15211_v39  ;;  %v14542_v4 = vld [vmem:[%s15963_s6 + $0x18] sm:$0xff]   ;;  %v10647_v50 = vpack.c.bf16 %v15513_v57, %v15414_v52 }
0x136d   :  { %v11830_v58 = vmul.f32 -1.442695, %v13153_v3  ;;  %v14543_v39 = vld [vmem:[%s15963_s6 + $0x20] sm:$0xff]   ;;  %v14544_v48 = vld [vmem:[%s15963_s6 + $0x28] sm:$0xff]   ;;  %v14546_v17 = vld [vmem:[%s15963_s6 + $0x38] sm:$0xff]  }
0x136e   :  { %14767 = vpow2.f32 %v11829_v36  ;;  %v10648_v36 = vpack.c.bf16 %v15716_v2, %v15617_v61 }
0x136f   :  { %14769 = vpow2.f32 %v11830_v58 }
0x1378   :  { %v14768_v1 = vpop.eup %14767 }
0x1379   :  { %v10114_v45 = vadd.f32 1.0, %v14768_v1  ;;  %v14770_v23 = vpop.eup %14769 }
0x137a   :  { %v10115_v55 = vadd.f32 1.0, %v14770_v23 }
0x137b   :  { %14771 = vrcp.f32 %v10114_v45 }
0x1385   :  { %v14772_v33 = vpop.eup %14771 }
0x1386   :  { %v10121_v38 = vmul.f32 %v14772_v33, %v10120_v21 }
0x1388   :  { %v10122_v63 = vadd.f32 %v10121_v38, %v9860_v35 }
0x138a   :  { %14773 = vtanh.f32 %v10122_v63 }
0x138b   :  { %14775 = vrcp.f32 %v10115_v55 }
0x1394   :  { %v14774_v22 = vpop.eup %14773 }
0x1395   :  { %v10124_v25 = vsub.f32 %v15763_v43, %v14774_v22  ;;  %v14776_v51 = vpop.eup %14775  ;;  %v14517_v43 = vld [vmem:[#allocation5 + $0x1b4] ss:$12 sps:$4 sm:$0xff]  }
0x1397   :  { %v10125_v31 = vmul.f32 %v14776_v51, %v10124_v25 }
0x1399   :  { %v10126_v13 = vadd.f32 %v14774_v22, %v10125_v31 }
0x139b   :  { %v10127_v16 = vpack.c.bf16 %v10126_v13, %v10126_v13  ;;  %11881 = vst [vmem:[%s15966_s9 + $0x8] sm:$0xff] %v10126_v13 }
0x139d   :  { %10321 = vmatmul.mubr.bf16.vlgmr.msra.gmra.mrb[92].mxu0 %v10127_v16  ;;  %13077 = vmatmul.mubr.bf16.vlgmr.msra.gmra.mrb[176].mxu1 %v10127_v16 }
0x139e   :  { %10531 = vmatpush1.bf16.msra.mxu0 %v14507_v53  ;;  %13081 = vmatpush3.bf16.msra.mxu1 %v14510_v9  ;;  %v11883_v9 = vld [vmem:[%s15964_s7] ss:$0 sm:$0xff] }
0x139f   :  { %10532 = vmatprep.subr.bf16.mxu0 %v14513_v37  ;;  %13082 = vmatprep.subr.bf16.mxu1 %v14883_v56 }
0x13a0   :  { %10562 = vmatprep.mubr.bf16.mxu0 %v14882_v0  ;;  %13096 = vmatprep.mubr.msk.bf16.mxu1 %vm14884_vm0, %v14883_v56  ;;  %v14523_v0 = vld [vmem:[#allocation5 + $0x1e0] ss:$12 sps:$4 sm:$0xff]  }
0x13a2   :  { %10533 = vmatpush1.bf16.msra.mxu0 %v14511_v6  ;;  %13083 = vmatpush3.bf16.msra.mxu1 %v14514_v15 }
0x13a3   :  { %10534 = vmatprep.subr.bf16.mxu0 %v14517_v43  ;;  %13084 = vmatprep.subr.bf16.mxu1 %v14883_v56 }
0x13a6   :  { %10535 = vmatpush1.bf16.msra.mxu0 %v14515_v59  ;;  %13085 = vmatpush3.bf16.msra.mxu1 %v14518_v28 }
0x13a7   :  { %10536 = vmatprep.subr.bf16.mxu0 %v14521_v46  ;;  %13086 = vmatprep.subr.bf16.mxu1 %v14883_v56 }
0x13aa   :  { %10537 = vmatpush1.bf16.msra.mxu0 %v14519_v47  ;;  %13087 = vmatpush3.bf16.msra.mxu1 %v14522_v5 }
0x13ab   :  { %10538 = vmatprep.subr.bf16.mxu0 %v14525_v8  ;;  %13088 = vmatprep.subr.bf16.mxu1 %v14883_v56 }
0x13ae   :  { %10539 = vmatpush1.bf16.msra.mxu0 %v14523_v0  ;;  %13089 = vmatpush3.bf16.msra.mxu1 %v14526_v27 }
0x13af   :  { %10540 = vmatprep.subr.bf16.mxu0 %v14529_v18  ;;  %13090 = vmatprep.subr.bf16.mxu1 %v14883_v56 }
0x13b2   :  { %10541 = vmatpush1.bf16.msra.mxu0 %v14527_v34  ;;  %13091 = vmatpush3.bf16.msra.mxu1 %v14530_v49 }
0x13b3   :  { %10542 = vmatprep.subr.bf16.mxu0 %v14533_v30  ;;  %13092 = vmatprep.subr.bf16.mxu1 %v14883_v56 }
0x13b6   :  { %10543 = vmatpush1.bf16.msra.mxu0 %v14531_v60  ;;  %13093 = vmatpush3.bf16.msra.mxu1 %v14534_v14 }
0x13b7   :  { %10544 = vmatprep.subr.bf16.mxu0 %v14537_v24  ;;  %13094 = vmatprep.subr.bf16.mxu1 %v14883_v56  ;;  %v14541_v56 = vld [vmem:[%s15963_s6 + $0x10] sm:$0xff]  }
0x13ba   :  { %10545 = vmatpush1.bf16.msra.mxu0 %v14535_v62  ;;  %13095 = vmatpush3.bf16.msra.mxu1 %v14538_v41  ;;  %v10795_v62 = vand.u32 127, %v106_v26 }
0x13bb   :  { %13100 = vmatprep.subr.bf16.mxu0 %v14539_v19 }
0x13bc   :  { %vm10796_vm1 = vcmp.lt.s32.totalorder %v10795_v62, 32 }
0x13bd   :  { %10563 = vmatmul.mubr.bf16.vlgmr.msra.gmra.mrb[92].mxu0 %v10369_v20  ;;  %13097 = vmatmul.mubr.bf16.vlgmr.msra.gmra.mrb[180].mxu1 %v10369_v20 }
0x13be   :  { %13101 = vmatpush3.bf16.msra.mxu0 %v14539_v19  ;;  %13116 = vmatprep.mubr.bf16.mxu0 %v10646_v44 }
0x13bf   :  { %13102 = vmatprep.subr.bf16.mxu0 %v14540_v32 }
0x13c2   :  { %13103 = vmatpush3.bf16.msra.mxu0 %v14540_v32 }
0x13c3   :  { %13104 = vmatprep.subr.bf16.mxu0 %v14541_v56 }
0x13c6   :  { %13105 = vmatpush3.bf16.msra.mxu0 %v14541_v56 }
0x13c7   :  { %13106 = vmatprep.subr.bf16.mxu0 %v14542_v4 }
0x13ca   :  { %13107 = vmatpush3.bf16.msra.mxu0 %v14542_v4 }
0x13cb   :  { %13108 = vmatprep.subr.bf16.mxu0 %v14543_v39 }
0x13ce   :  { %13109 = vmatpush3.bf16.msra.mxu0 %v14543_v39 }
0x13cf   :  { %13110 = vmatprep.subr.bf16.mxu0 %v14544_v48 }
0x13d2   :  { %13111 = vmatpush3.bf16.msra.mxu0 %v14544_v48 }
0x13d3   :  { %13112 = vmatprep.subr.bf16.mxu0 %v14545_v11 }
0x13d6   :  { %13113 = vmatpush3.bf16.msra.mxu0 %v14545_v11 }
0x13d7   :  { %13114 = vmatprep.subr.bf16.mxu0 %v14546_v17 }
0x13da   :  { %13115 = vmatpush3.bf16.msra.mxu0 %v14546_v17 }
0x13dd   :  { %13117 = vmatmul.mubr.bf16.vlgmr.msra.gmra.mrb[96].mxu0 %v10647_v50 }
0x13de   :  { %13120 = vmatprep.mubr.bf16.mxu0 %v10648_v36 }
0x1470   :  { %v10363_v54 = vpop.f32.mrb[176].mxu1 }
0x1471   :  { %v13078_v10 = vpop.f32.mrb[177].mxu1 }
0x1472   :  { %v10366_v3 = vpop.f32.mrb[178].mxu1 }
0x1473   :  { %v13079_v58 = vpop.f32.mrb[179].mxu1 }
0x1490   :  { %v10564_v1 = vpop.f32.mrb[92].mxu0  ;;  %v10605_v45 = vpop.f32.mrb[180].mxu1 }
0x1491   :  { %v13154_v23 = vadd.f32 %v10564_v1, %v15191_v12  ;;  %v10566_v21 = vpop.f32.mrb[93].mxu0  ;;  %v13098_v33 = vpop.f32.mrb[181].mxu1  ;;  %v10625_v51 = vadd.f32 %v15813_v40, %v10605_v45  ;;  %v10364_v12 = vadd.f32 %v10363_v54, %v15204_v42 }
0x1492   :  { %v10568_v35 = vpop.f32.mrb[94].mxu0  ;;  %v10608_v38 = vpop.f32.mrb[182].mxu1  ;;  %v13155_v57 = vadd.f32 %v10566_v21, %v15195_v29 }
0x1493   :  { %v11879_v63 = vmul.f32 -1.442695, %v13154_v23  ;;  %v10569_v55 = vpop.f32.mrb[95].mxu0  ;;  %v13099_v52 = vpop.f32.mrb[183].mxu1 }
0x1494   :  { %v11880_v61 = vmul.f32 -1.442695, %v13155_v57 }
0x1495   :  { %14777 = vpow2.f32 %v11879_v63 }
0x1496   :  { %14779 = vpow2.f32 %v11880_v61 }
0x149f   :  { %v14778_v2 = vpop.eup %14777 }
0x14a0   :  { %v10619_v22 = vadd.f32 1.0, %v14778_v2  ;;  %v14780_v25 = vpop.eup %14779 }
0x14a1   :  { %v10620_v53 = vadd.f32 1.0, %v14780_v25 }
0x14a2   :  { %14781 = vrcp.f32 %v10619_v22 }
0x14ac   :  { %v14782_v31 = vpop.eup %14781 }
0x14ad   :  { %v10626_v13 = vmul.f32 %v14782_v31, %v10625_v51 }
0x14af   :  { %v10627_v16 = vadd.f32 %v10626_v13, %v10364_v12 }
0x14b0   :  { %v13118_v37 = vpop.f32.mrb[96].mxu0 }
0x14b1   :  { %14783 = vtanh.f32 %v10627_v16  ;;  %v10764_v29 = vadd.f32 %v13118_v37, %v11883_v9  ;;  %v10755_v6 = vpop.f32.mrb[97].mxu0 }
0x14b2   :  { %14785 = vrcp.f32 %v10620_v53  ;;  %v10756_v15 = vadd.f32 %v11883_v9, %v10755_v6  ;;  %v13119_v43 = vpop.f32.mrb[98].mxu0 }
0x14b3   :  { %14787 = vtanh.f32 %v10764_v29  ;;  %v10767_v59 = vadd.f32 %v13119_v43, %v11883_v9  ;;  %v10758_v40 = vpop.f32.mrb[99].mxu0 }
0x14b4   :  { %14789 = vtanh.f32 %v10756_v15  ;;  %v10759_v28 = vadd.f32 %v11883_v9, %v10758_v40 }
0x14b5   :  { %14791 = vtanh.f32 %v10767_v59 }
0x14b6   :  { %14793 = vtanh.f32 %v10759_v28 }
0x14bb   :  { %v14784_v42 = vpop.eup %14783 }
0x14bc   :  { %v14786_v46 = vpop.eup %14785  ;;  %v10629_v47 = vsub.f32 %v15820_v7, %v14784_v42 }
0x14bd   :  { %v14788_v5 = vpop.eup %14787 }
0x14be   :  { %v14790_v8 = vpop.eup %14789  ;;  %v10801_v0 = vmul.f32 1.442695, %v14788_v5  ;;  %v10630_v27 = vmul.f32 %v14786_v46, %v10629_v47 }
0x14bf   :  { %v14792_v18 = vpop.eup %14791  ;;  %v10797_v34 = vmul.f32 1.442695, %v14790_v8 }
0x14c0   :  { %v14794_v49 = vpop.eup %14793  ;;  %14795 = vpow2.f32 %v10801_v0  ;;  %v10803_v30 = vmul.f32 1.442695, %v14792_v18  ;;  %v10631_v60 = vadd.f32 %v14784_v42, %v10630_v27 }
0x14c1   :  { %14797 = vpow2.f32 %v10797_v34  ;;  %v10799_v14 = vmul.f32 1.442695, %v14794_v49 }
0x14c2   :  { %14799 = vpow2.f32 %v10803_v30  ;;  %11882 = vst [vmem:[%s15966_s9 + $0x10] sm:$0xff] %v10631_v60  ;;  %v10649_v24 = vpack.c.bf16 %v10631_v60, %v15820_v7 }
0x14c3   :  { %14801 = vpow2.f32 %v10799_v14 }
0x14c4   :  { %13121 = vmatmul.mubr.bf16.gmra.mrb[100].mxu0 %v10649_v24 }
0x14ca   :  { %v14796_v41 = vpop.eup %14795 }
0x14cb   :  { %v14798_v19 = vpop.eup %14797  ;;  %v10815_v20 = vsel %vm10796_vm1, %v14788_v5, %v14796_v41 }
0x14cc   :  { %v14800_v32 = vpop.eup %14799  ;;  %10824 = vst.msk [vmem:[%s15965_s8 + $0x10] sm:$0xff] %vm10821_vm2, %v10815_v20  ;;  %v10813_v44 = vsel %vm10796_vm1, %v14790_v8, %v14798_v19 }
0x14cd   :  { %v14802_v56 = vpop.eup %14801  ;;  %10822 = vst.msk [vmem:[%s15965_s8] sm:$0xff] %vm10821_vm2, %v10813_v44  ;;  %v10816_v26 = vsel %vm10796_vm1, %v14792_v18, %v14800_v32 }
0x14ce   :  { %10825 = vst.msk [vmem:[%s15965_s8 + $0x18] sm:$0xff] %vm10821_vm2, %v10816_v26  ;;  %v10814_v7 = vsel %vm10796_vm1, %v14794_v49, %v14802_v56 }
0x14cf   :  { %10823 = vst.msk [vmem:[%s15965_s8 + $0x8] sm:$0xff] %vm10821_vm2, %v10814_v7 }
0x1597   :  { %v13122_v4 = vpop.f32.mrb[100].mxu0 }
0x1598   :  { %v10780_v39 = vadd.f32 %v13122_v4, %v11883_v9  ;;  %v10771_v48 = vpop.f32.mrb[101].mxu0 }
0x1599   :  { %v10772_v11 = vadd.f32 %v11883_v9, %v10771_v48  ;;  %v13123_v17 = vpop.f32.mrb[102].mxu0 }
0x159a   :  { %14803 = vtanh.f32 %v10780_v39  ;;  %v10783_v50 = vadd.f32 %v13123_v17, %v11883_v9  ;;  %v10774_v36 = vpop.f32.mrb[103].mxu0 }
0x159b   :  { %14805 = vtanh.f32 %v10772_v11  ;;  %v10775_v54 = vadd.f32 %v11883_v9, %v10774_v36 }
0x159c   :  { %14807 = vtanh.f32 %v10783_v50 }
0x159d   :  { %14809 = vtanh.f32 %v10775_v54 }
0x15a4   :  { %v14804_v10 = vpop.eup %14803 }
0x15a5   :  { %v14806_v3 = vpop.eup %14805  ;;  %v10809_v58 = vmul.f32 1.442695, %v14804_v10 }
0x15a6   :  { %v14808_v1 = vpop.eup %14807  ;;  %v10805_v45 = vmul.f32 1.442695, %v14806_v3 }
0x15a7   :  { %v14810_v23 = vpop.eup %14809  ;;  %14811 = vpow2.f32 %v10809_v58  ;;  %v10811_v21 = vmul.f32 1.442695, %v14808_v1 }
0x15a8   :  { %14813 = vpow2.f32 %v10805_v45  ;;  %v10807_v33 = vmul.f32 1.442695, %v14810_v23 }
0x15a9   :  { %14815 = vpow2.f32 %v10811_v21 }
0x15aa   :  { %14817 = vpow2.f32 %v10807_v33 }
0x15b1   :  { %v14812_v35 = vpop.eup %14811 }
0x15b2   :  { %v14814_v38 = vpop.eup %14813  ;;  %v10819_v63 = vsel %vm10796_vm1, %v14804_v10, %v14812_v35 }
0x15b3   :  { %v14816_v55 = vpop.eup %14815  ;;  %10828 = vst.msk [vmem:[%s15965_s8 + $0x30] sm:$0xff] %vm10821_vm2, %v10819_v63  ;;  %v10817_v52 = vsel %vm10796_vm1, %v14806_v3, %v14814_v38 }
0x15b4   :  { %v14818_v57 = vpop.eup %14817  ;;  %10826 = vst.msk [vmem:[%s15965_s8 + $0x20] sm:$0xff] %vm10821_vm2, %v10817_v52  ;;  %v10820_v61 = vsel %vm10796_vm1, %v14808_v1, %v14816_v55 }
0x15b5   :  { %10829 = vst.msk [vmem:[%s15965_s8 + $0x38] sm:$0xff] %vm10821_vm2, %v10820_v61  ;;  %v10818_v2 = vsel %vm10796_vm1, %v14810_v23, %v14818_v57 }
0x15b6   :  { %10827 = vst.msk [vmem:[%s15965_s8 + $0x28] sm:$0xff] %vm10821_vm2, %v10818_v2 }
0x15b7   :  { %10838 = vsyncpa [#allocation4], 1 }
0x15b8   :  { %10839 = vsyncpa [#allocation6], 1 }

</bundles_post_ra>
